<compile_context>
chip_gen: v7x
topology: tpu7x:2x2x1
jax: 0.10.0
libtpu: 0.0.40
codegen_flags: <defaults>
</compile_context>

<pallas_src>
import math
import jax
import jax.numpy as jnp
from jax.experimental import pallas as pl
from jax.experimental.pallas import tpu as pltpu

LEAKY_SLOPE = 0.2   # connectomics get_activation('leaky_relu') -> nn.LeakyReLU(0.2)
GN_GROUPS = 8       # connectomics get_norm_2d('gn', C) -> nn.GroupNorm(8, C)
GN_EPS = 1e-5       # nn.GroupNorm default eps
FILTERS = (8, 16, 32)   # small synthetic config (defaults are [32,64,128,256,512])
IN_CH = 1
OUT_CH = 3
CP = 128            # lane-padded channel width carried between layers
# TODO(synk): model_init(mode='orthogonal') is replaced by deterministic
# scaled-normal weight init; forward-pass semantics are unchanged.


# ------------------- Pallas kernel 1: conv + GroupNorm (+res) (+act) -------------------
def _make_conv_gn_kernel(with_res, act):
    """Fused im2col-matmul -> GroupNorm -> [+residual] -> [leaky_relu]."""
    def kernel(p_ref, w_ref, anorm_ref, g_ref, b_ref, *rest):
        if with_res:
            r_ref, o_ref = rest
        else:
            (o_ref,) = rest
        # (Ms, K) bf16 @ (K, CP) bf16 -> (Ms, CP) f32 on the MXU, lane-dense out.
        acc = jnp.dot(p_ref[0], w_ref[...], preferred_element_type=jnp.float32)
        # GroupNorm statistics in f32.  Per-channel sums -> per-group mean/var
        # via a (CP, CP) aggregation matmul that also broadcasts the group
        # value back onto every channel lane.  Padded channels are exact zeros.
        s1 = jnp.sum(acc, axis=0, keepdims=True)                           # (1, CP)
        mean = jnp.dot(s1, anorm_ref[...], preferred_element_type=jnp.float32)
        xc = acc - mean
        s2 = jnp.sum(xc * xc, axis=0, keepdims=True)
        var = jnp.dot(s2, anorm_ref[...], preferred_element_type=jnp.float32)
        y = xc * jax.lax.rsqrt(var + GN_EPS) * g_ref[...] + b_ref[...]
        if with_res:
            y = y + r_ref[0]
        if act:
            y = jnp.where(y >= 0, y, LEAKY_SLOPE * y)
        o_ref[0] = y
    return kernel


# ------------------------- Pallas kernel 2: conv + bias (conv_out) -------------------------
def _conv_bias_kernel(p_ref, w_ref, bias_ref, o_ref):
    acc = jnp.dot(p_ref[0], w_ref[...], preferred_element_type=jnp.float32)
    o_ref[0] = acc + bias_ref[...]


# ------------------------------ conv glue (plain JAX) ------------------------------
def _replicate_pad_nhwc(x, p):
    return jnp.pad(x, ((0, 0), (p, p), (p, p), (0, 0)), mode="edge")


def _patches_nhwc(x_p, cin, k, stride, padding):
    """x_p: (N, H, W, CP) -> bf16 patches (N, Ho*Wo, k*k*cin), tap-major / channel-minor."""
    x = x_p[..., :cin]                                  # drop lane padding before gather
    xp = _replicate_pad_nhwc(x, padding)
    N, Hp, Wp, _ = xp.shape
    Ho = (Hp - k) // stride + 1
    Wo = (Wp - k) // stride + 1
    taps = []
    for i in range(k):
        for j in range(k):
            taps.append(xp[:, i:i + stride * (Ho - 1) + 1:stride,
                              j:j + stride * (Wo - 1) + 1:stride, :])
    pt = jnp.stack(taps, axis=3)                        # (N, Ho, Wo, k*k, cin)
    pt = pt.reshape(N, Ho * Wo, k * k * cin).astype(jnp.bfloat16)
    return pt, Ho, Wo


def _weight_matrix(w):
    """PyTorch (Cout, Cin, k, k) -> bf16 (k*k*Cin, CP), tap-major / channel-minor, zero-padded."""
    cout, cin, k, _ = w.shape
    wm = w.transpose(2, 3, 1, 0).reshape(k * k * cin, cout)
    return jnp.pad(wm, ((0, 0), (0, CP - cout))).astype(jnp.bfloat16)


def _group_mean_matrix(cout, hw):
    """(CP, CP) f32: per-channel sums -> per-group mean, broadcast back to channels."""
    cpg = cout // GN_GROUPS
    c = jnp.arange(CP)
    same = ((c[:, None] // cpg) == (c[None, :] // cpg)) & (c[:, None] < cout) & (c[None, :] < cout)
    return same.astype(jnp.float32) / float(cpg * hw)


def _pad_vec(v):
    return jnp.pad(v, (0, CP - v.shape[0])).reshape(1, CP).astype(jnp.float32)


# ------------------------------ fused layer wrappers ------------------------------
def conv_gn_act(x_p, p, stride=1, padding=1, act=True, residual=None):
    """Conv2d (replicate pad, no bias) -> GroupNorm(8) -> [+residual] -> [leaky_relu].

    x_p / residual / output: (N, H, W, CP) channel-padded NHWC, f32.
    """
    w = p["w"]
    cout, cin, k, _ = w.shape
    assert cout % GN_GROUPS == 0 and cout <= CP
    N = x_p.shape[0]
    pt, Ho, Wo = _patches_nhwc(x_p, cin, k, stride, padding)
    Ms, K = Ho * Wo, k * k * cin
    wm = _weight_matrix(w)
    anorm = _group_mean_matrix(cout, Ms)
    gamma, beta = _pad_vec(p["gamma"]), _pad_vec(p["beta"])

    ins = [pt, wm, anorm, gamma, beta]
    in_specs = [
        pl.BlockSpec((1, Ms, K), lambda n: (n, 0, 0)),
        pl.BlockSpec((K, CP), lambda n: (0, 0)),
        pl.BlockSpec((CP, CP), lambda n: (0, 0)),
        pl.BlockSpec((1, CP), lambda n: (0, 0)),
        pl.BlockSpec((1, CP), lambda n: (0, 0)),
    ]
    with_res = residual is not None
    if with_res:
        ins.append(residual.reshape(N, Ms, CP))
        in_specs.append(pl.BlockSpec((1, Ms, CP), lambda n: (n, 0, 0)))

    out = pl.pallas_call(
        _make_conv_gn_kernel(with_res, act),
        out_shape=jax.ShapeDtypeStruct((N, Ms, CP), jnp.float32),
        grid=(N,),
        in_specs=in_specs,
        out_specs=pl.BlockSpec((1, Ms, CP), lambda n: (n, 0, 0)),
        compiler_params=pltpu.CompilerParams(dimension_semantics=("parallel",)),
    )(*ins)
    return out.reshape(N, Ho, Wo, CP)


def conv_bias(x_p, p, stride=1, padding=2):
    """Plain Conv2d (replicate pad) + bias, no norm / act (the conv_out layer)."""
    w = p["w"]
    cout, cin, k, _ = w.shape
    N = x_p.shape[0]
    pt, Ho, Wo = _patches_nhwc(x_p, cin, k, stride, padding)
    Ms, K = Ho * Wo, k * k * cin
    wm = _weight_matrix(w)
    bias = _pad_vec(p["b"])

    out = pl.pallas_call(
        _conv_bias_kernel,
        out_shape=jax.ShapeDtypeStruct((N, Ms, CP), jnp.float32),
        grid=(N,),
        in_specs=[
            pl.BlockSpec((1, Ms, K), lambda n: (n, 0, 0)),
            pl.BlockSpec((K, CP), lambda n: (0, 0)),
            pl.BlockSpec((1, CP), lambda n: (0, 0)),
        ],
        out_specs=pl.BlockSpec((1, Ms, CP), lambda n: (n, 0, 0)),
        compiler_params=pltpu.CompilerParams(dimension_semantics=("parallel",)),
    )(pt, wm, bias)
    return out.reshape(N, Ho, Wo, CP)


# ------------------- bilinear upsample (align_corners=True), plain JAX -------------------
def _bilinear_matrix(out_size, in_size):
    if out_size == 1:
        return jnp.zeros((1, in_size), jnp.float32).at[0, 0].set(1.0)
    i = jnp.arange(out_size, dtype=jnp.float32)
    src = i * (in_size - 1) / (out_size - 1)
    i0 = jnp.clip(jnp.floor(src).astype(jnp.int32), 0, in_size - 1)
    i1 = jnp.minimum(i0 + 1, in_size - 1)
    w1 = src - i0.astype(jnp.float32)
    w0 = 1.0 - w1
    A = jnp.zeros((out_size, in_size), jnp.float32)
    A = A.at[jnp.arange(out_size), i0].add(w0)
    A = A.at[jnp.arange(out_size), i1].add(w1)
    return A


def upsample_add(x_p, y_p):
    """F.interpolate(x, size=y.shape, mode='bilinear', align_corners=True) + y (NHWC)."""
    Ah = _bilinear_matrix(y_p.shape[1], x_p.shape[1])
    Aw = _bilinear_matrix(y_p.shape[2], x_p.shape[2])
    up = jnp.einsum("Hh,nhwc,Ww->nHWc", Ah, x_p, Aw)
    return up + y_p


# ------------------------------ UNet2D modules ------------------------------
def basic_block(x_p, p):
    # BasicBlock2d: conv_norm_act -> conv_norm -> (+x) -> leaky_relu  (all fused per conv)
    y = conv_gn_act(x_p, p["conv1"], stride=1, padding=1, act=True)
    return conv_gn_act(y, p["conv2"], stride=1, padding=1, act=True, residual=x_p)


def down_layer(x_p, p, stride):
    x_p = conv_gn_act(x_p, p["conv"], stride=stride, padding=1, act=True)
    return basic_block(x_p, p["block"])


def unet2d_forward(params, x):
    """x: (N, C, H, W) float32 (public NCHW API) -> (N, OUT_CH, H, W)."""
    depth = len(FILTERS)
    N, cin, H, W = x.shape
    # NCHW -> channel-padded NHWC once, at the API boundary only.
    x_p = jnp.pad(x.transpose(0, 2, 3, 1), ((0, 0), (0, 0), (0, 0), (0, CP - cin)))

    x_p = conv_gn_act(x_p, params["conv_in"], stride=1, padding=2, act=True)
    down_x = []
    for i in range(depth - 1):
        x_p = down_layer(x_p, params["down"][i], stride=(1 if i == 0 else 2))
        down_x.append(x_p)
    x_p = down_layer(x_p, params["down"][depth - 1], stride=(2 if depth > 1 else 1))
    for j in range(depth - 1):
        i = depth - 2 - j
        p = params["up"][i]
        x_p = conv_gn_act(x_p, p["conv"], stride=1, padding=1, act=True)
        x_p = upsample_add(x_p, down_x[i])
        x_p = basic_block(x_p, p["block"])
    out = conv_bias(x_p, params["conv_out"], stride=1, padding=2)
    return out[..., :OUT_CH].transpose(0, 3, 1, 2)


# ------------------------------ parameter init ------------------------------
def init_params(key):
    keys = iter(jax.random.split(key, 128))

    def cna(cin, cout, k):
        w = jax.random.normal(next(keys), (cout, cin, k, k), jnp.float32)
        w = w * (0.5 / math.sqrt(cin * k * k))
        return {"w": w, "gamma": jnp.ones((cout,), jnp.float32),
                "beta": jnp.zeros((cout,), jnp.float32)}

    def block(ch):
        return {"conv1": cna(ch, ch, 3), "conv2": cna(ch, ch, 3)}

    depth = len(FILTERS)
    params = {"conv_in": cna(IN_CH, FILTERS[0], 5)}
    w_out = jax.random.normal(next(keys), (OUT_CH, FILTERS[0], 5, 5), jnp.float32)
    w_out = w_out * (0.5 / math.sqrt(FILTERS[0] * 25))
    params["conv_out"] = {"w": w_out, "b": jnp.zeros((OUT_CH,), jnp.float32)}
    params["down"] = []
    for i in range(depth):
        prev = max(0, i - 1)
        params["down"].append({"conv": cna(FILTERS[prev], FILTERS[i], 3),
                               "block": block(FILTERS[i])})
    params["up"] = []
    for j in range(1, depth):
        params["up"].append({"conv": cna(FILTERS[j], FILTERS[j - 1], 3),
                             "block": block(FILTERS[j - 1])})
    return params


if __name__ == "__main__":
    key = jax.random.PRNGKey(0)
    k_param, k_x = jax.random.split(key)
    params = init_params(k_param)
    # stride-downsampling UNet assumes odd (2n+1) spatial size
    x = jax.random.normal(k_x, (2, IN_CH, 17, 17), jnp.float32)

    fwd = jax.jit(unet2d_forward)
    out = fwd(params, x)
    out = jax.block_until_ready(out)

    assert out.shape == (2, OUT_CH, 17, 17), out.shape
    assert bool(jnp.all(jnp.isfinite(out)))
    print("KERNEL_OK")
</pallas_src>

<mosaic_0001>
module attributes {stable_mosaic.version = 11 : i64} {
  func.func @kernel(%arg0: i32, %arg1: memref<1x289x25xbf16, #tpu.memory_space<vmem>>, %arg2: memref<25x128xbf16, #tpu.memory_space<vmem>>, %arg3: memref<128x128xf32, #tpu.memory_space<vmem>>, %arg4: memref<1x128xf32, #tpu.memory_space<vmem>>, %arg5: memref<1x128xf32, #tpu.memory_space<vmem>>, %arg6: memref<1x289x128xf32, #tpu.memory_space<vmem>>) attributes {dimension_semantics = [#tpu.dimension_semantics<parallel>], iteration_bounds = array<i64: 2>, scalar_prefetch = 0 : i64, scratch_operands = 0 : i64, tpu.core_type = #tpu.core_type<tc>, window_params = [{transform_indices = @transform_0, window_bounds = array<i64: 1, 289, 25>}, {pipeline_mode = #tpu.pipeline_mode<synchronous>, transform_indices = @transform_1, window_bounds = array<i64: 25, 128>}, {pipeline_mode = #tpu.pipeline_mode<synchronous>, transform_indices = @transform_2, window_bounds = array<i64: 128, 128>}, {pipeline_mode = #tpu.pipeline_mode<synchronous>, transform_indices = @transform_3, window_bounds = array<i64: 1, 128>}, {pipeline_mode = #tpu.pipeline_mode<synchronous>, transform_indices = @transform_4, window_bounds = array<i64: 1, 128>}, {transform_indices = @transform_5, window_bounds = array<i64: 1, 289, 128>}]} {
    %c0 = arith.constant 0 : index
    %c0_0 = arith.constant 0 : index
    %c0_1 = arith.constant 0 : index
    %0 = vector.load %arg1[%c0, %c0_0, %c0_1] : memref<1x289x25xbf16, #tpu.memory_space<vmem>>, vector<1x289x25xbf16>
    %1 = vector.shape_cast %0 : vector<1x289x25xbf16> to vector<289x25xbf16>
    %c0_2 = arith.constant 0 : index
    %c0_3 = arith.constant 0 : index
    %2 = vector.load %arg2[%c0_2, %c0_3] : memref<25x128xbf16, #tpu.memory_space<vmem>>, vector<25x128xbf16>
    %cst = arith.constant dense<0.000000e+00> : vector<289x128xf32>
    %3 = tpu.matmul %1, %2, %cst {dimension_numbers = #tpu.dot_dimension_numbers<[1], [0], [0], [1], [0, 0, 1, 1], [], []>} : vector<289x25xbf16>, vector<25x128xbf16>, vector<289x128xf32> -> vector<289x128xf32>
    %cst_4 = arith.constant dense<0.000000e+00> : vector<128xf32>
    %4 = vector.multi_reduction <add>, %3, %cst_4 [0] : vector<289x128xf32> to vector<128xf32>
    %5 = vector.shape_cast %4 : vector<128xf32> to vector<1x128xf32>
    %c0_5 = arith.constant 0 : index
    %c0_6 = arith.constant 0 : index
    %6 = vector.load %arg3[%c0_5, %c0_6] : memref<128x128xf32, #tpu.memory_space<vmem>>, vector<128x128xf32>
    %cst_7 = arith.constant dense<0.000000e+00> : vector<1x128xf32>
    %7 = tpu.matmul %5, %6, %cst_7 {dimension_numbers = #tpu.dot_dimension_numbers<[1], [0], [0], [1], [0, 0, 1, 1], [], []>} : vector<1x128xf32>, vector<128x128xf32>, vector<1x128xf32> -> vector<1x128xf32>
    %8 = vector.broadcast %7 : vector<1x128xf32> to vector<289x128xf32>
    %9 = arith.subf %3, %8 : vector<289x128xf32>
    %10 = arith.mulf %9, %9 : vector<289x128xf32>
    %cst_8 = arith.constant dense<0.000000e+00> : vector<128xf32>
    %11 = vector.multi_reduction <add>, %10, %cst_8 [0] : vector<289x128xf32> to vector<128xf32>
    %12 = vector.shape_cast %11 : vector<128xf32> to vector<1x128xf32>
    %c0_9 = arith.constant 0 : index
    %c0_10 = arith.constant 0 : index
    %13 = vector.load %arg3[%c0_9, %c0_10] : memref<128x128xf32, #tpu.memory_space<vmem>>, vector<128x128xf32>
    %cst_11 = arith.constant dense<0.000000e+00> : vector<1x128xf32>
    %14 = tpu.matmul %12, %13, %cst_11 {dimension_numbers = #tpu.dot_dimension_numbers<[1], [0], [0], [1], [0, 0, 1, 1], [], []>} : vector<1x128xf32>, vector<128x128xf32>, vector<1x128xf32> -> vector<1x128xf32>
    %cst_12 = arith.constant 9.99999974E-6 : f32
    %15 = vector.broadcast %cst_12 : f32 to vector<1x128xf32>
    %16 = arith.addf %14, %15 : vector<1x128xf32>
    %17 = math.rsqrt %16 : vector<1x128xf32>
    %18 = vector.broadcast %17 : vector<1x128xf32> to vector<289x128xf32>
    %19 = arith.mulf %9, %18 : vector<289x128xf32>
    %c0_13 = arith.constant 0 : index
    %c0_14 = arith.constant 0 : index
    %20 = vector.load %arg4[%c0_13, %c0_14] : memref<1x128xf32, #tpu.memory_space<vmem>>, vector<1x128xf32>
    %21 = vector.broadcast %20 : vector<1x128xf32> to vector<289x128xf32>
    %22 = arith.mulf %19, %21 : vector<289x128xf32>
    %c0_15 = arith.constant 0 : index
    %c0_16 = arith.constant 0 : index
    %23 = vector.load %arg5[%c0_15, %c0_16] : memref<1x128xf32, #tpu.memory_space<vmem>>, vector<1x128xf32>
    %24 = vector.broadcast %23 : vector<1x128xf32> to vector<289x128xf32>
    %25 = arith.addf %22, %24 : vector<289x128xf32>
    %cst_17 = arith.constant 0.000000e+00 : f32
    %26 = vector.broadcast %cst_17 : f32 to vector<289x128xf32>
    %27 = arith.cmpf oge, %25, %26 : vector<289x128xf32>
    %cst_18 = arith.constant 2.000000e-01 : f32
    %28 = vector.broadcast %cst_18 : f32 to vector<289x128xf32>
    %29 = arith.mulf %28, %25 : vector<289x128xf32>
    %30 = arith.select %27, %25, %29 : vector<289x128xi1>, vector<289x128xf32>
    %c0_19 = arith.constant 0 : index
    %c0_20 = arith.constant 0 : index
    %c0_21 = arith.constant 0 : index
    %31 = vector.load %arg6[%c0_19, %c0_20, %c0_21] : memref<1x289x128xf32, #tpu.memory_space<vmem>>, vector<1x289x128xf32>
    %32 = vector.shape_cast %31 : vector<1x289x128xf32> to vector<289x128xf32>
    %33 = vector.shape_cast %30 : vector<289x128xf32> to vector<1x289x128xf32>
    tpu.vector_store %arg6[%c0_19, %c0_20, %c0_21], %33 {strides = array<i32>} : memref<1x289x128xf32, #tpu.memory_space<vmem>>, vector<1x289x128xf32>,
    return
  }
  func.func @transform_0(%arg0: i32) -> (i32, i32, i32) {
    %c0_i32 = arith.constant 0 : i32
    %c0_i32_0 = arith.constant 0 : i32
    %c0_i32_1 = arith.constant 0 : i32
    return %arg0, %c0_i32, %c0_i32_0 : i32, i32, i32
  }
  func.func @transform_1(%arg0: i32) -> (i32, i32) {
    %c0_i32 = arith.constant 0 : i32
    %c0_i32_0 = arith.constant 0 : i32
    %c0_i32_1 = arith.constant 0 : i32
    return %c0_i32, %c0_i32_0 : i32, i32
  }
  func.func @transform_2(%arg0: i32) -> (i32, i32) {
    %c0_i32 = arith.constant 0 : i32
    %c0_i32_0 = arith.constant 0 : i32
    %c0_i32_1 = arith.constant 0 : i32
    return %c0_i32, %c0_i32_0 : i32, i32
  }
  func.func @transform_3(%arg0: i32) -> (i32, i32) {
    %c0_i32 = arith.constant 0 : i32
    %c0_i32_0 = arith.constant 0 : i32
    %c0_i32_1 = arith.constant 0 : i32
    return %c0_i32, %c0_i32_0 : i32, i32
  }
  func.func @transform_4(%arg0: i32) -> (i32, i32) {
    %c0_i32 = arith.constant 0 : i32
    %c0_i32_0 = arith.constant 0 : i32
    %c0_i32_1 = arith.constant 0 : i32
    return %c0_i32, %c0_i32_0 : i32, i32
  }
  func.func @transform_5(%arg0: i32) -> (i32, i32, i32) {
    %c0_i32 = arith.constant 0 : i32
    %c0_i32_0 = arith.constant 0 : i32
    %c0_i32_1 = arith.constant 0 : i32
    return %arg0, %c0_i32, %c0_i32_0 : i32, i32, i32
  }
}

module attributes {stable_mosaic.version = 11 : i64} {
  func.func @kernel(%arg0: i32, %arg1: memref<1x289x72xbf16, #tpu.memory_space<vmem>>, %arg2: memref<72x128xbf16, #tpu.memory_space<vmem>>, %arg3: memref<128x128xf32, #tpu.memory_space<vmem>>, %arg4: memref<1x128xf32, #tpu.memory_space<vmem>>, %arg5: memref<1x128xf32, #tpu.memory_space<vmem>>, %arg6: memref<1x289x128xf32, #tpu.memory_space<vmem>>, %arg7: memref<1x289x128xf32, #tpu.memory_space<vmem>>) attributes {dimension_semantics = [#tpu.dimension_semantics<parallel>], iteration_bounds = array<i64: 2>, scalar_prefetch = 0 : i64, scratch_operands = 0 : i64, tpu.core_type = #tpu.core_type<tc>, window_params = [{transform_indices = @transform_0, window_bounds = array<i64: 1, 289, 72>}, {pipeline_mode = #tpu.pipeline_mode<synchronous>, transform_indices = @transform_1, window_bounds = array<i64: 72, 128>}, {pipeline_mode = #tpu.pipeline_mode<synchronous>, transform_indices = @transform_2, window_bounds = array<i64: 128, 128>}, {pipeline_mode = #tpu.pipeline_mode<synchronous>, transform_indices = @transform_3, window_bounds = array<i64: 1, 128>}, {pipeline_mode = #tpu.pipeline_mode<synchronous>, transform_indices = @transform_4, window_bounds = array<i64: 1, 128>}, {transform_indices = @transform_5, window_bounds = array<i64: 1, 289, 128>}, {transform_indices = @transform_6, window_bounds = array<i64: 1, 289, 128>}]} {
    %c0 = arith.constant 0 : index
    %c0_0 = arith.constant 0 : index
    %c0_1 = arith.constant 0 : index
    %0 = vector.load %arg1[%c0, %c0_0, %c0_1] : memref<1x289x72xbf16, #tpu.memory_space<vmem>>, vector<1x289x72xbf16>
    %1 = vector.shape_cast %0 : vector<1x289x72xbf16> to vector<289x72xbf16>
    %c0_2 = arith.constant 0 : index
    %c0_3 = arith.constant 0 : index
    %2 = vector.load %arg2[%c0_2, %c0_3] : memref<72x128xbf16, #tpu.memory_space<vmem>>, vector<72x128xbf16>
    %cst = arith.constant dense<0.000000e+00> : vector<289x128xf32>
    %3 = tpu.matmul %1, %2, %cst {dimension_numbers = #tpu.dot_dimension_numbers<[1], [0], [0], [1], [0, 0, 1, 1], [], []>} : vector<289x72xbf16>, vector<72x128xbf16>, vector<289x128xf32> -> vector<289x128xf32>
    %cst_4 = arith.constant dense<0.000000e+00> : vector<128xf32>
    %4 = vector.multi_reduction <add>, %3, %cst_4 [0] : vector<289x128xf32> to vector<128xf32>
    %5 = vector.shape_cast %4 : vector<128xf32> to vector<1x128xf32>
    %c0_5 = arith.constant 0 : index
    %c0_6 = arith.constant 0 : index
    %6 = vector.load %arg3[%c0_5, %c0_6] : memref<128x128xf32, #tpu.memory_space<vmem>>, vector<128x128xf32>
    %cst_7 = arith.constant dense<0.000000e+00> : vector<1x128xf32>
    %7 = tpu.matmul %5, %6, %cst_7 {dimension_numbers = #tpu.dot_dimension_numbers<[1], [0], [0], [1], [0, 0, 1, 1], [], []>} : vector<1x128xf32>, vector<128x128xf32>, vector<1x128xf32> -> vector<1x128xf32>
    %8 = vector.broadcast %7 : vector<1x128xf32> to vector<289x128xf32>
    %9 = arith.subf %3, %8 : vector<289x128xf32>
    %10 = arith.mulf %9, %9 : vector<289x128xf32>
    %cst_8 = arith.constant dense<0.000000e+00> : vector<128xf32>
    %11 = vector.multi_reduction <add>, %10, %cst_8 [0] : vector<289x128xf32> to vector<128xf32>
    %12 = vector.shape_cast %11 : vector<128xf32> to vector<1x128xf32>
    %c0_9 = arith.constant 0 : index
    %c0_10 = arith.constant 0 : index
    %13 = vector.load %arg3[%c0_9, %c0_10] : memref<128x128xf32, #tpu.memory_space<vmem>>, vector<128x128xf32>
    %cst_11 = arith.constant dense<0.000000e+00> : vector<1x128xf32>
    %14 = tpu.matmul %12, %13, %cst_11 {dimension_numbers = #tpu.dot_dimension_numbers<[1], [0], [0], [1], [0, 0, 1, 1], [], []>} : vector<1x128xf32>, vector<128x128xf32>, vector<1x128xf32> -> vector<1x128xf32>
    %cst_12 = arith.constant 9.99999974E-6 : f32
    %15 = vector.broadcast %cst_12 : f32 to vector<1x128xf32>
    %16 = arith.addf %14, %15 : vector<1x128xf32>
    %17 = math.rsqrt %16 : vector<1x128xf32>
    %18 = vector.broadcast %17 : vector<1x128xf32> to vector<289x128xf32>
    %19 = arith.mulf %9, %18 : vector<289x128xf32>
    %c0_13 = arith.constant 0 : index
    %c0_14 = arith.constant 0 : index
    %20 = vector.load %arg4[%c0_13, %c0_14] : memref<1x128xf32, #tpu.memory_space<vmem>>, vector<1x128xf32>
    %21 = vector.broadcast %20 : vector<1x128xf32> to vector<289x128xf32>
    %22 = arith.mulf %19, %21 : vector<289x128xf32>
    %c0_15 = arith.constant 0 : index
    %c0_16 = arith.constant 0 : index
    %23 = vector.load %arg5[%c0_15, %c0_16] : memref<1x128xf32, #tpu.memory_space<vmem>>, vector<1x128xf32>
    %24 = vector.broadcast %23 : vector<1x128xf32> to vector<289x128xf32>
    %25 = arith.addf %22, %24 : vector<289x128xf32>
    %c0_17 = arith.constant 0 : index
    %c0_18 = arith.constant 0 : index
    %c0_19 = arith.constant 0 : index
    %26 = vector.load %arg6[%c0_17, %c0_18, %c0_19] : memref<1x289x128xf32, #tpu.memory_space<vmem>>, vector<1x289x128xf32>
    %27 = vector.shape_cast %26 : vector<1x289x128xf32> to vector<289x128xf32>
    %28 = arith.addf %25, %27 : vector<289x128xf32>
    %cst_20 = arith.constant 0.000000e+00 : f32
    %29 = vector.broadcast %cst_20 : f32 to vector<289x128xf32>
    %30 = arith.cmpf oge, %28, %29 : vector<289x128xf32>
    %cst_21 = arith.constant 2.000000e-01 : f32
    %31 = vector.broadcast %cst_21 : f32 to vector<289x128xf32>
    %32 = arith.mulf %31, %28 : vector<289x128xf32>
    %33 = arith.select %30, %28, %32 : vector<289x128xi1>, vector<289x128xf32>
    %c0_22 = arith.constant 0 : index
    %c0_23 = arith.constant 0 : index
    %c0_24 = arith.constant 0 : index
    %34 = vector.load %arg7[%c0_22, %c0_23, %c0_24] : memref<1x289x128xf32, #tpu.memory_space<vmem>>, vector<1x289x128xf32>
    %35 = vector.shape_cast %34 : vector<1x289x128xf32> to vector<289x128xf32>
    %36 = vector.shape_cast %33 : vector<289x128xf32> to vector<1x289x128xf32>
    tpu.vector_store %arg7[%c0_22, %c0_23, %c0_24], %36 {strides = array<i32>} : memref<1x289x128xf32, #tpu.memory_space<vmem>>, vector<1x289x128xf32>,
    return
  }
  func.func @transform_0(%arg0: i32) -> (i32, i32, i32) {
    %c0_i32 = arith.constant 0 : i32
    %c0_i32_0 = arith.constant 0 : i32
    %c0_i32_1 = arith.constant 0 : i32
    return %arg0, %c0_i32, %c0_i32_0 : i32, i32, i32
  }
  func.func @transform_1(%arg0: i32) -> (i32, i32) {
    %c0_i32 = arith.constant 0 : i32
    %c0_i32_0 = arith.constant 0 : i32
    %c0_i32_1 = arith.constant 0 : i32
    return %c0_i32, %c0_i32_0 : i32, i32
  }
  func.func @transform_2(%arg0: i32) -> (i32, i32) {
    %c0_i32 = arith.constant 0 : i32
    %c0_i32_0 = arith.constant 0 : i32
    %c0_i32_1 = arith.constant 0 : i32
    return %c0_i32, %c0_i32_0 : i32, i32
  }
  func.func @transform_3(%arg0: i32) -> (i32, i32) {
    %c0_i32 = arith.constant 0 : i32
    %c0_i32_0 = arith.constant 0 : i32
    %c0_i32_1 = arith.constant 0 : i32
    return %c0_i32, %c0_i32_0 : i32, i32
  }
  func.func @transform_4(%arg0: i32) -> (i32, i32) {
    %c0_i32 = arith.constant 0 : i32
    %c0_i32_0 = arith.constant 0 : i32
    %c0_i32_1 = arith.constant 0 : i32
    return %c0_i32, %c0_i32_0 : i32, i32
  }
  func.func @transform_5(%arg0: i32) -> (i32, i32, i32) {
    %c0_i32 = arith.constant 0 : i32
    %c0_i32_0 = arith.constant 0 : i32
    %c0_i32_1 = arith.constant 0 : i32
    return %arg0, %c0_i32, %c0_i32_0 : i32, i32, i32
  }
  func.func @transform_6(%arg0: i32) -> (i32, i32, i32) {
    %c0_i32 = arith.constant 0 : i32
    %c0_i32_0 = arith.constant 0 : i32
    %c0_i32_1 = arith.constant 0 : i32
    return %arg0, %c0_i32, %c0_i32_0 : i32, i32, i32
  }
}

module attributes {stable_mosaic.version = 11 : i64} {
  func.func @kernel(%arg0: i32, %arg1: memref<1x289x72xbf16, #tpu.memory_space<vmem>>, %arg2: memref<72x128xbf16, #tpu.memory_space<vmem>>, %arg3: memref<128x128xf32, #tpu.memory_space<vmem>>, %arg4: memref<1x128xf32, #tpu.memory_space<vmem>>, %arg5: memref<1x128xf32, #tpu.memory_space<vmem>>, %arg6: memref<1x289x128xf32, #tpu.memory_space<vmem>>) attributes {dimension_semantics = [#tpu.dimension_semantics<parallel>], iteration_bounds = array<i64: 2>, scalar_prefetch = 0 : i64, scratch_operands = 0 : i64, tpu.core_type = #tpu.core_type<tc>, window_params = [{transform_indices = @transform_0, window_bounds = array<i64: 1, 289, 72>}, {pipeline_mode = #tpu.pipeline_mode<synchronous>, transform_indices = @transform_1, window_bounds = array<i64: 72, 128>}, {pipeline_mode = #tpu.pipeline_mode<synchronous>, transform_indices = @transform_2, window_bounds = array<i64: 128, 128>}, {pipeline_mode = #tpu.pipeline_mode<synchronous>, transform_indices = @transform_3, window_bounds = array<i64: 1, 128>}, {pipeline_mode = #tpu.pipeline_mode<synchronous>, transform_indices = @transform_4, window_bounds = array<i64: 1, 128>}, {transform_indices = @transform_5, window_bounds = array<i64: 1, 289, 128>}]} {
    %c0 = arith.constant 0 : index
    %c0_0 = arith.constant 0 : index
    %c0_1 = arith.constant 0 : index
    %0 = vector.load %arg1[%c0, %c0_0, %c0_1] : memref<1x289x72xbf16, #tpu.memory_space<vmem>>, vector<1x289x72xbf16>
    %1 = vector.shape_cast %0 : vector<1x289x72xbf16> to vector<289x72xbf16>
    %c0_2 = arith.constant 0 : index
    %c0_3 = arith.constant 0 : index
    %2 = vector.load %arg2[%c0_2, %c0_3] : memref<72x128xbf16, #tpu.memory_space<vmem>>, vector<72x128xbf16>
    %cst = arith.constant dense<0.000000e+00> : vector<289x128xf32>
    %3 = tpu.matmul %1, %2, %cst {dimension_numbers = #tpu.dot_dimension_numbers<[1], [0], [0], [1], [0, 0, 1, 1], [], []>} : vector<289x72xbf16>, vector<72x128xbf16>, vector<289x128xf32> -> vector<289x128xf32>
    %cst_4 = arith.constant dense<0.000000e+00> : vector<128xf32>
    %4 = vector.multi_reduction <add>, %3, %cst_4 [0] : vector<289x128xf32> to vector<128xf32>
    %5 = vector.shape_cast %4 : vector<128xf32> to vector<1x128xf32>
    %c0_5 = arith.constant 0 : index
    %c0_6 = arith.constant 0 : index
    %6 = vector.load %arg3[%c0_5, %c0_6] : memref<128x128xf32, #tpu.memory_space<vmem>>, vector<128x128xf32>
    %cst_7 = arith.constant dense<0.000000e+00> : vector<1x128xf32>
    %7 = tpu.matmul %5, %6, %cst_7 {dimension_numbers = #tpu.dot_dimension_numbers<[1], [0], [0], [1], [0, 0, 1, 1], [], []>} : vector<1x128xf32>, vector<128x128xf32>, vector<1x128xf32> -> vector<1x128xf32>
    %8 = vector.broadcast %7 : vector<1x128xf32> to vector<289x128xf32>
    %9 = arith.subf %3, %8 : vector<289x128xf32>
    %10 = arith.mulf %9, %9 : vector<289x128xf32>
    %cst_8 = arith.constant dense<0.000000e+00> : vector<128xf32>
    %11 = vector.multi_reduction <add>, %10, %cst_8 [0] : vector<289x128xf32> to vector<128xf32>
    %12 = vector.shape_cast %11 : vector<128xf32> to vector<1x128xf32>
    %c0_9 = arith.constant 0 : index
    %c0_10 = arith.constant 0 : index
    %13 = vector.load %arg3[%c0_9, %c0_10] : memref<128x128xf32, #tpu.memory_space<vmem>>, vector<128x128xf32>
    %cst_11 = arith.constant dense<0.000000e+00> : vector<1x128xf32>
    %14 = tpu.matmul %12, %13, %cst_11 {dimension_numbers = #tpu.dot_dimension_numbers<[1], [0], [0], [1], [0, 0, 1, 1], [], []>} : vector<1x128xf32>, vector<128x128xf32>, vector<1x128xf32> -> vector<1x128xf32>
    %cst_12 = arith.constant 9.99999974E-6 : f32
    %15 = vector.broadcast %cst_12 : f32 to vector<1x128xf32>
    %16 = arith.addf %14, %15 : vector<1x128xf32>
    %17 = math.rsqrt %16 : vector<1x128xf32>
    %18 = vector.broadcast %17 : vector<1x128xf32> to vector<289x128xf32>
    %19 = arith.mulf %9, %18 : vector<289x128xf32>
    %c0_13 = arith.constant 0 : index
    %c0_14 = arith.constant 0 : index
    %20 = vector.load %arg4[%c0_13, %c0_14] : memref<1x128xf32, #tpu.memory_space<vmem>>, vector<1x128xf32>
    %21 = vector.broadcast %20 : vector<1x128xf32> to vector<289x128xf32>
    %22 = arith.mulf %19, %21 : vector<289x128xf32>
    %c0_15 = arith.constant 0 : index
    %c0_16 = arith.constant 0 : index
    %23 = vector.load %arg5[%c0_15, %c0_16] : memref<1x128xf32, #tpu.memory_space<vmem>>, vector<1x128xf32>
    %24 = vector.broadcast %23 : vector<1x128xf32> to vector<289x128xf32>
    %25 = arith.addf %22, %24 : vector<289x128xf32>
    %cst_17 = arith.constant 0.000000e+00 : f32
    %26 = vector.broadcast %cst_17 : f32 to vector<289x128xf32>
    %27 = arith.cmpf oge, %25, %26 : vector<289x128xf32>
    %cst_18 = arith.constant 2.000000e-01 : f32
    %28 = vector.broadcast %cst_18 : f32 to vector<289x128xf32>
    %29 = arith.mulf %28, %25 : vector<289x128xf32>
    %30 = arith.select %27, %25, %29 : vector<289x128xi1>, vector<289x128xf32>
    %c0_19 = arith.constant 0 : index
    %c0_20 = arith.constant 0 : index
    %c0_21 = arith.constant 0 : index
    %31 = vector.load %arg6[%c0_19, %c0_20, %c0_21] : memref<1x289x128xf32, #tpu.memory_space<vmem>>, vector<1x289x128xf32>
    %32 = vector.shape_cast %31 : vector<1x289x128xf32> to vector<289x128xf32>
    %33 = vector.shape_cast %30 : vector<289x128xf32> to vector<1x289x128xf32>
    tpu.vector_store %arg6[%c0_19, %c0_20, %c0_21], %33 {strides = array<i32>} : memref<1x289x128xf32, #tpu.memory_space<vmem>>, vector<1x289x128xf32>,
    return
  }
  func.func @transform_0(%arg0: i32) -> (i32, i32, i32) {
    %c0_i32 = arith.constant 0 : i32
    %c0_i32_0 = arith.constant 0 : i32
    %c0_i32_1 = arith.constant 0 : i32
    return %arg0, %c0_i32, %c0_i32_0 : i32, i32, i32
  }
  func.func @transform_1(%arg0: i32) -> (i32, i32) {
    %c0_i32 = arith.constant 0 : i32
    %c0_i32_0 = arith.constant 0 : i32
    %c0_i32_1 = arith.constant 0 : i32
    return %c0_i32, %c0_i32_0 : i32, i32
  }
  func.func @transform_2(%arg0: i32) -> (i32, i32) {
    %c0_i32 = arith.constant 0 : i32
    %c0_i32_0 = arith.constant 0 : i32
    %c0_i32_1 = arith.constant 0 : i32
    return %c0_i32, %c0_i32_0 : i32, i32
  }
  func.func @transform_3(%arg0: i32) -> (i32, i32) {
    %c0_i32 = arith.constant 0 : i32
    %c0_i32_0 = arith.constant 0 : i32
    %c0_i32_1 = arith.constant 0 : i32
    return %c0_i32, %c0_i32_0 : i32, i32
  }
  func.func @transform_4(%arg0: i32) -> (i32, i32) {
    %c0_i32 = arith.constant 0 : i32
    %c0_i32_0 = arith.constant 0 : i32
    %c0_i32_1 = arith.constant 0 : i32
    return %c0_i32, %c0_i32_0 : i32, i32
  }
  func.func @transform_5(%arg0: i32) -> (i32, i32, i32) {
    %c0_i32 = arith.constant 0 : i32
    %c0_i32_0 = arith.constant 0 : i32
    %c0_i32_1 = arith.constant 0 : i32
    return %arg0, %c0_i32, %c0_i32_0 : i32, i32, i32
  }
}

module attributes {stable_mosaic.version = 11 : i64} {
  func.func @kernel(%arg0: i32, %arg1: memref<1x81x72xbf16, #tpu.memory_space<vmem>>, %arg2: memref<72x128xbf16, #tpu.memory_space<vmem>>, %arg3: memref<128x128xf32, #tpu.memory_space<vmem>>, %arg4: memref<1x128xf32, #tpu.memory_space<vmem>>, %arg5: memref<1x128xf32, #tpu.memory_space<vmem>>, %arg6: memref<1x81x128xf32, #tpu.memory_space<vmem>>) attributes {dimension_semantics = [#tpu.dimension_semantics<parallel>], iteration_bounds = array<i64: 2>, scalar_prefetch = 0 : i64, scratch_operands = 0 : i64, tpu.core_type = #tpu.core_type<tc>, window_params = [{transform_indices = @transform_0, window_bounds = array<i64: 1, 81, 72>}, {pipeline_mode = #tpu.pipeline_mode<synchronous>, transform_indices = @transform_1, window_bounds = array<i64: 72, 128>}, {pipeline_mode = #tpu.pipeline_mode<synchronous>, transform_indices = @transform_2, window_bounds = array<i64: 128, 128>}, {pipeline_mode = #tpu.pipeline_mode<synchronous>, transform_indices = @transform_3, window_bounds = array<i64: 1, 128>}, {pipeline_mode = #tpu.pipeline_mode<synchronous>, transform_indices = @transform_4, window_bounds = array<i64: 1, 128>}, {transform_indices = @transform_5, window_bounds = array<i64: 1, 81, 128>}]} {
    %c0 = arith.constant 0 : index
    %c0_0 = arith.constant 0 : index
    %c0_1 = arith.constant 0 : index
    %0 = vector.load %arg1[%c0, %c0_0, %c0_1] : memref<1x81x72xbf16, #tpu.memory_space<vmem>>, vector<1x81x72xbf16>
    %1 = vector.shape_cast %0 : vector<1x81x72xbf16> to vector<81x72xbf16>
    %c0_2 = arith.constant 0 : index
    %c0_3 = arith.constant 0 : index
    %2 = vector.load %arg2[%c0_2, %c0_3] : memref<72x128xbf16, #tpu.memory_space<vmem>>, vector<72x128xbf16>
    %cst = arith.constant dense<0.000000e+00> : vector<81x128xf32>
    %3 = tpu.matmul %1, %2, %cst {dimension_numbers = #tpu.dot_dimension_numbers<[1], [0], [0], [1], [0, 0, 1, 1], [], []>} : vector<81x72xbf16>, vector<72x128xbf16>, vector<81x128xf32> -> vector<81x128xf32>
    %cst_4 = arith.constant dense<0.000000e+00> : vector<128xf32>
    %4 = vector.multi_reduction <add>, %3, %cst_4 [0] : vector<81x128xf32> to vector<128xf32>
    %5 = vector.shape_cast %4 : vector<128xf32> to vector<1x128xf32>
    %c0_5 = arith.constant 0 : index
    %c0_6 = arith.constant 0 : index
    %6 = vector.load %arg3[%c0_5, %c0_6] : memref<128x128xf32, #tpu.memory_space<vmem>>, vector<128x128xf32>
    %cst_7 = arith.constant dense<0.000000e+00> : vector<1x128xf32>
    %7 = tpu.matmul %5, %6, %cst_7 {dimension_numbers = #tpu.dot_dimension_numbers<[1], [0], [0], [1], [0, 0, 1, 1], [], []>} : vector<1x128xf32>, vector<128x128xf32>, vector<1x128xf32> -> vector<1x128xf32>
    %8 = vector.broadcast %7 : vector<1x128xf32> to vector<81x128xf32>
    %9 = arith.subf %3, %8 : vector<81x128xf32>
    %10 = arith.mulf %9, %9 : vector<81x128xf32>
    %cst_8 = arith.constant dense<0.000000e+00> : vector<128xf32>
    %11 = vector.multi_reduction <add>, %10, %cst_8 [0] : vector<81x128xf32> to vector<128xf32>
    %12 = vector.shape_cast %11 : vector<128xf32> to vector<1x128xf32>
    %c0_9 = arith.constant 0 : index
    %c0_10 = arith.constant 0 : index
    %13 = vector.load %arg3[%c0_9, %c0_10] : memref<128x128xf32, #tpu.memory_space<vmem>>, vector<128x128xf32>
    %cst_11 = arith.constant dense<0.000000e+00> : vector<1x128xf32>
    %14 = tpu.matmul %12, %13, %cst_11 {dimension_numbers = #tpu.dot_dimension_numbers<[1], [0], [0], [1], [0, 0, 1, 1], [], []>} : vector<1x128xf32>, vector<128x128xf32>, vector<1x128xf32> -> vector<1x128xf32>
    %cst_12 = arith.constant 9.99999974E-6 : f32
    %15 = vector.broadcast %cst_12 : f32 to vector<1x128xf32>
    %16 = arith.addf %14, %15 : vector<1x128xf32>
    %17 = math.rsqrt %16 : vector<1x128xf32>
    %18 = vector.broadcast %17 : vector<1x128xf32> to vector<81x128xf32>
    %19 = arith.mulf %9, %18 : vector<81x128xf32>
    %c0_13 = arith.constant 0 : index
    %c0_14 = arith.constant 0 : index
    %20 = vector.load %arg4[%c0_13, %c0_14] : memref<1x128xf32, #tpu.memory_space<vmem>>, vector<1x128xf32>
    %21 = vector.broadcast %20 : vector<1x128xf32> to vector<81x128xf32>
    %22 = arith.mulf %19, %21 : vector<81x128xf32>
    %c0_15 = arith.constant 0 : index
    %c0_16 = arith.constant 0 : index
    %23 = vector.load %arg5[%c0_15, %c0_16] : memref<1x128xf32, #tpu.memory_space<vmem>>, vector<1x128xf32>
    %24 = vector.broadcast %23 : vector<1x128xf32> to vector<81x128xf32>
    %25 = arith.addf %22, %24 : vector<81x128xf32>
    %cst_17 = arith.constant 0.000000e+00 : f32
    %26 = vector.broadcast %cst_17 : f32 to vector<81x128xf32>
    %27 = arith.cmpf oge, %25, %26 : vector<81x128xf32>
    %cst_18 = arith.constant 2.000000e-01 : f32
    %28 = vector.broadcast %cst_18 : f32 to vector<81x128xf32>
    %29 = arith.mulf %28, %25 : vector<81x128xf32>
    %30 = arith.select %27, %25, %29 : vector<81x128xi1>, vector<81x128xf32>
    %c0_19 = arith.constant 0 : index
    %c0_20 = arith.constant 0 : index
    %c0_21 = arith.constant 0 : index
    %31 = vector.load %arg6[%c0_19, %c0_20, %c0_21] : memref<1x81x128xf32, #tpu.memory_space<vmem>>, vector<1x81x128xf32>
    %32 = vector.shape_cast %31 : vector<1x81x128xf32> to vector<81x128xf32>
    %33 = vector.shape_cast %30 : vector<81x128xf32> to vector<1x81x128xf32>
    tpu.vector_store %arg6[%c0_19, %c0_20, %c0_21], %33 {strides = array<i32>} : memref<1x81x128xf32, #tpu.memory_space<vmem>>, vector<1x81x128xf32>,
    return
  }
  func.func @transform_0(%arg0: i32) -> (i32, i32, i32) {
    %c0_i32 = arith.constant 0 : i32
    %c0_i32_0 = arith.constant 0 : i32
    %c0_i32_1 = arith.constant 0 : i32
    return %arg0, %c0_i32, %c0_i32_0 : i32, i32, i32
  }
  func.func @transform_1(%arg0: i32) -> (i32, i32) {
    %c0_i32 = arith.constant 0 : i32
    %c0_i32_0 = arith.constant 0 : i32
    %c0_i32_1 = arith.constant 0 : i32
    return %c0_i32, %c0_i32_0 : i32, i32
  }
  func.func @transform_2(%arg0: i32) -> (i32, i32) {
    %c0_i32 = arith.constant 0 : i32
    %c0_i32_0 = arith.constant 0 : i32
    %c0_i32_1 = arith.constant 0 : i32
    return %c0_i32, %c0_i32_0 : i32, i32
  }
  func.func @transform_3(%arg0: i32) -> (i32, i32) {
    %c0_i32 = arith.constant 0 : i32
    %c0_i32_0 = arith.constant 0 : i32
    %c0_i32_1 = arith.constant 0 : i32
    return %c0_i32, %c0_i32_0 : i32, i32
  }
  func.func @transform_4(%arg0: i32) -> (i32, i32) {
    %c0_i32 = arith.constant 0 : i32
    %c0_i32_0 = arith.constant 0 : i32
    %c0_i32_1 = arith.constant 0 : i32
    return %c0_i32, %c0_i32_0 : i32, i32
  }
  func.func @transform_5(%arg0: i32) -> (i32, i32, i32) {
    %c0_i32 = arith.constant 0 : i32
    %c0_i32_0 = arith.constant 0 : i32
    %c0_i32_1 = arith.constant 0 : i32
    return %arg0, %c0_i32, %c0_i32_0 : i32, i32, i32
  }
}

module attributes {stable_mosaic.version = 11 : i64} {
  func.func @kernel(%arg0: i32, %arg1: memref<1x81x144xbf16, #tpu.memory_space<vmem>>, %arg2: memref<144x128xbf16, #tpu.memory_space<vmem>>, %arg3: memref<128x128xf32, #tpu.memory_space<vmem>>, %arg4: memref<1x128xf32, #tpu.memory_space<vmem>>, %arg5: memref<1x128xf32, #tpu.memory_space<vmem>>, %arg6: memref<1x81x128xf32, #tpu.memory_space<vmem>>) attributes {dimension_semantics = [#tpu.dimension_semantics<parallel>], iteration_bounds = array<i64: 2>, scalar_prefetch = 0 : i64, scratch_operands = 0 : i64, tpu.core_type = #tpu.core_type<tc>, window_params = [{transform_indices = @transform_0, window_bounds = array<i64: 1, 81, 144>}, {pipeline_mode = #tpu.pipeline_mode<synchronous>, transform_indices = @transform_1, window_bounds = array<i64: 144, 128>}, {pipeline_mode = #tpu.pipeline_mode<synchronous>, transform_indices = @transform_2, window_bounds = array<i64: 128, 128>}, {pipeline_mode = #tpu.pipeline_mode<synchronous>, transform_indices = @transform_3, window_bounds = array<i64: 1, 128>}, {pipeline_mode = #tpu.pipeline_mode<synchronous>, transform_indices = @transform_4, window_bounds = array<i64: 1, 128>}, {transform_indices = @transform_5, window_bounds = array<i64: 1, 81, 128>}]} {
    %c0 = arith.constant 0 : index
    %c0_0 = arith.constant 0 : index
    %c0_1 = arith.constant 0 : index
    %0 = vector.load %arg1[%c0, %c0_0, %c0_1] : memref<1x81x144xbf16, #tpu.memory_space<vmem>>, vector<1x81x144xbf16>
    %1 = vector.shape_cast %0 : vector<1x81x144xbf16> to vector<81x144xbf16>
    %c0_2 = arith.constant 0 : index
    %c0_3 = arith.constant 0 : index
    %2 = vector.load %arg2[%c0_2, %c0_3] : memref<144x128xbf16, #tpu.memory_space<vmem>>, vector<144x128xbf16>
    %cst = arith.constant dense<0.000000e+00> : vector<81x128xf32>
    %3 = tpu.matmul %1, %2, %cst {dimension_numbers = #tpu.dot_dimension_numbers<[1], [0], [0], [1], [0, 0, 1, 1], [], []>} : vector<81x144xbf16>, vector<144x128xbf16>, vector<81x128xf32> -> vector<81x128xf32>
    %cst_4 = arith.constant dense<0.000000e+00> : vector<128xf32>
    %4 = vector.multi_reduction <add>, %3, %cst_4 [0] : vector<81x128xf32> to vector<128xf32>
    %5 = vector.shape_cast %4 : vector<128xf32> to vector<1x128xf32>
    %c0_5 = arith.constant 0 : index
    %c0_6 = arith.constant 0 : index
    %6 = vector.load %arg3[%c0_5, %c0_6] : memref<128x128xf32, #tpu.memory_space<vmem>>, vector<128x128xf32>
    %cst_7 = arith.constant dense<0.000000e+00> : vector<1x128xf32>
    %7 = tpu.matmul %5, %6, %cst_7 {dimension_numbers = #tpu.dot_dimension_numbers<[1], [0], [0], [1], [0, 0, 1, 1], [], []>} : vector<1x128xf32>, vector<128x128xf32>, vector<1x128xf32> -> vector<1x128xf32>
    %8 = vector.broadcast %7 : vector<1x128xf32> to vector<81x128xf32>
    %9 = arith.subf %3, %8 : vector<81x128xf32>
    %10 = arith.mulf %9, %9 : vector<81x128xf32>
    %cst_8 = arith.constant dense<0.000000e+00> : vector<128xf32>
    %11 = vector.multi_reduction <add>, %10, %cst_8 [0] : vector<81x128xf32> to vector<128xf32>
    %12 = vector.shape_cast %11 : vector<128xf32> to vector<1x128xf32>
    %c0_9 = arith.constant 0 : index
    %c0_10 = arith.constant 0 : index
    %13 = vector.load %arg3[%c0_9, %c0_10] : memref<128x128xf32, #tpu.memory_space<vmem>>, vector<128x128xf32>
    %cst_11 = arith.constant dense<0.000000e+00> : vector<1x128xf32>
    %14 = tpu.matmul %12, %13, %cst_11 {dimension_numbers = #tpu.dot_dimension_numbers<[1], [0], [0], [1], [0, 0, 1, 1], [], []>} : vector<1x128xf32>, vector<128x128xf32>, vector<1x128xf32> -> vector<1x128xf32>
    %cst_12 = arith.constant 9.99999974E-6 : f32
    %15 = vector.broadcast %cst_12 : f32 to vector<1x128xf32>
    %16 = arith.addf %14, %15 : vector<1x128xf32>
    %17 = math.rsqrt %16 : vector<1x128xf32>
    %18 = vector.broadcast %17 : vector<1x128xf32> to vector<81x128xf32>
    %19 = arith.mulf %9, %18 : vector<81x128xf32>
    %c0_13 = arith.constant 0 : index
    %c0_14 = arith.constant 0 : index
    %20 = vector.load %arg4[%c0_13, %c0_14] : memref<1x128xf32, #tpu.memory_space<vmem>>, vector<1x128xf32>
    %21 = vector.broadcast %20 : vector<1x128xf32> to vector<81x128xf32>
    %22 = arith.mulf %19, %21 : vector<81x128xf32>
    %c0_15 = arith.constant 0 : index
    %c0_16 = arith.constant 0 : index
    %23 = vector.load %arg5[%c0_15, %c0_16] : memref<1x128xf32, #tpu.memory_space<vmem>>, vector<1x128xf32>
    %24 = vector.broadcast %23 : vector<1x128xf32> to vector<81x128xf32>
    %25 = arith.addf %22, %24 : vector<81x128xf32>
    %cst_17 = arith.constant 0.000000e+00 : f32
    %26 = vector.broadcast %cst_17 : f32 to vector<81x128xf32>
    %27 = arith.cmpf oge, %25, %26 : vector<81x128xf32>
    %cst_18 = arith.constant 2.000000e-01 : f32
    %28 = vector.broadcast %cst_18 : f32 to vector<81x128xf32>
    %29 = arith.mulf %28, %25 : vector<81x128xf32>
    %30 = arith.select %27, %25, %29 : vector<81x128xi1>, vector<81x128xf32>
    %c0_19 = arith.constant 0 : index
    %c0_20 = arith.constant 0 : index
    %c0_21 = arith.constant 0 : index
    %31 = vector.load %arg6[%c0_19, %c0_20, %c0_21] : memref<1x81x128xf32, #tpu.memory_space<vmem>>, vector<1x81x128xf32>
    %32 = vector.shape_cast %31 : vector<1x81x128xf32> to vector<81x128xf32>
    %33 = vector.shape_cast %30 : vector<81x128xf32> to vector<1x81x128xf32>
    tpu.vector_store %arg6[%c0_19, %c0_20, %c0_21], %33 {strides = array<i32>} : memref<1x81x128xf32, #tpu.memory_space<vmem>>, vector<1x81x128xf32>,
    return
  }
  func.func @transform_0(%arg0: i32) -> (i32, i32, i32) {
    %c0_i32 = arith.constant 0 : i32
    %c0_i32_0 = arith.constant 0 : i32
    %c0_i32_1 = arith.constant 0 : i32
    return %arg0, %c0_i32, %c0_i32_0 : i32, i32, i32
  }
  func.func @transform_1(%arg0: i32) -> (i32, i32) {
    %c0_i32 = arith.constant 0 : i32
    %c0_i32_0 = arith.constant 0 : i32
    %c0_i32_1 = arith.constant 0 : i32
    return %c0_i32, %c0_i32_0 : i32, i32
  }
  func.func @transform_2(%arg0: i32) -> (i32, i32) {
    %c0_i32 = arith.constant 0 : i32
    %c0_i32_0 = arith.constant 0 : i32
    %c0_i32_1 = arith.constant 0 : i32
    return %c0_i32, %c0_i32_0 : i32, i32
  }
  func.func @transform_3(%arg0: i32) -> (i32, i32) {
    %c0_i32 = arith.constant 0 : i32
    %c0_i32_0 = arith.constant 0 : i32
    %c0_i32_1 = arith.constant 0 : i32
    return %c0_i32, %c0_i32_0 : i32, i32
  }
  func.func @transform_4(%arg0: i32) -> (i32, i32) {
    %c0_i32 = arith.constant 0 : i32
    %c0_i32_0 = arith.constant 0 : i32
    %c0_i32_1 = arith.constant 0 : i32
    return %c0_i32, %c0_i32_0 : i32, i32
  }
  func.func @transform_5(%arg0: i32) -> (i32, i32, i32) {
    %c0_i32 = arith.constant 0 : i32
    %c0_i32_0 = arith.constant 0 : i32
    %c0_i32_1 = arith.constant 0 : i32
    return %arg0, %c0_i32, %c0_i32_0 : i32, i32, i32
  }
}

module attributes {stable_mosaic.version = 11 : i64} {
  func.func @kernel(%arg0: i32, %arg1: memref<1x81x144xbf16, #tpu.memory_space<vmem>>, %arg2: memref<144x128xbf16, #tpu.memory_space<vmem>>, %arg3: memref<128x128xf32, #tpu.memory_space<vmem>>, %arg4: memref<1x128xf32, #tpu.memory_space<vmem>>, %arg5: memref<1x128xf32, #tpu.memory_space<vmem>>, %arg6: memref<1x81x128xf32, #tpu.memory_space<vmem>>, %arg7: memref<1x81x128xf32, #tpu.memory_space<vmem>>) attributes {dimension_semantics = [#tpu.dimension_semantics<parallel>], iteration_bounds = array<i64: 2>, scalar_prefetch = 0 : i64, scratch_operands = 0 : i64, tpu.core_type = #tpu.core_type<tc>, window_params = [{transform_indices = @transform_0, window_bounds = array<i64: 1, 81, 144>}, {pipeline_mode = #tpu.pipeline_mode<synchronous>, transform_indices = @transform_1, window_bounds = array<i64: 144, 128>}, {pipeline_mode = #tpu.pipeline_mode<synchronous>, transform_indices = @transform_2, window_bounds = array<i64: 128, 128>}, {pipeline_mode = #tpu.pipeline_mode<synchronous>, transform_indices = @transform_3, window_bounds = array<i64: 1, 128>}, {pipeline_mode = #tpu.pipeline_mode<synchronous>, transform_indices = @transform_4, window_bounds = array<i64: 1, 128>}, {transform_indices = @transform_5, window_bounds = array<i64: 1, 81, 128>}, {transform_indices = @transform_6, window_bounds = array<i64: 1, 81, 128>}]} {
    %c0 = arith.constant 0 : index
    %c0_0 = arith.constant 0 : index
    %c0_1 = arith.constant 0 : index
    %0 = vector.load %arg1[%c0, %c0_0, %c0_1] : memref<1x81x144xbf16, #tpu.memory_space<vmem>>, vector<1x81x144xbf16>
    %1 = vector.shape_cast %0 : vector<1x81x144xbf16> to vector<81x144xbf16>
    %c0_2 = arith.constant 0 : index
    %c0_3 = arith.constant 0 : index
    %2 = vector.load %arg2[%c0_2, %c0_3] : memref<144x128xbf16, #tpu.memory_space<vmem>>, vector<144x128xbf16>
    %cst = arith.constant dense<0.000000e+00> : vector<81x128xf32>
    %3 = tpu.matmul %1, %2, %cst {dimension_numbers = #tpu.dot_dimension_numbers<[1], [0], [0], [1], [0, 0, 1, 1], [], []>} : vector<81x144xbf16>, vector<144x128xbf16>, vector<81x128xf32> -> vector<81x128xf32>
    %cst_4 = arith.constant dense<0.000000e+00> : vector<128xf32>
    %4 = vector.multi_reduction <add>, %3, %cst_4 [0] : vector<81x128xf32> to vector<128xf32>
    %5 = vector.shape_cast %4 : vector<128xf32> to vector<1x128xf32>
    %c0_5 = arith.constant 0 : index
    %c0_6 = arith.constant 0 : index
    %6 = vector.load %arg3[%c0_5, %c0_6] : memref<128x128xf32, #tpu.memory_space<vmem>>, vector<128x128xf32>
    %cst_7 = arith.constant dense<0.000000e+00> : vector<1x128xf32>
    %7 = tpu.matmul %5, %6, %cst_7 {dimension_numbers = #tpu.dot_dimension_numbers<[1], [0], [0], [1], [0, 0, 1, 1], [], []>} : vector<1x128xf32>, vector<128x128xf32>, vector<1x128xf32> -> vector<1x128xf32>
    %8 = vector.broadcast %7 : vector<1x128xf32> to vector<81x128xf32>
    %9 = arith.subf %3, %8 : vector<81x128xf32>
    %10 = arith.mulf %9, %9 : vector<81x128xf32>
    %cst_8 = arith.constant dense<0.000000e+00> : vector<128xf32>
    %11 = vector.multi_reduction <add>, %10, %cst_8 [0] : vector<81x128xf32> to vector<128xf32>
    %12 = vector.shape_cast %11 : vector<128xf32> to vector<1x128xf32>
    %c0_9 = arith.constant 0 : index
    %c0_10 = arith.constant 0 : index
    %13 = vector.load %arg3[%c0_9, %c0_10] : memref<128x128xf32, #tpu.memory_space<vmem>>, vector<128x128xf32>
    %cst_11 = arith.constant dense<0.000000e+00> : vector<1x128xf32>
    %14 = tpu.matmul %12, %13, %cst_11 {dimension_numbers = #tpu.dot_dimension_numbers<[1], [0], [0], [1], [0, 0, 1, 1], [], []>} : vector<1x128xf32>, vector<128x128xf32>, vector<1x128xf32> -> vector<1x128xf32>
    %cst_12 = arith.constant 9.99999974E-6 : f32
    %15 = vector.broadcast %cst_12 : f32 to vector<1x128xf32>
    %16 = arith.addf %14, %15 : vector<1x128xf32>
    %17 = math.rsqrt %16 : vector<1x128xf32>
    %18 = vector.broadcast %17 : vector<1x128xf32> to vector<81x128xf32>
    %19 = arith.mulf %9, %18 : vector<81x128xf32>
    %c0_13 = arith.constant 0 : index
    %c0_14 = arith.constant 0 : index
    %20 = vector.load %arg4[%c0_13, %c0_14] : memref<1x128xf32, #tpu.memory_space<vmem>>, vector<1x128xf32>
    %21 = vector.broadcast %20 : vector<1x128xf32> to vector<81x128xf32>
    %22 = arith.mulf %19, %21 : vector<81x128xf32>
    %c0_15 = arith.constant 0 : index
    %c0_16 = arith.constant 0 : index
    %23 = vector.load %arg5[%c0_15, %c0_16] : memref<1x128xf32, #tpu.memory_space<vmem>>, vector<1x128xf32>
    %24 = vector.broadcast %23 : vector<1x128xf32> to vector<81x128xf32>
    %25 = arith.addf %22, %24 : vector<81x128xf32>
    %c0_17 = arith.constant 0 : index
    %c0_18 = arith.constant 0 : index
    %c0_19 = arith.constant 0 : index
    %26 = vector.load %arg6[%c0_17, %c0_18, %c0_19] : memref<1x81x128xf32, #tpu.memory_space<vmem>>, vector<1x81x128xf32>
    %27 = vector.shape_cast %26 : vector<1x81x128xf32> to vector<81x128xf32>
    %28 = arith.addf %25, %27 : vector<81x128xf32>
    %cst_20 = arith.constant 0.000000e+00 : f32
    %29 = vector.broadcast %cst_20 : f32 to vector<81x128xf32>
    %30 = arith.cmpf oge, %28, %29 : vector<81x128xf32>
    %cst_21 = arith.constant 2.000000e-01 : f32
    %31 = vector.broadcast %cst_21 : f32 to vector<81x128xf32>
    %32 = arith.mulf %31, %28 : vector<81x128xf32>
    %33 = arith.select %30, %28, %32 : vector<81x128xi1>, vector<81x128xf32>
    %c0_22 = arith.constant 0 : index
    %c0_23 = arith.constant 0 : index
    %c0_24 = arith.constant 0 : index
    %34 = vector.load %arg7[%c0_22, %c0_23, %c0_24] : memref<1x81x128xf32, #tpu.memory_space<vmem>>, vector<1x81x128xf32>
    %35 = vector.shape_cast %34 : vector<1x81x128xf32> to vector<81x128xf32>
    %36 = vector.shape_cast %33 : vector<81x128xf32> to vector<1x81x128xf32>
    tpu.vector_store %arg7[%c0_22, %c0_23, %c0_24], %36 {strides = array<i32>} : memref<1x81x128xf32, #tpu.memory_space<vmem>>, vector<1x81x128xf32>,
    return
  }
  func.func @transform_0(%arg0: i32) -> (i32, i32, i32) {
    %c0_i32 = arith.constant 0 : i32
    %c0_i32_0 = arith.constant 0 : i32
    %c0_i32_1 = arith.constant 0 : i32
    return %arg0, %c0_i32, %c0_i32_0 : i32, i32, i32
  }
  func.func @transform_1(%arg0: i32) -> (i32, i32) {
    %c0_i32 = arith.constant 0 : i32
    %c0_i32_0 = arith.constant 0 : i32
    %c0_i32_1 = arith.constant 0 : i32
    return %c0_i32, %c0_i32_0 : i32, i32
  }
  func.func @transform_2(%arg0: i32) -> (i32, i32) {
    %c0_i32 = arith.constant 0 : i32
    %c0_i32_0 = arith.constant 0 : i32
    %c0_i32_1 = arith.constant 0 : i32
    return %c0_i32, %c0_i32_0 : i32, i32
  }
  func.func @transform_3(%arg0: i32) -> (i32, i32) {
    %c0_i32 = arith.constant 0 : i32
    %c0_i32_0 = arith.constant 0 : i32
    %c0_i32_1 = arith.constant 0 : i32
    return %c0_i32, %c0_i32_0 : i32, i32
  }
  func.func @transform_4(%arg0: i32) -> (i32, i32) {
    %c0_i32 = arith.constant 0 : i32
    %c0_i32_0 = arith.constant 0 : i32
    %c0_i32_1 = arith.constant 0 : i32
    return %c0_i32, %c0_i32_0 : i32, i32
  }
  func.func @transform_5(%arg0: i32) -> (i32, i32, i32) {
    %c0_i32 = arith.constant 0 : i32
    %c0_i32_0 = arith.constant 0 : i32
    %c0_i32_1 = arith.constant 0 : i32
    return %arg0, %c0_i32, %c0_i32_0 : i32, i32, i32
  }
  func.func @transform_6(%arg0: i32) -> (i32, i32, i32) {
    %c0_i32 = arith.constant 0 : i32
    %c0_i32_0 = arith.constant 0 : i32
    %c0_i32_1 = arith.constant 0 : i32
    return %arg0, %c0_i32, %c0_i32_0 : i32, i32, i32
  }
}

module attributes {stable_mosaic.version = 11 : i64} {
  func.func @kernel(%arg0: i32, %arg1: memref<1x25x144xbf16, #tpu.memory_space<vmem>>, %arg2: memref<144x128xbf16, #tpu.memory_space<vmem>>, %arg3: memref<128x128xf32, #tpu.memory_space<vmem>>, %arg4: memref<1x128xf32, #tpu.memory_space<vmem>>, %arg5: memref<1x128xf32, #tpu.memory_space<vmem>>, %arg6: memref<1x25x128xf32, #tpu.memory_space<vmem>>) attributes {dimension_semantics = [#tpu.dimension_semantics<parallel>], iteration_bounds = array<i64: 2>, scalar_prefetch = 0 : i64, scratch_operands = 0 : i64, tpu.core_type = #tpu.core_type<tc>, window_params = [{transform_indices = @transform_0, window_bounds = array<i64: 1, 25, 144>}, {pipeline_mode = #tpu.pipeline_mode<synchronous>, transform_indices = @transform_1, window_bounds = array<i64: 144, 128>}, {pipeline_mode = #tpu.pipeline_mode<synchronous>, transform_indices = @transform_2, window_bounds = array<i64: 128, 128>}, {pipeline_mode = #tpu.pipeline_mode<synchronous>, transform_indices = @transform_3, window_bounds = array<i64: 1, 128>}, {pipeline_mode = #tpu.pipeline_mode<synchronous>, transform_indices = @transform_4, window_bounds = array<i64: 1, 128>}, {transform_indices = @transform_5, window_bounds = array<i64: 1, 25, 128>}]} {
    %c0 = arith.constant 0 : index
    %c0_0 = arith.constant 0 : index
    %c0_1 = arith.constant 0 : index
    %0 = vector.load %arg1[%c0, %c0_0, %c0_1] : memref<1x25x144xbf16, #tpu.memory_space<vmem>>, vector<1x25x144xbf16>
    %1 = vector.shape_cast %0 : vector<1x25x144xbf16> to vector<25x144xbf16>
    %c0_2 = arith.constant 0 : index
    %c0_3 = arith.constant 0 : index
    %2 = vector.load %arg2[%c0_2, %c0_3] : memref<144x128xbf16, #tpu.memory_space<vmem>>, vector<144x128xbf16>
    %cst = arith.constant dense<0.000000e+00> : vector<25x128xf32>
    %3 = tpu.matmul %1, %2, %cst {dimension_numbers = #tpu.dot_dimension_numbers<[1], [0], [0], [1], [0, 0, 1, 1], [], []>} : vector<25x144xbf16>, vector<144x128xbf16>, vector<25x128xf32> -> vector<25x128xf32>
    %cst_4 = arith.constant dense<0.000000e+00> : vector<128xf32>
    %4 = vector.multi_reduction <add>, %3, %cst_4 [0] : vector<25x128xf32> to vector<128xf32>
    %5 = vector.shape_cast %4 : vector<128xf32> to vector<1x128xf32>
    %c0_5 = arith.constant 0 : index
    %c0_6 = arith.constant 0 : index
    %6 = vector.load %arg3[%c0_5, %c0_6] : memref<128x128xf32, #tpu.memory_space<vmem>>, vector<128x128xf32>
    %cst_7 = arith.constant dense<0.000000e+00> : vector<1x128xf32>
    %7 = tpu.matmul %5, %6, %cst_7 {dimension_numbers = #tpu.dot_dimension_numbers<[1], [0], [0], [1], [0, 0, 1, 1], [], []>} : vector<1x128xf32>, vector<128x128xf32>, vector<1x128xf32> -> vector<1x128xf32>
    %8 = vector.broadcast %7 : vector<1x128xf32> to vector<25x128xf32>
    %9 = arith.subf %3, %8 : vector<25x128xf32>
    %10 = arith.mulf %9, %9 : vector<25x128xf32>
    %cst_8 = arith.constant dense<0.000000e+00> : vector<128xf32>
    %11 = vector.multi_reduction <add>, %10, %cst_8 [0] : vector<25x128xf32> to vector<128xf32>
    %12 = vector.shape_cast %11 : vector<128xf32> to vector<1x128xf32>
    %c0_9 = arith.constant 0 : index
    %c0_10 = arith.constant 0 : index
    %13 = vector.load %arg3[%c0_9, %c0_10] : memref<128x128xf32, #tpu.memory_space<vmem>>, vector<128x128xf32>
    %cst_11 = arith.constant dense<0.000000e+00> : vector<1x128xf32>
    %14 = tpu.matmul %12, %13, %cst_11 {dimension_numbers = #tpu.dot_dimension_numbers<[1], [0], [0], [1], [0, 0, 1, 1], [], []>} : vector<1x128xf32>, vector<128x128xf32>, vector<1x128xf32> -> vector<1x128xf32>
    %cst_12 = arith.constant 9.99999974E-6 : f32
    %15 = vector.broadcast %cst_12 : f32 to vector<1x128xf32>
    %16 = arith.addf %14, %15 : vector<1x128xf32>
    %17 = math.rsqrt %16 : vector<1x128xf32>
    %18 = vector.broadcast %17 : vector<1x128xf32> to vector<25x128xf32>
    %19 = arith.mulf %9, %18 : vector<25x128xf32>
    %c0_13 = arith.constant 0 : index
    %c0_14 = arith.constant 0 : index
    %20 = vector.load %arg4[%c0_13, %c0_14] : memref<1x128xf32, #tpu.memory_space<vmem>>, vector<1x128xf32>
    %21 = vector.broadcast %20 : vector<1x128xf32> to vector<25x128xf32>
    %22 = arith.mulf %19, %21 : vector<25x128xf32>
    %c0_15 = arith.constant 0 : index
    %c0_16 = arith.constant 0 : index
    %23 = vector.load %arg5[%c0_15, %c0_16] : memref<1x128xf32, #tpu.memory_space<vmem>>, vector<1x128xf32>
    %24 = vector.broadcast %23 : vector<1x128xf32> to vector<25x128xf32>
    %25 = arith.addf %22, %24 : vector<25x128xf32>
    %cst_17 = arith.constant 0.000000e+00 : f32
    %26 = vector.broadcast %cst_17 : f32 to vector<25x128xf32>
    %27 = arith.cmpf oge, %25, %26 : vector<25x128xf32>
    %cst_18 = arith.constant 2.000000e-01 : f32
    %28 = vector.broadcast %cst_18 : f32 to vector<25x128xf32>
    %29 = arith.mulf %28, %25 : vector<25x128xf32>
    %30 = arith.select %27, %25, %29 : vector<25x128xi1>, vector<25x128xf32>
    %c0_19 = arith.constant 0 : index
    %c0_20 = arith.constant 0 : index
    %c0_21 = arith.constant 0 : index
    %31 = vector.load %arg6[%c0_19, %c0_20, %c0_21] : memref<1x25x128xf32, #tpu.memory_space<vmem>>, vector<1x25x128xf32>
    %32 = vector.shape_cast %31 : vector<1x25x128xf32> to vector<25x128xf32>
    %33 = vector.shape_cast %30 : vector<25x128xf32> to vector<1x25x128xf32>
    tpu.vector_store %arg6[%c0_19, %c0_20, %c0_21], %33 {strides = array<i32>} : memref<1x25x128xf32, #tpu.memory_space<vmem>>, vector<1x25x128xf32>,
    return
  }
  func.func @transform_0(%arg0: i32) -> (i32, i32, i32) {
    %c0_i32 = arith.constant 0 : i32
    %c0_i32_0 = arith.constant 0 : i32
    %c0_i32_1 = arith.constant 0 : i32
    return %arg0, %c0_i32, %c0_i32_0 : i32, i32, i32
  }
  func.func @transform_1(%arg0: i32) -> (i32, i32) {
    %c0_i32 = arith.constant 0 : i32
    %c0_i32_0 = arith.constant 0 : i32
    %c0_i32_1 = arith.constant 0 : i32
    return %c0_i32, %c0_i32_0 : i32, i32
  }
  func.func @transform_2(%arg0: i32) -> (i32, i32) {
    %c0_i32 = arith.constant 0 : i32
    %c0_i32_0 = arith.constant 0 : i32
    %c0_i32_1 = arith.constant 0 : i32
    return %c0_i32, %c0_i32_0 : i32, i32
  }
  func.func @transform_3(%arg0: i32) -> (i32, i32) {
    %c0_i32 = arith.constant 0 : i32
    %c0_i32_0 = arith.constant 0 : i32
    %c0_i32_1 = arith.constant 0 : i32
    return %c0_i32, %c0_i32_0 : i32, i32
  }
  func.func @transform_4(%arg0: i32) -> (i32, i32) {
    %c0_i32 = arith.constant 0 : i32
    %c0_i32_0 = arith.constant 0 : i32
    %c0_i32_1 = arith.constant 0 : i32
    return %c0_i32, %c0_i32_0 : i32, i32
  }
  func.func @transform_5(%arg0: i32) -> (i32, i32, i32) {
    %c0_i32 = arith.constant 0 : i32
    %c0_i32_0 = arith.constant 0 : i32
    %c0_i32_1 = arith.constant 0 : i32
    return %arg0, %c0_i32, %c0_i32_0 : i32, i32, i32
  }
}

module attributes {stable_mosaic.version = 11 : i64} {
  func.func @kernel(%arg0: i32, %arg1: memref<1x25x288xbf16, #tpu.memory_space<vmem>>, %arg2: memref<288x128xbf16, #tpu.memory_space<vmem>>, %arg3: memref<128x128xf32, #tpu.memory_space<vmem>>, %arg4: memref<1x128xf32, #tpu.memory_space<vmem>>, %arg5: memref<1x128xf32, #tpu.memory_space<vmem>>, %arg6: memref<1x25x128xf32, #tpu.memory_space<vmem>>) attributes {dimension_semantics = [#tpu.dimension_semantics<parallel>], iteration_bounds = array<i64: 2>, scalar_prefetch = 0 : i64, scratch_operands = 0 : i64, tpu.core_type = #tpu.core_type<tc>, window_params = [{transform_indices = @transform_0, window_bounds = array<i64: 1, 25, 288>}, {pipeline_mode = #tpu.pipeline_mode<synchronous>, transform_indices = @transform_1, window_bounds = array<i64: 288, 128>}, {pipeline_mode = #tpu.pipeline_mode<synchronous>, transform_indices = @transform_2, window_bounds = array<i64: 128, 128>}, {pipeline_mode = #tpu.pipeline_mode<synchronous>, transform_indices = @transform_3, window_bounds = array<i64: 1, 128>}, {pipeline_mode = #tpu.pipeline_mode<synchronous>, transform_indices = @transform_4, window_bounds = array<i64: 1, 128>}, {transform_indices = @transform_5, window_bounds = array<i64: 1, 25, 128>}]} {
    %c0 = arith.constant 0 : index
    %c0_0 = arith.constant 0 : index
    %c0_1 = arith.constant 0 : index
    %0 = vector.load %arg1[%c0, %c0_0, %c0_1] : memref<1x25x288xbf16, #tpu.memory_space<vmem>>, vector<1x25x288xbf16>
    %1 = vector.shape_cast %0 : vector<1x25x288xbf16> to vector<25x288xbf16>
    %c0_2 = arith.constant 0 : index
    %c0_3 = arith.constant 0 : index
    %2 = vector.load %arg2[%c0_2, %c0_3] : memref<288x128xbf16, #tpu.memory_space<vmem>>, vector<288x128xbf16>
    %cst = arith.constant dense<0.000000e+00> : vector<25x128xf32>
    %3 = tpu.matmul %1, %2, %cst {dimension_numbers = #tpu.dot_dimension_numbers<[1], [0], [0], [1], [0, 0, 1, 1], [], []>} : vector<25x288xbf16>, vector<288x128xbf16>, vector<25x128xf32> -> vector<25x128xf32>
    %cst_4 = arith.constant dense<0.000000e+00> : vector<128xf32>
    %4 = vector.multi_reduction <add>, %3, %cst_4 [0] : vector<25x128xf32> to vector<128xf32>
    %5 = vector.shape_cast %4 : vector<128xf32> to vector<1x128xf32>
    %c0_5 = arith.constant 0 : index
    %c0_6 = arith.constant 0 : index
    %6 = vector.load %arg3[%c0_5, %c0_6] : memref<128x128xf32, #tpu.memory_space<vmem>>, vector<128x128xf32>
    %cst_7 = arith.constant dense<0.000000e+00> : vector<1x128xf32>
    %7 = tpu.matmul %5, %6, %cst_7 {dimension_numbers = #tpu.dot_dimension_numbers<[1], [0], [0], [1], [0, 0, 1, 1], [], []>} : vector<1x128xf32>, vector<128x128xf32>, vector<1x128xf32> -> vector<1x128xf32>
    %8 = vector.broadcast %7 : vector<1x128xf32> to vector<25x128xf32>
    %9 = arith.subf %3, %8 : vector<25x128xf32>
    %10 = arith.mulf %9, %9 : vector<25x128xf32>
    %cst_8 = arith.constant dense<0.000000e+00> : vector<128xf32>
    %11 = vector.multi_reduction <add>, %10, %cst_8 [0] : vector<25x128xf32> to vector<128xf32>
    %12 = vector.shape_cast %11 : vector<128xf32> to vector<1x128xf32>
    %c0_9 = arith.constant 0 : index
    %c0_10 = arith.constant 0 : index
    %13 = vector.load %arg3[%c0_9, %c0_10] : memref<128x128xf32, #tpu.memory_space<vmem>>, vector<128x128xf32>
    %cst_11 = arith.constant dense<0.000000e+00> : vector<1x128xf32>
    %14 = tpu.matmul %12, %13, %cst_11 {dimension_numbers = #tpu.dot_dimension_numbers<[1], [0], [0], [1], [0, 0, 1, 1], [], []>} : vector<1x128xf32>, vector<128x128xf32>, vector<1x128xf32> -> vector<1x128xf32>
    %cst_12 = arith.constant 9.99999974E-6 : f32
    %15 = vector.broadcast %cst_12 : f32 to vector<1x128xf32>
    %16 = arith.addf %14, %15 : vector<1x128xf32>
    %17 = math.rsqrt %16 : vector<1x128xf32>
    %18 = vector.broadcast %17 : vector<1x128xf32> to vector<25x128xf32>
    %19 = arith.mulf %9, %18 : vector<25x128xf32>
    %c0_13 = arith.constant 0 : index
    %c0_14 = arith.constant 0 : index
    %20 = vector.load %arg4[%c0_13, %c0_14] : memref<1x128xf32, #tpu.memory_space<vmem>>, vector<1x128xf32>
    %21 = vector.broadcast %20 : vector<1x128xf32> to vector<25x128xf32>
    %22 = arith.mulf %19, %21 : vector<25x128xf32>
    %c0_15 = arith.constant 0 : index
    %c0_16 = arith.constant 0 : index
    %23 = vector.load %arg5[%c0_15, %c0_16] : memref<1x128xf32, #tpu.memory_space<vmem>>, vector<1x128xf32>
    %24 = vector.broadcast %23 : vector<1x128xf32> to vector<25x128xf32>
    %25 = arith.addf %22, %24 : vector<25x128xf32>
    %cst_17 = arith.constant 0.000000e+00 : f32
    %26 = vector.broadcast %cst_17 : f32 to vector<25x128xf32>
    %27 = arith.cmpf oge, %25, %26 : vector<25x128xf32>
    %cst_18 = arith.constant 2.000000e-01 : f32
    %28 = vector.broadcast %cst_18 : f32 to vector<25x128xf32>
    %29 = arith.mulf %28, %25 : vector<25x128xf32>
    %30 = arith.select %27, %25, %29 : vector<25x128xi1>, vector<25x128xf32>
    %c0_19 = arith.constant 0 : index
    %c0_20 = arith.constant 0 : index
    %c0_21 = arith.constant 0 : index
    %31 = vector.load %arg6[%c0_19, %c0_20, %c0_21] : memref<1x25x128xf32, #tpu.memory_space<vmem>>, vector<1x25x128xf32>
    %32 = vector.shape_cast %31 : vector<1x25x128xf32> to vector<25x128xf32>
    %33 = vector.shape_cast %30 : vector<25x128xf32> to vector<1x25x128xf32>
    tpu.vector_store %arg6[%c0_19, %c0_20, %c0_21], %33 {strides = array<i32>} : memref<1x25x128xf32, #tpu.memory_space<vmem>>, vector<1x25x128xf32>,
    return
  }
  func.func @transform_0(%arg0: i32) -> (i32, i32, i32) {
    %c0_i32 = arith.constant 0 : i32
    %c0_i32_0 = arith.constant 0 : i32
    %c0_i32_1 = arith.constant 0 : i32
    return %arg0, %c0_i32, %c0_i32_0 : i32, i32, i32
  }
  func.func @transform_1(%arg0: i32) -> (i32, i32) {
    %c0_i32 = arith.constant 0 : i32
    %c0_i32_0 = arith.constant 0 : i32
    %c0_i32_1 = arith.constant 0 : i32
    return %c0_i32, %c0_i32_0 : i32, i32
  }
  func.func @transform_2(%arg0: i32) -> (i32, i32) {
    %c0_i32 = arith.constant 0 : i32
    %c0_i32_0 = arith.constant 0 : i32
    %c0_i32_1 = arith.constant 0 : i32
    return %c0_i32, %c0_i32_0 : i32, i32
  }
  func.func @transform_3(%arg0: i32) -> (i32, i32) {
    %c0_i32 = arith.constant 0 : i32
    %c0_i32_0 = arith.constant 0 : i32
    %c0_i32_1 = arith.constant 0 : i32
    return %c0_i32, %c0_i32_0 : i32, i32
  }
  func.func @transform_4(%arg0: i32) -> (i32, i32) {
    %c0_i32 = arith.constant 0 : i32
    %c0_i32_0 = arith.constant 0 : i32
    %c0_i32_1 = arith.constant 0 : i32
    return %c0_i32, %c0_i32_0 : i32, i32
  }
  func.func @transform_5(%arg0: i32) -> (i32, i32, i32) {
    %c0_i32 = arith.constant 0 : i32
    %c0_i32_0 = arith.constant 0 : i32
    %c0_i32_1 = arith.constant 0 : i32
    return %arg0, %c0_i32, %c0_i32_0 : i32, i32, i32
  }
}

module attributes {stable_mosaic.version = 11 : i64} {
  func.func @kernel(%arg0: i32, %arg1: memref<1x25x288xbf16, #tpu.memory_space<vmem>>, %arg2: memref<288x128xbf16, #tpu.memory_space<vmem>>, %arg3: memref<128x128xf32, #tpu.memory_space<vmem>>, %arg4: memref<1x128xf32, #tpu.memory_space<vmem>>, %arg5: memref<1x128xf32, #tpu.memory_space<vmem>>, %arg6: memref<1x25x128xf32, #tpu.memory_space<vmem>>, %arg7: memref<1x25x128xf32, #tpu.memory_space<vmem>>) attributes {dimension_semantics = [#tpu.dimension_semantics<parallel>], iteration_bounds = array<i64: 2>, scalar_prefetch = 0 : i64, scratch_operands = 0 : i64, tpu.core_type = #tpu.core_type<tc>, window_params = [{transform_indices = @transform_0, window_bounds = array<i64: 1, 25, 288>}, {pipeline_mode = #tpu.pipeline_mode<synchronous>, transform_indices = @transform_1, window_bounds = array<i64: 288, 128>}, {pipeline_mode = #tpu.pipeline_mode<synchronous>, transform_indices = @transform_2, window_bounds = array<i64: 128, 128>}, {pipeline_mode = #tpu.pipeline_mode<synchronous>, transform_indices = @transform_3, window_bounds = array<i64: 1, 128>}, {pipeline_mode = #tpu.pipeline_mode<synchronous>, transform_indices = @transform_4, window_bounds = array<i64: 1, 128>}, {transform_indices = @transform_5, window_bounds = array<i64: 1, 25, 128>}, {transform_indices = @transform_6, window_bounds = array<i64: 1, 25, 128>}]} {
    %c0 = arith.constant 0 : index
    %c0_0 = arith.constant 0 : index
    %c0_1 = arith.constant 0 : index
    %0 = vector.load %arg1[%c0, %c0_0, %c0_1] : memref<1x25x288xbf16, #tpu.memory_space<vmem>>, vector<1x25x288xbf16>
    %1 = vector.shape_cast %0 : vector<1x25x288xbf16> to vector<25x288xbf16>
    %c0_2 = arith.constant 0 : index
    %c0_3 = arith.constant 0 : index
    %2 = vector.load %arg2[%c0_2, %c0_3] : memref<288x128xbf16, #tpu.memory_space<vmem>>, vector<288x128xbf16>
    %cst = arith.constant dense<0.000000e+00> : vector<25x128xf32>
    %3 = tpu.matmul %1, %2, %cst {dimension_numbers = #tpu.dot_dimension_numbers<[1], [0], [0], [1], [0, 0, 1, 1], [], []>} : vector<25x288xbf16>, vector<288x128xbf16>, vector<25x128xf32> -> vector<25x128xf32>
    %cst_4 = arith.constant dense<0.000000e+00> : vector<128xf32>
    %4 = vector.multi_reduction <add>, %3, %cst_4 [0] : vector<25x128xf32> to vector<128xf32>
    %5 = vector.shape_cast %4 : vector<128xf32> to vector<1x128xf32>
    %c0_5 = arith.constant 0 : index
    %c0_6 = arith.constant 0 : index
    %6 = vector.load %arg3[%c0_5, %c0_6] : memref<128x128xf32, #tpu.memory_space<vmem>>, vector<128x128xf32>
    %cst_7 = arith.constant dense<0.000000e+00> : vector<1x128xf32>
    %7 = tpu.matmul %5, %6, %cst_7 {dimension_numbers = #tpu.dot_dimension_numbers<[1], [0], [0], [1], [0, 0, 1, 1], [], []>} : vector<1x128xf32>, vector<128x128xf32>, vector<1x128xf32> -> vector<1x128xf32>
    %8 = vector.broadcast %7 : vector<1x128xf32> to vector<25x128xf32>
    %9 = arith.subf %3, %8 : vector<25x128xf32>
    %10 = arith.mulf %9, %9 : vector<25x128xf32>
    %cst_8 = arith.constant dense<0.000000e+00> : vector<128xf32>
    %11 = vector.multi_reduction <add>, %10, %cst_8 [0] : vector<25x128xf32> to vector<128xf32>
    %12 = vector.shape_cast %11 : vector<128xf32> to vector<1x128xf32>
    %c0_9 = arith.constant 0 : index
    %c0_10 = arith.constant 0 : index
    %13 = vector.load %arg3[%c0_9, %c0_10] : memref<128x128xf32, #tpu.memory_space<vmem>>, vector<128x128xf32>
    %cst_11 = arith.constant dense<0.000000e+00> : vector<1x128xf32>
    %14 = tpu.matmul %12, %13, %cst_11 {dimension_numbers = #tpu.dot_dimension_numbers<[1], [0], [0], [1], [0, 0, 1, 1], [], []>} : vector<1x128xf32>, vector<128x128xf32>, vector<1x128xf32> -> vector<1x128xf32>
    %cst_12 = arith.constant 9.99999974E-6 : f32
    %15 = vector.broadcast %cst_12 : f32 to vector<1x128xf32>
    %16 = arith.addf %14, %15 : vector<1x128xf32>
    %17 = math.rsqrt %16 : vector<1x128xf32>
    %18 = vector.broadcast %17 : vector<1x128xf32> to vector<25x128xf32>
    %19 = arith.mulf %9, %18 : vector<25x128xf32>
    %c0_13 = arith.constant 0 : index
    %c0_14 = arith.constant 0 : index
    %20 = vector.load %arg4[%c0_13, %c0_14] : memref<1x128xf32, #tpu.memory_space<vmem>>, vector<1x128xf32>
    %21 = vector.broadcast %20 : vector<1x128xf32> to vector<25x128xf32>
    %22 = arith.mulf %19, %21 : vector<25x128xf32>
    %c0_15 = arith.constant 0 : index
    %c0_16 = arith.constant 0 : index
    %23 = vector.load %arg5[%c0_15, %c0_16] : memref<1x128xf32, #tpu.memory_space<vmem>>, vector<1x128xf32>
    %24 = vector.broadcast %23 : vector<1x128xf32> to vector<25x128xf32>
    %25 = arith.addf %22, %24 : vector<25x128xf32>
    %c0_17 = arith.constant 0 : index
    %c0_18 = arith.constant 0 : index
    %c0_19 = arith.constant 0 : index
    %26 = vector.load %arg6[%c0_17, %c0_18, %c0_19] : memref<1x25x128xf32, #tpu.memory_space<vmem>>, vector<1x25x128xf32>
    %27 = vector.shape_cast %26 : vector<1x25x128xf32> to vector<25x128xf32>
    %28 = arith.addf %25, %27 : vector<25x128xf32>
    %cst_20 = arith.constant 0.000000e+00 : f32
    %29 = vector.broadcast %cst_20 : f32 to vector<25x128xf32>
    %30 = arith.cmpf oge, %28, %29 : vector<25x128xf32>
    %cst_21 = arith.constant 2.000000e-01 : f32
    %31 = vector.broadcast %cst_21 : f32 to vector<25x128xf32>
    %32 = arith.mulf %31, %28 : vector<25x128xf32>
    %33 = arith.select %30, %28, %32 : vector<25x128xi1>, vector<25x128xf32>
    %c0_22 = arith.constant 0 : index
    %c0_23 = arith.constant 0 : index
    %c0_24 = arith.constant 0 : index
    %34 = vector.load %arg7[%c0_22, %c0_23, %c0_24] : memref<1x25x128xf32, #tpu.memory_space<vmem>>, vector<1x25x128xf32>
    %35 = vector.shape_cast %34 : vector<1x25x128xf32> to vector<25x128xf32>
    %36 = vector.shape_cast %33 : vector<25x128xf32> to vector<1x25x128xf32>
    tpu.vector_store %arg7[%c0_22, %c0_23, %c0_24], %36 {strides = array<i32>} : memref<1x25x128xf32, #tpu.memory_space<vmem>>, vector<1x25x128xf32>,
    return
  }
  func.func @transform_0(%arg0: i32) -> (i32, i32, i32) {
    %c0_i32 = arith.constant 0 : i32
    %c0_i32_0 = arith.constant 0 : i32
    %c0_i32_1 = arith.constant 0 : i32
    return %arg0, %c0_i32, %c0_i32_0 : i32, i32, i32
  }
  func.func @transform_1(%arg0: i32) -> (i32, i32) {
    %c0_i32 = arith.constant 0 : i32
    %c0_i32_0 = arith.constant 0 : i32
    %c0_i32_1 = arith.constant 0 : i32
    return %c0_i32, %c0_i32_0 : i32, i32
  }
  func.func @transform_2(%arg0: i32) -> (i32, i32) {
    %c0_i32 = arith.constant 0 : i32
    %c0_i32_0 = arith.constant 0 : i32
    %c0_i32_1 = arith.constant 0 : i32
    return %c0_i32, %c0_i32_0 : i32, i32
  }
  func.func @transform_3(%arg0: i32) -> (i32, i32) {
    %c0_i32 = arith.constant 0 : i32
    %c0_i32_0 = arith.constant 0 : i32
    %c0_i32_1 = arith.constant 0 : i32
    return %c0_i32, %c0_i32_0 : i32, i32
  }
  func.func @transform_4(%arg0: i32) -> (i32, i32) {
    %c0_i32 = arith.constant 0 : i32
    %c0_i32_0 = arith.constant 0 : i32
    %c0_i32_1 = arith.constant 0 : i32
    return %c0_i32, %c0_i32_0 : i32, i32
  }
  func.func @transform_5(%arg0: i32) -> (i32, i32, i32) {
    %c0_i32 = arith.constant 0 : i32
    %c0_i32_0 = arith.constant 0 : i32
    %c0_i32_1 = arith.constant 0 : i32
    return %arg0, %c0_i32, %c0_i32_0 : i32, i32, i32
  }
  func.func @transform_6(%arg0: i32) -> (i32, i32, i32) {
    %c0_i32 = arith.constant 0 : i32
    %c0_i32_0 = arith.constant 0 : i32
    %c0_i32_1 = arith.constant 0 : i32
    return %arg0, %c0_i32, %c0_i32_0 : i32, i32, i32
  }
}

module attributes {stable_mosaic.version = 11 : i64} {
  func.func @_conv_bias_kernel(%arg0: i32, %arg1: memref<1x289x200xbf16, #tpu.memory_space<vmem>>, %arg2: memref<200x128xbf16, #tpu.memory_space<vmem>>, %arg3: memref<1x128xf32, #tpu.memory_space<vmem>>, %arg4: memref<1x289x128xf32, #tpu.memory_space<vmem>>) attributes {dimension_semantics = [#tpu.dimension_semantics<parallel>], iteration_bounds = array<i64: 2>, scalar_prefetch = 0 : i64, scratch_operands = 0 : i64, tpu.core_type = #tpu.core_type<tc>, window_params = [{transform_indices = @transform_0, window_bounds = array<i64: 1, 289, 200>}, {pipeline_mode = #tpu.pipeline_mode<synchronous>, transform_indices = @transform_1, window_bounds = array<i64: 200, 128>}, {pipeline_mode = #tpu.pipeline_mode<synchronous>, transform_indices = @transform_2, window_bounds = array<i64: 1, 128>}, {transform_indices = @transform_3, window_bounds = array<i64: 1, 289, 128>}]} {
    %c0 = arith.constant 0 : index
    %c0_0 = arith.constant 0 : index
    %c0_1 = arith.constant 0 : index
    %0 = vector.load %arg1[%c0, %c0_0, %c0_1] : memref<1x289x200xbf16, #tpu.memory_space<vmem>>, vector<1x289x200xbf16>
    %1 = vector.shape_cast %0 : vector<1x289x200xbf16> to vector<289x200xbf16>
    %c0_2 = arith.constant 0 : index
    %c0_3 = arith.constant 0 : index
    %2 = vector.load %arg2[%c0_2, %c0_3] : memref<200x128xbf16, #tpu.memory_space<vmem>>, vector<200x128xbf16>
    %cst = arith.constant dense<0.000000e+00> : vector<289x128xf32>
    %3 = tpu.matmul %1, %2, %cst {dimension_numbers = #tpu.dot_dimension_numbers<[1], [0], [0], [1], [0, 0, 1, 1], [], []>} : vector<289x200xbf16>, vector<200x128xbf16>, vector<289x128xf32> -> vector<289x128xf32>
    %c0_4 = arith.constant 0 : index
    %c0_5 = arith.constant 0 : index
    %4 = vector.load %arg3[%c0_4, %c0_5] : memref<1x128xf32, #tpu.memory_space<vmem>>, vector<1x128xf32>
    %5 = vector.broadcast %4 : vector<1x128xf32> to vector<289x128xf32>
    %6 = arith.addf %3, %5 : vector<289x128xf32>
    %c0_6 = arith.constant 0 : index
    %c0_7 = arith.constant 0 : index
    %c0_8 = arith.constant 0 : index
    %7 = vector.load %arg4[%c0_6, %c0_7, %c0_8] : memref<1x289x128xf32, #tpu.memory_space<vmem>>, vector<1x289x128xf32>
    %8 = vector.shape_cast %7 : vector<1x289x128xf32> to vector<289x128xf32>
    %9 = vector.shape_cast %6 : vector<289x128xf32> to vector<1x289x128xf32>
    tpu.vector_store %arg4[%c0_6, %c0_7, %c0_8], %9 {strides = array<i32>} : memref<1x289x128xf32, #tpu.memory_space<vmem>>, vector<1x289x128xf32>,
    return
  }
  func.func @transform_0(%arg0: i32) -> (i32, i32, i32) {
    %c0_i32 = arith.constant 0 : i32
    %c0_i32_0 = arith.constant 0 : i32
    %c0_i32_1 = arith.constant 0 : i32
    return %arg0, %c0_i32, %c0_i32_0 : i32, i32, i32
  }
  func.func @transform_1(%arg0: i32) -> (i32, i32) {
    %c0_i32 = arith.constant 0 : i32
    %c0_i32_0 = arith.constant 0 : i32
    %c0_i32_1 = arith.constant 0 : i32
    return %c0_i32, %c0_i32_0 : i32, i32
  }
  func.func @transform_2(%arg0: i32) -> (i32, i32) {
    %c0_i32 = arith.constant 0 : i32
    %c0_i32_0 = arith.constant 0 : i32
    %c0_i32_1 = arith.constant 0 : i32
    return %c0_i32, %c0_i32_0 : i32, i32
  }
  func.func @transform_3(%arg0: i32) -> (i32, i32, i32) {
    %c0_i32 = arith.constant 0 : i32
    %c0_i32_0 = arith.constant 0 : i32
    %c0_i32_1 = arith.constant 0 : i32
    return %arg0, %c0_i32, %c0_i32_0 : i32, i32, i32
  }
}

</mosaic_0001>

<bundles_post_ra>
// kernel: unet2d_forward.17
= control target key start
LH: loop header
LB: loop body
LE: loop exit
PB: predicated region body
PF: predicated region fallthrough
CT: control target
= control target key end

     0   :  { %s1661_s18 = smov 0   ;;  %s2516_s0 = inlined_call_operand.vmem [shape: bf16[2,289,25], index: 0, kind: input, shape index: {}]   ;;  %s2517_s1 = inlined_call_operand.vmem [shape: bf16[25,128], index: 1, kind: input, shape index: {}]   ;;  %s2518_s2 = inlined_call_operand.vmem [shape: f32[128,128], index: 2, kind: input, shape index: {}]   ;;  %s2519_s3 = inlined_call_operand.vmem [shape: f32[1,128], index: 3, kind: input, shape index: {}]   ;;  %s2520_s4 = inlined_call_operand.vmem [shape: f32[1,128], index: 4, kind: input, shape index: {}]   ;;  %s2521_s5 = inlined_call_operand.vmem [shape: f32[2,289,128], index: 5, kind: output, shape index: {}]  }
   0x1 LB: > { %s1274_s19 = sadd.s32 4294967295, %s1625_s18   ;;  %p1278_p0 = scmp.ge.s32.totalorder %s1625_s18, 1  ;;  %s1625_s18 = sphi %s1661_s18, %s15_s18  }
   0x2   : > { %p187_p1 = scmp.lt.s32.totalorder %s1625_s18, 3 }
   0x4   : > { %p188_p2 = pnand %p1278_p0, %p187_p1 }
   0x5   : > { %v1596_v0 = vld [vmem:[%s2517_s1] sm:$0xff] (!%p188_p2)   ;;  %v1627_v1 = vmov (!%p188_p2), 0.0   ;;  %v1597_v2 = vld [vmem:[%s2517_s1 + $0x8] sm:$0x1f] (!%p188_p2)   ;;  %vm429_vm0 = vcmask (!%p188_p2), 1043456   ;;  %vm430_vm1 = vcmask (!%p188_p2), 1044480  }
   0x6   : > { %191 = sbr.rel (%p188_p2) target bundleno = 956 (0x3bc), region = 40  ;;  %1380 = vmatprep.subr.bf16.mxu0 (!%p188_p2), %v1627_v1  ;;  %1578 = vmatprep.subr.bf16.mxu1 (!%p188_p2), %v1627_v1  ;;  %p215_p3 = scmp.lt.s32.totalorder (!%p188_p2), %s1274_s19, 1  ;;  %v1628_v3 = vmov (!%p188_p2), 65535   ;;  %vm1629_vm2 = vmmov (!%p188_p2), 0   ;;  %vm371_vm3 = vcmask (!%p188_p2), 203776   ;;  %v664_v26 = vld [vmem:[%s2518_s2] sm:$0xff] (!%p188_p2) }
   0x7   : > { %1381 = vmatpush3.bf16.msra.mxu0 (!%p188_p2), %v1596_v0  ;;  %1580 = vmatpush3.bf16.msra.mxu1 (!%p188_p2), %v1596_v0  ;;  %v431_v4 = vsel (!%p188_p2), %vm429_vm0, 4294967295, %v1628_v3  ;;  %v665_v27 = vld [vmem:[%s2518_s2 + $0x8] sm:$0xff] (!%p188_p2)  ;;  %v1630_v28 = vmov (!%p188_p2), 0.0|0.0   ;;  %v666_v30 = vld [vmem:[%s2518_s2 + $0x10] sm:$0xff] (!%p188_p2)  ;;  %v667_v31 = vld [vmem:[%s2518_s2 + $0x18] sm:$0xff] (!%p188_p2)  ;;  %vm655_vm4 = vcmask (!%p188_p2), 1040384  }
   0x8   : > { %1382 = vmatprep.subr.bf16.mxu0 (!%p188_p2), %v1627_v1  ;;  %1384 = vmatprep.mubr.msk.bf16.mxu0 (!%p188_p2), %vm1629_vm2, %v1627_v1  ;;  %v432_v5 = vsel (!%p188_p2), %vm430_vm1, %v431_v4, 0  ;;  %v1772_v29 = vpack.c.bf16 (!%p188_p2), %v665_v27, %v664_v26  ;;  %v1782_v32 = vpack.c.bf16 (!%p188_p2), %v667_v31, %v666_v30  ;;  %v668_v33 = vld [vmem:[%s2518_s2 + $0x20] sm:$0xff] (!%p188_p2)  ;;  %v669_v34 = vld [vmem:[%s2518_s2 + $0x28] sm:$0xff] (!%p188_p2)  ;;  %v670_v36 = vld [vmem:[%s2518_s2 + $0x30] sm:$0xff] (!%p188_p2) }
   0x9   : > { %1579 = vmatprep.subr.bf16.mxu1 (!%p188_p2), %v1627_v1  ;;  %1432 = vmatprep.mubr.msk.bf16.mxu1 (!%p188_p2), %vm1629_vm2, %v1627_v1  ;;  %v434_v6 = vand.u32 (!%p188_p2), %v1597_v2, %v432_v5  ;;  %v1792_v35 = vpack.c.bf16 (!%p188_p2), %v669_v34, %v668_v33  ;;  %v671_v37 = vld [vmem:[%s2518_s2 + $0x38] sm:$0xff] (!%p188_p2)  ;;  %v672_v39 = vld [vmem:[%s2518_s2 + $0x40] sm:$0xff] (!%p188_p2)  ;;  %v673_v40 = vld [vmem:[%s2518_s2 + $0x48] sm:$0xff] (!%p188_p2) }
   0xa   : > { %v1802_v38 = vpack.c.bf16 (!%p188_p2), %v671_v37, %v670_v36  ;;  %v1811_v41 = vpack.c.bf16 (!%p188_p2), %v673_v40, %v672_v39  ;;  %v674_v42 = vld [vmem:[%s2518_s2 + $0x50] sm:$0xff] (!%p188_p2)  ;;  %v675_v43 = vld [vmem:[%s2518_s2 + $0x58] sm:$0xff] (!%p188_p2)  ;;  %v676_v45 = vld [vmem:[%s2518_s2 + $0x60] sm:$0xff] (!%p188_p2) }
   0xb   : > { %1383 = vmatpush3.bf16.msra.mxu0 (!%p188_p2), %v434_v6  ;;  %1581 = vmatpush3.bf16.msra.mxu1 (!%p188_p2), %v434_v6  ;;  %v1821_v44 = vpack.c.bf16 (!%p188_p2), %v675_v43, %v674_v42  ;;  %v677_v46 = vld [vmem:[%s2518_s2 + $0x68] sm:$0xff] (!%p188_p2)  ;;  %v678_v48 = vld [vmem:[%s2518_s2 + $0x70] sm:$0xff] (!%p188_p2)  ;;  %v679_v49 = vld [vmem:[%s2518_s2 + $0x78] sm:$0xff] (!%p188_p2) }
   0xc   : > { %1530 = vmatprep.subr.bf16.mxu1 (!%p188_p2), %v1630_v28  ;;  %v1832_v47 = vpack.c.bf16 (!%p188_p2), %v677_v46, %v676_v45  ;;  %v1842_v50 = vpack.c.bf16 (!%p188_p2), %v679_v49, %v678_v48 }
   0xd   : > { %s2540_s19 = smov (!%p215_p3, %s1274_s19), 1 }
   0xe   : > { %s1582_s24 = smul.u32 148, %s2540_s19 }
   0xf   : > { %s1583_s16 = smul.u32 296, %s2540_s19 }
  0x10   : > { %s1689_s27 = scalar_lea.vmem %s2516_s0, %s1582_s24 }
  0x11   : > { %v1598_v7 = vld [vmem:[%s1689_s27] sm:$0xff]   ;;  %v1599_v8 = vld [vmem:[%s1689_s27 + $0x8] sm:$0xff]   ;;  %v1600_v10 = vld [vmem:[%s1689_s27 + $0x10] sm:$0xff]   ;;  %s2294_s20 = scalar_lea.vmem %s2521_s5, %s1583_s16 }
  0x12   : > { %1385 = vmatmul.mubr.msk.bf16.vlgmr.msra.gmra.mrb[0].mxu0 %vm371_vm3, %v1598_v7  ;;  %v1607_v9 = vld [vmem:[%s1689_s27 + $0x60] sm:$0xff]   ;;  %v1609_v11 = vld [vmem:[%s1689_s27 + $0x68] sm:$0xff]   ;;  %v1601_v12 = vld [vmem:[%s1689_s27 + $0x18] sm:$0xff]  }
  0x13   : > { %1388 = vmatprep.mubr.msk.bf16.mxu0 %vm1629_vm2, %v1627_v1  ;;  %1433 = vmatmul.mubr.msk.bf16.vlgmr.msra.gmra.mrb[0].mxu1 %vm371_vm3, %v1607_v9  ;;  %v1611_v13 = vld [vmem:[%s1689_s27 + $0x70] sm:$0xff]   ;;  %v1602_v14 = vld [vmem:[%s1689_s27 + $0x20] sm:$0xff]   ;;  %v1613_v15 = vld [vmem:[%s1689_s27 + $0x78] sm:$0xff]  }
  0x14   : > { %1436 = vmatprep.mubr.msk.bf16.mxu1 %vm1629_vm2, %v1627_v1  ;;  %v1603_v16 = vld [vmem:[%s1689_s27 + $0x28] sm:$0xff]   ;;  %v1614_v17 = vld [vmem:[%s1689_s27 + $0x80] sm:$0xff]   ;;  %v1604_v18 = vld [vmem:[%s1689_s27 + $0x30] sm:$0xff]   ;;  %1532 = vmatpush3.bf16.msra.mxu1 %v1772_v29 }
  0x15   : > { %v1615_v19 = vld [vmem:[%s1689_s27 + $0x88] sm:$0xff]   ;;  %v1605_v20 = vld [vmem:[%s1689_s27 + $0x38] sm:$0xff]   ;;  %v1616_v21 = vld [vmem:[%s1689_s27 + $0x90] ss:$0 sps:$4 sm:$0x11]   ;;  %1533 = vmatprep.subr.bf16.mxu1 %v1630_v28 }
  0x16   : > { %v1606_v22 = vld [vmem:[%s1689_s27 + $0x40] sm:$0xff]   ;;  %v1608_v23 = vld [vmem:[%s1689_s27 + $0x48] sm:$0xff]   ;;  %v1610_v24 = vld [vmem:[%s1689_s27 + $0x50] sm:$0xff]  }
  0x17   : > { %v1612_v25 = vld [vmem:[%s1689_s27 + $0x58] sm:$0xff]  }
  0x18   : > { %1535 = vmatpush3.bf16.msra.mxu1 %v1782_v32 }
  0x19   : > { %1536 = vmatprep.subr.bf16.mxu1 %v1630_v28 }
  0x1a   : > { %1389 = vmatmul.mubr.msk.bf16.gmra.mrb[4].mxu0 %vm371_vm3, %v1599_v8 }
  0x1b   : > { %1392 = vmatprep.mubr.msk.bf16.mxu0 %vm1629_vm2, %v1627_v1  ;;  %1437 = vmatmul.mubr.msk.bf16.gmra.mrb[4].mxu1 %vm371_vm3, %v1609_v11 }
  0x1c   : > { %1440 = vmatprep.mubr.msk.bf16.mxu1 %vm1629_vm2, %v1627_v1  ;;  %1538 = vmatpush3.bf16.msra.mxu1 %v1792_v35 }
  0x1d   : > { %1539 = vmatprep.subr.bf16.mxu1 %v1630_v28 }
  0x20   : > { %1541 = vmatpush3.bf16.msra.mxu1 %v1802_v38 }
  0x21   : > { %1542 = vmatprep.subr.bf16.mxu1 %v1630_v28 }
  0x22   : > { %1393 = vmatmul.mubr.msk.bf16.gmra.mrb[8].mxu0 %vm371_vm3, %v1600_v10 }
  0x23   : > { %1396 = vmatprep.mubr.msk.bf16.mxu0 %vm1629_vm2, %v1627_v1  ;;  %1441 = vmatmul.mubr.msk.bf16.gmra.mrb[8].mxu1 %vm371_vm3, %v1611_v13 }
  0x24   : > { %1444 = vmatprep.mubr.msk.bf16.mxu1 %vm1629_vm2, %v1627_v1  ;;  %1544 = vmatpush3.bf16.msra.mxu1 %v1811_v41 }
  0x25   : > { %1545 = vmatprep.subr.bf16.mxu1 %v1630_v28 }
  0x28   : > { %1547 = vmatpush3.bf16.msra.mxu1 %v1821_v44 }
  0x29   : > { %1548 = vmatprep.subr.bf16.mxu1 %v1630_v28 }
  0x2a   : > { %1397 = vmatmul.mubr.msk.bf16.gmra.mrb[12].mxu0 %vm371_vm3, %v1601_v12 }
  0x2b   : > { %1400 = vmatprep.mubr.msk.bf16.mxu0 %vm1629_vm2, %v1627_v1  ;;  %1445 = vmatmul.mubr.msk.bf16.gmra.mrb[12].mxu1 %vm371_vm3, %v1613_v15 }
  0x2c   : > { %1448 = vmatprep.mubr.msk.bf16.mxu1 %vm1629_vm2, %v1627_v1  ;;  %1550 = vmatpush3.bf16.msra.mxu1 %v1832_v47 }
  0x2d   : > { %1551 = vmatprep.subr.bf16.mxu1 %v1630_v28 }
  0x30   : > { %1553 = vmatpush3.bf16.msra.mxu1 %v1842_v50 }
  0x31   : > { %1554 = vmatprep.subr.bf16.mxu1 %v1630_v28 }
  0x32   : > { %1401 = vmatmul.mubr.msk.bf16.gmra.mrb[16].mxu0 %vm371_vm3, %v1602_v14 }
  0x33   : > { %1404 = vmatprep.mubr.msk.bf16.mxu0 %vm1629_vm2, %v1627_v1  ;;  %1449 = vmatmul.mubr.msk.bf16.gmra.mrb[16].mxu1 %vm371_vm3, %v1614_v17 }
  0x34   : > { %1452 = vmatprep.mubr.msk.bf16.mxu1 %vm1629_vm2, %v1627_v1 }
  0x3a   : > { %1405 = vmatmul.mubr.msk.bf16.gmra.mrb[20].mxu0 %vm371_vm3, %v1603_v16 }
  0x3b   : > { %1408 = vmatprep.mubr.msk.bf16.mxu0 %vm1629_vm2, %v1627_v1  ;;  %1453 = vmatmul.mubr.msk.bf16.gmra.mrb[20].mxu1 %vm371_vm3, %v1615_v19 }
  0x3c   : > { %1456 = vmatprep.mubr.msk.bf16.mxu1 %vm1629_vm2, %v1627_v1 }
  0x42   : > { %1409 = vmatmul.mubr.msk.bf16.gmra.mrb[24].mxu0 %vm371_vm3, %v1604_v18 }
  0x43   : > { %1412 = vmatprep.mubr.msk.bf16.mxu0 %vm1629_vm2, %v1627_v1  ;;  %1457 = vmatmul.mubr.msk.bf16.gmra.mrb[24].mxu1 %vm371_vm3, %v1616_v21 }
  0x44   : > { %1492 = vmatprep.mubr.msk.f32.mxu1 %vm1629_vm2, %v1627_v1 }
  0x4a   : > { %1413 = vmatmul.mubr.msk.bf16.gmra.mrb[28].mxu0 %vm371_vm3, %v1605_v20 }
  0x4b   : > { %1416 = vmatprep.mubr.msk.bf16.mxu0 %vm1629_vm2, %v1627_v1 }
  0x52   : > { %1417 = vmatmul.mubr.msk.bf16.gmra.mrb[32].mxu0 %vm371_vm3, %v1606_v22 }
  0x53   : > { %1420 = vmatprep.mubr.msk.bf16.mxu0 %vm1629_vm2, %v1627_v1 }
  0x5a   : > { %1421 = vmatmul.mubr.msk.bf16.gmra.mrb[36].mxu0 %vm371_vm3, %v1608_v23 }
  0x5b   : > { %1424 = vmatprep.mubr.msk.bf16.mxu0 %vm1629_vm2, %v1627_v1 }
  0x62   : > { %1425 = vmatmul.mubr.msk.bf16.gmra.mrb[40].mxu0 %vm371_vm3, %v1610_v24 }
  0x63   : > { %1428 = vmatprep.mubr.msk.bf16.mxu0 %vm1629_vm2, %v1627_v1 }
  0x6a   : > { %1429 = vmatmul.mubr.msk.bf16.gmra.mrb[44].mxu0 %vm371_vm3, %v1612_v25 }
  0xe5   : > { %v1844_v51 = vpop.f32.mrb[0].mxu0 }
  0xe6   : > { %v1386_v52 = vpop.f32.mrb[1].mxu0  ;;  %v1855_v59 = vpop.f32.mrb[0].mxu1 }
  0xe7   : > { %v1848_v53 = vpop.f32.mrb[2].mxu0  ;;  %v1434_v61 = vpop.f32.mrb[1].mxu1 }
  0xe8   : > { %v620_v54 = vadd.f32 %v1848_v53, %v1844_v51  ;;  %v1387_v55 = vpop.f32.mrb[3].mxu0  ;;  %v1860_v0 = vpop.f32.mrb[2].mxu1 }
  0xe9   : > { %v1435_v2 = vpop.f32.mrb[3].mxu1 }
  0xed   : > { %v1852_v56 = vpop.f32.mrb[4].mxu0 }
  0xee   : > { %v621_v57 = vadd.f32 %v620_v54, %v1852_v56  ;;  %v1390_v58 = vpop.f32.mrb[5].mxu0  ;;  %v1865_v6 = vpop.f32.mrb[4].mxu1 }
  0xef   : > { %v1857_v60 = vpop.f32.mrb[6].mxu0  ;;  %v1438_v8 = vpop.f32.mrb[5].mxu1 }
  0xf0   : > { %v622_v62 = vadd.f32 %v621_v57, %v1857_v60  ;;  %v1391_v63 = vpop.f32.mrb[7].mxu0  ;;  %v1870_v11 = vpop.f32.mrb[6].mxu1 }
  0xf1   : > { %v1439_v12 = vpop.f32.mrb[7].mxu1 }
  0xf5   : > { %v1862_v3 = vpop.f32.mrb[8].mxu0 }
  0xf6   : > { %v623_v4 = vadd.f32 %v622_v62, %v1862_v3  ;;  %v1394_v5 = vpop.f32.mrb[9].mxu0  ;;  %v1875_v16 = vpop.f32.mrb[8].mxu1 }
  0xf7   : > { %v1867_v7 = vpop.f32.mrb[10].mxu0  ;;  %v1442_v18 = vpop.f32.mrb[9].mxu1 }
  0xf8   : > { %v624_v9 = vadd.f32 %v623_v4, %v1867_v7  ;;  %v1395_v10 = vpop.f32.mrb[11].mxu0  ;;  %v1880_v21 = vpop.f32.mrb[10].mxu1 }
  0xf9   : > { %v1443_v22 = vpop.f32.mrb[11].mxu1 }
  0xfd   : > { %v1872_v13 = vpop.f32.mrb[12].mxu0 }
  0xfe   : > { %v625_v14 = vadd.f32 %v624_v9, %v1872_v13  ;;  %v1398_v15 = vpop.f32.mrb[13].mxu0  ;;  %v1885_v26 = vpop.f32.mrb[12].mxu1 }
  0xff   : > { %v1877_v17 = vpop.f32.mrb[14].mxu0  ;;  %v1446_v30 = vpop.f32.mrb[13].mxu1 }
 0x100   : > { %v626_v19 = vadd.f32 %v625_v14, %v1877_v17  ;;  %v1399_v20 = vpop.f32.mrb[15].mxu0  ;;  %v1890_v34 = vpop.f32.mrb[14].mxu1 }
 0x101   : > { %v1447_v36 = vpop.f32.mrb[15].mxu1 }
 0x105   : > { %v1882_v23 = vpop.f32.mrb[16].mxu0 }
 0x106   : > { %v627_v24 = vadd.f32 %v626_v19, %v1882_v23  ;;  %v1402_v25 = vpop.f32.mrb[17].mxu0  ;;  %v1895_v42 = vpop.f32.mrb[16].mxu1 }
 0x107   : > { %v1887_v27 = vpop.f32.mrb[18].mxu0  ;;  %v1450_v45 = vpop.f32.mrb[17].mxu1 }
 0x108   : > { %v628_v31 = vadd.f32 %v627_v24, %v1887_v27  ;;  %v1403_v33 = vpop.f32.mrb[19].mxu0  ;;  %v1900_v49 = vpop.f32.mrb[18].mxu1 }
 0x109   : > { %v1451_v52 = vpop.f32.mrb[19].mxu1 }
 0x10d   : > { %v1892_v37 = vpop.f32.mrb[20].mxu0 }
 0x10e   : > { %v629_v39 = vadd.f32 %v628_v31, %v1892_v37  ;;  %v1406_v40 = vpop.f32.mrb[21].mxu0  ;;  %v1905_v58 = vpop.f32.mrb[20].mxu1 }
 0x10f   : > { %v1897_v43 = vpop.f32.mrb[22].mxu0  ;;  %v1454_v62 = vpop.f32.mrb[21].mxu1 }
 0x110   : > { %v630_v46 = vadd.f32 %v629_v39, %v1897_v43  ;;  %v1407_v48 = vpop.f32.mrb[23].mxu0  ;;  %v1910_v4 = vpop.f32.mrb[22].mxu1 }
 0x111   : > { %v1455_v5 = vpop.f32.mrb[23].mxu1 }
 0x115   : > { %v1902_v54 = vpop.f32.mrb[24].mxu0 }
 0x116   : > { %v631_v55 = vadd.f32 %v630_v46, %v1902_v54  ;;  %v1410_v57 = vpop.f32.mrb[25].mxu0  ;;  %v1915_v12 = vpop.f32.mrb[24].mxu1 }
 0x117   : > { %v1907_v61 = vpop.f32.mrb[26].mxu0  ;;  %v1458_v15 = vpop.f32.mrb[25].mxu1 }
 0x118   : > { %v632_v63 = vadd.f32 %v631_v55, %v1907_v61  ;;  %v1411_v2 = vpop.f32.mrb[27].mxu0  ;;  %v617_v20 = vpop.f32.mrb[26].mxu1 }
 0x119   : > { %v1459_v22 = vpop.f32.mrb[27].mxu1 }
 0x11d   : > { %v1912_v8 = vpop.f32.mrb[28].mxu0 }
 0x11e   : > { %v633_v9 = vadd.f32 %v632_v63, %v1912_v8  ;;  %v1414_v10 = vpop.f32.mrb[29].mxu0 }
 0x11f   : > { %v1917_v14 = vpop.f32.mrb[30].mxu0 }
 0x120   : > { %v634_v18 = vadd.f32 %v633_v9, %v1917_v14  ;;  %v1415_v19 = vpop.f32.mrb[31].mxu0 }
 0x125   : > { %v1920_v24 = vpop.f32.mrb[32].mxu0 }
 0x126   : > { %v635_v25 = vadd.f32 %v634_v18, %v1920_v24  ;;  %v1418_v30 = vpop.f32.mrb[33].mxu0 }
 0x127   : > { %v1923_v31 = vpop.f32.mrb[34].mxu0 }
 0x128   : > { %v636_v33 = vadd.f32 %v635_v25, %v1923_v31  ;;  %v1419_v36 = vpop.f32.mrb[35].mxu0 }
 0x12d   : > { %v1926_v39 = vpop.f32.mrb[36].mxu0 }
 0x12e   : > { %v637_v40 = vadd.f32 %v636_v33, %v1926_v39  ;;  %v1422_v45 = vpop.f32.mrb[37].mxu0 }
 0x12f   : > { %v1929_v46 = vpop.f32.mrb[38].mxu0 }
 0x130   : > { %v638_v48 = vadd.f32 %v637_v40, %v1929_v46  ;;  %v1423_v52 = vpop.f32.mrb[39].mxu0 }
 0x135   : > { %v1932_v55 = vpop.f32.mrb[40].mxu0 }
 0x136   : > { %v639_v57 = vadd.f32 %v638_v48, %v1932_v55  ;;  %v1426_v62 = vpop.f32.mrb[41].mxu0 }
 0x137   : > { %v1935_v63 = vpop.f32.mrb[42].mxu0 }
 0x138   : > { %v640_v2 = vadd.f32 %v639_v57, %v1935_v63  ;;  %v1427_v5 = vpop.f32.mrb[43].mxu0 }
 0x13d   : > { %v1938_v9 = vpop.f32.mrb[44].mxu0 }
 0x13e   : > { %v641_v10 = vadd.f32 %v640_v2, %v1938_v9  ;;  %v1430_v15 = vpop.f32.mrb[45].mxu0  ;;  %v656_v2 = vsel %vm655_vm4, %v1915_v12, 0.0 }
 0x13f   : > { %v1941_v18 = vpop.f32.mrb[46].mxu0 }
 0x140   : > { %v642_v19 = vadd.f32 %v641_v10, %v1941_v18  ;;  %v1431_v20 = vpop.f32.mrb[47].mxu0 }
 0x142   : > { %v643_v22 = vadd.f32 %v642_v19, %v1855_v59 }
 0x144   : > { %v644_v25 = vadd.f32 %v643_v22, %v1860_v0 }
 0x146   : > { %v645_v30 = vadd.f32 %v644_v25, %v1865_v6 }
 0x148   : > { %v646_v33 = vadd.f32 %v645_v30, %v1870_v11 }
 0x14a   : > { %v647_v36 = vadd.f32 %v646_v33, %v1875_v16 }
 0x14c   : > { %v648_v40 = vadd.f32 %v647_v36, %v1880_v21 }
 0x14e   : > { %v649_v45 = vadd.f32 %v648_v40, %v1885_v26 }
 0x150   : > { %v650_v48 = vadd.f32 %v649_v45, %v1890_v34 }
 0x152   : > { %v651_v52 = vadd.f32 %v650_v48, %v1895_v42 }
 0x154   : > { %v652_v57 = vadd.f32 %v651_v52, %v1900_v49 }
 0x156   : > { %v653_v62 = vadd.f32 %v652_v57, %v1905_v58 }
 0x158   : > { %v654_v5 = vadd.f32 %v653_v62, %v1910_v4 }
 0x15a   : > { %v657_v10 = vadd.f32 %v656_v2, %v654_v5 }
 0x15c   : > { %v658_v15 = vrot.slane %v657_v10, 4 }
 0x15e   : > { %v659_v19 = vadd.f32 %v658_v15, %v657_v10 }
 0x160   : > { %v660_v20 = vrot.slane %v659_v19, 2 }
 0x162   : > { %v661_v22 = vadd.f32 %v660_v20, %v659_v19 }
 0x164   : > { %v662_v25 = vrot.slane %v661_v22, 1 }
 0x166   : > { %v663_v30 = vadd.f32 %v662_v25, %v661_v22 }
 0x168   : > { %1493 = vmatmul.mubr.f32.vlgmr.msra.gmra.mrb[28].mxu1 %v663_v30 }
 0x169   : > { %1556 = vmatpush3.bf16.msra.mxu1 %v1772_v29  ;;  %1527 = vmatprep.mubr.msk.f32.mxu1 %vm1629_vm2, %v1627_v1  ;;  %v750_v1 = vlaneseq }
 0x16a   : > { %1557 = vmatprep.subr.bf16.mxu1 %v1630_v28 }
 0x16b   : > { %v1975_v29 = vshrl.u32 %v750_v1, 7 }
 0x16d   : > { %1559 = vmatpush3.bf16.msra.mxu1 %v1782_v32  ;;  %v752_v32 = vsub.s32 0, %v1975_v29 }
 0x16e   : > { %1560 = vmatprep.subr.bf16.mxu1 %v1630_v28 }
 0x171   : > { %1562 = vmatpush3.bf16.msra.mxu1 %v1792_v35 }
 0x172   : > { %1563 = vmatprep.subr.bf16.mxu1 %v1630_v28 }
 0x175   : > { %1565 = vmatpush3.bf16.msra.mxu1 %v1802_v38 }
 0x176   : > { %1566 = vmatprep.subr.bf16.mxu1 %v1630_v28 }
 0x179   : > { %1568 = vmatpush3.bf16.msra.mxu1 %v1811_v41 }
 0x17a   : > { %1569 = vmatprep.subr.bf16.mxu1 %v1630_v28 }
 0x17d   : > { %1571 = vmatpush3.bf16.msra.mxu1 %v1821_v44 }
 0x17e   : > { %1572 = vmatprep.subr.bf16.mxu1 %v1630_v28 }
 0x181   : > { %1574 = vmatpush3.bf16.msra.mxu1 %v1832_v47 }
 0x182   : > { %1575 = vmatprep.subr.bf16.mxu1 %v1630_v28 }
 0x185   : > { %1577 = vmatpush3.bf16.msra.mxu1 %v1842_v50 }
 0x23b   : > { %v746_v35 = vpop.f32.mrb[28].mxu1 }
 0x23c   : > { %v753_v38 = vrot.slane %v746_v35, %v752_v32  ;;  %v1494_v41 = vpop.f32.mrb[29].mxu1 }
 0x23e   : > { %v1981_v44 = vsub.f32 %v1844_v51, %v753_v38  ;;  %v1984_v33 = vsub.f32 %v1848_v53, %v753_v38  ;;  %v1987_v28 = vsub.f32 %v1852_v56, %v753_v38  ;;  %v1990_v47 = vsub.f32 %v1857_v60, %v753_v38 }
 0x23f   : > { %v1993_v50 = vsub.f32 %v1862_v3, %v753_v38  ;;  %v1996_v36 = vsub.f32 %v1867_v7, %v753_v38  ;;  %v1999_v40 = vsub.f32 %v1872_v13, %v753_v38  ;;  %v2002_v51 = vsub.f32 %v1877_v17, %v753_v38 }
 0x240   : > { %v2005_v53 = vsub.f32 %v1882_v23, %v753_v38  ;;  %v2008_v56 = vsub.f32 %v1887_v27, %v753_v38  ;;  %v2011_v60 = vsub.f32 %v1892_v37, %v753_v38  ;;  %v2014_v3 = vsub.f32 %v1897_v43, %v753_v38 }
 0x241   : > { %v2017_v7 = vsub.f32 %v1902_v54, %v753_v38  ;;  %v2020_v13 = vsub.f32 %v1907_v61, %v753_v38  ;;  %v2023_v17 = vsub.f32 %v1912_v8, %v753_v38  ;;  %v2026_v23 = vsub.f32 %v1917_v14, %v753_v38 }
 0x242   : > { %v2029_v27 = vsub.f32 %v1920_v24, %v753_v38  ;;  %v2032_v37 = vsub.f32 %v1923_v31, %v753_v38  ;;  %v2035_v43 = vsub.f32 %v1926_v39, %v753_v38  ;;  %v2038_v54 = vsub.f32 %v1929_v46, %v753_v38 }
 0x243   : > { %v2041_v61 = vsub.f32 %v1932_v55, %v753_v38  ;;  %v2044_v8 = vsub.f32 %v1935_v63, %v753_v38  ;;  %v2047_v14 = vsub.f32 %v1938_v9, %v753_v38  ;;  %v2050_v24 = vsub.f32 %v1941_v18, %v753_v38 }
 0x244   : > { %v2053_v31 = vsub.f32 %v1855_v59, %v753_v38  ;;  %v2056_v39 = vsub.f32 %v1860_v0, %v753_v38  ;;  %v2059_v46 = vsub.f32 %v1865_v6, %v753_v38  ;;  %v2062_v55 = vsub.f32 %v1870_v11, %v753_v38 }
 0x245   : > { %v2065_v63 = vsub.f32 %v1875_v16, %v753_v38  ;;  %v2068_v9 = vsub.f32 %v1880_v21, %v753_v38  ;;  %v2071_v18 = vsub.f32 %v1885_v26, %v753_v38  ;;  %v2074_v59 = vsub.f32 %v1890_v34, %v753_v38 }
 0x246   : > { %v2077_v0 = vsub.f32 %v1895_v42, %v753_v38  ;;  %v2080_v6 = vsub.f32 %v1900_v49, %v753_v38  ;;  %v2083_v11 = vsub.f32 %v1905_v58, %v753_v38  ;;  %v2086_v16 = vsub.f32 %v1910_v4, %v753_v38 }
 0x247   : > { %v2089_v21 = vsub.f32 %v1915_v12, %v753_v38  ;;  %v791_v26 = vmul.f32 %v1981_v44, %v1981_v44  ;;  %v792_v34 = vmul.f32 %v1984_v33, %v1984_v33  ;;  %v793_v42 = vmul.f32 %v1987_v28, %v1987_v28 }
 0x248   : > { %v794_v58 = vmul.f32 %v1990_v47, %v1990_v47  ;;  %v795_v4 = vmul.f32 %v1993_v50, %v1993_v50  ;;  %v796_v12 = vmul.f32 %v1996_v36, %v1996_v36  ;;  %v797_v57 = vmul.f32 %v1999_v40, %v1999_v40 }
 0x249   : > { %v828_v49 = vadd.f32 %v792_v34, %v791_v26  ;;  %v798_v2 = vmul.f32 %v2002_v51, %v2002_v51  ;;  %v799_v10 = vmul.f32 %v2005_v53, %v2005_v53  ;;  %v800_v19 = vmul.f32 %v2008_v56, %v2008_v56 }
 0x24a   : > { %v801_v22 = vmul.f32 %v2011_v60, %v2011_v60  ;;  %v802_v30 = vmul.f32 %v2014_v3, %v2014_v3  ;;  %v803_v35 = vmul.f32 %v2017_v7, %v2017_v7  ;;  %v804_v41 = vmul.f32 %v2020_v13, %v2020_v13 }
 0x24b   : > { %v829_v45 = vadd.f32 %v828_v49, %v793_v42  ;;  %v805_v34 = vmul.f32 %v2023_v17, %v2023_v17  ;;  %v806_v49 = vmul.f32 %v2026_v23, %v2026_v23 }
 0x24d   : > { %v830_v48 = vadd.f32 %v829_v45, %v794_v58  ;;  %v807_v45 = vmul.f32 %v2029_v27, %v2029_v27 }
 0x24f   : > { %v831_v52 = vadd.f32 %v830_v48, %v795_v4  ;;  %v808_v48 = vmul.f32 %v2032_v37, %v2032_v37 }
 0x251   : > { %v832_v62 = vadd.f32 %v831_v52, %v796_v12  ;;  %v809_v52 = vmul.f32 %v2035_v43, %v2035_v43 }
 0x253   : > { %v833_v5 = vadd.f32 %v832_v62, %v797_v57  ;;  %v810_v62 = vmul.f32 %v2038_v54, %v2038_v54 }
 0x255   : > { %v834_v15 = vadd.f32 %v833_v5, %v798_v2  ;;  %v811_v5 = vmul.f32 %v2041_v61, %v2041_v61 }
 0x257   : > { %v835_v20 = vadd.f32 %v834_v15, %v799_v10  ;;  %v812_v15 = vmul.f32 %v2044_v8, %v2044_v8 }
 0x259   : > { %v836_v25 = vadd.f32 %v835_v20, %v800_v19  ;;  %v813_v20 = vmul.f32 %v2047_v14, %v2047_v14 }
 0x25b   : > { %v837_v1 = vadd.f32 %v836_v25, %v801_v22  ;;  %v814_v25 = vmul.f32 %v2050_v24, %v2050_v24 }
 0x25d   : > { %v838_v38 = vadd.f32 %v837_v1, %v802_v30  ;;  %v815_v1 = vmul.f32 %v2053_v31, %v2053_v31 }
 0x25f   : > { %v839_v26 = vadd.f32 %v838_v38, %v803_v35  ;;  %v816_v38 = vmul.f32 %v2056_v39, %v2056_v39 }
 0x261   : > { %v840_v42 = vadd.f32 %v839_v26, %v804_v41  ;;  %v817_v26 = vmul.f32 %v2059_v46, %v2059_v46 }
 0x263   : > { %v841_v58 = vadd.f32 %v840_v42, %v805_v34  ;;  %v818_v42 = vmul.f32 %v2062_v55, %v2062_v55 }
 0x265   : > { %v842_v4 = vadd.f32 %v841_v58, %v806_v49  ;;  %v819_v58 = vmul.f32 %v2065_v63, %v2065_v63 }
 0x267   : > { %v843_v12 = vadd.f32 %v842_v4, %v807_v45  ;;  %v820_v4 = vmul.f32 %v2068_v9, %v2068_v9 }
 0x269   : > { %v844_v57 = vadd.f32 %v843_v12, %v808_v48  ;;  %v821_v12 = vmul.f32 %v2071_v18, %v2071_v18 }
 0x26b   : > { %v845_v2 = vadd.f32 %v844_v57, %v809_v52  ;;  %v822_v57 = vmul.f32 %v2074_v59, %v2074_v59 }
 0x26d   : > { %v846_v10 = vadd.f32 %v845_v2, %v810_v62  ;;  %v823_v2 = vmul.f32 %v2077_v0, %v2077_v0 }
 0x26f   : > { %v847_v19 = vadd.f32 %v846_v10, %v811_v5  ;;  %v824_v10 = vmul.f32 %v2080_v6, %v2080_v6 }
 0x271   : > { %v848_v22 = vadd.f32 %v847_v19, %v812_v15  ;;  %v825_v19 = vmul.f32 %v2083_v11, %v2083_v11 }
 0x273   : > { %v849_v30 = vadd.f32 %v848_v22, %v813_v20  ;;  %v827_v22 = vmul.f32 %v2089_v21, %v2089_v21 }
 0x275   : > { %v850_v35 = vadd.f32 %v849_v30, %v814_v25  ;;  %v826_v25 = vmul.f32 %v2086_v16, %v2086_v16 }
 0x277   : > { %v851_v41 = vadd.f32 %v850_v35, %v815_v1  ;;  %v863_v35 = vsel %vm655_vm4, %v827_v22, 0.0 }
 0x279   : > { %v852_v34 = vadd.f32 %v851_v41, %v816_v38 }
 0x27b   : > { %v853_v49 = vadd.f32 %v852_v34, %v817_v26 }
 0x27d   : > { %v854_v45 = vadd.f32 %v853_v49, %v818_v42 }
 0x27f   : > { %v855_v48 = vadd.f32 %v854_v45, %v819_v58 }
 0x281   : > { %v856_v52 = vadd.f32 %v855_v48, %v820_v4 }
 0x283   : > { %v857_v62 = vadd.f32 %v856_v52, %v821_v12 }
 0x285   : > { %v858_v5 = vadd.f32 %v857_v62, %v822_v57 }
 0x287   : > { %v859_v15 = vadd.f32 %v858_v5, %v823_v2 }
 0x289   : > { %v860_v20 = vadd.f32 %v859_v15, %v824_v10 }
 0x28b   : > { %v861_v30 = vadd.f32 %v860_v20, %v825_v19 }
 0x28d   : > { %v862_v1 = vadd.f32 %v861_v30, %v826_v25 }
 0x28f   : > { %v864_v38 = vadd.f32 %v863_v35, %v862_v1 }
 0x291   : > { %v865_v41 = vrot.slane %v864_v38, 4 }
 0x293   : > { %v866_v26 = vadd.f32 %v865_v41, %v864_v38 }
 0x295   : > { %v867_v34 = vrot.slane %v866_v26, 2 }
 0x297   : > { %v868_v42 = vadd.f32 %v867_v34, %v866_v26 }
 0x299   : > { %v869_v49 = vrot.slane %v868_v42, 1 }
 0x29b   : > { %v870_v58 = vadd.f32 %v869_v49, %v868_v42 }
 0x29d   : > { %1528 = vmatmul.mubr.f32.vlgmr.msra.gmra.mrb[30].mxu1 %v870_v58 }
 0x370   : > { %v937_v45 = vpop.f32.mrb[30].mxu1 }
 0x371   : > { %v1529_v4 = vpop.f32.mrb[31].mxu1  ;;  %v938_v48 = vadd.f32 1e-05, %v937_v45 }
 0x373   : > { %1617 = vrsqrt.f32 %v938_v48 }
 0x37d   : > { %v1618_v12 = vpop.eup %1617 }
 0x37e   : > { %v945_v52 = vrot.slane %v1618_v12, %v752_v32 }
 0x380   : > { %v946_v57 = vmul.f32 %v945_v52, %v1981_v44  ;;  %v947_v62 = vmul.f32 %v945_v52, %v1984_v33  ;;  %v948_v2 = vmul.f32 %v945_v52, %v1987_v28  ;;  %v949_v5 = vmul.f32 %v945_v52, %v1990_v47 }
 0x381   : > { %v950_v10 = vmul.f32 %v945_v52, %v1993_v50  ;;  %v951_v15 = vmul.f32 %v945_v52, %v1996_v36  ;;  %v952_v19 = vmul.f32 %v945_v52, %v1999_v40  ;;  %v953_v20 = vmul.f32 %v945_v52, %v2002_v51 }
 0x382   : > { %v954_v22 = vmul.f32 %v945_v52, %v2005_v53  ;;  %v955_v29 = vmul.f32 %v945_v52, %v2008_v56  ;;  %v956_v32 = vmul.f32 %v945_v52, %v2011_v60  ;;  %v957_v44 = vmul.f32 %v945_v52, %v2014_v3 }
 0x383   : > { %v958_v33 = vmul.f32 %v945_v52, %v2017_v7  ;;  %v959_v28 = vmul.f32 %v945_v52, %v2020_v13  ;;  %v960_v47 = vmul.f32 %v945_v52, %v2023_v17  ;;  %v961_v50 = vmul.f32 %v945_v52, %v2026_v23  ;;  %v1321_v23 = vld [vmem:[%s2519_s3] ss:$0 sm:$0xff] }
 0x384   : > { %v962_v36 = vmul.f32 %v945_v52, %v2029_v27  ;;  %v963_v40 = vmul.f32 %v945_v52, %v2032_v37  ;;  %v964_v51 = vmul.f32 %v945_v52, %v2035_v43  ;;  %v965_v53 = vmul.f32 %v945_v52, %v2038_v54 }
 0x385   : > { %v966_v56 = vmul.f32 %v945_v52, %v2041_v61  ;;  %v967_v60 = vmul.f32 %v945_v52, %v2044_v8  ;;  %v968_v3 = vmul.f32 %v945_v52, %v2047_v14  ;;  %v969_v7 = vmul.f32 %v945_v52, %v2050_v24 }
 0x386   : > { %v970_v13 = vmul.f32 %v945_v52, %v2053_v31  ;;  %v971_v17 = vmul.f32 %v945_v52, %v2056_v39  ;;  %v972_v27 = vmul.f32 %v945_v52, %v2059_v46  ;;  %v973_v37 = vmul.f32 %v945_v52, %v2062_v55 }
 0x387   : > { %v974_v43 = vmul.f32 %v945_v52, %v2065_v63  ;;  %v975_v54 = vmul.f32 %v945_v52, %v2068_v9  ;;  %v976_v61 = vmul.f32 %v945_v52, %v2071_v18  ;;  %v977_v8 = vmul.f32 %v945_v52, %v2074_v59 }
 0x388   : > { %v978_v14 = vmul.f32 %v945_v52, %v2077_v0  ;;  %v979_v24 = vmul.f32 %v945_v52, %v2080_v6  ;;  %v980_v31 = vmul.f32 %v945_v52, %v2083_v11  ;;  %v981_v39 = vmul.f32 %v945_v52, %v2086_v16 }
 0x389   : > { %v982_v46 = vmul.f32 %v945_v52, %v2089_v21  ;;  %v990_v25 = vmul.f32 %v1321_v23, %v946_v57  ;;  %v991_v55 = vmul.f32 %v1321_v23, %v947_v62  ;;  %v992_v30 = vmul.f32 %v1321_v23, %v948_v2 }
 0x38a   : > { %v993_v63 = vmul.f32 %v1321_v23, %v949_v5  ;;  %v994_v1 = vmul.f32 %v1321_v23, %v950_v10  ;;  %v995_v9 = vmul.f32 %v1321_v23, %v951_v15  ;;  %v996_v35 = vmul.f32 %v1321_v23, %v952_v19  ;;  %v1322_v5 = vld [vmem:[%s2520_s4] ss:$0 sm:$0xff] }
 0x38b   : > { %v997_v18 = vmul.f32 %v1321_v23, %v953_v20  ;;  %v998_v38 = vmul.f32 %v1321_v23, %v954_v22  ;;  %v999_v59 = vmul.f32 %v1321_v23, %v955_v29  ;;  %v1000_v41 = vmul.f32 %v1321_v23, %v956_v32 }
 0x38c   : > { %v1001_v0 = vmul.f32 %v1321_v23, %v957_v44  ;;  %v1002_v26 = vmul.f32 %v1321_v23, %v958_v33  ;;  %v1003_v6 = vmul.f32 %v1321_v23, %v959_v28  ;;  %v1004_v34 = vmul.f32 %v1321_v23, %v960_v47 }
 0x38d   : > { %v1005_v11 = vmul.f32 %v1321_v23, %v961_v50  ;;  %v1006_v42 = vmul.f32 %v1321_v23, %v962_v36  ;;  %v1007_v16 = vmul.f32 %v1321_v23, %v963_v40  ;;  %v1008_v49 = vmul.f32 %v1321_v23, %v964_v51 }
 0x38e   : > { %v1009_v21 = vmul.f32 %v1321_v23, %v965_v53  ;;  %v1010_v58 = vmul.f32 %v1321_v23, %v966_v56  ;;  %v1011_v45 = vmul.f32 %v1321_v23, %v967_v60  ;;  %v1012_v4 = vmul.f32 %v1321_v23, %v968_v3 }
 0x38f   : > { %v1013_v48 = vmul.f32 %v1321_v23, %v969_v7  ;;  %v1014_v12 = vmul.f32 %v1321_v23, %v970_v13  ;;  %v1015_v52 = vmul.f32 %v1321_v23, %v971_v17  ;;  %v1016_v57 = vmul.f32 %v1321_v23, %v972_v27 }
 0x390   : > { %v1017_v62 = vmul.f32 %v1321_v23, %v973_v37  ;;  %v1018_v2 = vmul.f32 %v1321_v23, %v974_v43  ;;  %v1019_v10 = vmul.f32 %v1321_v23, %v975_v54  ;;  %v1020_v15 = vmul.f32 %v1321_v23, %v976_v61 }
 0x391   : > { %v1021_v19 = vmul.f32 %v1321_v23, %v977_v8  ;;  %v1022_v20 = vmul.f32 %v1321_v23, %v978_v14  ;;  %v1023_v22 = vmul.f32 %v1321_v23, %v979_v24  ;;  %v1024_v29 = vmul.f32 %v1321_v23, %v980_v31 }
 0x392   : > { %v1025_v32 = vmul.f32 %v1321_v23, %v981_v39  ;;  %v1026_v44 = vmul.f32 %v1321_v23, %v982_v46  ;;  %v2211_v33 = vadd.f32 %v1322_v5, %v990_v25  ;;  %v2213_v28 = vadd.f32 %v1322_v5, %v991_v55 }
 0x393   : > { %v2215_v47 = vadd.f32 %v1322_v5, %v992_v30  ;;  %v2217_v50 = vadd.f32 %v1322_v5, %v993_v63  ;;  %v2219_v36 = vadd.f32 %v1322_v5, %v994_v1  ;;  %v2221_v40 = vadd.f32 %v1322_v5, %v995_v9 }
 0x394   : > { %v2223_v51 = vadd.f32 %v1322_v5, %v996_v35  ;;  %v2225_v53 = vadd.f32 %v1322_v5, %v997_v18  ;;  %v2227_v56 = vadd.f32 %v1322_v5, %v998_v38  ;;  %v2229_v60 = vadd.f32 %v1322_v5, %v999_v59 }
 0x395   : > { %v2231_v3 = vadd.f32 %v1322_v5, %v1000_v41  ;;  %v2233_v7 = vadd.f32 %v1322_v5, %v1001_v0  ;;  %v2235_v13 = vadd.f32 %v1322_v5, %v1002_v26  ;;  %v2237_v17 = vadd.f32 %v1322_v5, %v1003_v6 }
 0x396   : > { %v2239_v23 = vadd.f32 %v1322_v5, %v1004_v34  ;;  %v2241_v27 = vadd.f32 %v1322_v5, %v1005_v11  ;;  %v2243_v37 = vadd.f32 %v1322_v5, %v1006_v42  ;;  %v2245_v43 = vadd.f32 %v1322_v5, %v1007_v16 }
 0x397   : > { %v2247_v54 = vadd.f32 %v1322_v5, %v1008_v49  ;;  %v2249_v61 = vadd.f32 %v1322_v5, %v1009_v21  ;;  %v2251_v8 = vadd.f32 %v1322_v5, %v1010_v58  ;;  %v2253_v14 = vadd.f32 %v1322_v5, %v1011_v45 }
 0x398   : > { %v2255_v24 = vadd.f32 %v1322_v5, %v1012_v4  ;;  %v2257_v31 = vadd.f32 %v1322_v5, %v1013_v48  ;;  %v2259_v39 = vadd.f32 %v1322_v5, %v1014_v12  ;;  %v2261_v46 = vadd.f32 %v1322_v5, %v1015_v52 }
 0x399   : > { %v2263_v25 = vadd.f32 %v1322_v5, %v1016_v57  ;;  %v2265_v55 = vadd.f32 %v1322_v5, %v1017_v62  ;;  %v2268_v30 = vadd.f32 %v1322_v5, %v1018_v2  ;;  %v2270_v63 = vadd.f32 %v1322_v5, %v1019_v10 }
 0x39a   : > { %v2272_v1 = vadd.f32 %v1322_v5, %v1020_v15  ;;  %v2274_v9 = vadd.f32 %v1322_v5, %v1021_v19  ;;  %v2276_v35 = vadd.f32 %v1322_v5, %v1022_v20  ;;  %v2278_v18 = vadd.f32 %v1322_v5, %v1023_v22 }
 0x39b   : > { %v2280_v38 = vadd.f32 %v1322_v5, %v1024_v29  ;;  %vm1071_vm5 = vcmp.ge.f32.partialorder %v2211_v33, 0.0  ;;  %vm1072_vm6 = vcmp.ge.f32.partialorder %v2213_v28, 0.0  ;;  %vm1073_vm7 = vcmp.ge.f32.partialorder %v2215_v47, 0.0 }
 0x39c   : > { %vm1074_vm8 = vcmp.ge.f32.partialorder %v2217_v50, 0.0  ;;  %vm1075_vm9 = vcmp.ge.f32.partialorder %v2219_v36, 0.0  ;;  %vm1076_vm10 = vcmp.ge.f32.partialorder %v2221_v40, 0.0  ;;  %vm1077_vm11 = vcmp.ge.f32.partialorder %v2223_v51, 0.0 }
 0x39d   : > { %vm1078_vm12 = vcmp.ge.f32.partialorder %v2225_v53, 0.0  ;;  %vm1079_vm13 = vcmp.ge.f32.partialorder %v2227_v56, 0.0  ;;  %v2296_v59 = vadd.f32 %v1322_v5, %v1025_v32  ;;  %v1108_v41 = vmul.f32 0.2, %v2211_v33 }
 0x39e   : > { %v1109_v0 = vmul.f32 0.2, %v2213_v28  ;;  %v1110_v26 = vmul.f32 0.2, %v2215_v47  ;;  %v2302_v6 = vadd.f32 %v1322_v5, %v1026_v44  ;;  %vm1081_vm15 = vcmp.ge.f32.partialorder %v2231_v3, 0.0 }
 0x39f   : > { %vm1082_vm0 = vcmp.ge.f32.partialorder %v2233_v7, 0.0  ;;  %v1111_v34 = vmul.f32 0.2, %v2217_v50  ;;  %v1112_v11 = vmul.f32 0.2, %v2219_v36  ;;  %vm1087_vm14 = vcmp.ge.f32.partialorder %v2243_v37, 0.0 }
 0x3a0   : > { %v1113_v42 = vmul.f32 0.2, %v2221_v40  ;;  %v1114_v16 = vmul.f32 0.2, %v2223_v51  ;;  %v1115_v49 = vmul.f32 0.2, %v2225_v53  ;;  %v1145_v58 = vsel %vm1071_vm5, %v2211_v33, %v1108_v41 }
 0x3a1   : > { %v1116_v21 = vmul.f32 0.2, %v2227_v56  ;;  %vm1088_vm1 = vcmp.ge.f32.partialorder %v2245_v43, 0.0  ;;  %v1117_v45 = vmul.f32 0.2, %v2229_v60  ;;  %v1146_v12 = vsel %vm1072_vm6, %v2213_v28, %v1109_v0  ;;  %1182 = vst [vmem:[%s2294_s20] sm:$0xff] %v1145_v58 }
 0x3a2   : > { %v1118_v4 = vmul.f32 0.2, %v2231_v3  ;;  %v1119_v48 = vmul.f32 0.2, %v2233_v7  ;;  %vm1092_vm5 = vcmp.ge.f32.partialorder %v2253_v14, 0.0  ;;  %v1147_v2 = vsel %vm1073_vm7, %v2215_v47, %v1110_v26  ;;  %1183 = vst [vmem:[%s2294_s20 + $0x8] sm:$0xff] %v1146_v12 }
 0x3a3   : > { %v1120_v52 = vmul.f32 0.2, %v2235_v13  ;;  %v1121_v57 = vmul.f32 0.2, %v2237_v17  ;;  %v1122_v62 = vmul.f32 0.2, %v2239_v23  ;;  %v1148_v19 = vsel %vm1074_vm8, %v2217_v50, %v1111_v34 }
 0x3a4   : > { %vm1096_vm6 = vcmp.ge.f32.partialorder %v2261_v46, 0.0  ;;  %v1123_v5 = vmul.f32 0.2, %v2241_v27  ;;  %v1124_v10 = vmul.f32 0.2, %v2243_v37  ;;  %1184 = vst [vmem:[%s2294_s20 + $0x10] sm:$0xff] %v1147_v2  ;;  %v1149_v32 = vsel %vm1075_vm9, %v2219_v36, %v1112_v11 }
 0x3a5   : > { %v1125_v15 = vmul.f32 0.2, %v2245_v43  ;;  %vm1100_vm7 = vcmp.ge.f32.partialorder %v2270_v63, 0.0  ;;  %v1126_v20 = vmul.f32 0.2, %v2247_v54  ;;  %1185 = vst [vmem:[%s2294_s20 + $0x18] sm:$0xff] %v1148_v19  ;;  %v1150_v47 = vsel %vm1076_vm10, %v2221_v40, %v1113_v42 }
 0x3a6   : > { %v1127_v22 = vmul.f32 0.2, %v2249_v61  ;;  %v1128_v29 = vmul.f32 0.2, %v2251_v8  ;;  %vm1104_vm8 = vcmp.ge.f32.partialorder %v2278_v18, 0.0  ;;  %vm1105_vm2 = vcmp.ge.f32.partialorder %v2280_v38, 0.0 }
 0x3a7   : > { %vm1106_vm3 = vcmp.ge.f32.partialorder %v2296_v59, 0.0  ;;  %vm1107_vm4 = vcmp.ge.f32.partialorder %v2302_v6, 0.0  ;;  %v1129_v44 = vmul.f32 0.2, %v2253_v14  ;;  %v1130_v33 = vmul.f32 0.2, %v2255_v24 }
 0x3a8   : > { %v1131_v28 = vmul.f32 0.2, %v2257_v31  ;;  %1186 = vst [vmem:[%s2294_s20 + $0x20] sm:$0xff] %v1149_v32  ;;  %v1132_v50 = vmul.f32 0.2, %v2259_v39  ;;  %v1151_v0 = vsel %vm1077_vm11, %v2223_v51, %v1114_v16  ;;  %1187 = vst [vmem:[%s2294_s20 + $0x28] sm:$0xff] %v1150_v47  ;;  %v1152_v11 = vsel %vm1078_vm12, %v2225_v53, %v1115_v49 }
 0x3a9   : > { %v1133_v36 = vmul.f32 0.2, %v2261_v46  ;;  %v1134_v41 = vmul.f32 0.2, %v2263_v25  ;;  %v1135_v26 = vmul.f32 0.2, %v2265_v55  ;;  %v1153_v16 = vsel %vm1079_vm13, %v2227_v56, %v1116_v21 }
 0x3aa   : > { %v1136_v34 = vmul.f32 0.2, %v2268_v30  ;;  %v1137_v40 = vmul.f32 0.2, %v2270_v63  ;;  %1188 = vst [vmem:[%s2294_s20 + $0x30] sm:$0xff] %v1151_v0  ;;  %1189 = vst [vmem:[%s2294_s20 + $0x38] sm:$0xff] %v1152_v11  ;;  %v1155_v56 = vsel %vm1081_vm15, %v2231_v3, %v1118_v4  ;;  %v1156_v21 = vsel %vm1082_vm0, %v2233_v7, %v1119_v48 }
 0x3ab   : > { %v1138_v42 = vmul.f32 0.2, %v2272_v1  ;;  %v1139_v58 = vmul.f32 0.2, %v2274_v9  ;;  %v1140_v51 = vmul.f32 0.2, %v2276_v35  ;;  %v1161_v7 = vsel %vm1087_vm14, %v2243_v37, %v1124_v10 }
 0x3ac   : > { %v1141_v12 = vmul.f32 0.2, %v2278_v18  ;;  %v1142_v53 = vmul.f32 0.2, %v2280_v38  ;;  %v1143_v49 = vmul.f32 0.2, %v2296_v59  ;;  %v1166_v37 = vsel %vm1092_vm5, %v2253_v14, %v1129_v44 }
 0x3ad   : > { %vm2522_vm9 = vcmp.ge.f32.partialorder %v2229_v60, 0.0  ;;  %1190 = vst [vmem:[%s2294_s20 + $0x40] sm:$0xff] %v1153_v16  ;;  %v1144_v19 = vmul.f32 0.2, %v2302_v6  ;;  %vm2523_vm10 = vcmp.ge.f32.partialorder %v2235_v13, 0.0  ;;  %vm2524_vm11 = vcmp.ge.f32.partialorder %v2237_v17, 0.0 }
 0x3ae   : > { %v1154_v2 = vsel %vm2522_vm9, %v2229_v60, %v1117_v45  ;;  %v1157_v32 = vsel %vm2523_vm10, %v2235_v13, %v1120_v52  ;;  %v1158_v60 = vsel %vm2524_vm11, %v2237_v17, %v1121_v57  ;;  %vm2525_vm12 = vcmp.ge.f32.partialorder %v2239_v23, 0.0  ;;  %1192 = vst [vmem:[%s2294_s20 + $0x50] sm:$0xff] %v1155_v56  ;;  %1193 = vst [vmem:[%s2294_s20 + $0x58] sm:$0xff] %v1156_v21 }
 0x3af   : > { %1191 = vst [vmem:[%s2294_s20 + $0x48] sm:$0xff] %v1154_v2  ;;  %v1159_v3 = vsel %vm2525_vm12, %v2239_v23, %v1122_v62  ;;  %vm2526_vm13 = vcmp.ge.f32.partialorder %v2241_v27, 0.0  ;;  %1194 = vst [vmem:[%s2294_s20 + $0x60] sm:$0xff] %v1157_v32  ;;  %v1162_v13 = vsel %vm1088_vm1, %v2245_v43, %v1125_v15  ;;  %vm2527_vm15 = vcmp.ge.f32.partialorder %v2247_v54, 0.0 }
 0x3b0   : > { %v1160_v45 = vsel %vm2526_vm13, %v2241_v27, %v1123_v5  ;;  %v1163_v17 = vsel %vm2527_vm15, %v2247_v54, %v1126_v20  ;;  %vm2528_vm0 = vcmp.ge.f32.partialorder %v2249_v61, 0.0  ;;  %vm2529_vm14 = vcmp.ge.f32.partialorder %v2251_v8, 0.0  ;;  %1195 = vst [vmem:[%s2294_s20 + $0x68] sm:$0xff] %v1158_v60  ;;  %1196 = vst [vmem:[%s2294_s20 + $0x70] sm:$0xff] %v1159_v3 }
 0x3b1   : > { %v1164_v23 = vsel %vm2528_vm0, %v2249_v61, %v1127_v22  ;;  %v1165_v27 = vsel %vm2529_vm14, %v2251_v8, %v1128_v29  ;;  %1197 = vst [vmem:[%s2294_s20 + $0x78] sm:$0xff] %v1160_v45  ;;  %1198 = vst [vmem:[%s2294_s20 + $0x80] sm:$0xff] %v1161_v7  ;;  %vm2530_vm1 = vcmp.ge.f32.partialorder %v2255_v24, 0.0  ;;  %vm2531_vm9 = vcmp.ge.f32.partialorder %v2257_v31, 0.0 }
 0x3b2   : > { %v1167_v43 = vsel %vm2530_vm1, %v2255_v24, %v1130_v33  ;;  %v1168_v54 = vsel %vm2531_vm9, %v2257_v31, %v1131_v28  ;;  %vm2532_vm10 = vcmp.ge.f32.partialorder %v2259_v39, 0.0  ;;  %1199 = vst [vmem:[%s2294_s20 + $0x88] sm:$0xff] %v1162_v13  ;;  %1200 = vst [vmem:[%s2294_s20 + $0x90] sm:$0xff] %v1163_v17  ;;  %v1170_v8 = vsel %vm1096_vm6, %v2261_v46, %v1133_v36 }
 0x3b3   : > { %v1169_v61 = vsel %vm2532_vm10, %v2259_v39, %v1132_v50  ;;  %1201 = vst [vmem:[%s2294_s20 + $0x98] sm:$0xff] %v1164_v23  ;;  %1202 = vst [vmem:[%s2294_s20 + $0xa0] sm:$0xff] %v1165_v27  ;;  %vm2533_vm5 = vcmp.ge.f32.partialorder %v2263_v25, 0.0  ;;  %vm2534_vm11 = vcmp.ge.f32.partialorder %v2265_v55, 0.0  ;;  %vm2535_vm12 = vcmp.ge.f32.partialorder %v2268_v30, 0.0 }
 0x3b4   : > { %v1171_v14 = vsel %vm2533_vm5, %v2263_v25, %v1134_v41  ;;  %v1172_v24 = vsel %vm2534_vm11, %v2265_v55, %v1135_v26  ;;  %v1173_v31 = vsel %vm2535_vm12, %v2268_v30, %v1136_v34  ;;  %1203 = vst [vmem:[%s2294_s20 + $0xa8] sm:$0xff] %v1166_v37  ;;  %1204 = vst [vmem:[%s2294_s20 + $0xb0] sm:$0xff] %v1167_v43  ;;  %vm2536_vm6 = vcmp.ge.f32.partialorder %v2272_v1, 0.0 }
 0x3b5   : > { %1205 = vst [vmem:[%s2294_s20 + $0xb8] sm:$0xff] %v1168_v54  ;;  %1206 = vst [vmem:[%s2294_s20 + $0xc0] sm:$0xff] %v1169_v61  ;;  %v1174_v39 = vsel %vm1100_vm7, %v2270_v63, %v1137_v40  ;;  %v1175_v46 = vsel %vm2536_vm6, %v2272_v1, %v1138_v42  ;;  %vm2537_vm13 = vcmp.ge.f32.partialorder %v2274_v9, 0.0  ;;  %vm2538_vm15 = vcmp.ge.f32.partialorder %v2276_v35, 0.0 }
 0x3b6   : > { %v1176_v25 = vsel %vm2537_vm13, %v2274_v9, %v1139_v58  ;;  %v1177_v55 = vsel %vm2538_vm15, %v2276_v35, %v1140_v51  ;;  %1207 = vst [vmem:[%s2294_s20 + $0xc8] sm:$0xff] %v1170_v8  ;;  %1208 = vst [vmem:[%s2294_s20 + $0xd0] sm:$0xff] %v1171_v14  ;;  %v1178_v30 = vsel %vm1104_vm8, %v2278_v18, %v1141_v12 }
 0x3b7   : > { %1209 = vst [vmem:[%s2294_s20 + $0xd8] sm:$0xff] %v1172_v24  ;;  %1210 = vst [vmem:[%s2294_s20 + $0xe0] sm:$0xff] %v1173_v31  ;;  %v1179_v63 = vsel %vm1105_vm2, %v2280_v38, %v1142_v53  ;;  %v1180_v1 = vsel %vm1106_vm3, %v2296_v59, %v1143_v49  ;;  %v1181_v9 = vsel %vm1107_vm4, %v2302_v6, %v1144_v19 }
 0x3b8   : > { %1211 = vst [vmem:[%s2294_s20 + $0xe8] sm:$0xff] %v1174_v39  ;;  %1212 = vst [vmem:[%s2294_s20 + $0xf0] sm:$0xff] %v1175_v46 }
 0x3b9   : > { %1213 = vst [vmem:[%s2294_s20 + $0xf8] sm:$0xff] %v1176_v25  ;;  %1214 = vst [vmem:[%s2294_s20 + $0x100] sm:$0xff] %v1177_v55 }
 0x3ba   : > { %1215 = vst [vmem:[%s2294_s20 + $0x108] sm:$0xff] %v1178_v30  ;;  %1216 = vst [vmem:[%s2294_s20 + $0x110] sm:$0xff] %v1179_v63 }
 0x3bb   : > { %1217 = vst [vmem:[%s2294_s20 + $0x118] sm:$0xff] %v1180_v1  ;;  %1218 = vst [vmem:[%s2294_s20 + $0x120] sm:$0x1] %v1181_v9 }
 0x3bc PF: > { %s15_s18 = sadd.s32 1, %s1625_s18  }
 0x3bd   : > { %p12_p4 = scmp.ge.s32.totalorder %s15_s18, 4  }
 0x3bf   :  { %14 = sbr.rel (!%p12_p4) target bundleno = 1 (0x1), region = 70 }

// kernel: unet2d_forward.20
= control target key start
LH: loop header
LB: loop body
LE: loop exit
PB: predicated region body
PF: predicated region fallthrough
CT: control target
= control target key end

     0   :  { %s1837_s21 = smov 0   ;;  %s2846_s0 = inlined_call_operand.vmem [shape: bf16[2,289,72], index: 0, kind: input, shape index: {}]   ;;  %s2847_s1 = inlined_call_operand.vmem [shape: bf16[72,128], index: 1, kind: input, shape index: {}]   ;;  %s2848_s2 = inlined_call_operand.vmem [shape: f32[128,128], index: 2, kind: input, shape index: {}]   ;;  %s2849_s3 = inlined_call_operand.vmem [shape: f32[1,128], index: 3, kind: input, shape index: {}]   ;;  %s2850_s4 = inlined_call_operand.vmem [shape: f32[1,128], index: 4, kind: input, shape index: {}]   ;;  %s2851_s5 = inlined_call_operand.vmem [shape: f32[2,289,128], index: 5, kind: input, shape index: {}]   ;;  %s2852_s6 = inlined_call_operand.vmem [shape: f32[2,289,128], index: 6, kind: output, shape index: {}]  }
   0x1 LB: > { %s1425_s22 = sadd.s32 4294967295, %s1797_s21   ;;  %p1429_p0 = scmp.ge.s32.totalorder %s1797_s21, 1  ;;  %s1797_s21 = sphi %s1837_s21, %s16_s21  }
   0x2   : > { %p222_p1 = scmp.lt.s32.totalorder %s1797_s21, 3 }
   0x4   : > { %p223_p2 = pnand %p1429_p0, %p222_p1 }
   0x6   : > { %226 = sbr.rel (%p223_p2) target bundleno = 982 (0x3d6), region = 44 }
   0xd   : > { %v1765_v0 = vld [vmem:[%s2847_s1] sm:$0xff]   ;;  %v1799_v1 = vmov 0.0   ;;  %v1766_v2 = vld [vmem:[%s2847_s1 + $0x8] sm:$0xff]   ;;  %vm1800_vm0 = vmmov 0   ;;  %p257_p3 = scmp.lt.s32.totalorder %s1425_s22, 1  ;;  %v1767_v3 = vld [vmem:[%s2847_s1 + $0x10] sm:$0xff]  }
   0xe   : > { %1538 = vmatprep.subr.bf16.mxu0 %v1799_v1  ;;  %1742 = vmatprep.subr.bf16.mxu1 %v1799_v1  ;;  %v1768_v4 = vld [vmem:[%s2847_s1 + $0x18] sm:$0xff]   ;;  %v1769_v5 = vld [vmem:[%s2847_s1 + $0x20] ss:$0 sps:$4 sm:$0xff]   ;;  %vm497_vm1 = vcmask 1043456   ;;  %vm439_vm2 = vcmask 588800   ;;  %v730_v27 = vld [vmem:[%s2848_s2 + $0x8] sm:$0xff] }
   0xf   : > { %1539 = vmatpush3.bf16.msra.mxu0 %v1765_v0  ;;  %1747 = vmatpush3.bf16.msra.mxu1 %v1765_v0  ;;  %s2879_s22 = smov (!%p257_p3, %s1425_s22), 1  ;;  %v499_v6 = vsel %vm497_vm1, %v1769_v5, 0  ;;  %v729_v26 = vld [vmem:[%s2848_s2] sm:$0xff]  ;;  %v1801_v28 = vmov 0.0|0.0   ;;  %v731_v30 = vld [vmem:[%s2848_s2 + $0x10] sm:$0xff]  ;;  %v732_v31 = vld [vmem:[%s2848_s2 + $0x18] sm:$0xff] }
  0x10   : > { %1540 = vmatprep.subr.bf16.mxu0 %v1799_v1  ;;  %1548 = vmatprep.mubr.msk.bf16.mxu0 %vm1800_vm0, %v1799_v1  ;;  %s1752_s29 = smul.u32 148, %s2879_s22  ;;  %v1963_v29 = vpack.c.bf16 %v730_v27, %v729_v26  ;;  %v1973_v32 = vpack.c.bf16 %v732_v31, %v731_v30  ;;  %v733_v33 = vld [vmem:[%s2848_s2 + $0x20] sm:$0xff]  ;;  %v734_v34 = vld [vmem:[%s2848_s2 + $0x28] sm:$0xff]  ;;  %v735_v36 = vld [vmem:[%s2848_s2 + $0x30] sm:$0xff]  ;;  %vm720_vm3 = vcmask 1040384  }
  0x11   : > { %1743 = vmatprep.subr.bf16.mxu1 %v1799_v1  ;;  %1596 = vmatprep.mubr.msk.bf16.mxu1 %vm1800_vm0, %v1799_v1  ;;  %v1983_v35 = vpack.c.bf16 %v734_v34, %v733_v33  ;;  %v736_v37 = vld [vmem:[%s2848_s2 + $0x38] sm:$0xff]  ;;  %v737_v39 = vld [vmem:[%s2848_s2 + $0x40] sm:$0xff]  ;;  %v738_v40 = vld [vmem:[%s2848_s2 + $0x48] sm:$0xff]  ;;  %s1753_s27 = smul.u32 296, %s2879_s22 }
  0x12   : > { %s1870_s8 = scalar_lea.vmem %s2846_s0, %s1752_s29  ;;  %v1993_v38 = vpack.c.bf16 %v736_v37, %v735_v36  ;;  %v2002_v41 = vpack.c.bf16 %v738_v40, %v737_v39  ;;  %v739_v42 = vld [vmem:[%s2848_s2 + $0x50] sm:$0xff]  ;;  %v740_v43 = vld [vmem:[%s2848_s2 + $0x58] sm:$0xff]  ;;  %v741_v45 = vld [vmem:[%s2848_s2 + $0x60] sm:$0xff] }
  0x13   : > { %1541 = vmatpush3.bf16.msra.mxu0 %v1766_v2  ;;  %1748 = vmatpush3.bf16.msra.mxu1 %v1766_v2  ;;  %v1770_v7 = vld [vmem:[%s1870_s8] sm:$0xff]   ;;  %v1771_v8 = vld [vmem:[%s1870_s8 + $0x8] sm:$0xff]   ;;  %v1772_v10 = vld [vmem:[%s1870_s8 + $0x10] sm:$0xff]   ;;  %v2012_v44 = vpack.c.bf16 %v740_v43, %v739_v42  ;;  %s2624_s11 = scalar_lea.vmem %s2852_s6, %s1753_s27 }
  0x14   : > { %1542 = vmatprep.subr.bf16.mxu0 %v1799_v1  ;;  %1744 = vmatprep.subr.bf16.mxu1 %v1799_v1  ;;  %v1779_v9 = vld [vmem:[%s1870_s8 + $0x60] sm:$0xff]   ;;  %v1781_v11 = vld [vmem:[%s1870_s8 + $0x68] sm:$0xff]   ;;  %v1773_v12 = vld [vmem:[%s1870_s8 + $0x18] sm:$0xff]  }
  0x15   : > { %v1783_v13 = vld [vmem:[%s1870_s8 + $0x70] sm:$0xff]   ;;  %v1774_v14 = vld [vmem:[%s1870_s8 + $0x20] sm:$0xff]   ;;  %v1785_v15 = vld [vmem:[%s1870_s8 + $0x78] sm:$0xff]  }
  0x16   : > { %v1775_v16 = vld [vmem:[%s1870_s8 + $0x28] sm:$0xff]   ;;  %v1786_v17 = vld [vmem:[%s1870_s8 + $0x80] sm:$0xff]   ;;  %v1776_v18 = vld [vmem:[%s1870_s8 + $0x30] sm:$0xff]  }
  0x17   : > { %1543 = vmatpush3.bf16.msra.mxu0 %v1767_v3  ;;  %1749 = vmatpush3.bf16.msra.mxu1 %v1767_v3  ;;  %v1787_v19 = vld [vmem:[%s1870_s8 + $0x88] sm:$0xff]   ;;  %v1777_v20 = vld [vmem:[%s1870_s8 + $0x38] sm:$0xff]   ;;  %v1788_v21 = vld [vmem:[%s1870_s8 + $0x90] ss:$0 sps:$4 sm:$0x11]  }
  0x18   : > { %1544 = vmatprep.subr.bf16.mxu0 %v1799_v1  ;;  %1745 = vmatprep.subr.bf16.mxu1 %v1799_v1  ;;  %v1778_v22 = vld [vmem:[%s1870_s8 + $0x40] sm:$0xff]   ;;  %v1780_v23 = vld [vmem:[%s1870_s8 + $0x48] sm:$0xff]   ;;  %v1782_v24 = vld [vmem:[%s1870_s8 + $0x50] sm:$0xff]  }
  0x19   : > { %v1784_v25 = vld [vmem:[%s1870_s8 + $0x58] sm:$0xff]   ;;  %v742_v46 = vld [vmem:[%s2848_s2 + $0x68] sm:$0xff]  ;;  %v743_v48 = vld [vmem:[%s2848_s2 + $0x70] sm:$0xff]  ;;  %s2412_s8 = scalar_lea.vmem %s2851_s5, %s1753_s27 }
  0x1a   : > { %v2023_v47 = vpack.c.bf16 %v742_v46, %v741_v45  ;;  %v744_v49 = vld [vmem:[%s2848_s2 + $0x78] sm:$0xff] }
  0x1b   : > { %1545 = vmatpush3.bf16.msra.mxu0 %v1768_v4  ;;  %1750 = vmatpush3.bf16.msra.mxu1 %v1768_v4  ;;  %v2033_v50 = vpack.c.bf16 %v744_v49, %v743_v48 }
  0x1c   : > { %1546 = vmatprep.subr.bf16.mxu0 %v1799_v1  ;;  %1746 = vmatprep.subr.bf16.mxu1 %v1799_v1 }
  0x1f   : > { %1547 = vmatpush3.bf16.msra.mxu0 %v499_v6  ;;  %1751 = vmatpush3.bf16.msra.mxu1 %v499_v6 }
  0x20   : > { %1694 = vmatprep.subr.bf16.mxu1 %v1801_v28 }
  0x22   : > { %1549 = vmatmul.mubr.msk.bf16.vlgmr.msra.gmra.mrb[0].mxu0 %vm439_vm2, %v1770_v7  ;;  %1597 = vmatmul.mubr.msk.bf16.vlgmr.msra.gmra.mrb[0].mxu1 %vm439_vm2, %v1779_v9 }
  0x23   : > { %1552 = vmatprep.mubr.msk.bf16.mxu0 %vm1800_vm0, %v1799_v1  ;;  %1600 = vmatprep.mubr.msk.bf16.mxu1 %vm1800_vm0, %v1799_v1 }
  0x24   : > { %1696 = vmatpush3.bf16.msra.mxu1 %v1963_v29 }
  0x25   : > { %1697 = vmatprep.subr.bf16.mxu1 %v1801_v28 }
  0x28   : > { %1699 = vmatpush3.bf16.msra.mxu1 %v1973_v32 }
  0x29   : > { %1700 = vmatprep.subr.bf16.mxu1 %v1801_v28 }
  0x2a   : > { %1553 = vmatmul.mubr.msk.bf16.gmra.mrb[4].mxu0 %vm439_vm2, %v1771_v8  ;;  %1601 = vmatmul.mubr.msk.bf16.gmra.mrb[4].mxu1 %vm439_vm2, %v1781_v11 }
  0x2b   : > { %1556 = vmatprep.mubr.msk.bf16.mxu0 %vm1800_vm0, %v1799_v1  ;;  %1604 = vmatprep.mubr.msk.bf16.mxu1 %vm1800_vm0, %v1799_v1 }
  0x2c   : > { %1702 = vmatpush3.bf16.msra.mxu1 %v1983_v35 }
  0x2d   : > { %1703 = vmatprep.subr.bf16.mxu1 %v1801_v28 }
  0x30   : > { %1705 = vmatpush3.bf16.msra.mxu1 %v1993_v38 }
  0x31   : > { %1706 = vmatprep.subr.bf16.mxu1 %v1801_v28 }
  0x32   : > { %1557 = vmatmul.mubr.msk.bf16.gmra.mrb[8].mxu0 %vm439_vm2, %v1772_v10  ;;  %1605 = vmatmul.mubr.msk.bf16.gmra.mrb[8].mxu1 %vm439_vm2, %v1783_v13 }
  0x33   : > { %1560 = vmatprep.mubr.msk.bf16.mxu0 %vm1800_vm0, %v1799_v1  ;;  %1608 = vmatprep.mubr.msk.bf16.mxu1 %vm1800_vm0, %v1799_v1 }
  0x34   : > { %1708 = vmatpush3.bf16.msra.mxu1 %v2002_v41 }
  0x35   : > { %1709 = vmatprep.subr.bf16.mxu1 %v1801_v28 }
  0x38   : > { %1711 = vmatpush3.bf16.msra.mxu1 %v2012_v44 }
  0x39   : > { %1712 = vmatprep.subr.bf16.mxu1 %v1801_v28 }
  0x3a   : > { %1561 = vmatmul.mubr.msk.bf16.gmra.mrb[12].mxu0 %vm439_vm2, %v1773_v12  ;;  %1609 = vmatmul.mubr.msk.bf16.gmra.mrb[12].mxu1 %vm439_vm2, %v1785_v15 }
  0x3b   : > { %1564 = vmatprep.mubr.msk.bf16.mxu0 %vm1800_vm0, %v1799_v1  ;;  %1612 = vmatprep.mubr.msk.bf16.mxu1 %vm1800_vm0, %v1799_v1 }
  0x3c   : > { %1714 = vmatpush3.bf16.msra.mxu1 %v2023_v47 }
  0x3d   : > { %1715 = vmatprep.subr.bf16.mxu1 %v1801_v28 }
  0x40   : > { %1717 = vmatpush3.bf16.msra.mxu1 %v2033_v50 }
  0x41   : > { %1718 = vmatprep.subr.bf16.mxu1 %v1801_v28 }
  0x42   : > { %1565 = vmatmul.mubr.msk.bf16.gmra.mrb[16].mxu0 %vm439_vm2, %v1774_v14  ;;  %1613 = vmatmul.mubr.msk.bf16.gmra.mrb[16].mxu1 %vm439_vm2, %v1786_v17 }
  0x43   : > { %1568 = vmatprep.mubr.msk.bf16.mxu0 %vm1800_vm0, %v1799_v1  ;;  %1616 = vmatprep.mubr.msk.bf16.mxu1 %vm1800_vm0, %v1799_v1 }
  0x4a   : > { %1569 = vmatmul.mubr.msk.bf16.gmra.mrb[20].mxu0 %vm439_vm2, %v1775_v16  ;;  %1617 = vmatmul.mubr.msk.bf16.gmra.mrb[20].mxu1 %vm439_vm2, %v1787_v19 }
  0x4b   : > { %1572 = vmatprep.mubr.msk.bf16.mxu0 %vm1800_vm0, %v1799_v1  ;;  %1620 = vmatprep.mubr.msk.bf16.mxu1 %vm1800_vm0, %v1799_v1 }
  0x52   : > { %1573 = vmatmul.mubr.msk.bf16.gmra.mrb[24].mxu0 %vm439_vm2, %v1776_v18  ;;  %1621 = vmatmul.mubr.msk.bf16.gmra.mrb[24].mxu1 %vm439_vm2, %v1788_v21 }
  0x53   : > { %1576 = vmatprep.mubr.msk.bf16.mxu0 %vm1800_vm0, %v1799_v1  ;;  %1656 = vmatprep.mubr.msk.f32.mxu1 %vm1800_vm0, %v1799_v1 }
  0x5a   : > { %1577 = vmatmul.mubr.msk.bf16.gmra.mrb[28].mxu0 %vm439_vm2, %v1777_v20 }
  0x5b   : > { %1580 = vmatprep.mubr.msk.bf16.mxu0 %vm1800_vm0, %v1799_v1 }
  0x62   : > { %1581 = vmatmul.mubr.msk.bf16.gmra.mrb[32].mxu0 %vm439_vm2, %v1778_v22 }
  0x63   : > { %1584 = vmatprep.mubr.msk.bf16.mxu0 %vm1800_vm0, %v1799_v1 }
  0x6a   : > { %1585 = vmatmul.mubr.msk.bf16.gmra.mrb[36].mxu0 %vm439_vm2, %v1780_v23 }
  0x6b   : > { %1588 = vmatprep.mubr.msk.bf16.mxu0 %vm1800_vm0, %v1799_v1 }
  0x72   : > { %1589 = vmatmul.mubr.msk.bf16.gmra.mrb[40].mxu0 %vm439_vm2, %v1782_v24 }
  0x73   : > { %1592 = vmatprep.mubr.msk.bf16.mxu0 %vm1800_vm0, %v1799_v1 }
  0x7a   : > { %1593 = vmatmul.mubr.msk.bf16.gmra.mrb[44].mxu0 %vm439_vm2, %v1784_v25 }
  0xf5   : > { %v2035_v51 = vpop.f32.mrb[0].mxu0  ;;  %v2049_v62 = vpop.f32.mrb[0].mxu1 }
  0xf6   : > { %v1550_v52 = vpop.f32.mrb[1].mxu0  ;;  %v1598_v63 = vpop.f32.mrb[1].mxu1 }
  0xf7   : > { %v2039_v53 = vpop.f32.mrb[2].mxu0  ;;  %v2051_v0 = vpop.f32.mrb[2].mxu1 }
  0xf8   : > { %v685_v54 = vadd.f32 %v2039_v53, %v2035_v51  ;;  %v1551_v55 = vpop.f32.mrb[3].mxu0  ;;  %v1599_v3 = vpop.f32.mrb[3].mxu1 }
  0xfd   : > { %v2043_v56 = vpop.f32.mrb[4].mxu0  ;;  %v2059_v9 = vpop.f32.mrb[4].mxu1 }
  0xfe   : > { %v686_v57 = vadd.f32 %v685_v54, %v2043_v56  ;;  %v1554_v58 = vpop.f32.mrb[5].mxu0  ;;  %v1602_v10 = vpop.f32.mrb[5].mxu1 }
  0xff   : > { %v2046_v59 = vpop.f32.mrb[6].mxu0  ;;  %v2061_v11 = vpop.f32.mrb[6].mxu1 }
 0x100   : > { %v687_v60 = vadd.f32 %v686_v57, %v2046_v59  ;;  %v1555_v61 = vpop.f32.mrb[7].mxu0  ;;  %v1603_v13 = vpop.f32.mrb[7].mxu1 }
 0x105   : > { %v2053_v2 = vpop.f32.mrb[8].mxu0  ;;  %v2069_v19 = vpop.f32.mrb[8].mxu1 }
 0x106   : > { %v688_v4 = vadd.f32 %v687_v60, %v2053_v2  ;;  %v1558_v5 = vpop.f32.mrb[9].mxu0  ;;  %v1606_v20 = vpop.f32.mrb[9].mxu1 }
 0x107   : > { %v2056_v6 = vpop.f32.mrb[10].mxu0  ;;  %v2071_v21 = vpop.f32.mrb[10].mxu1 }
 0x108   : > { %v689_v7 = vadd.f32 %v688_v4, %v2056_v6  ;;  %v1559_v8 = vpop.f32.mrb[11].mxu0  ;;  %v1607_v23 = vpop.f32.mrb[11].mxu1 }
 0x10d   : > { %v2063_v12 = vpop.f32.mrb[12].mxu0  ;;  %v2079_v31 = vpop.f32.mrb[12].mxu1 }
 0x10e   : > { %v690_v14 = vadd.f32 %v689_v7, %v2063_v12  ;;  %v1562_v15 = vpop.f32.mrb[13].mxu0  ;;  %v1610_v33 = vpop.f32.mrb[13].mxu1 }
 0x10f   : > { %v2066_v16 = vpop.f32.mrb[14].mxu0  ;;  %v2081_v34 = vpop.f32.mrb[14].mxu1 }
 0x110   : > { %v691_v17 = vadd.f32 %v690_v14, %v2066_v16  ;;  %v1563_v18 = vpop.f32.mrb[15].mxu0  ;;  %v1611_v37 = vpop.f32.mrb[15].mxu1 }
 0x115   : > { %v2073_v22 = vpop.f32.mrb[16].mxu0  ;;  %v2089_v46 = vpop.f32.mrb[16].mxu1 }
 0x116   : > { %v692_v24 = vadd.f32 %v691_v17, %v2073_v22  ;;  %v1566_v25 = vpop.f32.mrb[17].mxu0  ;;  %v1614_v48 = vpop.f32.mrb[17].mxu1 }
 0x117   : > { %v2076_v26 = vpop.f32.mrb[18].mxu0  ;;  %v2091_v49 = vpop.f32.mrb[18].mxu1 }
 0x118   : > { %v693_v27 = vadd.f32 %v692_v24, %v2076_v26  ;;  %v1567_v30 = vpop.f32.mrb[19].mxu0  ;;  %v1615_v54 = vpop.f32.mrb[19].mxu1 }
 0x11d   : > { %v2083_v36 = vpop.f32.mrb[20].mxu0  ;;  %v2099_v63 = vpop.f32.mrb[20].mxu1 }
 0x11e   : > { %v694_v39 = vadd.f32 %v693_v27, %v2083_v36  ;;  %v1570_v40 = vpop.f32.mrb[21].mxu0  ;;  %v1618_v3 = vpop.f32.mrb[21].mxu1 }
 0x11f   : > { %v2086_v42 = vpop.f32.mrb[22].mxu0  ;;  %v2101_v4 = vpop.f32.mrb[22].mxu1 }
 0x120   : > { %v695_v43 = vadd.f32 %v694_v39, %v2086_v42  ;;  %v1571_v45 = vpop.f32.mrb[23].mxu0  ;;  %v1619_v7 = vpop.f32.mrb[23].mxu1 }
 0x125   : > { %v2093_v52 = vpop.f32.mrb[24].mxu0  ;;  %v2109_v17 = vpop.f32.mrb[24].mxu1 }
 0x126   : > { %v696_v55 = vadd.f32 %v695_v43, %v2093_v52  ;;  %v1574_v57 = vpop.f32.mrb[25].mxu0  ;;  %v1622_v18 = vpop.f32.mrb[25].mxu1 }
 0x127   : > { %v2096_v58 = vpop.f32.mrb[26].mxu0  ;;  %v682_v20 = vpop.f32.mrb[26].mxu1 }
 0x128   : > { %v697_v60 = vadd.f32 %v696_v55, %v2096_v58  ;;  %v1575_v61 = vpop.f32.mrb[27].mxu0  ;;  %v1623_v24 = vpop.f32.mrb[27].mxu1 }
 0x12d   : > { %v2103_v5 = vpop.f32.mrb[28].mxu0 }
 0x12e   : > { %v698_v8 = vadd.f32 %v697_v60, %v2103_v5  ;;  %v1578_v10 = vpop.f32.mrb[29].mxu0 }
 0x12f   : > { %v2106_v13 = vpop.f32.mrb[30].mxu0 }
 0x130   : > { %v699_v14 = vadd.f32 %v698_v8, %v2106_v13  ;;  %v1579_v15 = vpop.f32.mrb[31].mxu0 }
 0x135   : > { %v2111_v23 = vpop.f32.mrb[32].mxu0 }
 0x136   : > { %v700_v25 = vadd.f32 %v699_v14, %v2111_v23  ;;  %v1582_v27 = vpop.f32.mrb[33].mxu0 }
 0x137   : > { %v2114_v30 = vpop.f32.mrb[34].mxu0 }
 0x138   : > { %v701_v33 = vadd.f32 %v700_v25, %v2114_v30  ;;  %v1583_v37 = vpop.f32.mrb[35].mxu0 }
 0x13d   : > { %v2117_v39 = vpop.f32.mrb[36].mxu0 }
 0x13e   : > { %v702_v40 = vadd.f32 %v701_v33, %v2117_v39  ;;  %v1586_v43 = vpop.f32.mrb[37].mxu0 }
 0x13f   : > { %v2120_v45 = vpop.f32.mrb[38].mxu0 }
 0x140   : > { %v703_v48 = vadd.f32 %v702_v40, %v2120_v45  ;;  %v1587_v54 = vpop.f32.mrb[39].mxu0 }
 0x145   : > { %v2123_v55 = vpop.f32.mrb[40].mxu0 }
 0x146   : > { %v704_v57 = vadd.f32 %v703_v48, %v2123_v55  ;;  %v1590_v60 = vpop.f32.mrb[41].mxu0 }
 0x147   : > { %v2126_v61 = vpop.f32.mrb[42].mxu0 }
 0x148   : > { %v705_v3 = vadd.f32 %v704_v57, %v2126_v61  ;;  %v1591_v7 = vpop.f32.mrb[43].mxu0 }
 0x14d   : > { %v2129_v8 = vpop.f32.mrb[44].mxu0 }
 0x14e   : > { %v706_v10 = vadd.f32 %v705_v3, %v2129_v8  ;;  %v1594_v14 = vpop.f32.mrb[45].mxu0  ;;  %v721_v3 = vsel %vm720_vm3, %v2109_v17, 0.0 }
 0x14f   : > { %v2132_v15 = vpop.f32.mrb[46].mxu0 }
 0x150   : > { %v707_v18 = vadd.f32 %v706_v10, %v2132_v15  ;;  %v1595_v20 = vpop.f32.mrb[47].mxu0 }
 0x152   : > { %v708_v24 = vadd.f32 %v707_v18, %v2049_v62 }
 0x154   : > { %v709_v25 = vadd.f32 %v708_v24, %v2051_v0 }
 0x156   : > { %v710_v27 = vadd.f32 %v709_v25, %v2059_v9 }
 0x158   : > { %v711_v33 = vadd.f32 %v710_v27, %v2061_v11 }
 0x15a   : > { %v712_v37 = vadd.f32 %v711_v33, %v2069_v19 }
 0x15c   : > { %v713_v40 = vadd.f32 %v712_v37, %v2071_v21 }
 0x15e   : > { %v714_v43 = vadd.f32 %v713_v40, %v2079_v31 }
 0x160   : > { %v715_v48 = vadd.f32 %v714_v43, %v2081_v34 }
 0x162   : > { %v716_v54 = vadd.f32 %v715_v48, %v2089_v46 }
 0x164   : > { %v717_v57 = vadd.f32 %v716_v54, %v2091_v49 }
 0x166   : > { %v718_v60 = vadd.f32 %v717_v57, %v2099_v63 }
 0x168   : > { %v719_v7 = vadd.f32 %v718_v60, %v2101_v4 }
 0x16a   : > { %v722_v10 = vadd.f32 %v721_v3, %v719_v7 }
 0x16c   : > { %v723_v14 = vrot.slane %v722_v10, 4 }
 0x16e   : > { %v724_v18 = vadd.f32 %v723_v14, %v722_v10 }
 0x170   : > { %v725_v20 = vrot.slane %v724_v18, 2 }
 0x172   : > { %v726_v24 = vadd.f32 %v725_v20, %v724_v18 }
 0x174   : > { %v727_v25 = vrot.slane %v726_v24, 1 }
 0x176   : > { %v728_v27 = vadd.f32 %v727_v25, %v726_v24 }
 0x178   : > { %1657 = vmatmul.mubr.f32.vlgmr.msra.gmra.mrb[28].mxu1 %v728_v27 }
 0x179   : > { %1720 = vmatpush3.bf16.msra.mxu1 %v1963_v29  ;;  %1691 = vmatprep.mubr.msk.f32.mxu1 %vm1800_vm0, %v1799_v1  ;;  %v815_v1 = vlaneseq }
 0x17a   : > { %1721 = vmatprep.subr.bf16.mxu1 %v1801_v28 }
 0x17b   : > { %v2166_v29 = vshrl.u32 %v815_v1, 7 }
 0x17d   : > { %1723 = vmatpush3.bf16.msra.mxu1 %v1973_v32  ;;  %v817_v32 = vsub.s32 0, %v2166_v29 }
 0x17e   : > { %1724 = vmatprep.subr.bf16.mxu1 %v1801_v28 }
 0x181   : > { %1726 = vmatpush3.bf16.msra.mxu1 %v1983_v35 }
 0x182   : > { %1727 = vmatprep.subr.bf16.mxu1 %v1801_v28 }
 0x185   : > { %1729 = vmatpush3.bf16.msra.mxu1 %v1993_v38 }
 0x186   : > { %1730 = vmatprep.subr.bf16.mxu1 %v1801_v28 }
 0x189   : > { %1732 = vmatpush3.bf16.msra.mxu1 %v2002_v41 }
 0x18a   : > { %1733 = vmatprep.subr.bf16.mxu1 %v1801_v28 }
 0x18d   : > { %1735 = vmatpush3.bf16.msra.mxu1 %v2012_v44 }
 0x18e   : > { %1736 = vmatprep.subr.bf16.mxu1 %v1801_v28 }
 0x191   : > { %1738 = vmatpush3.bf16.msra.mxu1 %v2023_v47 }
 0x192   : > { %1739 = vmatprep.subr.bf16.mxu1 %v1801_v28 }
 0x195   : > { %1741 = vmatpush3.bf16.msra.mxu1 %v2033_v50 }
 0x24b   : > { %v811_v35 = vpop.f32.mrb[28].mxu1 }
 0x24c   : > { %v818_v38 = vrot.slane %v811_v35, %v817_v32  ;;  %v1658_v41 = vpop.f32.mrb[29].mxu1 }
 0x24e   : > { %v2172_v44 = vsub.f32 %v2035_v51, %v818_v38  ;;  %v2175_v33 = vsub.f32 %v2039_v53, %v818_v38  ;;  %v2178_v28 = vsub.f32 %v2043_v56, %v818_v38  ;;  %v2181_v47 = vsub.f32 %v2046_v59, %v818_v38 }
 0x24f   : > { %v2184_v50 = vsub.f32 %v2053_v2, %v818_v38  ;;  %v2187_v37 = vsub.f32 %v2056_v6, %v818_v38  ;;  %v2190_v40 = vsub.f32 %v2063_v12, %v818_v38  ;;  %v2193_v51 = vsub.f32 %v2066_v16, %v818_v38 }
 0x250   : > { %v2196_v53 = vsub.f32 %v2073_v22, %v818_v38  ;;  %v2199_v56 = vsub.f32 %v2076_v26, %v818_v38  ;;  %v2202_v59 = vsub.f32 %v2083_v36, %v818_v38  ;;  %v2205_v2 = vsub.f32 %v2086_v42, %v818_v38 }
 0x251   : > { %v2208_v6 = vsub.f32 %v2093_v52, %v818_v38  ;;  %v2211_v12 = vsub.f32 %v2096_v58, %v818_v38  ;;  %v2214_v16 = vsub.f32 %v2103_v5, %v818_v38  ;;  %v2217_v22 = vsub.f32 %v2106_v13, %v818_v38 }
 0x252   : > { %v2220_v26 = vsub.f32 %v2111_v23, %v818_v38  ;;  %v2223_v36 = vsub.f32 %v2114_v30, %v818_v38  ;;  %v2226_v42 = vsub.f32 %v2117_v39, %v818_v38  ;;  %v2229_v52 = vsub.f32 %v2120_v45, %v818_v38 }
 0x253   : > { %v2232_v58 = vsub.f32 %v2123_v55, %v818_v38  ;;  %v2235_v5 = vsub.f32 %v2126_v61, %v818_v38  ;;  %v2238_v13 = vsub.f32 %v2129_v8, %v818_v38  ;;  %v2241_v23 = vsub.f32 %v2132_v15, %v818_v38 }
 0x254   : > { %v2244_v30 = vsub.f32 %v2049_v62, %v818_v38  ;;  %v2247_v39 = vsub.f32 %v2051_v0, %v818_v38  ;;  %v2250_v45 = vsub.f32 %v2059_v9, %v818_v38  ;;  %v2253_v55 = vsub.f32 %v2061_v11, %v818_v38 }
 0x255   : > { %v2256_v61 = vsub.f32 %v2069_v19, %v818_v38  ;;  %v2259_v8 = vsub.f32 %v2071_v21, %v818_v38  ;;  %v2262_v15 = vsub.f32 %v2079_v31, %v818_v38  ;;  %v2265_v62 = vsub.f32 %v2081_v34, %v818_v38 }
 0x256   : > { %v2268_v0 = vsub.f32 %v2089_v46, %v818_v38  ;;  %v2271_v9 = vsub.f32 %v2091_v49, %v818_v38  ;;  %v2274_v11 = vsub.f32 %v2099_v63, %v818_v38  ;;  %v2277_v19 = vsub.f32 %v2101_v4, %v818_v38 }
 0x257   : > { %v2280_v21 = vsub.f32 %v2109_v17, %v818_v38  ;;  %v856_v31 = vmul.f32 %v2172_v44, %v2172_v44  ;;  %v857_v34 = vmul.f32 %v2175_v33, %v2175_v33  ;;  %v858_v46 = vmul.f32 %v2178_v28, %v2178_v28 }
 0x258   : > { %v859_v63 = vmul.f32 %v2181_v47, %v2181_v47  ;;  %v860_v4 = vmul.f32 %v2184_v50, %v2184_v50  ;;  %v861_v17 = vmul.f32 %v2187_v37, %v2187_v37  ;;  %v862_v57 = vmul.f32 %v2190_v40, %v2190_v40 }
 0x259   : > { %v893_v49 = vadd.f32 %v857_v34, %v856_v31  ;;  %v863_v3 = vmul.f32 %v2193_v51, %v2193_v51  ;;  %v864_v10 = vmul.f32 %v2196_v53, %v2196_v53  ;;  %v865_v18 = vmul.f32 %v2199_v56, %v2199_v56 }
 0x25a   : > { %v866_v24 = vmul.f32 %v2202_v59, %v2202_v59  ;;  %v867_v27 = vmul.f32 %v2205_v2, %v2205_v2  ;;  %v868_v35 = vmul.f32 %v2208_v6, %v2208_v6  ;;  %v869_v41 = vmul.f32 %v2211_v12, %v2211_v12 }
 0x25b   : > { %v894_v43 = vadd.f32 %v893_v49, %v858_v46  ;;  %v870_v34 = vmul.f32 %v2214_v16, %v2214_v16  ;;  %v871_v49 = vmul.f32 %v2217_v22, %v2217_v22 }
 0x25d   : > { %v895_v48 = vadd.f32 %v894_v43, %v859_v63  ;;  %v872_v43 = vmul.f32 %v2220_v26, %v2220_v26 }
 0x25f   : > { %v896_v54 = vadd.f32 %v895_v48, %v860_v4  ;;  %v873_v48 = vmul.f32 %v2223_v36, %v2223_v36 }
 0x261   : > { %v897_v60 = vadd.f32 %v896_v54, %v861_v17  ;;  %v874_v54 = vmul.f32 %v2226_v42, %v2226_v42 }
 0x263   : > { %v898_v7 = vadd.f32 %v897_v60, %v862_v57  ;;  %v875_v60 = vmul.f32 %v2229_v52, %v2229_v52 }
 0x265   : > { %v899_v14 = vadd.f32 %v898_v7, %v863_v3  ;;  %v876_v7 = vmul.f32 %v2232_v58, %v2232_v58 }
 0x267   : > { %v900_v20 = vadd.f32 %v899_v14, %v864_v10  ;;  %v877_v14 = vmul.f32 %v2235_v5, %v2235_v5 }
 0x269   : > { %v901_v25 = vadd.f32 %v900_v20, %v865_v18  ;;  %v878_v20 = vmul.f32 %v2238_v13, %v2238_v13 }
 0x26b   : > { %v902_v1 = vadd.f32 %v901_v25, %v866_v24  ;;  %v879_v25 = vmul.f32 %v2241_v23, %v2241_v23 }
 0x26d   : > { %v903_v38 = vadd.f32 %v902_v1, %v867_v27  ;;  %v880_v1 = vmul.f32 %v2244_v30, %v2244_v30 }
 0x26f   : > { %v904_v31 = vadd.f32 %v903_v38, %v868_v35  ;;  %v881_v38 = vmul.f32 %v2247_v39, %v2247_v39 }
 0x271   : > { %v905_v46 = vadd.f32 %v904_v31, %v869_v41  ;;  %v882_v31 = vmul.f32 %v2250_v45, %v2250_v45 }
 0x273   : > { %v906_v63 = vadd.f32 %v905_v46, %v870_v34  ;;  %v883_v46 = vmul.f32 %v2253_v55, %v2253_v55 }
 0x275   : > { %v907_v4 = vadd.f32 %v906_v63, %v871_v49  ;;  %v884_v63 = vmul.f32 %v2256_v61, %v2256_v61 }
 0x277   : > { %v908_v17 = vadd.f32 %v907_v4, %v872_v43  ;;  %v885_v4 = vmul.f32 %v2259_v8, %v2259_v8 }
 0x279   : > { %v909_v57 = vadd.f32 %v908_v17, %v873_v48  ;;  %v886_v17 = vmul.f32 %v2262_v15, %v2262_v15 }
 0x27b   : > { %v910_v3 = vadd.f32 %v909_v57, %v874_v54  ;;  %v887_v57 = vmul.f32 %v2265_v62, %v2265_v62 }
 0x27d   : > { %v911_v10 = vadd.f32 %v910_v3, %v875_v60  ;;  %v888_v3 = vmul.f32 %v2268_v0, %v2268_v0 }
 0x27f   : > { %v912_v18 = vadd.f32 %v911_v10, %v876_v7  ;;  %v889_v10 = vmul.f32 %v2271_v9, %v2271_v9 }
 0x281   : > { %v913_v24 = vadd.f32 %v912_v18, %v877_v14  ;;  %v890_v18 = vmul.f32 %v2274_v11, %v2274_v11 }
 0x283   : > { %v914_v27 = vadd.f32 %v913_v24, %v878_v20  ;;  %v892_v24 = vmul.f32 %v2280_v21, %v2280_v21 }
 0x285   : > { %v915_v35 = vadd.f32 %v914_v27, %v879_v25  ;;  %v891_v25 = vmul.f32 %v2277_v19, %v2277_v19 }
 0x287   : > { %v916_v41 = vadd.f32 %v915_v35, %v880_v1  ;;  %v928_v35 = vsel %vm720_vm3, %v892_v24, 0.0 }
 0x289   : > { %v917_v34 = vadd.f32 %v916_v41, %v881_v38 }
 0x28b   : > { %v918_v49 = vadd.f32 %v917_v34, %v882_v31 }
 0x28d   : > { %v919_v43 = vadd.f32 %v918_v49, %v883_v46 }
 0x28f   : > { %v920_v48 = vadd.f32 %v919_v43, %v884_v63 }
 0x291   : > { %v921_v54 = vadd.f32 %v920_v48, %v885_v4 }
 0x293   : > { %v922_v60 = vadd.f32 %v921_v54, %v886_v17 }
 0x295   : > { %v923_v7 = vadd.f32 %v922_v60, %v887_v57 }
 0x297   : > { %v924_v14 = vadd.f32 %v923_v7, %v888_v3 }
 0x299   : > { %v925_v20 = vadd.f32 %v924_v14, %v889_v10 }
 0x29b   : > { %v926_v27 = vadd.f32 %v925_v20, %v890_v18 }
 0x29d   : > { %v927_v1 = vadd.f32 %v926_v27, %v891_v25 }
 0x29f   : > { %v929_v38 = vadd.f32 %v928_v35, %v927_v1 }
 0x2a1   : > { %v930_v41 = vrot.slane %v929_v38, 4 }
 0x2a3   : > { %v931_v31 = vadd.f32 %v930_v41, %v929_v38 }
 0x2a5   : > { %v932_v34 = vrot.slane %v931_v31, 2 }
 0x2a7   : > { %v933_v46 = vadd.f32 %v932_v34, %v931_v31 }
 0x2a9   : > { %v934_v49 = vrot.slane %v933_v46, 1 }
 0x2ab   : > { %v935_v63 = vadd.f32 %v934_v49, %v933_v46 }
 0x2ad   : > { %1692 = vmatmul.mubr.f32.vlgmr.msra.gmra.mrb[30].mxu1 %v935_v63 }
 0x380   : > { %v1002_v43 = vpop.f32.mrb[30].mxu1 }
 0x381   : > { %v1003_v4 = vadd.f32 1e-05, %v1002_v43  ;;  %v1693_v48 = vpop.f32.mrb[31].mxu1 }
 0x383   : > { %1789 = vrsqrt.f32 %v1003_v4 }
 0x38d   : > { %v1790_v17 = vpop.eup %1789 }
 0x38e   : > { %v1010_v54 = vrot.slane %v1790_v17, %v817_v32 }
 0x390   : > { %v1011_v57 = vmul.f32 %v1010_v54, %v2172_v44  ;;  %v1012_v60 = vmul.f32 %v1010_v54, %v2175_v33  ;;  %v1013_v3 = vmul.f32 %v1010_v54, %v2178_v28  ;;  %v1014_v7 = vmul.f32 %v1010_v54, %v2181_v47 }
 0x391   : > { %v1015_v10 = vmul.f32 %v1010_v54, %v2184_v50  ;;  %v1016_v14 = vmul.f32 %v1010_v54, %v2187_v37  ;;  %v1017_v18 = vmul.f32 %v1010_v54, %v2190_v40  ;;  %v1018_v20 = vmul.f32 %v1010_v54, %v2193_v51 }
 0x392   : > { %v1019_v24 = vmul.f32 %v1010_v54, %v2196_v53  ;;  %v1020_v29 = vmul.f32 %v1010_v54, %v2199_v56  ;;  %v1021_v32 = vmul.f32 %v1010_v54, %v2202_v59  ;;  %v1022_v44 = vmul.f32 %v1010_v54, %v2205_v2 }
 0x393   : > { %v1023_v33 = vmul.f32 %v1010_v54, %v2208_v6  ;;  %v1024_v28 = vmul.f32 %v1010_v54, %v2211_v12  ;;  %v1025_v47 = vmul.f32 %v1010_v54, %v2214_v16  ;;  %v1026_v50 = vmul.f32 %v1010_v54, %v2217_v22 }
 0x394   : > { %v1027_v37 = vmul.f32 %v1010_v54, %v2220_v26  ;;  %v1028_v40 = vmul.f32 %v1010_v54, %v2223_v36  ;;  %v1029_v51 = vmul.f32 %v1010_v54, %v2226_v42  ;;  %v1030_v53 = vmul.f32 %v1010_v54, %v2229_v52  ;;  %v1476_v36 = vld [vmem:[%s2849_s3] ss:$0 sm:$0xff] }
 0x395   : > { %v1031_v56 = vmul.f32 %v1010_v54, %v2232_v58  ;;  %v1032_v59 = vmul.f32 %v1010_v54, %v2235_v5  ;;  %v1033_v2 = vmul.f32 %v1010_v54, %v2238_v13  ;;  %v1034_v6 = vmul.f32 %v1010_v54, %v2241_v23 }
 0x396   : > { %v1035_v12 = vmul.f32 %v1010_v54, %v2244_v30  ;;  %v1036_v16 = vmul.f32 %v1010_v54, %v2247_v39  ;;  %v1037_v22 = vmul.f32 %v1010_v54, %v2250_v45  ;;  %v1038_v26 = vmul.f32 %v1010_v54, %v2253_v55 }
 0x397   : > { %v1039_v42 = vmul.f32 %v1010_v54, %v2256_v61  ;;  %v1040_v52 = vmul.f32 %v1010_v54, %v2259_v8  ;;  %v1041_v58 = vmul.f32 %v1010_v54, %v2262_v15  ;;  %v1042_v5 = vmul.f32 %v1010_v54, %v2265_v62 }
 0x398   : > { %v1043_v13 = vmul.f32 %v1010_v54, %v2268_v0  ;;  %v1044_v23 = vmul.f32 %v1010_v54, %v2271_v9  ;;  %v1045_v30 = vmul.f32 %v1010_v54, %v2274_v11  ;;  %v1046_v39 = vmul.f32 %v1010_v54, %v2277_v19 }
 0x399   : > { %v1047_v45 = vmul.f32 %v1010_v54, %v2280_v21  ;;  %v1055_v55 = vmul.f32 %v1476_v36, %v1011_v57  ;;  %v1056_v25 = vmul.f32 %v1476_v36, %v1012_v60  ;;  %v1057_v27 = vmul.f32 %v1476_v36, %v1013_v3  ;;  %v2403_v60 = vld [vmem:[%s2850_s4] ss:$0 sm:$0xff] }
 0x39a   : > { %v1058_v61 = vmul.f32 %v1476_v36, %v1014_v7  ;;  %v1059_v1 = vmul.f32 %v1476_v36, %v1015_v10  ;;  %v1060_v8 = vmul.f32 %v1476_v36, %v1016_v14  ;;  %v1061_v35 = vmul.f32 %v1476_v36, %v1017_v18 }
 0x39b   : > { %v1062_v15 = vmul.f32 %v1476_v36, %v1018_v20  ;;  %v1063_v62 = vmul.f32 %v1476_v36, %v1019_v24  ;;  %v1064_v38 = vmul.f32 %v1476_v36, %v1020_v29  ;;  %v1065_v0 = vmul.f32 %v1476_v36, %v1021_v32 }
 0x39c   : > { %v1066_v41 = vmul.f32 %v1476_v36, %v1022_v44  ;;  %v1067_v9 = vmul.f32 %v1476_v36, %v1023_v33  ;;  %v1068_v31 = vmul.f32 %v1476_v36, %v1024_v28  ;;  %v1069_v11 = vmul.f32 %v1476_v36, %v1025_v47 }
 0x39d   : > { %v1070_v34 = vmul.f32 %v1476_v36, %v1026_v50  ;;  %v1071_v19 = vmul.f32 %v1476_v36, %v1027_v37  ;;  %v1072_v46 = vmul.f32 %v1476_v36, %v1028_v40  ;;  %v1073_v21 = vmul.f32 %v1476_v36, %v1029_v51 }
 0x39e   : > { %v1074_v49 = vmul.f32 %v1476_v36, %v1030_v53  ;;  %v1075_v63 = vmul.f32 %v1476_v36, %v1031_v56  ;;  %v1076_v43 = vmul.f32 %v1476_v36, %v1032_v59  ;;  %v1077_v4 = vmul.f32 %v1476_v36, %v1033_v2 }
 0x39f   : > { %v1078_v48 = vmul.f32 %v1476_v36, %v1034_v6  ;;  %v1079_v17 = vmul.f32 %v1476_v36, %v1035_v12  ;;  %v1080_v54 = vmul.f32 %v1476_v36, %v1036_v16  ;;  %v1081_v57 = vmul.f32 %v1476_v36, %v1037_v22  ;;  %v1136_v22 = vld [vmem:[%s2412_s8] sm:$0xff] }
 0x3a0   : > { %v1082_v3 = vmul.f32 %v1476_v36, %v1038_v26  ;;  %v1083_v7 = vmul.f32 %v1476_v36, %v1039_v42  ;;  %v1084_v10 = vmul.f32 %v1476_v36, %v1040_v52  ;;  %v1085_v14 = vmul.f32 %v1476_v36, %v1041_v58  ;;  %v1137_v58 = vld [vmem:[%s2412_s8 + $0x8] sm:$0xff] }
 0x3a1   : > { %v1086_v18 = vmul.f32 %v1476_v36, %v1042_v5  ;;  %v1087_v20 = vmul.f32 %v1476_v36, %v1043_v13  ;;  %v1088_v24 = vmul.f32 %v1476_v36, %v1044_v23  ;;  %v1089_v29 = vmul.f32 %v1476_v36, %v1045_v30  ;;  %v1138_v5 = vld [vmem:[%s2412_s8 + $0x10] sm:$0xff]  ;;  %v1139_v13 = vld [vmem:[%s2412_s8 + $0x18] sm:$0xff]  ;;  %v1140_v23 = vld [vmem:[%s2412_s8 + $0x20] sm:$0xff] }
 0x3a2   : > { %v1090_v32 = vmul.f32 %v1476_v36, %v1046_v39  ;;  %v1091_v44 = vmul.f32 %v1476_v36, %v1047_v45  ;;  %v1099_v33 = vadd.f32 %v2403_v60, %v1055_v55  ;;  %v1100_v28 = vadd.f32 %v2403_v60, %v1056_v25  ;;  %v1141_v25 = vld [vmem:[%s2412_s8 + $0x28] sm:$0xff] }
 0x3a3   : > { %v1101_v47 = vadd.f32 %v2403_v60, %v1057_v27  ;;  %v1102_v50 = vadd.f32 %v2403_v60, %v1058_v61  ;;  %v1103_v37 = vadd.f32 %v2403_v60, %v1059_v1  ;;  %v1104_v40 = vadd.f32 %v2403_v60, %v1060_v8  ;;  %v1142_v27 = vld [vmem:[%s2412_s8 + $0x30] sm:$0xff]  ;;  %v1143_v61 = vld [vmem:[%s2412_s8 + $0x38] sm:$0xff]  ;;  %v1144_v1 = vld [vmem:[%s2412_s8 + $0x40] sm:$0xff] }
 0x3a4   : > { %v1105_v51 = vadd.f32 %v2403_v60, %v1061_v35  ;;  %v1106_v53 = vadd.f32 %v2403_v60, %v1062_v15  ;;  %v1107_v56 = vadd.f32 %v2403_v60, %v1063_v62  ;;  %v2422_v59 = vadd.f32 %v2403_v60, %v1064_v38  ;;  %v1145_v38 = vld [vmem:[%s2412_s8 + $0x48] sm:$0xff] }
 0x3a5   : > { %v2425_v2 = vadd.f32 %v2403_v60, %v1065_v0  ;;  %v2428_v6 = vadd.f32 %v2403_v60, %v1066_v41  ;;  %v2431_v12 = vadd.f32 %v2403_v60, %v1067_v9  ;;  %v2434_v16 = vadd.f32 %v2403_v60, %v1068_v31  ;;  %v1146_v0 = vld [vmem:[%s2412_s8 + $0x50] sm:$0xff]  ;;  %v1147_v41 = vld [vmem:[%s2412_s8 + $0x58] sm:$0xff]  ;;  %v1148_v9 = vld [vmem:[%s2412_s8 + $0x60] sm:$0xff] }
 0x3a6   : > { %v2438_v26 = vadd.f32 %v2403_v60, %v1069_v11  ;;  %v2441_v36 = vadd.f32 %v2403_v60, %v1070_v34  ;;  %v2444_v42 = vadd.f32 %v2403_v60, %v1071_v19  ;;  %v2447_v52 = vadd.f32 %v2403_v60, %v1072_v46  ;;  %v1149_v46 = vld [vmem:[%s2412_s8 + $0x68] sm:$0xff] }
 0x3a7   : > { %v2454_v30 = vadd.f32 %v2403_v60, %v1073_v21  ;;  %v2457_v39 = vadd.f32 %v2403_v60, %v1074_v49  ;;  %v2460_v45 = vadd.f32 %v2403_v60, %v1075_v63  ;;  %v2463_v55 = vadd.f32 %v2403_v60, %v1076_v43  ;;  %v1150_v21 = vld [vmem:[%s2412_s8 + $0x70] sm:$0xff]  ;;  %v1151_v49 = vld [vmem:[%s2412_s8 + $0x78] sm:$0xff] }
 0x3a8   : > { %v2470_v8 = vadd.f32 %v2403_v60, %v1077_v4  ;;  %v2473_v35 = vadd.f32 %v2403_v60, %v1078_v48  ;;  %v2476_v15 = vadd.f32 %v2403_v60, %v1079_v17  ;;  %v2479_v62 = vadd.f32 %v2403_v60, %v1080_v54  ;;  %v1152_v17 = vld [vmem:[%s2412_s8 + $0x80] sm:$0xff]  ;;  %v1153_v54 = vld [vmem:[%s2412_s8 + $0x88] sm:$0xff] }
 0x3a9   : > { %v1125_v31 = vadd.f32 %v2403_v60, %v1081_v57  ;;  %v1126_v11 = vadd.f32 %v2403_v60, %v1082_v3  ;;  %v1127_v34 = vadd.f32 %v2403_v60, %v1083_v7  ;;  %v1128_v19 = vadd.f32 %v2403_v60, %v1084_v10  ;;  %v1154_v57 = vld [vmem:[%s2412_s8 + $0x90] sm:$0xff] }
 0x3aa   : > { %2854 = vst [vmem:[#allocation2_spill] sm:$0xff] %v2473_v35  ;;  %2855 = vst [vmem:[#allocation3_spill] sm:$0xff] %v2476_v15  ;;  %v1129_v63 = vadd.f32 %v2403_v60, %v1085_v14  ;;  %v1130_v43 = vadd.f32 %v2403_v60, %v1086_v18  ;;  %v1131_v4 = vadd.f32 %v2403_v60, %v1087_v20  ;;  %v1155_v18 = vld [vmem:[%s2412_s8 + $0x98] sm:$0xff]  ;;  %v1156_v20 = vld [vmem:[%s2412_s8 + $0xa0] sm:$0xff] }
 0x3ab   : > { %2856 = vst [vmem:[#allocation4_spill] sm:$0xff] %v2479_v62  ;;  %v1132_v48 = vadd.f32 %v2403_v60, %v1088_v24  ;;  %v1133_v3 = vadd.f32 %v2403_v60, %v1089_v29  ;;  %v1134_v7 = vadd.f32 %v2403_v60, %v1090_v32  ;;  %v1135_v10 = vadd.f32 %v2403_v60, %v1091_v44  ;;  %v1157_v62 = vld [vmem:[%s2412_s8 + $0xa8] sm:$0xff]  ;;  %v1158_v32 = vld [vmem:[%s2412_s8 + $0xb0] sm:$0xff]  ;;  %v1159_v60 = vld [vmem:[%s2412_s8 + $0xb8] sm:$0xff] }
 0x3ac   : > { %v2502_v14 = vadd.f32 %v1136_v22, %v1099_v33  ;;  %v2507_v24 = vadd.f32 %v1137_v58, %v1100_v28  ;;  %v2509_v15 = vadd.f32 %v1138_v5, %v1101_v47  ;;  %v2511_v35 = vadd.f32 %v1139_v13, %v1102_v50  ;;  %v1160_v44 = vld [vmem:[%s2412_s8 + $0xc0] sm:$0xff]  ;;  %v1161_v47 = vld [vmem:[%s2412_s8 + $0xc8] sm:$0xff]  ;;  %v1162_v50 = vld [vmem:[%s2412_s8 + $0xd0] sm:$0xff] }
 0x3ad   : > { %v2513_v29 = vadd.f32 %v1140_v23, %v1103_v37  ;;  %v2518_v33 = vadd.f32 %v1141_v25, %v1104_v40  ;;  %v2520_v22 = vadd.f32 %v1142_v27, %v1105_v51  ;;  %v2524_v28 = vadd.f32 %v1144_v1, %v1107_v56  ;;  %v1163_v37 = vld [vmem:[%s2412_s8 + $0xd8] sm:$0xff]  ;;  %v1165_v56 = vld [vmem:[%s2412_s8 + $0xe8] sm:$0xff]  ;;  %v1166_v13 = vld [vmem:[%s2412_s8 + $0xf0] sm:$0xff] }
 0x3ae   : > { %2857 = vst [vmem:[#allocation5_spill] sm:$0xff] %v2502_v14  ;;  %v2522_v14 = vadd.f32 %v1143_v61, %v1106_v53  ;;  %v2530_v58 = vadd.f32 %v1145_v38, %v2422_v59  ;;  %v2533_v5 = vadd.f32 %v1146_v0, %v2425_v2  ;;  %v2536_v40 = vadd.f32 %v1147_v41, %v2428_v6  ;;  %v1164_v53 = vld [vmem:[%s2412_s8 + $0xe0] sm:$0xff]  ;;  %v1167_v25 = vld [vmem:[%s2412_s8 + $0xf8] sm:$0xff]  ;;  %v1169_v27 = vld [vmem:[%s2412_s8 + $0x108] sm:$0xff] }
 0x3af   : > { %v2539_v51 = vadd.f32 %v1148_v9, %v2431_v12  ;;  %v2545_v23 = vadd.f32 %v1149_v46, %v2434_v16  ;;  %v2548_v59 = vadd.f32 %v1150_v21, %v2438_v26  ;;  %v2551_v2 = vadd.f32 %v1151_v49, %v2441_v36  ;;  %v1168_v12 = vld [vmem:[%s2412_s8 + $0x100] sm:$0xff]  ;;  %v1170_v36 = vld [vmem:[%s2412_s8 + $0x110] sm:$0xff]  ;;  %v1171_v38 = vld [vmem:[%s2412_s8 + $0x118] sm:$0xff] }
 0x3b0   : > { %v2554_v6 = vadd.f32 %v1152_v17, %v2444_v42  ;;  %v2560_v61 = vadd.f32 %v1153_v54, %v2447_v52  ;;  %v2563_v1 = vadd.f32 %v1154_v57, %v2454_v30  ;;  %v2566_v16 = vadd.f32 %v1155_v18, %v2457_v39  ;;  %v1172_v0 = vld [vmem:[%s2412_s8 + $0x120] sm:$0x1] }
 0x3b1   : > { %v2569_v26 = vadd.f32 %v1156_v20, %v2460_v45  ;;  %v2575_v42 = vadd.f32 %v1157_v62, %v2463_v55  ;;  %v2578_v41 = vadd.f32 %v1158_v32, %v2470_v8  ;;  %v2858_v52 = vld [vmem:[#allocation2_spill] sm:$0xff]  ;;  %v2859_v30 = vld [vmem:[#allocation3_spill] sm:$0xff]  ;;  %v2589_v45 = vadd.f32 %v1162_v50, %v1125_v31 }
 0x3b2   : > { %v2581_v9 = vadd.f32 %v1159_v60, %v2858_v52  ;;  %v2584_v46 = vadd.f32 %v1160_v44, %v2859_v30  ;;  %v2860_v39 = vld [vmem:[#allocation4_spill] sm:$0xff]  ;;  %v2591_v49 = vadd.f32 %v1163_v37, %v1126_v11  ;;  %v2593_v17 = vadd.f32 %v1164_v53, %v1127_v34 }
 0x3b3   : > { %v2587_v21 = vadd.f32 %v1161_v47, %v2860_v39  ;;  %v2595_v55 = vadd.f32 %v1165_v56, %v1128_v19  ;;  %v2597_v8 = vadd.f32 %v1166_v13, %v1129_v63  ;;  %v2599_v62 = vadd.f32 %v1167_v25, %v1130_v43 }
 0x3b4   : > { %v2601_v54 = vadd.f32 %v1168_v12, %v1131_v4  ;;  %v2603_v57 = vadd.f32 %v1169_v27, %v1132_v48  ;;  %v2605_v18 = vadd.f32 %v1170_v36, %v1133_v3  ;;  %v2607_v20 = vadd.f32 %v1171_v38, %v1134_v7 }
 0x3b5   : > { %v2609_v31 = vadd.f32 %v1172_v0, %v1135_v10  ;;  %v2861_v11 = vld [vmem:[#allocation5_spill] sm:$0xff]  ;;  %vm1211_vm5 = vcmp.ge.f32.partialorder %v2507_v24, 0.0  ;;  %vm1212_vm6 = vcmp.ge.f32.partialorder %v2509_v15, 0.0  ;;  %vm1213_vm7 = vcmp.ge.f32.partialorder %v2511_v35, 0.0 }
 0x3b6   : > { %vm1210_vm4 = vcmp.ge.f32.partialorder %v2861_v11, 0.0  ;;  %vm1214_vm8 = vcmp.ge.f32.partialorder %v2513_v29, 0.0  ;;  %vm1215_vm9 = vcmp.ge.f32.partialorder %v2518_v33, 0.0  ;;  %vm1216_vm10 = vcmp.ge.f32.partialorder %v2520_v22, 0.0 }
 0x3b7   : > { %vm1217_vm11 = vcmp.ge.f32.partialorder %v2522_v14, 0.0  ;;  %vm1218_vm12 = vcmp.ge.f32.partialorder %v2524_v28, 0.0  ;;  %vm1219_vm13 = vcmp.ge.f32.partialorder %v2530_v58, 0.0  ;;  %v1247_v34 = vmul.f32 0.2, %v2861_v11 }
 0x3b8   : > { %v1248_v19 = vmul.f32 0.2, %v2507_v24  ;;  %vm1220_vm14 = vcmp.ge.f32.partialorder %v2533_v5, 0.0  ;;  %v1249_v63 = vmul.f32 0.2, %v2509_v15  ;;  %vm1225_vm3 = vcmp.ge.f32.partialorder %v2551_v2, 0.0 }
 0x3b9   : > { %v1250_v43 = vmul.f32 0.2, %v2511_v35  ;;  %v1251_v4 = vmul.f32 0.2, %v2513_v29  ;;  %v1252_v48 = vmul.f32 0.2, %v2518_v33  ;;  %v1284_v10 = vsel %vm1210_vm4, %v2861_v11, %v1247_v34 }
 0x3ba   : > { %v1253_v3 = vmul.f32 0.2, %v2520_v22  ;;  %v1254_v7 = vmul.f32 0.2, %v2522_v14  ;;  %vm1226_vm15 = vcmp.ge.f32.partialorder %v2554_v6, 0.0  ;;  %v1285_v47 = vsel %vm1211_vm5, %v2507_v24, %v1248_v19  ;;  %1321 = vst [vmem:[%s2624_s11] sm:$0xff] %v1284_v10 }
 0x3bb   : > { %v1255_v32 = vmul.f32 0.2, %v2524_v28  ;;  %v1256_v60 = vmul.f32 0.2, %v2530_v58  ;;  %v2652_v44 = vmul.f32 0.2, %v2533_v5  ;;  %v1286_v24 = vsel %vm1212_vm6, %v2509_v15, %v1249_v63 }
 0x3bc   : > { %vm1230_vm4 = vcmp.ge.f32.partialorder %v2569_v26, 0.0  ;;  %v1258_v50 = vmul.f32 0.2, %v2536_v40  ;;  %v1259_v37 = vmul.f32 0.2, %v2539_v51  ;;  %1322 = vst [vmem:[%s2624_s11 + $0x8] sm:$0xff] %v1285_v47  ;;  %v1287_v15 = vsel %vm1213_vm7, %v2511_v35, %v1250_v43 }
 0x3bd   : > { %v1260_v53 = vmul.f32 0.2, %v2545_v23  ;;  %vm1234_vm5 = vcmp.ge.f32.partialorder %v2584_v46, 0.0  ;;  %v1261_v56 = vmul.f32 0.2, %v2548_v59  ;;  %1323 = vst [vmem:[%s2624_s11 + $0x10] sm:$0xff] %v1286_v24  ;;  %v1288_v35 = vsel %vm1214_vm8, %v2513_v29, %v1251_v4 }
 0x3be   : > { %v1262_v13 = vmul.f32 0.2, %v2551_v2  ;;  %v1263_v25 = vmul.f32 0.2, %v2554_v6  ;;  %vm1238_vm6 = vcmp.ge.f32.partialorder %v2593_v17, 0.0  ;;  %1324 = vst [vmem:[%s2624_s11 + $0x18] sm:$0xff] %v1287_v15  ;;  %v1289_v29 = vsel %vm1215_vm9, %v2518_v33, %v1252_v48 }
 0x3bf   : > { %v1264_v12 = vmul.f32 0.2, %v2560_v61  ;;  %v1265_v27 = vmul.f32 0.2, %v2563_v1  ;;  %v1266_v36 = vmul.f32 0.2, %v2566_v16  ;;  %v1290_v34 = vsel %vm1216_vm10, %v2520_v22, %v1253_v3 }
 0x3c0   : > { %vm1242_vm7 = vcmp.ge.f32.partialorder %v2601_v54, 0.0  ;;  %vm1243_vm0 = vcmp.ge.f32.partialorder %v2603_v57, 0.0  ;;  %vm1244_vm1 = vcmp.ge.f32.partialorder %v2605_v18, 0.0  ;;  %vm1245_vm2 = vcmp.ge.f32.partialorder %v2607_v20, 0.0  ;;  %1325 = vst [vmem:[%s2624_s11 + $0x20] sm:$0xff] %v1288_v35  ;;  %1326 = vst [vmem:[%s2624_s11 + $0x28] sm:$0xff] %v1289_v29 }
 0x3c1   : > { %v1267_v38 = vmul.f32 0.2, %v2569_v26  ;;  %v1268_v0 = vmul.f32 0.2, %v2575_v42  ;;  %v1269_v52 = vmul.f32 0.2, %v2578_v41  ;;  %v1291_v43 = vsel %vm1217_vm11, %v2522_v14, %v1254_v7 }
 0x3c2   : > { %vm1246_vm8 = vcmp.ge.f32.partialorder %v2609_v31, 0.0  ;;  %v1270_v30 = vmul.f32 0.2, %v2581_v9  ;;  %v1271_v39 = vmul.f32 0.2, %v2584_v46  ;;  %1327 = vst [vmem:[%s2624_s11 + $0x30] sm:$0xff] %v1290_v34  ;;  %v1292_v3 = vsel %vm1218_vm12, %v2524_v28, %v1255_v32 }
 0x3c3   : > { %v1272_v11 = vmul.f32 0.2, %v2587_v21  ;;  %v1273_v19 = vmul.f32 0.2, %v2589_v45  ;;  %v1274_v33 = vmul.f32 0.2, %v2591_v49  ;;  %v1293_v7 = vsel %vm1219_vm13, %v2530_v58, %v1256_v60 }
 0x3c4   : > { %v1275_v63 = vmul.f32 0.2, %v2593_v17  ;;  %v1276_v4 = vmul.f32 0.2, %v2595_v55  ;;  %v1277_v48 = vmul.f32 0.2, %v2597_v8  ;;  %v1294_v32 = vsel %vm1220_vm14, %v2533_v5, %v2652_v44 }
 0x3c5   : > { %v1278_v22 = vmul.f32 0.2, %v2599_v62  ;;  %1328 = vst [vmem:[%s2624_s11 + $0x38] sm:$0xff] %v1291_v43  ;;  %v1279_v10 = vmul.f32 0.2, %v2601_v54  ;;  %1329 = vst [vmem:[%s2624_s11 + $0x40] sm:$0xff] %v1292_v3  ;;  %v1299_v5 = vsel %vm1225_vm3, %v2551_v2, %v1262_v13  ;;  %v1304_v2 = vsel %vm1230_vm4, %v2569_v26, %v1267_v38 }
 0x3c6   : > { %v1280_v47 = vmul.f32 0.2, %v2603_v57  ;;  %v1281_v14 = vmul.f32 0.2, %v2605_v18  ;;  %v1282_v24 = vmul.f32 0.2, %v2607_v20 }
 0x3c7   : > { %v1283_v28 = vmul.f32 0.2, %v2609_v31  ;;  %vm2862_vm9 = vcmp.ge.f32.partialorder %v2536_v40, 0.0  ;;  %1330 = vst [vmem:[%s2624_s11 + $0x48] sm:$0xff] %v1293_v7  ;;  %vm2863_vm10 = vcmp.ge.f32.partialorder %v2539_v51, 0.0  ;;  %vm2864_vm11 = vcmp.ge.f32.partialorder %v2545_v23, 0.0 }
 0x3c8   : > { %v1295_v15 = vsel %vm2862_vm9, %v2536_v40, %v1258_v50  ;;  %v1296_v58 = vsel %vm2863_vm10, %v2539_v51, %v1259_v37  ;;  %v1297_v60 = vsel %vm2864_vm11, %v2545_v23, %v1260_v53  ;;  %vm2865_vm12 = vcmp.ge.f32.partialorder %v2548_v59, 0.0  ;;  %1331 = vst [vmem:[%s2624_s11 + $0x50] sm:$0xff] %v1294_v32  ;;  %1336 = vst [vmem:[%s2624_s11 + $0x78] sm:$0xff] %v1299_v5 }
 0x3c9   : > { %v1298_v35 = vsel %vm2865_vm12, %v2548_v59, %v1261_v56  ;;  %1332 = vst [vmem:[%s2624_s11 + $0x58] sm:$0xff] %v1295_v15  ;;  %v1300_v40 = vsel %vm1226_vm15, %v2554_v6, %v1263_v25  ;;  %vm2866_vm13 = vcmp.ge.f32.partialorder %v2560_v61, 0.0  ;;  %vm2867_vm14 = vcmp.ge.f32.partialorder %v2563_v1, 0.0  ;;  %1333 = vst [vmem:[%s2624_s11 + $0x60] sm:$0xff] %v1296_v58 }
 0x3ca   : > { %v1301_v51 = vsel %vm2866_vm13, %v2560_v61, %v1264_v12  ;;  %v1302_v23 = vsel %vm2867_vm14, %v2563_v1, %v1265_v27  ;;  %vm2868_vm3 = vcmp.ge.f32.partialorder %v2566_v16, 0.0  ;;  %1334 = vst [vmem:[%s2624_s11 + $0x68] sm:$0xff] %v1297_v60  ;;  %1335 = vst [vmem:[%s2624_s11 + $0x70] sm:$0xff] %v1298_v35  ;;  %vm2869_vm15 = vcmp.ge.f32.partialorder %v2575_v42, 0.0 }
 0x3cb   : > { %v1303_v59 = vsel %vm2868_vm3, %v2566_v16, %v1266_v36  ;;  %v1305_v6 = vsel %vm2869_vm15, %v2575_v42, %v1268_v0  ;;  %vm2870_vm9 = vcmp.ge.f32.partialorder %v2578_v41, 0.0  ;;  %vm2871_vm10 = vcmp.ge.f32.partialorder %v2581_v9, 0.0  ;;  %1337 = vst [vmem:[%s2624_s11 + $0x80] sm:$0xff] %v1300_v40  ;;  %1338 = vst [vmem:[%s2624_s11 + $0x88] sm:$0xff] %v1301_v51 }
 0x3cc   : > { %v1306_v61 = vsel %vm2870_vm9, %v2578_v41, %v1269_v52  ;;  %v1307_v1 = vsel %vm2871_vm10, %v2581_v9, %v1270_v30  ;;  %1339 = vst [vmem:[%s2624_s11 + $0x90] sm:$0xff] %v1302_v23  ;;  %1340 = vst [vmem:[%s2624_s11 + $0x98] sm:$0xff] %v1303_v59  ;;  %v1308_v16 = vsel %vm1234_vm5, %v2584_v46, %v1271_v39  ;;  %vm2872_vm4 = vcmp.ge.f32.partialorder %v2587_v21, 0.0 }
 0x3cd   : > { %v1309_v26 = vsel %vm2872_vm4, %v2587_v21, %v1272_v11  ;;  %vm2873_vm11 = vcmp.ge.f32.partialorder %v2589_v45, 0.0  ;;  %vm2874_vm12 = vcmp.ge.f32.partialorder %v2591_v49, 0.0  ;;  %1341 = vst [vmem:[%s2624_s11 + $0xa0] sm:$0xff] %v1304_v2  ;;  %1342 = vst [vmem:[%s2624_s11 + $0xa8] sm:$0xff] %v1305_v6  ;;  %v1312_v9 = vsel %vm1238_vm6, %v2593_v17, %v1275_v63 }
 0x3ce   : > { %v1310_v42 = vsel %vm2873_vm11, %v2589_v45, %v1273_v19  ;;  %v1311_v41 = vsel %vm2874_vm12, %v2591_v49, %v1274_v33  ;;  %1343 = vst [vmem:[%s2624_s11 + $0xb0] sm:$0xff] %v1306_v61  ;;  %1344 = vst [vmem:[%s2624_s11 + $0xb8] sm:$0xff] %v1307_v1  ;;  %vm2875_vm5 = vcmp.ge.f32.partialorder %v2595_v55, 0.0  ;;  %vm2876_vm13 = vcmp.ge.f32.partialorder %v2597_v8, 0.0 }
 0x3cf   : > { %v1313_v46 = vsel %vm2875_vm5, %v2595_v55, %v1276_v4  ;;  %v1314_v21 = vsel %vm2876_vm13, %v2597_v8, %v1277_v48  ;;  %vm2877_vm14 = vcmp.ge.f32.partialorder %v2599_v62, 0.0  ;;  %1345 = vst [vmem:[%s2624_s11 + $0xc0] sm:$0xff] %v1308_v16  ;;  %1346 = vst [vmem:[%s2624_s11 + $0xc8] sm:$0xff] %v1309_v26  ;;  %v1316_v49 = vsel %vm1242_vm7, %v2601_v54, %v1279_v10 }
 0x3d0   : > { %v1315_v45 = vsel %vm2877_vm14, %v2599_v62, %v1278_v22  ;;  %1347 = vst [vmem:[%s2624_s11 + $0xd0] sm:$0xff] %v1310_v42  ;;  %1348 = vst [vmem:[%s2624_s11 + $0xd8] sm:$0xff] %v1311_v41  ;;  %v1317_v17 = vsel %vm1243_vm0, %v2603_v57, %v1280_v47  ;;  %v1318_v55 = vsel %vm1244_vm1, %v2605_v18, %v1281_v14 }
 0x3d1   : > { %v1319_v8 = vsel %vm1245_vm2, %v2607_v20, %v1282_v24  ;;  %1349 = vst [vmem:[%s2624_s11 + $0xe0] sm:$0xff] %v1312_v9  ;;  %1350 = vst [vmem:[%s2624_s11 + $0xe8] sm:$0xff] %v1313_v46  ;;  %v1320_v62 = vsel %vm1246_vm8, %v2609_v31, %v1283_v28 }
 0x3d2   : > { %1351 = vst [vmem:[%s2624_s11 + $0xf0] sm:$0xff] %v1314_v21  ;;  %1352 = vst [vmem:[%s2624_s11 + $0xf8] sm:$0xff] %v1315_v45 }
 0x3d3   : > { %1353 = vst [vmem:[%s2624_s11 + $0x100] sm:$0xff] %v1316_v49  ;;  %1354 = vst [vmem:[%s2624_s11 + $0x108] sm:$0xff] %v1317_v17 }
 0x3d4   : > { %1355 = vst [vmem:[%s2624_s11 + $0x110] sm:$0xff] %v1318_v55  ;;  %1356 = vst [vmem:[%s2624_s11 + $0x118] sm:$0xff] %v1319_v8 }
 0x3d5   : > { %1357 = vst [vmem:[%s2624_s11 + $0x120] sm:$0x1] %v1320_v62 }
 0x3d6 PF: > { %s16_s21 = sadd.s32 1, %s1797_s21  }
 0x3d7   : > { %p13_p4 = scmp.ge.s32.totalorder %s16_s21, 4  }
 0x3d9   :  { %15 = sbr.rel (!%p13_p4) target bundleno = 1 (0x1), region = 77 }

// kernel: unet2d_forward.18
= control target key start
LH: loop header
LB: loop body
LE: loop exit
PB: predicated region body
PF: predicated region fallthrough
CT: control target
= control target key end

     0   :  { %s1698_s18 = smov 0   ;;  %s2568_s0 = inlined_call_operand.vmem [shape: bf16[2,289,72], index: 0, kind: input, shape index: {}]   ;;  %s2569_s1 = inlined_call_operand.vmem [shape: bf16[72,128], index: 1, kind: input, shape index: {}]   ;;  %s2570_s2 = inlined_call_operand.vmem [shape: f32[128,128], index: 2, kind: input, shape index: {}]   ;;  %s2571_s3 = inlined_call_operand.vmem [shape: f32[1,128], index: 3, kind: input, shape index: {}]   ;;  %s2572_s4 = inlined_call_operand.vmem [shape: f32[1,128], index: 4, kind: input, shape index: {}]   ;;  %s2573_s5 = inlined_call_operand.vmem [shape: f32[2,289,128], index: 5, kind: output, shape index: {}]  }
   0x1 LB: > { %s1292_s19 = sadd.s32 4294967295, %s1663_s18   ;;  %p1296_p0 = scmp.ge.s32.totalorder %s1663_s18, 1  ;;  %s1663_s18 = sphi %s1698_s18, %s15_s18  }
   0x2   : > { %p187_p1 = scmp.lt.s32.totalorder %s1663_s18, 3 }
   0x4   : > { %p188_p2 = pnand %p1296_p0, %p187_p1 }
   0x5   : > { %v1631_v0 = vld [vmem:[%s2569_s1] sm:$0xff] (!%p188_p2)   ;;  %v1665_v1 = vmov (!%p188_p2), 0.0   ;;  %v1632_v2 = vld [vmem:[%s2569_s1 + $0x8] sm:$0xff] (!%p188_p2)   ;;  %vm1666_vm0 = vmmov (!%p188_p2), 0   ;;  %p215_p3 = scmp.lt.s32.totalorder (!%p188_p2), %s1292_s19, 1  ;;  %v1633_v3 = vld [vmem:[%s2569_s1 + $0x10] sm:$0xff] (!%p188_p2)  }
   0x6   : > { %191 = sbr.rel (%p188_p2) target bundleno = 964 (0x3c4), region = 40  ;;  %1404 = vmatprep.subr.bf16.mxu0 (!%p188_p2), %v1665_v1  ;;  %1608 = vmatprep.subr.bf16.mxu1 (!%p188_p2), %v1665_v1  ;;  %v1634_v4 = vld [vmem:[%s2569_s1 + $0x18] sm:$0xff] (!%p188_p2)   ;;  %v1635_v5 = vld [vmem:[%s2569_s1 + $0x20] ss:$0 sps:$4 sm:$0xff] (!%p188_p2)   ;;  %vm450_vm1 = vcmask (!%p188_p2), 1043456   ;;  %vm392_vm2 = vcmask (!%p188_p2), 588800  }
   0x7   : > { %1405 = vmatpush3.bf16.msra.mxu0 (!%p188_p2), %v1631_v0  ;;  %1613 = vmatpush3.bf16.msra.mxu1 (!%p188_p2), %v1631_v0  ;;  %v452_v6 = vsel (!%p188_p2), %vm450_vm1, %v1635_v5, 0  ;;  %v682_v26 = vld [vmem:[%s2570_s2] sm:$0xff] (!%p188_p2)  ;;  %v683_v27 = vld [vmem:[%s2570_s2 + $0x8] sm:$0xff] (!%p188_p2)  ;;  %v1667_v28 = vmov (!%p188_p2), 0.0|0.0   ;;  %v684_v30 = vld [vmem:[%s2570_s2 + $0x10] sm:$0xff] (!%p188_p2)  ;;  %vm673_vm3 = vcmask (!%p188_p2), 1040384  }
   0x8   : > { %1406 = vmatprep.subr.bf16.mxu0 (!%p188_p2), %v1665_v1  ;;  %1414 = vmatprep.mubr.msk.bf16.mxu0 (!%p188_p2), %vm1666_vm0, %v1665_v1  ;;  %v1824_v29 = vpack.c.bf16 (!%p188_p2), %v683_v27, %v682_v26  ;;  %v685_v31 = vld [vmem:[%s2570_s2 + $0x18] sm:$0xff] (!%p188_p2)  ;;  %v686_v33 = vld [vmem:[%s2570_s2 + $0x20] sm:$0xff] (!%p188_p2)  ;;  %v687_v34 = vld [vmem:[%s2570_s2 + $0x28] sm:$0xff] (!%p188_p2) }
   0x9   : > { %1609 = vmatprep.subr.bf16.mxu1 (!%p188_p2), %v1665_v1  ;;  %1462 = vmatprep.mubr.msk.bf16.mxu1 (!%p188_p2), %vm1666_vm0, %v1665_v1  ;;  %v1834_v32 = vpack.c.bf16 (!%p188_p2), %v685_v31, %v684_v30  ;;  %v1844_v35 = vpack.c.bf16 (!%p188_p2), %v687_v34, %v686_v33  ;;  %v688_v36 = vld [vmem:[%s2570_s2 + $0x30] sm:$0xff] (!%p188_p2)  ;;  %v689_v37 = vld [vmem:[%s2570_s2 + $0x38] sm:$0xff] (!%p188_p2)  ;;  %v690_v39 = vld [vmem:[%s2570_s2 + $0x40] sm:$0xff] (!%p188_p2) }
   0xa   : > { %v1854_v38 = vpack.c.bf16 (!%p188_p2), %v689_v37, %v688_v36  ;;  %v691_v40 = vld [vmem:[%s2570_s2 + $0x48] sm:$0xff] (!%p188_p2)  ;;  %v692_v42 = vld [vmem:[%s2570_s2 + $0x50] sm:$0xff] (!%p188_p2)  ;;  %v693_v43 = vld [vmem:[%s2570_s2 + $0x58] sm:$0xff] (!%p188_p2) }
   0xb   : > { %1407 = vmatpush3.bf16.msra.mxu0 (!%p188_p2), %v1632_v2  ;;  %1614 = vmatpush3.bf16.msra.mxu1 (!%p188_p2), %v1632_v2  ;;  %v1863_v41 = vpack.c.bf16 (!%p188_p2), %v691_v40, %v690_v39  ;;  %v1873_v44 = vpack.c.bf16 (!%p188_p2), %v693_v43, %v692_v42  ;;  %v694_v45 = vld [vmem:[%s2570_s2 + $0x60] sm:$0xff] (!%p188_p2)  ;;  %v695_v46 = vld [vmem:[%s2570_s2 + $0x68] sm:$0xff] (!%p188_p2)  ;;  %v696_v48 = vld [vmem:[%s2570_s2 + $0x70] sm:$0xff] (!%p188_p2) }
   0xc   : > { %1408 = vmatprep.subr.bf16.mxu0 (!%p188_p2), %v1665_v1  ;;  %1610 = vmatprep.subr.bf16.mxu1 (!%p188_p2), %v1665_v1  ;;  %v1884_v47 = vpack.c.bf16 (!%p188_p2), %v695_v46, %v694_v45  ;;  %v697_v49 = vld [vmem:[%s2570_s2 + $0x78] sm:$0xff] (!%p188_p2) }
   0xd   : > { %s2592_s19 = smov (!%p215_p3, %s1292_s19), 1  ;;  %v1894_v50 = vpack.c.bf16 %v697_v49, %v696_v48 }
   0xe   : > { %s1618_s26 = smul.u32 148, %s2592_s19 }
   0xf   : > { %1409 = vmatpush3.bf16.msra.mxu0 %v1633_v3  ;;  %1615 = vmatpush3.bf16.msra.mxu1 %v1633_v3  ;;  %s1619_s24 = smul.u32 296, %s2592_s19 }
  0x10   : > { %s1731_s29 = scalar_lea.vmem %s2568_s0, %s1618_s26  ;;  %1410 = vmatprep.subr.bf16.mxu0 %v1665_v1  ;;  %1611 = vmatprep.subr.bf16.mxu1 %v1665_v1 }
  0x11   : > { %v1636_v7 = vld [vmem:[%s1731_s29] sm:$0xff]   ;;  %v1637_v9 = vld [vmem:[%s1731_s29 + $0x8] sm:$0xff]   ;;  %v1638_v11 = vld [vmem:[%s1731_s29 + $0x10] sm:$0xff]   ;;  %s2346_s26 = scalar_lea.vmem %s2573_s5, %s1619_s24 }
  0x12   : > { %v1645_v8 = vld [vmem:[%s1731_s29 + $0x60] sm:$0xff]   ;;  %v1647_v10 = vld [vmem:[%s1731_s29 + $0x68] sm:$0xff]   ;;  %v1649_v12 = vld [vmem:[%s1731_s29 + $0x70] sm:$0xff]  }
  0x13   : > { %1411 = vmatpush3.bf16.msra.mxu0 %v1634_v4  ;;  %1616 = vmatpush3.bf16.msra.mxu1 %v1634_v4  ;;  %v1639_v13 = vld [vmem:[%s1731_s29 + $0x18] sm:$0xff]   ;;  %v1640_v15 = vld [vmem:[%s1731_s29 + $0x20] sm:$0xff]   ;;  %v1641_v17 = vld [vmem:[%s1731_s29 + $0x28] sm:$0xff]  }
  0x14   : > { %1412 = vmatprep.subr.bf16.mxu0 %v1665_v1  ;;  %1612 = vmatprep.subr.bf16.mxu1 %v1665_v1  ;;  %v1651_v14 = vld [vmem:[%s1731_s29 + $0x78] sm:$0xff]   ;;  %v1652_v16 = vld [vmem:[%s1731_s29 + $0x80] sm:$0xff]   ;;  %v1653_v18 = vld [vmem:[%s1731_s29 + $0x88] sm:$0xff]  }
  0x15   : > { %v1642_v19 = vld [vmem:[%s1731_s29 + $0x30] sm:$0xff]   ;;  %v1643_v21 = vld [vmem:[%s1731_s29 + $0x38] sm:$0xff]   ;;  %v1644_v22 = vld [vmem:[%s1731_s29 + $0x40] sm:$0xff]  }
  0x16   : > { %v1654_v20 = vld [vmem:[%s1731_s29 + $0x90] ss:$0 sps:$4 sm:$0x11]   ;;  %v1646_v23 = vld [vmem:[%s1731_s29 + $0x48] sm:$0xff]   ;;  %v1650_v25 = vld [vmem:[%s1731_s29 + $0x58] sm:$0xff]  }
  0x17   : > { %1413 = vmatpush3.bf16.msra.mxu0 %v452_v6  ;;  %1617 = vmatpush3.bf16.msra.mxu1 %v452_v6  ;;  %v1648_v24 = vld [vmem:[%s1731_s29 + $0x50] sm:$0xff]  }
  0x18   : > { %1560 = vmatprep.subr.bf16.mxu1 %v1667_v28 }
  0x1a   : > { %1415 = vmatmul.mubr.msk.bf16.vlgmr.msra.gmra.mrb[0].mxu0 %vm392_vm2, %v1636_v7  ;;  %1463 = vmatmul.mubr.msk.bf16.vlgmr.msra.gmra.mrb[0].mxu1 %vm392_vm2, %v1645_v8 }
  0x1b   : > { %1418 = vmatprep.mubr.msk.bf16.mxu0 %vm1666_vm0, %v1665_v1  ;;  %1466 = vmatprep.mubr.msk.bf16.mxu1 %vm1666_vm0, %v1665_v1 }
  0x1c   : > { %1562 = vmatpush3.bf16.msra.mxu1 %v1824_v29 }
  0x1d   : > { %1563 = vmatprep.subr.bf16.mxu1 %v1667_v28 }
  0x20   : > { %1565 = vmatpush3.bf16.msra.mxu1 %v1834_v32 }
  0x21   : > { %1566 = vmatprep.subr.bf16.mxu1 %v1667_v28 }
  0x22   : > { %1419 = vmatmul.mubr.msk.bf16.gmra.mrb[4].mxu0 %vm392_vm2, %v1637_v9  ;;  %1467 = vmatmul.mubr.msk.bf16.gmra.mrb[4].mxu1 %vm392_vm2, %v1647_v10 }
  0x23   : > { %1422 = vmatprep.mubr.msk.bf16.mxu0 %vm1666_vm0, %v1665_v1  ;;  %1470 = vmatprep.mubr.msk.bf16.mxu1 %vm1666_vm0, %v1665_v1 }
  0x24   : > { %1568 = vmatpush3.bf16.msra.mxu1 %v1844_v35 }
  0x25   : > { %1569 = vmatprep.subr.bf16.mxu1 %v1667_v28 }
  0x28   : > { %1571 = vmatpush3.bf16.msra.mxu1 %v1854_v38 }
  0x29   : > { %1572 = vmatprep.subr.bf16.mxu1 %v1667_v28 }
  0x2a   : > { %1423 = vmatmul.mubr.msk.bf16.gmra.mrb[8].mxu0 %vm392_vm2, %v1638_v11  ;;  %1471 = vmatmul.mubr.msk.bf16.gmra.mrb[8].mxu1 %vm392_vm2, %v1649_v12 }
  0x2b   : > { %1426 = vmatprep.mubr.msk.bf16.mxu0 %vm1666_vm0, %v1665_v1  ;;  %1474 = vmatprep.mubr.msk.bf16.mxu1 %vm1666_vm0, %v1665_v1 }
  0x2c   : > { %1574 = vmatpush3.bf16.msra.mxu1 %v1863_v41 }
  0x2d   : > { %1575 = vmatprep.subr.bf16.mxu1 %v1667_v28 }
  0x30   : > { %1577 = vmatpush3.bf16.msra.mxu1 %v1873_v44 }
  0x31   : > { %1578 = vmatprep.subr.bf16.mxu1 %v1667_v28 }
  0x32   : > { %1427 = vmatmul.mubr.msk.bf16.gmra.mrb[12].mxu0 %vm392_vm2, %v1639_v13  ;;  %1475 = vmatmul.mubr.msk.bf16.gmra.mrb[12].mxu1 %vm392_vm2, %v1651_v14 }
  0x33   : > { %1430 = vmatprep.mubr.msk.bf16.mxu0 %vm1666_vm0, %v1665_v1  ;;  %1478 = vmatprep.mubr.msk.bf16.mxu1 %vm1666_vm0, %v1665_v1 }
  0x34   : > { %1580 = vmatpush3.bf16.msra.mxu1 %v1884_v47 }
  0x35   : > { %1581 = vmatprep.subr.bf16.mxu1 %v1667_v28 }
  0x38   : > { %1583 = vmatpush3.bf16.msra.mxu1 %v1894_v50 }
  0x39   : > { %1584 = vmatprep.subr.bf16.mxu1 %v1667_v28 }
  0x3a   : > { %1431 = vmatmul.mubr.msk.bf16.gmra.mrb[16].mxu0 %vm392_vm2, %v1640_v15  ;;  %1479 = vmatmul.mubr.msk.bf16.gmra.mrb[16].mxu1 %vm392_vm2, %v1652_v16 }
  0x3b   : > { %1434 = vmatprep.mubr.msk.bf16.mxu0 %vm1666_vm0, %v1665_v1  ;;  %1482 = vmatprep.mubr.msk.bf16.mxu1 %vm1666_vm0, %v1665_v1 }
  0x42   : > { %1435 = vmatmul.mubr.msk.bf16.gmra.mrb[20].mxu0 %vm392_vm2, %v1641_v17  ;;  %1483 = vmatmul.mubr.msk.bf16.gmra.mrb[20].mxu1 %vm392_vm2, %v1653_v18 }
  0x43   : > { %1438 = vmatprep.mubr.msk.bf16.mxu0 %vm1666_vm0, %v1665_v1  ;;  %1486 = vmatprep.mubr.msk.bf16.mxu1 %vm1666_vm0, %v1665_v1 }
  0x4a   : > { %1439 = vmatmul.mubr.msk.bf16.gmra.mrb[24].mxu0 %vm392_vm2, %v1642_v19  ;;  %1487 = vmatmul.mubr.msk.bf16.gmra.mrb[24].mxu1 %vm392_vm2, %v1654_v20 }
  0x4b   : > { %1442 = vmatprep.mubr.msk.bf16.mxu0 %vm1666_vm0, %v1665_v1  ;;  %1522 = vmatprep.mubr.msk.f32.mxu1 %vm1666_vm0, %v1665_v1 }
  0x52   : > { %1443 = vmatmul.mubr.msk.bf16.gmra.mrb[28].mxu0 %vm392_vm2, %v1643_v21 }
  0x53   : > { %1446 = vmatprep.mubr.msk.bf16.mxu0 %vm1666_vm0, %v1665_v1 }
  0x5a   : > { %1447 = vmatmul.mubr.msk.bf16.gmra.mrb[32].mxu0 %vm392_vm2, %v1644_v22 }
  0x5b   : > { %1450 = vmatprep.mubr.msk.bf16.mxu0 %vm1666_vm0, %v1665_v1 }
  0x62   : > { %1451 = vmatmul.mubr.msk.bf16.gmra.mrb[36].mxu0 %vm392_vm2, %v1646_v23 }
  0x63   : > { %1454 = vmatprep.mubr.msk.bf16.mxu0 %vm1666_vm0, %v1665_v1 }
  0x6a   : > { %1455 = vmatmul.mubr.msk.bf16.gmra.mrb[40].mxu0 %vm392_vm2, %v1648_v24 }
  0x6b   : > { %1458 = vmatprep.mubr.msk.bf16.mxu0 %vm1666_vm0, %v1665_v1 }
  0x72   : > { %1459 = vmatmul.mubr.msk.bf16.gmra.mrb[44].mxu0 %vm392_vm2, %v1650_v25 }
  0xed   : > { %v1896_v51 = vpop.f32.mrb[0].mxu0  ;;  %v1898_v52 = vpop.f32.mrb[0].mxu1 }
  0xee   : > { %v1416_v53 = vpop.f32.mrb[1].mxu0  ;;  %v1464_v54 = vpop.f32.mrb[1].mxu1 }
  0xef   : > { %v1902_v55 = vpop.f32.mrb[2].mxu0  ;;  %v1904_v56 = vpop.f32.mrb[2].mxu1 }
  0xf0   : > { %v638_v57 = vadd.f32 %v1902_v55, %v1896_v51  ;;  %v1417_v58 = vpop.f32.mrb[3].mxu0  ;;  %v1465_v59 = vpop.f32.mrb[3].mxu1 }
  0xf5   : > { %v1908_v60 = vpop.f32.mrb[4].mxu0  ;;  %v1910_v61 = vpop.f32.mrb[4].mxu1 }
  0xf6   : > { %v639_v62 = vadd.f32 %v638_v57, %v1908_v60  ;;  %v1420_v63 = vpop.f32.mrb[5].mxu0  ;;  %v1468_v0 = vpop.f32.mrb[5].mxu1 }
  0xf7   : > { %v1913_v2 = vpop.f32.mrb[6].mxu0  ;;  %v1915_v3 = vpop.f32.mrb[6].mxu1 }
  0xf8   : > { %v640_v4 = vadd.f32 %v639_v62, %v1913_v2  ;;  %v1421_v5 = vpop.f32.mrb[7].mxu0  ;;  %v1469_v6 = vpop.f32.mrb[7].mxu1 }
  0xfd   : > { %v1918_v7 = vpop.f32.mrb[8].mxu0  ;;  %v1920_v8 = vpop.f32.mrb[8].mxu1 }
  0xfe   : > { %v641_v9 = vadd.f32 %v640_v4, %v1918_v7  ;;  %v1424_v10 = vpop.f32.mrb[9].mxu0  ;;  %v1472_v11 = vpop.f32.mrb[9].mxu1 }
  0xff   : > { %v1923_v12 = vpop.f32.mrb[10].mxu0  ;;  %v1925_v13 = vpop.f32.mrb[10].mxu1 }
 0x100   : > { %v642_v14 = vadd.f32 %v641_v9, %v1923_v12  ;;  %v1425_v15 = vpop.f32.mrb[11].mxu0  ;;  %v1473_v16 = vpop.f32.mrb[11].mxu1 }
 0x105   : > { %v1928_v17 = vpop.f32.mrb[12].mxu0  ;;  %v1930_v18 = vpop.f32.mrb[12].mxu1 }
 0x106   : > { %v643_v19 = vadd.f32 %v642_v14, %v1928_v17  ;;  %v1428_v20 = vpop.f32.mrb[13].mxu0  ;;  %v1476_v21 = vpop.f32.mrb[13].mxu1 }
 0x107   : > { %v1933_v22 = vpop.f32.mrb[14].mxu0  ;;  %v1935_v23 = vpop.f32.mrb[14].mxu1 }
 0x108   : > { %v644_v24 = vadd.f32 %v643_v19, %v1933_v22  ;;  %v1429_v25 = vpop.f32.mrb[15].mxu0  ;;  %v1477_v26 = vpop.f32.mrb[15].mxu1 }
 0x10d   : > { %v1938_v27 = vpop.f32.mrb[16].mxu0  ;;  %v1940_v30 = vpop.f32.mrb[16].mxu1 }
 0x10e   : > { %v645_v31 = vadd.f32 %v644_v24, %v1938_v27  ;;  %v1432_v33 = vpop.f32.mrb[17].mxu0  ;;  %v1480_v34 = vpop.f32.mrb[17].mxu1 }
 0x10f   : > { %v1943_v36 = vpop.f32.mrb[18].mxu0  ;;  %v1945_v37 = vpop.f32.mrb[18].mxu1 }
 0x110   : > { %v646_v39 = vadd.f32 %v645_v31, %v1943_v36  ;;  %v1433_v40 = vpop.f32.mrb[19].mxu0  ;;  %v1481_v42 = vpop.f32.mrb[19].mxu1 }
 0x115   : > { %v1948_v43 = vpop.f32.mrb[20].mxu0  ;;  %v1950_v45 = vpop.f32.mrb[20].mxu1 }
 0x116   : > { %v647_v46 = vadd.f32 %v646_v39, %v1948_v43  ;;  %v1436_v48 = vpop.f32.mrb[21].mxu0  ;;  %v1484_v49 = vpop.f32.mrb[21].mxu1 }
 0x117   : > { %v1953_v53 = vpop.f32.mrb[22].mxu0  ;;  %v1955_v54 = vpop.f32.mrb[22].mxu1 }
 0x118   : > { %v648_v57 = vadd.f32 %v647_v46, %v1953_v53  ;;  %v1437_v58 = vpop.f32.mrb[23].mxu0  ;;  %v1485_v59 = vpop.f32.mrb[23].mxu1 }
 0x11d   : > { %v1958_v62 = vpop.f32.mrb[24].mxu0  ;;  %v1960_v63 = vpop.f32.mrb[24].mxu1 }
 0x11e   : > { %v649_v0 = vadd.f32 %v648_v57, %v1958_v62  ;;  %v1440_v4 = vpop.f32.mrb[25].mxu0  ;;  %v1488_v5 = vpop.f32.mrb[25].mxu1 }
 0x11f   : > { %v1963_v6 = vpop.f32.mrb[26].mxu0  ;;  %v635_v9 = vpop.f32.mrb[26].mxu1 }
 0x120   : > { %v650_v10 = vadd.f32 %v649_v0, %v1963_v6  ;;  %v1441_v11 = vpop.f32.mrb[27].mxu0  ;;  %v1489_v14 = vpop.f32.mrb[27].mxu1 }
 0x125   : > { %v1966_v15 = vpop.f32.mrb[28].mxu0 }
 0x126   : > { %v651_v16 = vadd.f32 %v650_v10, %v1966_v15  ;;  %v1444_v19 = vpop.f32.mrb[29].mxu0 }
 0x127   : > { %v1969_v20 = vpop.f32.mrb[30].mxu0 }
 0x128   : > { %v652_v21 = vadd.f32 %v651_v16, %v1969_v20  ;;  %v1445_v24 = vpop.f32.mrb[31].mxu0 }
 0x12d   : > { %v1972_v25 = vpop.f32.mrb[32].mxu0 }
 0x12e   : > { %v653_v26 = vadd.f32 %v652_v21, %v1972_v25  ;;  %v1448_v31 = vpop.f32.mrb[33].mxu0 }
 0x12f   : > { %v1975_v33 = vpop.f32.mrb[34].mxu0 }
 0x130   : > { %v654_v34 = vadd.f32 %v653_v26, %v1975_v33  ;;  %v1449_v39 = vpop.f32.mrb[35].mxu0 }
 0x135   : > { %v1978_v40 = vpop.f32.mrb[36].mxu0 }
 0x136   : > { %v655_v42 = vadd.f32 %v654_v34, %v1978_v40  ;;  %v1452_v46 = vpop.f32.mrb[37].mxu0 }
 0x137   : > { %v1981_v48 = vpop.f32.mrb[38].mxu0 }
 0x138   : > { %v656_v49 = vadd.f32 %v655_v42, %v1981_v48  ;;  %v1453_v57 = vpop.f32.mrb[39].mxu0 }
 0x13d   : > { %v1984_v58 = vpop.f32.mrb[40].mxu0 }
 0x13e   : > { %v657_v59 = vadd.f32 %v656_v49, %v1984_v58  ;;  %v1456_v0 = vpop.f32.mrb[41].mxu0 }
 0x13f   : > { %v1987_v4 = vpop.f32.mrb[42].mxu0 }
 0x140   : > { %v658_v5 = vadd.f32 %v657_v59, %v1987_v4  ;;  %v1457_v9 = vpop.f32.mrb[43].mxu0 }
 0x145   : > { %v1990_v10 = vpop.f32.mrb[44].mxu0 }
 0x146   : > { %v659_v11 = vadd.f32 %v658_v5, %v1990_v10  ;;  %v1460_v14 = vpop.f32.mrb[45].mxu0  ;;  %v674_v5 = vsel %vm673_vm3, %v1960_v63, 0.0 }
 0x147   : > { %v1993_v16 = vpop.f32.mrb[46].mxu0 }
 0x148   : > { %v660_v19 = vadd.f32 %v659_v11, %v1993_v16  ;;  %v1461_v21 = vpop.f32.mrb[47].mxu0 }
 0x14a   : > { %v661_v24 = vadd.f32 %v660_v19, %v1898_v52 }
 0x14c   : > { %v662_v26 = vadd.f32 %v661_v24, %v1904_v56 }
 0x14e   : > { %v663_v31 = vadd.f32 %v662_v26, %v1910_v61 }
 0x150   : > { %v664_v34 = vadd.f32 %v663_v31, %v1915_v3 }
 0x152   : > { %v665_v39 = vadd.f32 %v664_v34, %v1920_v8 }
 0x154   : > { %v666_v42 = vadd.f32 %v665_v39, %v1925_v13 }
 0x156   : > { %v667_v46 = vadd.f32 %v666_v42, %v1930_v18 }
 0x158   : > { %v668_v49 = vadd.f32 %v667_v46, %v1935_v23 }
 0x15a   : > { %v669_v57 = vadd.f32 %v668_v49, %v1940_v30 }
 0x15c   : > { %v670_v59 = vadd.f32 %v669_v57, %v1945_v37 }
 0x15e   : > { %v671_v0 = vadd.f32 %v670_v59, %v1950_v45 }
 0x160   : > { %v672_v9 = vadd.f32 %v671_v0, %v1955_v54 }
 0x162   : > { %v675_v11 = vadd.f32 %v674_v5, %v672_v9 }
 0x164   : > { %v676_v14 = vrot.slane %v675_v11, 4 }
 0x166   : > { %v677_v19 = vadd.f32 %v676_v14, %v675_v11 }
 0x168   : > { %v678_v21 = vrot.slane %v677_v19, 2 }
 0x16a   : > { %v679_v24 = vadd.f32 %v678_v21, %v677_v19 }
 0x16c   : > { %v680_v26 = vrot.slane %v679_v24, 1 }
 0x16e   : > { %v681_v31 = vadd.f32 %v680_v26, %v679_v24 }
 0x170   : > { %1523 = vmatmul.mubr.f32.vlgmr.msra.gmra.mrb[28].mxu1 %v681_v31 }
 0x171   : > { %1586 = vmatpush3.bf16.msra.mxu1 %v1824_v29  ;;  %1557 = vmatprep.mubr.msk.f32.mxu1 %vm1666_vm0, %v1665_v1  ;;  %v768_v1 = vlaneseq }
 0x172   : > { %1587 = vmatprep.subr.bf16.mxu1 %v1667_v28 }
 0x173   : > { %v2027_v29 = vshrl.u32 %v768_v1, 7 }
 0x175   : > { %1589 = vmatpush3.bf16.msra.mxu1 %v1834_v32  ;;  %v770_v32 = vsub.s32 0, %v2027_v29 }
 0x176   : > { %1590 = vmatprep.subr.bf16.mxu1 %v1667_v28 }
 0x179   : > { %1592 = vmatpush3.bf16.msra.mxu1 %v1844_v35 }
 0x17a   : > { %1593 = vmatprep.subr.bf16.mxu1 %v1667_v28 }
 0x17d   : > { %1595 = vmatpush3.bf16.msra.mxu1 %v1854_v38 }
 0x17e   : > { %1596 = vmatprep.subr.bf16.mxu1 %v1667_v28 }
 0x181   : > { %1598 = vmatpush3.bf16.msra.mxu1 %v1863_v41 }
 0x182   : > { %1599 = vmatprep.subr.bf16.mxu1 %v1667_v28 }
 0x185   : > { %1601 = vmatpush3.bf16.msra.mxu1 %v1873_v44 }
 0x186   : > { %1602 = vmatprep.subr.bf16.mxu1 %v1667_v28 }
 0x189   : > { %1604 = vmatpush3.bf16.msra.mxu1 %v1884_v47 }
 0x18a   : > { %1605 = vmatprep.subr.bf16.mxu1 %v1667_v28 }
 0x18d   : > { %1607 = vmatpush3.bf16.msra.mxu1 %v1894_v50 }
 0x243   : > { %v764_v35 = vpop.f32.mrb[28].mxu1 }
 0x244   : > { %v771_v38 = vrot.slane %v764_v35, %v770_v32  ;;  %v1524_v41 = vpop.f32.mrb[29].mxu1 }
 0x246   : > { %v2033_v44 = vsub.f32 %v1896_v51, %v771_v38  ;;  %v2036_v34 = vsub.f32 %v1902_v55, %v771_v38  ;;  %v2039_v28 = vsub.f32 %v1908_v60, %v771_v38  ;;  %v2042_v47 = vsub.f32 %v1913_v2, %v771_v38 }
 0x247   : > { %v2045_v50 = vsub.f32 %v1918_v7, %v771_v38  ;;  %v2048_v39 = vsub.f32 %v1923_v12, %v771_v38  ;;  %v2051_v42 = vsub.f32 %v1928_v17, %v771_v38  ;;  %v2054_v51 = vsub.f32 %v1933_v22, %v771_v38 }
 0x248   : > { %v2057_v55 = vsub.f32 %v1938_v27, %v771_v38  ;;  %v2060_v60 = vsub.f32 %v1943_v36, %v771_v38  ;;  %v2063_v2 = vsub.f32 %v1948_v43, %v771_v38  ;;  %v2066_v7 = vsub.f32 %v1953_v53, %v771_v38 }
 0x249   : > { %v2069_v12 = vsub.f32 %v1958_v62, %v771_v38  ;;  %v2072_v17 = vsub.f32 %v1963_v6, %v771_v38  ;;  %v2075_v22 = vsub.f32 %v1966_v15, %v771_v38  ;;  %v2078_v27 = vsub.f32 %v1969_v20, %v771_v38 }
 0x24a   : > { %v2081_v36 = vsub.f32 %v1972_v25, %v771_v38  ;;  %v2084_v43 = vsub.f32 %v1975_v33, %v771_v38  ;;  %v2087_v53 = vsub.f32 %v1978_v40, %v771_v38  ;;  %v2090_v62 = vsub.f32 %v1981_v48, %v771_v38 }
 0x24b   : > { %v2093_v6 = vsub.f32 %v1984_v58, %v771_v38  ;;  %v2096_v15 = vsub.f32 %v1987_v4, %v771_v38  ;;  %v2099_v20 = vsub.f32 %v1990_v10, %v771_v38  ;;  %v2102_v25 = vsub.f32 %v1993_v16, %v771_v38 }
 0x24c   : > { %v2105_v33 = vsub.f32 %v1898_v52, %v771_v38  ;;  %v2108_v40 = vsub.f32 %v1904_v56, %v771_v38  ;;  %v2111_v48 = vsub.f32 %v1910_v61, %v771_v38  ;;  %v2114_v58 = vsub.f32 %v1915_v3, %v771_v38 }
 0x24d   : > { %v2117_v4 = vsub.f32 %v1920_v8, %v771_v38  ;;  %v2120_v10 = vsub.f32 %v1925_v13, %v771_v38  ;;  %v2123_v16 = vsub.f32 %v1930_v18, %v771_v38  ;;  %v2126_v52 = vsub.f32 %v1935_v23, %v771_v38 }
 0x24e   : > { %v2129_v56 = vsub.f32 %v1940_v30, %v771_v38  ;;  %v2132_v61 = vsub.f32 %v1945_v37, %v771_v38  ;;  %v2135_v3 = vsub.f32 %v1950_v45, %v771_v38  ;;  %v2138_v8 = vsub.f32 %v1955_v54, %v771_v38 }
 0x24f   : > { %v2141_v13 = vsub.f32 %v1960_v63, %v771_v38  ;;  %v809_v18 = vmul.f32 %v2033_v44, %v2033_v44  ;;  %v810_v23 = vmul.f32 %v2036_v34, %v2036_v34  ;;  %v811_v30 = vmul.f32 %v2039_v28, %v2039_v28 }
 0x250   : > { %v812_v45 = vmul.f32 %v2042_v47, %v2042_v47  ;;  %v813_v54 = vmul.f32 %v2045_v50, %v2045_v50  ;;  %v814_v63 = vmul.f32 %v2048_v39, %v2048_v39  ;;  %v815_v59 = vmul.f32 %v2051_v42, %v2051_v42 }
 0x251   : > { %v846_v37 = vadd.f32 %v810_v23, %v809_v18  ;;  %v816_v5 = vmul.f32 %v2054_v51, %v2054_v51  ;;  %v817_v11 = vmul.f32 %v2057_v55, %v2057_v55  ;;  %v818_v19 = vmul.f32 %v2060_v60, %v2060_v60 }
 0x252   : > { %v819_v24 = vmul.f32 %v2063_v2, %v2063_v2  ;;  %v820_v31 = vmul.f32 %v2066_v7, %v2066_v7  ;;  %v821_v35 = vmul.f32 %v2069_v12, %v2069_v12  ;;  %v822_v41 = vmul.f32 %v2072_v17, %v2072_v17 }
 0x253   : > { %v847_v46 = vadd.f32 %v846_v37, %v811_v30  ;;  %v823_v23 = vmul.f32 %v2075_v22, %v2075_v22  ;;  %v824_v37 = vmul.f32 %v2078_v27, %v2078_v27 }
 0x255   : > { %v848_v49 = vadd.f32 %v847_v46, %v812_v45  ;;  %v825_v46 = vmul.f32 %v2081_v36, %v2081_v36 }
 0x257   : > { %v849_v57 = vadd.f32 %v848_v49, %v813_v54  ;;  %v826_v49 = vmul.f32 %v2084_v43, %v2084_v43 }
 0x259   : > { %v850_v0 = vadd.f32 %v849_v57, %v814_v63  ;;  %v827_v57 = vmul.f32 %v2087_v53, %v2087_v53 }
 0x25b   : > { %v851_v9 = vadd.f32 %v850_v0, %v815_v59  ;;  %v828_v0 = vmul.f32 %v2090_v62, %v2090_v62 }
 0x25d   : > { %v852_v14 = vadd.f32 %v851_v9, %v816_v5  ;;  %v829_v9 = vmul.f32 %v2093_v6, %v2093_v6 }
 0x25f   : > { %v853_v21 = vadd.f32 %v852_v14, %v817_v11  ;;  %v830_v14 = vmul.f32 %v2096_v15, %v2096_v15 }
 0x261   : > { %v854_v26 = vadd.f32 %v853_v21, %v818_v19  ;;  %v831_v21 = vmul.f32 %v2099_v20, %v2099_v20 }
 0x263   : > { %v855_v1 = vadd.f32 %v854_v26, %v819_v24  ;;  %v832_v26 = vmul.f32 %v2102_v25, %v2102_v25 }
 0x265   : > { %v856_v38 = vadd.f32 %v855_v1, %v820_v31  ;;  %v833_v1 = vmul.f32 %v2105_v33, %v2105_v33 }
 0x267   : > { %v857_v18 = vadd.f32 %v856_v38, %v821_v35  ;;  %v834_v38 = vmul.f32 %v2108_v40, %v2108_v40 }
 0x269   : > { %v858_v30 = vadd.f32 %v857_v18, %v822_v41  ;;  %v835_v18 = vmul.f32 %v2111_v48, %v2111_v48 }
 0x26b   : > { %v859_v45 = vadd.f32 %v858_v30, %v823_v23  ;;  %v836_v30 = vmul.f32 %v2114_v58, %v2114_v58 }
 0x26d   : > { %v860_v54 = vadd.f32 %v859_v45, %v824_v37  ;;  %v837_v45 = vmul.f32 %v2117_v4, %v2117_v4 }
 0x26f   : > { %v861_v63 = vadd.f32 %v860_v54, %v825_v46  ;;  %v838_v54 = vmul.f32 %v2120_v10, %v2120_v10 }
 0x271   : > { %v862_v59 = vadd.f32 %v861_v63, %v826_v49  ;;  %v839_v63 = vmul.f32 %v2123_v16, %v2123_v16 }
 0x273   : > { %v863_v5 = vadd.f32 %v862_v59, %v827_v57  ;;  %v840_v59 = vmul.f32 %v2126_v52, %v2126_v52 }
 0x275   : > { %v864_v11 = vadd.f32 %v863_v5, %v828_v0  ;;  %v841_v5 = vmul.f32 %v2129_v56, %v2129_v56 }
 0x277   : > { %v865_v19 = vadd.f32 %v864_v11, %v829_v9  ;;  %v842_v11 = vmul.f32 %v2132_v61, %v2132_v61 }
 0x279   : > { %v866_v24 = vadd.f32 %v865_v19, %v830_v14  ;;  %v843_v19 = vmul.f32 %v2135_v3, %v2135_v3 }
 0x27b   : > { %v867_v31 = vadd.f32 %v866_v24, %v831_v21  ;;  %v845_v24 = vmul.f32 %v2141_v13, %v2141_v13 }
 0x27d   : > { %v868_v35 = vadd.f32 %v867_v31, %v832_v26  ;;  %v844_v26 = vmul.f32 %v2138_v8, %v2138_v8 }
 0x27f   : > { %v869_v41 = vadd.f32 %v868_v35, %v833_v1  ;;  %v881_v35 = vsel %vm673_vm3, %v845_v24, 0.0 }
 0x281   : > { %v870_v23 = vadd.f32 %v869_v41, %v834_v38 }
 0x283   : > { %v871_v37 = vadd.f32 %v870_v23, %v835_v18 }
 0x285   : > { %v872_v46 = vadd.f32 %v871_v37, %v836_v30 }
 0x287   : > { %v873_v49 = vadd.f32 %v872_v46, %v837_v45 }
 0x289   : > { %v874_v57 = vadd.f32 %v873_v49, %v838_v54 }
 0x28b   : > { %v875_v0 = vadd.f32 %v874_v57, %v839_v63 }
 0x28d   : > { %v876_v9 = vadd.f32 %v875_v0, %v840_v59 }
 0x28f   : > { %v877_v14 = vadd.f32 %v876_v9, %v841_v5 }
 0x291   : > { %v878_v21 = vadd.f32 %v877_v14, %v842_v11 }
 0x293   : > { %v879_v31 = vadd.f32 %v878_v21, %v843_v19 }
 0x295   : > { %v880_v1 = vadd.f32 %v879_v31, %v844_v26 }
 0x297   : > { %v882_v38 = vadd.f32 %v881_v35, %v880_v1 }
 0x299   : > { %v883_v41 = vrot.slane %v882_v38, 4 }
 0x29b   : > { %v884_v18 = vadd.f32 %v883_v41, %v882_v38 }
 0x29d   : > { %v885_v23 = vrot.slane %v884_v18, 2 }
 0x29f   : > { %v886_v30 = vadd.f32 %v885_v23, %v884_v18 }
 0x2a1   : > { %v887_v37 = vrot.slane %v886_v30, 1 }
 0x2a3   : > { %v888_v45 = vadd.f32 %v887_v37, %v886_v30 }
 0x2a5   : > { %1558 = vmatmul.mubr.f32.vlgmr.msra.gmra.mrb[30].mxu1 %v888_v45 }
 0x378   : > { %v955_v46 = vpop.f32.mrb[30].mxu1 }
 0x379   : > { %v1559_v54 = vpop.f32.mrb[31].mxu1  ;;  %v956_v49 = vadd.f32 1e-05, %v955_v46 }
 0x37b   : > { %1655 = vrsqrt.f32 %v956_v49 }
 0x385   : > { %v1656_v63 = vpop.eup %1655 }
 0x386   : > { %v963_v57 = vrot.slane %v1656_v63, %v770_v32 }
 0x388   : > { %v964_v59 = vmul.f32 %v963_v57, %v2033_v44  ;;  %v965_v0 = vmul.f32 %v963_v57, %v2036_v34  ;;  %v966_v5 = vmul.f32 %v963_v57, %v2039_v28  ;;  %v967_v9 = vmul.f32 %v963_v57, %v2042_v47 }
 0x389   : > { %v968_v11 = vmul.f32 %v963_v57, %v2045_v50  ;;  %v969_v14 = vmul.f32 %v963_v57, %v2048_v39  ;;  %v970_v19 = vmul.f32 %v963_v57, %v2051_v42  ;;  %v971_v21 = vmul.f32 %v963_v57, %v2054_v51 }
 0x38a   : > { %v972_v24 = vmul.f32 %v963_v57, %v2057_v55  ;;  %v973_v29 = vmul.f32 %v963_v57, %v2060_v60  ;;  %v974_v32 = vmul.f32 %v963_v57, %v2063_v2  ;;  %v975_v44 = vmul.f32 %v963_v57, %v2066_v7 }
 0x38b   : > { %v976_v34 = vmul.f32 %v963_v57, %v2069_v12  ;;  %v977_v28 = vmul.f32 %v963_v57, %v2072_v17  ;;  %v978_v47 = vmul.f32 %v963_v57, %v2075_v22  ;;  %v979_v50 = vmul.f32 %v963_v57, %v2078_v27  ;;  %v1342_v27 = vld [vmem:[%s2571_s3] ss:$0 sm:$0xff] }
 0x38c   : > { %v980_v39 = vmul.f32 %v963_v57, %v2081_v36  ;;  %v981_v42 = vmul.f32 %v963_v57, %v2084_v43  ;;  %v982_v51 = vmul.f32 %v963_v57, %v2087_v53  ;;  %v983_v55 = vmul.f32 %v963_v57, %v2090_v62 }
 0x38d   : > { %v984_v60 = vmul.f32 %v963_v57, %v2093_v6  ;;  %v985_v2 = vmul.f32 %v963_v57, %v2096_v15  ;;  %v986_v7 = vmul.f32 %v963_v57, %v2099_v20  ;;  %v987_v12 = vmul.f32 %v963_v57, %v2102_v25 }
 0x38e   : > { %v988_v17 = vmul.f32 %v963_v57, %v2105_v33  ;;  %v989_v22 = vmul.f32 %v963_v57, %v2108_v40  ;;  %v990_v36 = vmul.f32 %v963_v57, %v2111_v48  ;;  %v991_v43 = vmul.f32 %v963_v57, %v2114_v58 }
 0x38f   : > { %v992_v53 = vmul.f32 %v963_v57, %v2117_v4  ;;  %v993_v62 = vmul.f32 %v963_v57, %v2120_v10  ;;  %v994_v6 = vmul.f32 %v963_v57, %v2123_v16  ;;  %v995_v15 = vmul.f32 %v963_v57, %v2126_v52 }
 0x390   : > { %v996_v20 = vmul.f32 %v963_v57, %v2129_v56  ;;  %v997_v25 = vmul.f32 %v963_v57, %v2132_v61  ;;  %v998_v33 = vmul.f32 %v963_v57, %v2135_v3  ;;  %v999_v40 = vmul.f32 %v963_v57, %v2138_v8 }
 0x391   : > { %v1000_v48 = vmul.f32 %v963_v57, %v2141_v13  ;;  %v1008_v26 = vmul.f32 %v1342_v27, %v964_v59  ;;  %v1009_v58 = vmul.f32 %v1342_v27, %v965_v0  ;;  %v1010_v31 = vmul.f32 %v1342_v27, %v966_v5 }
 0x392   : > { %v1011_v4 = vmul.f32 %v1342_v27, %v967_v9  ;;  %v1012_v1 = vmul.f32 %v1342_v27, %v968_v11  ;;  %v1013_v10 = vmul.f32 %v1342_v27, %v969_v14  ;;  %v1014_v35 = vmul.f32 %v1342_v27, %v970_v19  ;;  %v1343_v9 = vld [vmem:[%s2572_s4] ss:$0 sm:$0xff] }
 0x393   : > { %v1015_v16 = vmul.f32 %v1342_v27, %v971_v21  ;;  %v1016_v38 = vmul.f32 %v1342_v27, %v972_v24  ;;  %v1017_v52 = vmul.f32 %v1342_v27, %v973_v29  ;;  %v1018_v41 = vmul.f32 %v1342_v27, %v974_v32 }
 0x394   : > { %v1019_v56 = vmul.f32 %v1342_v27, %v975_v44  ;;  %v1020_v18 = vmul.f32 %v1342_v27, %v976_v34  ;;  %v1021_v61 = vmul.f32 %v1342_v27, %v977_v28  ;;  %v1022_v23 = vmul.f32 %v1342_v27, %v978_v47 }
 0x395   : > { %v1023_v3 = vmul.f32 %v1342_v27, %v979_v50  ;;  %v1024_v30 = vmul.f32 %v1342_v27, %v980_v39  ;;  %v1025_v8 = vmul.f32 %v1342_v27, %v981_v42  ;;  %v1026_v37 = vmul.f32 %v1342_v27, %v982_v51 }
 0x396   : > { %v1027_v13 = vmul.f32 %v1342_v27, %v983_v55  ;;  %v1028_v45 = vmul.f32 %v1342_v27, %v984_v60  ;;  %v1029_v46 = vmul.f32 %v1342_v27, %v985_v2  ;;  %v1030_v54 = vmul.f32 %v1342_v27, %v986_v7 }
 0x397   : > { %v1031_v49 = vmul.f32 %v1342_v27, %v987_v12  ;;  %v1032_v63 = vmul.f32 %v1342_v27, %v988_v17  ;;  %v1033_v57 = vmul.f32 %v1342_v27, %v989_v22  ;;  %v1034_v59 = vmul.f32 %v1342_v27, %v990_v36 }
 0x398   : > { %v1035_v0 = vmul.f32 %v1342_v27, %v991_v43  ;;  %v1036_v5 = vmul.f32 %v1342_v27, %v992_v53  ;;  %v1037_v11 = vmul.f32 %v1342_v27, %v993_v62  ;;  %v1038_v14 = vmul.f32 %v1342_v27, %v994_v6 }
 0x399   : > { %v1039_v19 = vmul.f32 %v1342_v27, %v995_v15  ;;  %v1040_v21 = vmul.f32 %v1342_v27, %v996_v20  ;;  %v1041_v24 = vmul.f32 %v1342_v27, %v997_v25  ;;  %v1042_v29 = vmul.f32 %v1342_v27, %v998_v33 }
 0x39a   : > { %v1043_v32 = vmul.f32 %v1342_v27, %v999_v40  ;;  %v1044_v44 = vmul.f32 %v1342_v27, %v1000_v48  ;;  %v2263_v34 = vadd.f32 %v1343_v9, %v1008_v26  ;;  %v2265_v28 = vadd.f32 %v1343_v9, %v1009_v58 }
 0x39b   : > { %v2267_v47 = vadd.f32 %v1343_v9, %v1010_v31  ;;  %v2269_v50 = vadd.f32 %v1343_v9, %v1011_v4  ;;  %v2271_v39 = vadd.f32 %v1343_v9, %v1012_v1  ;;  %v2273_v42 = vadd.f32 %v1343_v9, %v1013_v10 }
 0x39c   : > { %v2275_v51 = vadd.f32 %v1343_v9, %v1014_v35  ;;  %v2277_v55 = vadd.f32 %v1343_v9, %v1015_v16  ;;  %v2279_v60 = vadd.f32 %v1343_v9, %v1016_v38  ;;  %v2281_v2 = vadd.f32 %v1343_v9, %v1017_v52 }
 0x39d   : > { %v2283_v7 = vadd.f32 %v1343_v9, %v1018_v41  ;;  %v2285_v12 = vadd.f32 %v1343_v9, %v1019_v56  ;;  %v2287_v17 = vadd.f32 %v1343_v9, %v1020_v18  ;;  %v2289_v22 = vadd.f32 %v1343_v9, %v1021_v61 }
 0x39e   : > { %v2291_v27 = vadd.f32 %v1343_v9, %v1022_v23  ;;  %v2293_v36 = vadd.f32 %v1343_v9, %v1023_v3  ;;  %v2295_v43 = vadd.f32 %v1343_v9, %v1024_v30  ;;  %v2297_v53 = vadd.f32 %v1343_v9, %v1025_v8 }
 0x39f   : > { %v2299_v62 = vadd.f32 %v1343_v9, %v1026_v37  ;;  %v2301_v6 = vadd.f32 %v1343_v9, %v1027_v13  ;;  %v2303_v15 = vadd.f32 %v1343_v9, %v1028_v45  ;;  %v2305_v20 = vadd.f32 %v1343_v9, %v1029_v46 }
 0x3a0   : > { %v2307_v25 = vadd.f32 %v1343_v9, %v1030_v54  ;;  %v2309_v33 = vadd.f32 %v1343_v9, %v1031_v49  ;;  %v2311_v40 = vadd.f32 %v1343_v9, %v1032_v63  ;;  %v2313_v48 = vadd.f32 %v1343_v9, %v1033_v57 }
 0x3a1   : > { %v2315_v26 = vadd.f32 %v1343_v9, %v1034_v59  ;;  %v2317_v58 = vadd.f32 %v1343_v9, %v1035_v0  ;;  %v2320_v31 = vadd.f32 %v1343_v9, %v1036_v5  ;;  %v2322_v4 = vadd.f32 %v1343_v9, %v1037_v11 }
 0x3a2   : > { %v2324_v1 = vadd.f32 %v1343_v9, %v1038_v14  ;;  %v2326_v10 = vadd.f32 %v1343_v9, %v1039_v19  ;;  %v2328_v35 = vadd.f32 %v1343_v9, %v1040_v21  ;;  %v2330_v16 = vadd.f32 %v1343_v9, %v1041_v24 }
 0x3a3   : > { %v2332_v38 = vadd.f32 %v1343_v9, %v1042_v29  ;;  %vm1089_vm4 = vcmp.ge.f32.partialorder %v2263_v34, 0.0  ;;  %vm1090_vm5 = vcmp.ge.f32.partialorder %v2265_v28, 0.0  ;;  %vm1091_vm6 = vcmp.ge.f32.partialorder %v2267_v47, 0.0 }
 0x3a4   : > { %vm1092_vm7 = vcmp.ge.f32.partialorder %v2269_v50, 0.0  ;;  %vm1093_vm8 = vcmp.ge.f32.partialorder %v2271_v39, 0.0  ;;  %vm1094_vm9 = vcmp.ge.f32.partialorder %v2273_v42, 0.0  ;;  %vm1095_vm10 = vcmp.ge.f32.partialorder %v2275_v51, 0.0 }
 0x3a5   : > { %vm1096_vm11 = vcmp.ge.f32.partialorder %v2277_v55, 0.0  ;;  %vm1097_vm12 = vcmp.ge.f32.partialorder %v2279_v60, 0.0  ;;  %v2348_v52 = vadd.f32 %v1343_v9, %v1043_v32  ;;  %v1126_v41 = vmul.f32 0.2, %v2263_v34 }
 0x3a6   : > { %v1127_v56 = vmul.f32 0.2, %v2265_v28  ;;  %v1128_v18 = vmul.f32 0.2, %v2267_v47  ;;  %v2354_v61 = vadd.f32 %v1343_v9, %v1044_v44  ;;  %vm1099_vm14 = vcmp.ge.f32.partialorder %v2283_v7, 0.0 }
 0x3a7   : > { %vm1100_vm15 = vcmp.ge.f32.partialorder %v2285_v12, 0.0  ;;  %v1129_v23 = vmul.f32 0.2, %v2269_v50  ;;  %v1130_v3 = vmul.f32 0.2, %v2271_v39  ;;  %vm1105_vm13 = vcmp.ge.f32.partialorder %v2295_v43, 0.0 }
 0x3a8   : > { %v1131_v30 = vmul.f32 0.2, %v2273_v42  ;;  %v1132_v8 = vmul.f32 0.2, %v2275_v51  ;;  %v1133_v37 = vmul.f32 0.2, %v2277_v55  ;;  %v1163_v45 = vsel %vm1089_vm4, %v2263_v34, %v1126_v41 }
 0x3a9   : > { %v1134_v13 = vmul.f32 0.2, %v2279_v60  ;;  %vm1106_vm0 = vcmp.ge.f32.partialorder %v2297_v53, 0.0  ;;  %v1135_v46 = vmul.f32 0.2, %v2281_v2  ;;  %v1164_v63 = vsel %vm1090_vm5, %v2265_v28, %v1127_v56  ;;  %1200 = vst [vmem:[%s2346_s26] sm:$0xff] %v1163_v45 }
 0x3aa   : > { %v1136_v54 = vmul.f32 0.2, %v2283_v7  ;;  %v1137_v49 = vmul.f32 0.2, %v2285_v12  ;;  %vm1110_vm4 = vcmp.ge.f32.partialorder %v2305_v20, 0.0  ;;  %v1165_v5 = vsel %vm1091_vm6, %v2267_v47, %v1128_v18  ;;  %1201 = vst [vmem:[%s2346_s26 + $0x8] sm:$0xff] %v1164_v63 }
 0x3ab   : > { %v1138_v57 = vmul.f32 0.2, %v2287_v17  ;;  %v1139_v59 = vmul.f32 0.2, %v2289_v22  ;;  %v1140_v0 = vmul.f32 0.2, %v2291_v27  ;;  %v1166_v19 = vsel %vm1092_vm7, %v2269_v50, %v1129_v23 }
 0x3ac   : > { %vm1114_vm5 = vcmp.ge.f32.partialorder %v2313_v48, 0.0  ;;  %v1141_v9 = vmul.f32 0.2, %v2293_v36  ;;  %v1142_v11 = vmul.f32 0.2, %v2295_v43  ;;  %1202 = vst [vmem:[%s2346_s26 + $0x10] sm:$0xff] %v1165_v5  ;;  %v1167_v32 = vsel %vm1093_vm8, %v2271_v39, %v1130_v3 }
 0x3ad   : > { %v1143_v14 = vmul.f32 0.2, %v2297_v53  ;;  %vm1118_vm6 = vcmp.ge.f32.partialorder %v2322_v4, 0.0  ;;  %v1144_v21 = vmul.f32 0.2, %v2299_v62  ;;  %1203 = vst [vmem:[%s2346_s26 + $0x18] sm:$0xff] %v1166_v19  ;;  %v1168_v47 = vsel %vm1094_vm9, %v2273_v42, %v1131_v30 }
 0x3ae   : > { %v1145_v24 = vmul.f32 0.2, %v2301_v6  ;;  %v1146_v29 = vmul.f32 0.2, %v2303_v15  ;;  %vm1122_vm7 = vcmp.ge.f32.partialorder %v2330_v16, 0.0  ;;  %vm1123_vm1 = vcmp.ge.f32.partialorder %v2332_v38, 0.0 }
 0x3af   : > { %vm1124_vm2 = vcmp.ge.f32.partialorder %v2348_v52, 0.0  ;;  %vm1125_vm3 = vcmp.ge.f32.partialorder %v2354_v61, 0.0  ;;  %v1147_v44 = vmul.f32 0.2, %v2305_v20  ;;  %v1148_v34 = vmul.f32 0.2, %v2307_v25 }
 0x3b0   : > { %v1149_v28 = vmul.f32 0.2, %v2309_v33  ;;  %1204 = vst [vmem:[%s2346_s26 + $0x20] sm:$0xff] %v1167_v32  ;;  %v1150_v50 = vmul.f32 0.2, %v2311_v40  ;;  %v1169_v56 = vsel %vm1095_vm10, %v2275_v51, %v1132_v8  ;;  %1205 = vst [vmem:[%s2346_s26 + $0x28] sm:$0xff] %v1168_v47  ;;  %v1170_v3 = vsel %vm1096_vm11, %v2277_v55, %v1133_v37 }
 0x3b1   : > { %v1151_v39 = vmul.f32 0.2, %v2313_v48  ;;  %v1152_v41 = vmul.f32 0.2, %v2315_v26  ;;  %v1153_v18 = vmul.f32 0.2, %v2317_v58  ;;  %v1171_v8 = vsel %vm1097_vm12, %v2279_v60, %v1134_v13 }
 0x3b2   : > { %v1154_v23 = vmul.f32 0.2, %v2320_v31  ;;  %v1155_v42 = vmul.f32 0.2, %v2322_v4  ;;  %1206 = vst [vmem:[%s2346_s26 + $0x30] sm:$0xff] %v1169_v56  ;;  %1207 = vst [vmem:[%s2346_s26 + $0x38] sm:$0xff] %v1170_v3  ;;  %v1173_v60 = vsel %vm1099_vm14, %v2283_v7, %v1136_v54  ;;  %v1174_v13 = vsel %vm1100_vm15, %v2285_v12, %v1137_v49 }
 0x3b3   : > { %v1156_v30 = vmul.f32 0.2, %v2324_v1  ;;  %v1157_v45 = vmul.f32 0.2, %v2326_v10  ;;  %v1158_v51 = vmul.f32 0.2, %v2328_v35  ;;  %v1179_v12 = vsel %vm1105_vm13, %v2295_v43, %v1142_v11 }
 0x3b4   : > { %v1159_v63 = vmul.f32 0.2, %v2330_v16  ;;  %v1160_v55 = vmul.f32 0.2, %v2332_v38  ;;  %v1161_v37 = vmul.f32 0.2, %v2348_v52  ;;  %v1184_v43 = vsel %vm1110_vm4, %v2305_v20, %v1147_v44 }
 0x3b5   : > { %vm2574_vm8 = vcmp.ge.f32.partialorder %v2281_v2, 0.0  ;;  %1208 = vst [vmem:[%s2346_s26 + $0x40] sm:$0xff] %v1171_v8  ;;  %v1162_v19 = vmul.f32 0.2, %v2354_v61  ;;  %vm2575_vm9 = vcmp.ge.f32.partialorder %v2287_v17, 0.0  ;;  %vm2576_vm10 = vcmp.ge.f32.partialorder %v2289_v22, 0.0 }
 0x3b6   : > { %v1172_v5 = vsel %vm2574_vm8, %v2281_v2, %v1135_v46  ;;  %v1175_v32 = vsel %vm2575_vm9, %v2287_v17, %v1138_v57  ;;  %v1176_v2 = vsel %vm2576_vm10, %v2289_v22, %v1139_v59  ;;  %vm2577_vm11 = vcmp.ge.f32.partialorder %v2291_v27, 0.0  ;;  %1210 = vst [vmem:[%s2346_s26 + $0x50] sm:$0xff] %v1173_v60  ;;  %1211 = vst [vmem:[%s2346_s26 + $0x58] sm:$0xff] %v1174_v13 }
 0x3b7   : > { %1209 = vst [vmem:[%s2346_s26 + $0x48] sm:$0xff] %v1172_v5  ;;  %v1177_v7 = vsel %vm2577_vm11, %v2291_v27, %v1140_v0  ;;  %vm2578_vm12 = vcmp.ge.f32.partialorder %v2293_v36, 0.0  ;;  %1212 = vst [vmem:[%s2346_s26 + $0x60] sm:$0xff] %v1175_v32  ;;  %v1180_v17 = vsel %vm1106_vm0, %v2297_v53, %v1143_v14  ;;  %vm2579_vm14 = vcmp.ge.f32.partialorder %v2299_v62, 0.0 }
 0x3b8   : > { %v1178_v46 = vsel %vm2578_vm12, %v2293_v36, %v1141_v9  ;;  %v1181_v22 = vsel %vm2579_vm14, %v2299_v62, %v1144_v21  ;;  %vm2580_vm15 = vcmp.ge.f32.partialorder %v2301_v6, 0.0  ;;  %vm2581_vm13 = vcmp.ge.f32.partialorder %v2303_v15, 0.0  ;;  %1213 = vst [vmem:[%s2346_s26 + $0x68] sm:$0xff] %v1176_v2  ;;  %1214 = vst [vmem:[%s2346_s26 + $0x70] sm:$0xff] %v1177_v7 }
 0x3b9   : > { %v1182_v27 = vsel %vm2580_vm15, %v2301_v6, %v1145_v24  ;;  %v1183_v36 = vsel %vm2581_vm13, %v2303_v15, %v1146_v29  ;;  %1215 = vst [vmem:[%s2346_s26 + $0x78] sm:$0xff] %v1178_v46  ;;  %1216 = vst [vmem:[%s2346_s26 + $0x80] sm:$0xff] %v1179_v12  ;;  %vm2582_vm0 = vcmp.ge.f32.partialorder %v2307_v25, 0.0  ;;  %vm2583_vm8 = vcmp.ge.f32.partialorder %v2309_v33, 0.0 }
 0x3ba   : > { %v1185_v53 = vsel %vm2582_vm0, %v2307_v25, %v1148_v34  ;;  %v1186_v62 = vsel %vm2583_vm8, %v2309_v33, %v1149_v28  ;;  %vm2584_vm9 = vcmp.ge.f32.partialorder %v2311_v40, 0.0  ;;  %1217 = vst [vmem:[%s2346_s26 + $0x88] sm:$0xff] %v1180_v17  ;;  %1218 = vst [vmem:[%s2346_s26 + $0x90] sm:$0xff] %v1181_v22  ;;  %v1188_v15 = vsel %vm1114_vm5, %v2313_v48, %v1151_v39 }
 0x3bb   : > { %v1187_v6 = vsel %vm2584_vm9, %v2311_v40, %v1150_v50  ;;  %1219 = vst [vmem:[%s2346_s26 + $0x98] sm:$0xff] %v1182_v27  ;;  %1220 = vst [vmem:[%s2346_s26 + $0xa0] sm:$0xff] %v1183_v36  ;;  %vm2585_vm4 = vcmp.ge.f32.partialorder %v2315_v26, 0.0  ;;  %vm2586_vm10 = vcmp.ge.f32.partialorder %v2317_v58, 0.0  ;;  %vm2587_vm11 = vcmp.ge.f32.partialorder %v2320_v31, 0.0 }
 0x3bc   : > { %v1189_v20 = vsel %vm2585_vm4, %v2315_v26, %v1152_v41  ;;  %v1190_v25 = vsel %vm2586_vm10, %v2317_v58, %v1153_v18  ;;  %v1191_v33 = vsel %vm2587_vm11, %v2320_v31, %v1154_v23  ;;  %1221 = vst [vmem:[%s2346_s26 + $0xa8] sm:$0xff] %v1184_v43  ;;  %1222 = vst [vmem:[%s2346_s26 + $0xb0] sm:$0xff] %v1185_v53  ;;  %vm2588_vm5 = vcmp.ge.f32.partialorder %v2324_v1, 0.0 }
 0x3bd   : > { %1223 = vst [vmem:[%s2346_s26 + $0xb8] sm:$0xff] %v1186_v62  ;;  %1224 = vst [vmem:[%s2346_s26 + $0xc0] sm:$0xff] %v1187_v6  ;;  %v1192_v40 = vsel %vm1118_vm6, %v2322_v4, %v1155_v42  ;;  %v1193_v48 = vsel %vm2588_vm5, %v2324_v1, %v1156_v30  ;;  %vm2589_vm12 = vcmp.ge.f32.partialorder %v2326_v10, 0.0  ;;  %vm2590_vm14 = vcmp.ge.f32.partialorder %v2328_v35, 0.0 }
 0x3be   : > { %v1194_v26 = vsel %vm2589_vm12, %v2326_v10, %v1157_v45  ;;  %v1195_v58 = vsel %vm2590_vm14, %v2328_v35, %v1158_v51  ;;  %1225 = vst [vmem:[%s2346_s26 + $0xc8] sm:$0xff] %v1188_v15  ;;  %1226 = vst [vmem:[%s2346_s26 + $0xd0] sm:$0xff] %v1189_v20  ;;  %v1196_v31 = vsel %vm1122_vm7, %v2330_v16, %v1159_v63 }
 0x3bf   : > { %1227 = vst [vmem:[%s2346_s26 + $0xd8] sm:$0xff] %v1190_v25  ;;  %1228 = vst [vmem:[%s2346_s26 + $0xe0] sm:$0xff] %v1191_v33  ;;  %v1197_v4 = vsel %vm1123_vm1, %v2332_v38, %v1160_v55  ;;  %v1198_v1 = vsel %vm1124_vm2, %v2348_v52, %v1161_v37  ;;  %v1199_v10 = vsel %vm1125_vm3, %v2354_v61, %v1162_v19 }
 0x3c0   : > { %1229 = vst [vmem:[%s2346_s26 + $0xe8] sm:$0xff] %v1192_v40  ;;  %1230 = vst [vmem:[%s2346_s26 + $0xf0] sm:$0xff] %v1193_v48 }
 0x3c1   : > { %1231 = vst [vmem:[%s2346_s26 + $0xf8] sm:$0xff] %v1194_v26  ;;  %1232 = vst [vmem:[%s2346_s26 + $0x100] sm:$0xff] %v1195_v58 }
 0x3c2   : > { %1233 = vst [vmem:[%s2346_s26 + $0x108] sm:$0xff] %v1196_v31  ;;  %1234 = vst [vmem:[%s2346_s26 + $0x110] sm:$0xff] %v1197_v4 }
 0x3c3   : > { %1235 = vst [vmem:[%s2346_s26 + $0x118] sm:$0xff] %v1198_v1  ;;  %1236 = vst [vmem:[%s2346_s26 + $0x120] sm:$0x1] %v1199_v10 }
 0x3c4 PF: > { %s15_s18 = sadd.s32 1, %s1663_s18  }
 0x3c5   : > { %p12_p4 = scmp.ge.s32.totalorder %s15_s18, 4  }
 0x3c7   :  { %14 = sbr.rel (!%p12_p4) target bundleno = 1 (0x1), region = 70 }

// kernel: unet2d_forward.21
= control target key start
LH: loop header
LB: loop body
LE: loop exit
PB: predicated region body
PF: predicated region fallthrough
CT: control target
= control target key end

     0   :  { %s1053_s18 = smov 0   ;;  %s1175_s0 = inlined_call_operand.vmem [shape: bf16[2,81,72], index: 0, kind: input, shape index: {}]   ;;  %s1176_s1 = inlined_call_operand.vmem [shape: bf16[72,128], index: 1, kind: input, shape index: {}]   ;;  %s1177_s2 = inlined_call_operand.vmem [shape: f32[128,128], index: 2, kind: input, shape index: {}]   ;;  %s1178_s3 = inlined_call_operand.vmem [shape: f32[1,128], index: 3, kind: input, shape index: {}]   ;;  %s1179_s4 = inlined_call_operand.vmem [shape: f32[1,128], index: 4, kind: input, shape index: {}]   ;;  %s1180_s5 = inlined_call_operand.vmem [shape: f32[2,81,128], index: 5, kind: output, shape index: {}]  }
   0x1 LB: > { %s772_s19 = sadd.s32 4294967295, %s1018_s18   ;;  %p776_p0 = scmp.ge.s32.totalorder %s1018_s18, 1  ;;  %s1018_s18 = sphi %s1053_s18, %s15_s18  }
   0x2   : > { %p187_p1 = scmp.lt.s32.totalorder %s1018_s18, 3 }
   0x4   : > { %p188_p2 = pnand %p776_p0, %p187_p1 }
   0x5   : > { %v999_v0 = vld [vmem:[%s1176_s1] sm:$0xff] (!%p188_p2)   ;;  %v1000_v1 = vld [vmem:[%s1176_s1 + $0x8] sm:$0xff] (!%p188_p2)   ;;  %p215_p3 = scmp.lt.s32.totalorder (!%p188_p2), %s772_s19, 1  ;;  %v1001_v2 = vld [vmem:[%s1176_s1 + $0x10] sm:$0xff] (!%p188_p2)   ;;  %vm301_vm0 = vcmask (!%p188_p2), 588800   ;;  %vm320_vm1 = vcmask (!%p188_p2), 1043456  }
   0x6   : > { %191 = sbr.rel (%p188_p2) target bundleno = 772 (0x304), region = 40  ;;  %845 = vmatprep.subr.bf16.mxu0 (!%p188_p2), %v999_v0  ;;  %v1002_v3 = vld [vmem:[%s1176_s1 + $0x18] sm:$0xff] (!%p188_p2)   ;;  %v1003_v5 = vld [vmem:[%s1176_s1 + $0x20] ss:$0 sps:$4 sm:$0xff] (!%p188_p2)   ;;  %v423_v13 = vld [vmem:[%s1177_s2 + $0x8] sm:$0xff] (!%p188_p2)  ;;  %v1020_v15 = vmov (!%p188_p2), 0.0|0.0  }
   0x7   : > { %846 = vmatpush3.bf16.msra.mxu0 (!%p188_p2), %v999_v0  ;;  %v322_v6 = vsel (!%p188_p2), %vm320_vm1, %v1003_v5, 0  ;;  %v422_v12 = vld [vmem:[%s1177_s2] sm:$0xff] (!%p188_p2)  ;;  %937 = vmatprep.subr.bf16.mxu1 (!%p188_p2), %v1020_v15  ;;  %v424_v16 = vld [vmem:[%s1177_s2 + $0x10] sm:$0xff] (!%p188_p2)  ;;  %v425_v17 = vld [vmem:[%s1177_s2 + $0x18] sm:$0xff] (!%p188_p2)  ;;  %vm1021_vm2 = vmmov (!%p188_p2), 0   ;;  %v1022_v37 = vmov (!%p188_p2), 0.0  }
   0x8   : > { %847 = vmatprep.subr.bf16.mxu0 (!%p188_p2), %v1000_v1  ;;  %v938_v14 = vpack.c.bf16 (!%p188_p2), %v423_v13, %v422_v12  ;;  %v941_v18 = vpack.c.bf16 (!%p188_p2), %v425_v17, %v424_v16  ;;  %v426_v19 = vld [vmem:[%s1177_s2 + $0x20] sm:$0xff] (!%p188_p2)  ;;  %v427_v20 = vld [vmem:[%s1177_s2 + $0x28] sm:$0xff] (!%p188_p2)  ;;  %v428_v22 = vld [vmem:[%s1177_s2 + $0x30] sm:$0xff] (!%p188_p2)  ;;  %899 = vmatprep.mubr.msk.f32.mxu1 (!%p188_p2), %vm1021_vm2, %v1022_v37  ;;  %vm413_vm3 = vcmask (!%p188_p2), 1040384  }
   0x9   : > { %v944_v21 = vpack.c.bf16 (!%p188_p2), %v427_v20, %v426_v19  ;;  %v429_v23 = vld [vmem:[%s1177_s2 + $0x38] sm:$0xff] (!%p188_p2)  ;;  %v430_v25 = vld [vmem:[%s1177_s2 + $0x40] sm:$0xff] (!%p188_p2)  ;;  %v431_v26 = vld [vmem:[%s1177_s2 + $0x48] sm:$0xff] (!%p188_p2) }
   0xa   : > { %939 = vmatpush3.bf16.msra.mxu1 (!%p188_p2), %v938_v14  ;;  %v947_v24 = vpack.c.bf16 (!%p188_p2), %v429_v23, %v428_v22  ;;  %v950_v27 = vpack.c.bf16 (!%p188_p2), %v431_v26, %v430_v25  ;;  %v432_v28 = vld [vmem:[%s1177_s2 + $0x50] sm:$0xff] (!%p188_p2)  ;;  %v433_v29 = vld [vmem:[%s1177_s2 + $0x58] sm:$0xff] (!%p188_p2)  ;;  %v434_v31 = vld [vmem:[%s1177_s2 + $0x60] sm:$0xff] (!%p188_p2) }
   0xb   : > { %848 = vmatpush3.bf16.msra.mxu0 (!%p188_p2), %v1000_v1  ;;  %940 = vmatprep.subr.bf16.mxu1 (!%p188_p2), %v1020_v15  ;;  %v953_v30 = vpack.c.bf16 (!%p188_p2), %v433_v29, %v432_v28  ;;  %v435_v32 = vld [vmem:[%s1177_s2 + $0x68] sm:$0xff] (!%p188_p2)  ;;  %v436_v34 = vld [vmem:[%s1177_s2 + $0x70] sm:$0xff] (!%p188_p2)  ;;  %v437_v35 = vld [vmem:[%s1177_s2 + $0x78] sm:$0xff] (!%p188_p2) }
   0xc   : > { %849 = vmatprep.subr.bf16.mxu0 (!%p188_p2), %v1001_v2  ;;  %v956_v33 = vpack.c.bf16 (!%p188_p2), %v435_v32, %v434_v31  ;;  %v959_v36 = vpack.c.bf16 (!%p188_p2), %v437_v35, %v436_v34 }
   0xd   : > { %s1182_s19 = smov (!%p215_p3, %s772_s19), 1 }
   0xe   : > { %s986_s26 = smul.u32 44, %s1182_s19  ;;  %942 = vmatpush3.bf16.msra.mxu1 %v941_v18 }
   0xf   : > { %850 = vmatpush3.bf16.msra.mxu0 %v1001_v2  ;;  %943 = vmatprep.subr.bf16.mxu1 %v1020_v15  ;;  %s987_s24 = smul.u32 88, %s1182_s19 }
  0x10   : > { %s219_s6 = scalar_lea.vmem %s1175_s0, %s986_s26  ;;  %851 = vmatprep.subr.bf16.mxu0 %v1002_v3 }
  0x11   : > { %v1004_v4 = vld [vmem:[%s219_s6] sm:$0xff]   ;;  %v1005_v7 = vld [vmem:[%s219_s6 + $0x8] sm:$0xff]   ;;  %v1006_v8 = vld [vmem:[%s219_s6 + $0x10] sm:$0xff]   ;;  %s1148_s19 = scalar_lea.vmem %s1180_s5, %s987_s24 }
  0x12   : > { %855 = vmatprep.mubr.msk.bf16.mxu0 %vm301_vm0, %v1004_v4  ;;  %v1007_v9 = vld [vmem:[%s219_s6 + $0x18] sm:$0xff]   ;;  %v1008_v10 = vld [vmem:[%s219_s6 + $0x20] sm:$0xff]   ;;  %v1009_v11 = vld [vmem:[%s219_s6 + $0x28] ss:$0 sps:$4 sm:$0x11]   ;;  %945 = vmatpush3.bf16.msra.mxu1 %v944_v21 }
  0x13   : > { %852 = vmatpush3.bf16.msra.mxu0 %v1002_v3  ;;  %946 = vmatprep.subr.bf16.mxu1 %v1020_v15  ;;  %v508_v3 = vlaneseq }
  0x14   : > { %985 = vmatprep.subr.msk.bf16.mxu0 %vm320_vm1, %v1003_v5 }
  0x15   : > { %v509_v4 = vshrl.u32 %v508_v3, 7 }
  0x16   : > { %948 = vmatpush3.bf16.msra.mxu1 %v947_v24 }
  0x17   : > { %854 = vmatpush3.bf16.msra.mxu0 %v322_v6  ;;  %949 = vmatprep.subr.bf16.mxu1 %v1020_v15  ;;  %v510_v5 = vsub.s32 0, %v509_v4 }
  0x18   : > { %961 = vmatprep.subr.bf16.mxu0 %v1020_v15 }
  0x1a   : > { %856 = vmatmul.mubr.msk.bf16.vlgmr.msra.gmra.mrb[0].mxu0 %vm301_vm0, %v1005_v7  ;;  %951 = vmatpush3.bf16.msra.mxu1 %v950_v27 }
  0x1b   : > { %859 = vmatprep.mubr.msk.bf16.mxu0 %vm301_vm0, %v1006_v8  ;;  %963 = vmatpush3.bf16.msra.mxu0 %v938_v14 }
  0x1c   : > { %964 = vmatprep.subr.bf16.mxu0 %v1020_v15  ;;  %952 = vmatprep.subr.bf16.mxu1 %v1020_v15 }
  0x1e   : > { %954 = vmatpush3.bf16.msra.mxu1 %v953_v30 }
  0x1f   : > { %966 = vmatpush3.bf16.msra.mxu0 %v941_v18  ;;  %955 = vmatprep.subr.bf16.mxu1 %v1020_v15 }
  0x20   : > { %967 = vmatprep.subr.bf16.mxu0 %v1020_v15 }
  0x22   : > { %860 = vmatmul.mubr.msk.bf16.gmra.mrb[4].mxu0 %vm301_vm0, %v1007_v9  ;;  %957 = vmatpush3.bf16.msra.mxu1 %v956_v33 }
  0x23   : > { %863 = vmatprep.mubr.msk.bf16.mxu0 %vm301_vm0, %v1008_v10  ;;  %969 = vmatpush3.bf16.msra.mxu0 %v944_v21 }
  0x24   : > { %970 = vmatprep.subr.bf16.mxu0 %v1020_v15  ;;  %958 = vmatprep.subr.bf16.mxu1 %v1020_v15 }
  0x26   : > { %960 = vmatpush3.bf16.msra.mxu1 %v959_v36 }
  0x27   : > { %972 = vmatpush3.bf16.msra.mxu0 %v947_v24 }
  0x28   : > { %973 = vmatprep.subr.bf16.mxu0 %v1020_v15 }
  0x2a   : > { %864 = vmatmul.mubr.msk.bf16.gmra.mrb[8].mxu0 %vm301_vm0, %v1009_v11 }
  0x2b   : > { %975 = vmatpush3.bf16.msra.mxu0 %v950_v27  ;;  %934 = vmatprep.mubr.msk.f32.mxu0 %vm1021_vm2, %v1022_v37 }
  0x2c   : > { %976 = vmatprep.subr.bf16.mxu0 %v1020_v15 }
  0x2f   : > { %978 = vmatpush3.bf16.msra.mxu0 %v953_v30 }
  0x30   : > { %979 = vmatprep.subr.bf16.mxu0 %v1020_v15 }
  0x33   : > { %981 = vmatpush3.bf16.msra.mxu0 %v956_v33 }
  0x34   : > { %982 = vmatprep.subr.bf16.mxu0 %v1020_v15 }
  0x37   : > { %984 = vmatpush3.bf16.msra.mxu0 %v959_v36 }
  0xed   : > { %v857_v38 = vpop.f32.mrb[0].mxu0 }
  0xee   : > { %v358_v39 = vpop.f32.mrb[1].mxu0 }
  0xef   : > { %v858_v40 = vpop.f32.mrb[2].mxu0 }
  0xf0   : > { %v361_v41 = vpop.f32.mrb[3].mxu0 }
  0xf1   : > { %v404_v42 = vadd.f32 %v361_v41, %v358_v39 }
  0xf3   : > { %v405_v43 = vadd.f32 %v857_v38, %v404_v42 }
  0xf5   : > { %v861_v44 = vpop.f32.mrb[4].mxu0  ;;  %v406_v45 = vadd.f32 %v858_v40, %v405_v43 }
  0xf6   : > { %v374_v46 = vpop.f32.mrb[5].mxu0 }
  0xf7   : > { %v407_v47 = vadd.f32 %v406_v45, %v374_v46  ;;  %v862_v48 = vpop.f32.mrb[6].mxu0 }
  0xf8   : > { %v377_v49 = vpop.f32.mrb[7].mxu0 }
  0xf9   : > { %v408_v50 = vadd.f32 %v407_v47, %v377_v49 }
  0xfb   : > { %v409_v51 = vadd.f32 %v861_v44, %v408_v50 }
  0xfd   : > { %v865_v52 = vpop.f32.mrb[8].mxu0  ;;  %v410_v53 = vadd.f32 %v862_v48, %v409_v51 }
  0xfe   : > { %v390_v54 = vpop.f32.mrb[9].mxu0  ;;  %v414_v59 = vsel %vm413_vm3, %v865_v52, 0.0 }
  0xff   : > { %v411_v55 = vadd.f32 %v410_v53, %v390_v54  ;;  %v866_v56 = vpop.f32.mrb[10].mxu0  ;;  %v796_v53 = vld [vmem:[%s1178_s3] ss:$0 sm:$0xff] }
 0x100   : > { %v393_v57 = vpop.f32.mrb[11].mxu0 }
 0x101   : > { %v412_v58 = vadd.f32 %v411_v55, %v393_v57 }
 0x103   : > { %v415_v60 = vadd.f32 %v414_v59, %v412_v58 }
 0x105   : > { %v416_v61 = vrot.slane %v415_v60, 4 }
 0x107   : > { %v417_v62 = vadd.f32 %v416_v61, %v415_v60 }
 0x109   : > { %v418_v63 = vrot.slane %v417_v62, 2 }
 0x10b   : > { %v419_v0 = vadd.f32 %v418_v63, %v417_v62 }
 0x10d   : > { %v420_v1 = vrot.slane %v419_v0, 1 }
 0x10f   : > { %v421_v2 = vadd.f32 %v420_v1, %v419_v0 }
 0x111   : > { %900 = vmatmul.mubr.f32.vlgmr.msra.gmra.mrb[0].mxu1 %v421_v2  ;;  %v797_v2 = vld [vmem:[%s1179_s4] ss:$0 sm:$0xff] }
 0x1e4   : > { %v504_v6 = vpop.f32.mrb[0].mxu1 }
 0x1e5   : > { %v511_v7 = vrot.slane %v504_v6, %v510_v5  ;;  %v901_v8 = vpop.f32.mrb[1].mxu1 }
 0x1e7   : > { %v512_v9 = vsub.f32 %v358_v39, %v511_v7  ;;  %v513_v10 = vsub.f32 %v361_v41, %v511_v7  ;;  %v514_v11 = vsub.f32 %v857_v38, %v511_v7  ;;  %v515_v12 = vsub.f32 %v858_v40, %v511_v7 }
 0x1e8   : > { %v516_v13 = vsub.f32 %v374_v46, %v511_v7  ;;  %v517_v14 = vsub.f32 %v377_v49, %v511_v7  ;;  %v518_v15 = vsub.f32 %v861_v44, %v511_v7  ;;  %v519_v16 = vsub.f32 %v862_v48, %v511_v7 }
 0x1e9   : > { %v520_v17 = vsub.f32 %v390_v54, %v511_v7  ;;  %v521_v18 = vsub.f32 %v393_v57, %v511_v7  ;;  %v522_v19 = vsub.f32 %v865_v52, %v511_v7  ;;  %v523_v20 = vmul.f32 %v512_v9, %v512_v9 }
 0x1ea   : > { %v524_v21 = vmul.f32 %v513_v10, %v513_v10  ;;  %v525_v22 = vmul.f32 %v514_v11, %v514_v11  ;;  %v526_v24 = vmul.f32 %v515_v12, %v515_v12  ;;  %v527_v26 = vmul.f32 %v516_v13, %v516_v13 }
 0x1eb   : > { %v528_v28 = vmul.f32 %v517_v14, %v517_v14  ;;  %v529_v30 = vmul.f32 %v518_v15, %v518_v15  ;;  %v530_v32 = vmul.f32 %v519_v16, %v519_v16  ;;  %v531_v34 = vmul.f32 %v520_v17, %v520_v17 }
 0x1ec   : > { %v534_v23 = vadd.f32 %v524_v21, %v523_v20  ;;  %v533_v36 = vmul.f32 %v522_v19, %v522_v19  ;;  %v532_v37 = vmul.f32 %v521_v18, %v521_v18 }
 0x1ee   : > { %v535_v25 = vadd.f32 %v534_v23, %v525_v22  ;;  %v543_v40 = vsel %vm413_vm3, %v533_v36, 0.0 }
 0x1f0   : > { %v536_v27 = vadd.f32 %v535_v25, %v526_v24 }
 0x1f2   : > { %v537_v29 = vadd.f32 %v536_v27, %v527_v26 }
 0x1f4   : > { %v538_v31 = vadd.f32 %v537_v29, %v528_v28 }
 0x1f6   : > { %v539_v33 = vadd.f32 %v538_v31, %v529_v30 }
 0x1f8   : > { %v540_v35 = vadd.f32 %v539_v33, %v530_v32 }
 0x1fa   : > { %v541_v38 = vadd.f32 %v540_v35, %v531_v34 }
 0x1fc   : > { %v542_v39 = vadd.f32 %v541_v38, %v532_v37 }
 0x1fe   : > { %v544_v41 = vadd.f32 %v543_v40, %v542_v39 }
 0x200   : > { %v545_v42 = vrot.slane %v544_v41, 4 }
 0x202   : > { %v546_v43 = vadd.f32 %v545_v42, %v544_v41 }
 0x204   : > { %v547_v44 = vrot.slane %v546_v43, 2 }
 0x206   : > { %v548_v45 = vadd.f32 %v547_v44, %v546_v43 }
 0x208   : > { %v549_v46 = vrot.slane %v548_v45, 1 }
 0x20a   : > { %v550_v47 = vadd.f32 %v549_v46, %v548_v45 }
 0x20c   : > { %935 = vmatmul.mubr.f32.vlgmr.msra.gmra.mrb[12].mxu0 %v550_v47 }
 0x2df   : > { %v617_v48 = vpop.f32.mrb[12].mxu0 }
 0x2e0   : > { %v618_v49 = vadd.f32 1e-05, %v617_v48  ;;  %v936_v50 = vpop.f32.mrb[13].mxu0 }
 0x2e2   : > { %1010 = vrsqrt.f32 %v618_v49 }
 0x2ec   : > { %v1011_v51 = vpop.eup %1010 }
 0x2ed   : > { %v625_v52 = vrot.slane %v1011_v51, %v510_v5 }
 0x2ef   : > { %v626_v54 = vmul.f32 %v625_v52, %v512_v9  ;;  %v627_v55 = vmul.f32 %v625_v52, %v513_v10  ;;  %v628_v56 = vmul.f32 %v625_v52, %v514_v11  ;;  %v629_v57 = vmul.f32 %v625_v52, %v515_v12 }
 0x2f0   : > { %v630_v58 = vmul.f32 %v625_v52, %v516_v13  ;;  %v631_v59 = vmul.f32 %v625_v52, %v517_v14  ;;  %v632_v60 = vmul.f32 %v625_v52, %v518_v15  ;;  %v633_v61 = vmul.f32 %v625_v52, %v519_v16 }
 0x2f1   : > { %v634_v62 = vmul.f32 %v625_v52, %v520_v17  ;;  %v635_v63 = vmul.f32 %v625_v52, %v521_v18  ;;  %v636_v0 = vmul.f32 %v625_v52, %v522_v19  ;;  %v644_v1 = vmul.f32 %v796_v53, %v626_v54 }
 0x2f2   : > { %v645_v3 = vmul.f32 %v796_v53, %v627_v55  ;;  %v646_v4 = vmul.f32 %v796_v53, %v628_v56  ;;  %v647_v5 = vmul.f32 %v796_v53, %v629_v57  ;;  %v648_v6 = vmul.f32 %v796_v53, %v630_v58 }
 0x2f3   : > { %v649_v7 = vmul.f32 %v796_v53, %v631_v59  ;;  %v650_v8 = vmul.f32 %v796_v53, %v632_v60  ;;  %v651_v9 = vmul.f32 %v796_v53, %v633_v61  ;;  %v652_v10 = vmul.f32 %v796_v53, %v634_v62 }
 0x2f4   : > { %v653_v11 = vmul.f32 %v796_v53, %v635_v63  ;;  %v654_v12 = vmul.f32 %v796_v53, %v636_v0  ;;  %v662_v13 = vadd.f32 %v797_v2, %v644_v1  ;;  %v663_v14 = vadd.f32 %v797_v2, %v645_v3 }
 0x2f5   : > { %v664_v15 = vadd.f32 %v797_v2, %v646_v4  ;;  %v665_v16 = vadd.f32 %v797_v2, %v647_v5  ;;  %v666_v17 = vadd.f32 %v797_v2, %v648_v6  ;;  %v667_v18 = vadd.f32 %v797_v2, %v649_v7 }
 0x2f6   : > { %v668_v19 = vadd.f32 %v797_v2, %v650_v8  ;;  %v669_v20 = vadd.f32 %v797_v2, %v651_v9  ;;  %v670_v21 = vadd.f32 %v797_v2, %v652_v10  ;;  %v671_v22 = vadd.f32 %v797_v2, %v653_v11 }
 0x2f7   : > { %v672_v23 = vadd.f32 %v797_v2, %v654_v12  ;;  %vm673_vm4 = vcmp.ge.f32.partialorder %v662_v13, 0.0  ;;  %vm674_vm5 = vcmp.ge.f32.partialorder %v663_v14, 0.0  ;;  %vm675_vm6 = vcmp.ge.f32.partialorder %v664_v15, 0.0 }
 0x2f8   : > { %vm676_vm7 = vcmp.ge.f32.partialorder %v665_v16, 0.0  ;;  %vm677_vm8 = vcmp.ge.f32.partialorder %v666_v17, 0.0  ;;  %vm678_vm9 = vcmp.ge.f32.partialorder %v667_v18, 0.0  ;;  %vm679_vm10 = vcmp.ge.f32.partialorder %v668_v19, 0.0 }
 0x2f9   : > { %vm680_vm11 = vcmp.ge.f32.partialorder %v669_v20, 0.0  ;;  %vm681_vm12 = vcmp.ge.f32.partialorder %v670_v21, 0.0  ;;  %vm682_vm13 = vcmp.ge.f32.partialorder %v671_v22, 0.0  ;;  %vm683_vm14 = vcmp.ge.f32.partialorder %v672_v23, 0.0 }
 0x2fa   : > { %v684_v24 = vmul.f32 0.2, %v662_v13  ;;  %v685_v25 = vmul.f32 0.2, %v663_v14  ;;  %v686_v26 = vmul.f32 0.2, %v664_v15 }
 0x2fb   : > { %v687_v27 = vmul.f32 0.2, %v665_v16  ;;  %v688_v28 = vmul.f32 0.2, %v666_v17  ;;  %v689_v29 = vmul.f32 0.2, %v667_v18 }
 0x2fc   : > { %v690_v30 = vmul.f32 0.2, %v668_v19  ;;  %v691_v31 = vmul.f32 0.2, %v669_v20  ;;  %v692_v32 = vmul.f32 0.2, %v670_v21  ;;  %v695_v33 = vsel %vm673_vm4, %v662_v13, %v684_v24 }
 0x2fd   : > { %v693_v34 = vmul.f32 0.2, %v671_v22  ;;  %v694_v35 = vmul.f32 0.2, %v672_v23  ;;  %v696_v36 = vsel %vm674_vm5, %v663_v14, %v685_v25  ;;  %v697_v37 = vsel %vm675_vm6, %v664_v15, %v686_v26  ;;  %706 = vst [vmem:[%s1148_s19] sm:$0xff] %v695_v33 }
 0x2fe   : > { %v698_v38 = vsel %vm676_vm7, %v665_v16, %v687_v27  ;;  %v699_v39 = vsel %vm677_vm8, %v666_v17, %v688_v28  ;;  %v700_v40 = vsel %vm678_vm9, %v667_v18, %v689_v29  ;;  %v701_v41 = vsel %vm679_vm10, %v668_v19, %v690_v30  ;;  %707 = vst [vmem:[%s1148_s19 + $0x8] sm:$0xff] %v696_v36 }
 0x2ff   : > { %708 = vst [vmem:[%s1148_s19 + $0x10] sm:$0xff] %v697_v37  ;;  %v702_v42 = vsel %vm680_vm11, %v669_v20, %v691_v31  ;;  %v703_v43 = vsel %vm681_vm12, %v670_v21, %v692_v32  ;;  %v704_v44 = vsel %vm682_vm13, %v671_v22, %v693_v34  ;;  %v705_v45 = vsel %vm683_vm14, %v672_v23, %v694_v35 }
 0x300   : > { %709 = vst [vmem:[%s1148_s19 + $0x18] sm:$0xff] %v698_v38  ;;  %710 = vst [vmem:[%s1148_s19 + $0x20] sm:$0xff] %v699_v39 }
 0x301   : > { %711 = vst [vmem:[%s1148_s19 + $0x28] sm:$0xff] %v700_v40  ;;  %712 = vst [vmem:[%s1148_s19 + $0x30] sm:$0xff] %v701_v41 }
 0x302   : > { %713 = vst [vmem:[%s1148_s19 + $0x38] sm:$0xff] %v702_v42  ;;  %714 = vst [vmem:[%s1148_s19 + $0x40] sm:$0xff] %v703_v43 }
 0x303   : > { %715 = vst [vmem:[%s1148_s19 + $0x48] sm:$0xff] %v704_v44  ;;  %716 = vst [vmem:[%s1148_s19 + $0x50] sm:$0x1] %v705_v45 }
 0x304 PF: > { %s15_s18 = sadd.s32 1, %s1018_s18  }
 0x305   : > { %p12_p4 = scmp.ge.s32.totalorder %s15_s18, 4  }
 0x307   :  { %14 = sbr.rel (!%p12_p4) target bundleno = 1 (0x1), region = 70 }

// kernel: unet2d_forward.22
= control target key start
LH: loop header
LB: loop body
LE: loop exit
PB: predicated region body
PF: predicated region fallthrough
CT: control target
= control target key end

     0   :  { %s1100_s18 = smov 0   ;;  %s1308_s0 = inlined_call_operand.vmem [shape: bf16[2,81,144], index: 0, kind: input, shape index: {}]   ;;  %s1309_s1 = inlined_call_operand.vmem [shape: bf16[144,128], index: 1, kind: input, shape index: {}]   ;;  %s1310_s2 = inlined_call_operand.vmem [shape: f32[128,128], index: 2, kind: input, shape index: {}]   ;;  %s1311_s3 = inlined_call_operand.vmem [shape: f32[1,128], index: 3, kind: input, shape index: {}]   ;;  %s1312_s4 = inlined_call_operand.vmem [shape: f32[1,128], index: 4, kind: input, shape index: {}]   ;;  %s1313_s5 = inlined_call_operand.vmem [shape: f32[2,81,128], index: 5, kind: output, shape index: {}]  }
   0x1 LB: > { %s827_s19 = sadd.s32 4294967295, %s1064_s18   ;;  %p831_p0 = scmp.ge.s32.totalorder %s1064_s18, 1  ;;  %s1064_s18 = sphi %s1100_s18, %s15_s18  }
   0x2   : > { %p187_p1 = scmp.lt.s32.totalorder %s1064_s18, 3 }
   0x4   : > { %p188_p2 = pnand %p831_p0, %p187_p1 }
   0x5   : > { %v1030_v0 = vld [vmem:[%s1309_s1] sm:$0xff] (!%p188_p2)   ;;  %v1066_v1 = vmov (!%p188_p2), 0   ;;  %p215_p3 = scmp.lt.s32.totalorder (!%p188_p2), %s827_s19, 1  ;;  %v1031_v2 = vld [vmem:[%s1309_s1 + $0x8] sm:$0xff] (!%p188_p2)   ;;  %v1032_v3 = vld [vmem:[%s1309_s1 + $0x10] sm:$0xff] (!%p188_p2)   ;;  %vm360_vm0 = vcmask (!%p188_p2), 130048  }
   0x6   : > { %191 = sbr.rel (%p188_p2) target bundleno = 808 (0x328), region = 40  ;;  %379 = vmatprep.subr.bf16.mxu0 (!%p188_p2), %v1066_v1  ;;  %v1033_v4 = vld [vmem:[%s1309_s1 + $0x18] sm:$0xff] (!%p188_p2)   ;;  %v1034_v6 = vld [vmem:[%s1309_s1 + $0x20] sm:$0xff] (!%p188_p2)   ;;  %v1035_v7 = vld [vmem:[%s1309_s1 + $0x28] sm:$0xff] (!%p188_p2)   ;;  %v1067_v26 = vmov (!%p188_p2), 0.0|0.0   ;;  %vm1068_vm1 = vmmov (!%p188_p2), 0  }
   0x7   : > { %380 = vmatpush1.bf16.msra.mxu0 (!%p188_p2), %v1030_v0  ;;  %v1036_v8 = vld [vmem:[%s1309_s1 + $0x30] sm:$0xff] (!%p188_p2)   ;;  %v1037_v9 = vld [vmem:[%s1309_s1 + $0x38] sm:$0xff] (!%p188_p2)   ;;  %v1038_v10 = vld [vmem:[%s1309_s1 + $0x40] sm:$0xff] (!%p188_p2)   ;;  %969 = vmatprep.subr.bf16.mxu1 (!%p188_p2), %v1067_v26  ;;  %v1069_v48 = vmov (!%p188_p2), 0.0   ;;  %vm468_vm2 = vcmask (!%p188_p2), 1040384  }
   0x8   : > { %381 = vmatprep.subr.bf16.mxu0 (!%p188_p2), %v1066_v1  ;;  %v477_v23 = vld [vmem:[%s1310_s2] sm:$0xff] (!%p188_p2)  ;;  %v478_v24 = vld [vmem:[%s1310_s2 + $0x8] sm:$0xff] (!%p188_p2)  ;;  %v479_v27 = vld [vmem:[%s1310_s2 + $0x10] sm:$0xff] (!%p188_p2)  ;;  %931 = vmatprep.mubr.msk.f32.mxu1 (!%p188_p2), %vm1068_vm1, %v1069_v48 }
   0x9   : > { %v1168_v25 = vpack.c.bf16 (!%p188_p2), %v478_v24, %v477_v23  ;;  %v480_v28 = vld [vmem:[%s1310_s2 + $0x18] sm:$0xff] (!%p188_p2)  ;;  %v481_v30 = vld [vmem:[%s1310_s2 + $0x20] sm:$0xff] (!%p188_p2)  ;;  %v482_v31 = vld [vmem:[%s1310_s2 + $0x28] sm:$0xff] (!%p188_p2) }
   0xa   : > { %v1179_v29 = vpack.c.bf16 (!%p188_p2), %v480_v28, %v479_v27  ;;  %v1189_v32 = vpack.c.bf16 (!%p188_p2), %v482_v31, %v481_v30  ;;  %v483_v33 = vld [vmem:[%s1310_s2 + $0x30] sm:$0xff] (!%p188_p2)  ;;  %v484_v34 = vld [vmem:[%s1310_s2 + $0x38] sm:$0xff] (!%p188_p2)  ;;  %v485_v36 = vld [vmem:[%s1310_s2 + $0x40] sm:$0xff] (!%p188_p2) }
   0xb   : > { %382 = vmatpush1.bf16.msra.mxu0 (!%p188_p2), %v1031_v2  ;;  %971 = vmatpush3.bf16.msra.mxu1 (!%p188_p2), %v1168_v25  ;;  %v1199_v35 = vpack.c.bf16 (!%p188_p2), %v484_v34, %v483_v33  ;;  %v486_v37 = vld [vmem:[%s1310_s2 + $0x48] sm:$0xff] (!%p188_p2)  ;;  %v487_v39 = vld [vmem:[%s1310_s2 + $0x50] sm:$0xff] (!%p188_p2)  ;;  %v488_v40 = vld [vmem:[%s1310_s2 + $0x58] sm:$0xff] (!%p188_p2) }
   0xc   : > { %383 = vmatprep.subr.bf16.mxu0 (!%p188_p2), %v1066_v1  ;;  %972 = vmatprep.subr.bf16.mxu1 (!%p188_p2), %v1067_v26  ;;  %v1209_v38 = vpack.c.bf16 (!%p188_p2), %v486_v37, %v485_v36  ;;  %v1219_v41 = vpack.c.bf16 (!%p188_p2), %v488_v40, %v487_v39  ;;  %v489_v42 = vld [vmem:[%s1310_s2 + $0x60] sm:$0xff] (!%p188_p2)  ;;  %v490_v43 = vld [vmem:[%s1310_s2 + $0x68] sm:$0xff] (!%p188_p2)  ;;  %v491_v45 = vld [vmem:[%s1310_s2 + $0x70] sm:$0xff] (!%p188_p2) }
   0xd   : > { %s1315_s19 = smov (!%p215_p3, %s827_s19), 1  ;;  %v1229_v44 = vpack.c.bf16 %v490_v43, %v489_v42  ;;  %v492_v46 = vld [vmem:[%s1310_s2 + $0x78] sm:$0xff] }
   0xe   : > { %s1017_s24 = smul.u32 88, %s1315_s19  ;;  %v1238_v47 = vpack.c.bf16 %v492_v46, %v491_v45 }
   0xf   : > { %384 = vmatpush1.bf16.msra.mxu0 %v1032_v3  ;;  %974 = vmatpush3.bf16.msra.mxu1 %v1179_v29 }
  0x10   : > { %s1125_s29 = scalar_lea.vmem %s1308_s0, %s1017_s24  ;;  %385 = vmatprep.subr.bf16.mxu0 %v1066_v1  ;;  %975 = vmatprep.subr.bf16.mxu1 %v1067_v26  ;;  %s1281_s11 = scalar_lea.vmem %s1313_s5, %s1017_s24 }
  0x11   : > { %v1041_v5 = vld [vmem:[%s1125_s29 + $0x4] ss:$8 sps:$4 sm:$0xff]   ;;  %v1039_v11 = vld [vmem:[%s1125_s29] ss:$8 sps:$4 sm:$0xff]   ;;  %v1042_v12 = vld [vmem:[%s1125_s29 + $0x14] ss:$8 sps:$4 sm:$0xff]  }
  0x12   : > { %855 = vmatprep.mubr.msk.bf16.mxu0 %vm360_vm0, %v1041_v5  ;;  %v1044_v13 = vld [vmem:[%s1125_s29 + $0x10] ss:$8 sps:$4 sm:$0xff]   ;;  %v1045_v14 = vld [vmem:[%s1125_s29 + $0x24] ss:$8 sps:$4 sm:$0xff]   ;;  %v1047_v15 = vld [vmem:[%s1125_s29 + $0x20] ss:$8 sps:$4 sm:$0xff]  }
  0x13   : > { %386 = vmatpush1.bf16.msra.mxu0 %v1033_v4  ;;  %v1048_v16 = vld [vmem:[%s1125_s29 + $0x34] ss:$8 sps:$4 sm:$0xff]   ;;  %v1050_v17 = vld [vmem:[%s1125_s29 + $0x30] ss:$8 sps:$4 sm:$0xff]   ;;  %v1051_v18 = vld [vmem:[%s1125_s29 + $0x44] ss:$8 sps:$4 sm:$0xff]   ;;  %977 = vmatpush3.bf16.msra.mxu1 %v1189_v32 }
  0x14   : > { %387 = vmatprep.subr.bf16.mxu0 %v1066_v1  ;;  %v236_v19 = vld [vmem:[%s1125_s29 + $0x50] sm:$0x11]  ;;  %v1053_v20 = vld [vmem:[%s1125_s29 + $0x40] ss:$8 sps:$4 sm:$0xff]   ;;  %978 = vmatprep.subr.bf16.mxu1 %v1067_v26 }
  0x15   : > { %v845_v21 = vcombine.high %v236_v19, %v236_v19  ;;  %v844_v22 = vcombine.low %v236_v19, %v236_v19 }
  0x17   : > { %388 = vmatpush1.bf16.msra.mxu0 %v1034_v6  ;;  %980 = vmatpush3.bf16.msra.mxu1 %v1199_v35 }
  0x18   : > { %389 = vmatprep.subr.bf16.mxu0 %v1066_v1  ;;  %981 = vmatprep.subr.bf16.mxu1 %v1067_v26 }
  0x1b   : > { %390 = vmatpush1.bf16.msra.mxu0 %v1035_v7  ;;  %983 = vmatpush3.bf16.msra.mxu1 %v1209_v38 }
  0x1c   : > { %391 = vmatprep.subr.bf16.mxu0 %v1066_v1  ;;  %984 = vmatprep.subr.bf16.mxu1 %v1067_v26 }
  0x1f   : > { %392 = vmatpush1.bf16.msra.mxu0 %v1036_v8  ;;  %986 = vmatpush3.bf16.msra.mxu1 %v1219_v41 }
  0x20   : > { %393 = vmatprep.subr.bf16.mxu0 %v1066_v1  ;;  %987 = vmatprep.subr.bf16.mxu1 %v1067_v26 }
  0x23   : > { %394 = vmatpush1.bf16.msra.mxu0 %v1037_v9  ;;  %989 = vmatpush3.bf16.msra.mxu1 %v1229_v44 }
  0x24   : > { %395 = vmatprep.subr.bf16.mxu0 %v1066_v1  ;;  %990 = vmatprep.subr.bf16.mxu1 %v1067_v26 }
  0x27   : > { %396 = vmatpush1.bf16.msra.mxu0 %v1038_v10  ;;  %992 = vmatpush3.bf16.msra.mxu1 %v1238_v47 }
  0x28   : > { %993 = vmatprep.subr.bf16.mxu1 %v1067_v26 }
  0x2a   : > { %412 = vmatmul.mubr.bf16.vlgmr.msra.gmra.mrb[0].mxu0 %v1039_v11 }
  0x2b   : > { %856 = vmatprep.mubr.msk.bf16.mxu0 %vm360_vm0, %v1042_v12 }
  0x32   : > { %420 = vmatmul.mubr.bf16.gmra.mrb[4].mxu0 %v1044_v13 }
  0x33   : > { %857 = vmatprep.mubr.msk.bf16.mxu0 %vm360_vm0, %v1045_v14 }
  0x3a   : > { %428 = vmatmul.mubr.bf16.gmra.mrb[8].mxu0 %v1047_v15 }
  0x3b   : > { %858 = vmatprep.mubr.msk.bf16.mxu0 %vm360_vm0, %v1048_v16 }
  0x42   : > { %436 = vmatmul.mubr.bf16.gmra.mrb[12].mxu0 %v1050_v17 }
  0x43   : > { %859 = vmatprep.mubr.msk.bf16.mxu0 %vm360_vm0, %v1051_v18 }
  0x4a   : > { %444 = vmatmul.mubr.bf16.gmra.mrb[16].mxu0 %v1053_v20 }
  0x4b   : > { %860 = vmatprep.mubr.msk.bf16.mxu0 %vm360_vm0, %v845_v21 }
  0x52   : > { %452 = vmatmul.mubr.bf16.gmra.mrb[20].mxu0 %v844_v22 }
  0xfd   : > { %v1244_v49 = vpop.f32.mrb[0].mxu0 }
  0xfe   : > { %v415_v50 = vpop.f32.mrb[1].mxu0 }
  0xff   : > { %v1246_v51 = vpop.f32.mrb[2].mxu0 }
 0x100   : > { %v459_v52 = vadd.f32 %v1246_v51, %v1244_v49  ;;  %v418_v53 = vpop.f32.mrb[3].mxu0 }
 0x105   : > { %v421_v54 = vpop.f32.mrb[4].mxu0 }
 0x106   : > { %v460_v55 = vadd.f32 %v459_v52, %v421_v54  ;;  %v423_v56 = vpop.f32.mrb[5].mxu0 }
 0x107   : > { %v424_v57 = vpop.f32.mrb[6].mxu0 }
 0x108   : > { %v461_v58 = vadd.f32 %v460_v55, %v424_v57  ;;  %v426_v59 = vpop.f32.mrb[7].mxu0 }
 0x10d   : > { %v429_v60 = vpop.f32.mrb[8].mxu0 }
 0x10e   : > { %v462_v61 = vadd.f32 %v461_v58, %v429_v60  ;;  %v431_v62 = vpop.f32.mrb[9].mxu0 }
 0x10f   : > { %v432_v63 = vpop.f32.mrb[10].mxu0 }
 0x110   : > { %v463_v0 = vadd.f32 %v462_v61, %v432_v63  ;;  %v434_v1 = vpop.f32.mrb[11].mxu0 }
 0x115   : > { %v437_v2 = vpop.f32.mrb[12].mxu0 }
 0x116   : > { %v464_v3 = vadd.f32 %v463_v0, %v437_v2  ;;  %v439_v4 = vpop.f32.mrb[13].mxu0 }
 0x117   : > { %v440_v5 = vpop.f32.mrb[14].mxu0 }
 0x118   : > { %v465_v6 = vadd.f32 %v464_v3, %v440_v5  ;;  %v442_v7 = vpop.f32.mrb[15].mxu0 }
 0x11d   : > { %v445_v8 = vpop.f32.mrb[16].mxu0 }
 0x11e   : > { %v466_v9 = vadd.f32 %v465_v6, %v445_v8  ;;  %v447_v10 = vpop.f32.mrb[17].mxu0 }
 0x11f   : > { %v448_v11 = vpop.f32.mrb[18].mxu0 }
 0x120   : > { %v467_v12 = vadd.f32 %v466_v9, %v448_v11  ;;  %v450_v13 = vpop.f32.mrb[19].mxu0 }
 0x125   : > { %v453_v14 = vpop.f32.mrb[20].mxu0 }
 0x126   : > { %v469_v15 = vsel %vm468_vm2, %v453_v14, 0.0  ;;  %v455_v16 = vpop.f32.mrb[21].mxu0 }
 0x127   : > { %v470_v17 = vadd.f32 %v469_v15, %v467_v12  ;;  %v456_v18 = vpop.f32.mrb[22].mxu0  ;;  %v861_v12 = vld [vmem:[%s1311_s3] ss:$0 sm:$0xff] }
 0x128   : > { %v457_v19 = vpop.f32.mrb[23].mxu0 }
 0x129   : > { %v471_v20 = vrot.slane %v470_v17, 4 }
 0x12b   : > { %v472_v21 = vadd.f32 %v471_v20, %v470_v17 }
 0x12d   : > { %v473_v22 = vrot.slane %v472_v21, 2 }
 0x12f   : > { %v474_v23 = vadd.f32 %v473_v22, %v472_v21 }
 0x131   : > { %v475_v24 = vrot.slane %v474_v23, 1 }
 0x133   : > { %v476_v27 = vadd.f32 %v475_v24, %v474_v23 }
 0x135   : > { %932 = vmatmul.mubr.f32.vlgmr.msra.gmra.mrb[0].mxu1 %v476_v27  ;;  %v862_v27 = vld [vmem:[%s1312_s4] ss:$0 sm:$0xff] }
 0x136   : > { %995 = vmatpush3.bf16.msra.mxu1 %v1168_v25  ;;  %966 = vmatprep.mubr.msk.f32.mxu1 %vm1068_vm1, %v1069_v48  ;;  %v563_v25 = vlaneseq }
 0x137   : > { %996 = vmatprep.subr.bf16.mxu1 %v1067_v26 }
 0x138   : > { %v564_v28 = vshrl.u32 %v563_v25, 7 }
 0x13a   : > { %998 = vmatpush3.bf16.msra.mxu1 %v1179_v29  ;;  %v565_v29 = vsub.s32 0, %v564_v28 }
 0x13b   : > { %999 = vmatprep.subr.bf16.mxu1 %v1067_v26 }
 0x13e   : > { %1001 = vmatpush3.bf16.msra.mxu1 %v1189_v32 }
 0x13f   : > { %1002 = vmatprep.subr.bf16.mxu1 %v1067_v26 }
 0x142   : > { %1004 = vmatpush3.bf16.msra.mxu1 %v1199_v35 }
 0x143   : > { %1005 = vmatprep.subr.bf16.mxu1 %v1067_v26 }
 0x146   : > { %1007 = vmatpush3.bf16.msra.mxu1 %v1209_v38 }
 0x147   : > { %1008 = vmatprep.subr.bf16.mxu1 %v1067_v26 }
 0x14a   : > { %1010 = vmatpush3.bf16.msra.mxu1 %v1219_v41 }
 0x14b   : > { %1011 = vmatprep.subr.bf16.mxu1 %v1067_v26 }
 0x14e   : > { %1013 = vmatpush3.bf16.msra.mxu1 %v1229_v44 }
 0x14f   : > { %1014 = vmatprep.subr.bf16.mxu1 %v1067_v26 }
 0x152   : > { %1016 = vmatpush3.bf16.msra.mxu1 %v1238_v47 }
 0x208   : > { %v559_v30 = vpop.f32.mrb[0].mxu1 }
 0x209   : > { %v566_v31 = vrot.slane %v559_v30, %v565_v29  ;;  %v933_v32 = vpop.f32.mrb[1].mxu1 }
 0x20b   : > { %v567_v33 = vsub.f32 %v1244_v49, %v566_v31  ;;  %v568_v34 = vsub.f32 %v1246_v51, %v566_v31  ;;  %v569_v35 = vsub.f32 %v421_v54, %v566_v31  ;;  %v570_v36 = vsub.f32 %v424_v57, %v566_v31 }
 0x20c   : > { %v571_v37 = vsub.f32 %v429_v60, %v566_v31  ;;  %v572_v38 = vsub.f32 %v432_v63, %v566_v31  ;;  %v573_v39 = vsub.f32 %v437_v2, %v566_v31  ;;  %v574_v40 = vsub.f32 %v440_v5, %v566_v31 }
 0x20d   : > { %v575_v41 = vsub.f32 %v445_v8, %v566_v31  ;;  %v576_v26 = vsub.f32 %v448_v11, %v566_v31  ;;  %v577_v42 = vsub.f32 %v453_v14, %v566_v31  ;;  %v578_v43 = vmul.f32 %v567_v33, %v567_v33 }
 0x20e   : > { %v579_v44 = vmul.f32 %v568_v34, %v568_v34  ;;  %v580_v45 = vmul.f32 %v569_v35, %v569_v35  ;;  %v581_v47 = vmul.f32 %v570_v36, %v570_v36  ;;  %v582_v50 = vmul.f32 %v571_v37, %v571_v37 }
 0x20f   : > { %v583_v49 = vmul.f32 %v572_v38, %v572_v38  ;;  %v584_v51 = vmul.f32 %v573_v39, %v573_v39  ;;  %v585_v55 = vmul.f32 %v574_v40, %v574_v40  ;;  %v586_v57 = vmul.f32 %v575_v41, %v575_v41 }
 0x210   : > { %v589_v46 = vadd.f32 %v579_v44, %v578_v43  ;;  %v588_v59 = vmul.f32 %v577_v42, %v577_v42  ;;  %v587_v60 = vmul.f32 %v576_v26, %v576_v26 }
 0x212   : > { %v590_v48 = vadd.f32 %v589_v46, %v580_v45  ;;  %v598_v63 = vsel %vm468_vm2, %v588_v59, 0.0 }
 0x214   : > { %v591_v52 = vadd.f32 %v590_v48, %v581_v47 }
 0x216   : > { %v592_v53 = vadd.f32 %v591_v52, %v582_v50 }
 0x218   : > { %v593_v54 = vadd.f32 %v592_v53, %v583_v49 }
 0x21a   : > { %v594_v56 = vadd.f32 %v593_v54, %v584_v51 }
 0x21c   : > { %v595_v58 = vadd.f32 %v594_v56, %v585_v55 }
 0x21e   : > { %v596_v61 = vadd.f32 %v595_v58, %v586_v57 }
 0x220   : > { %v597_v62 = vadd.f32 %v596_v61, %v587_v60 }
 0x222   : > { %v599_v0 = vadd.f32 %v598_v63, %v597_v62 }
 0x224   : > { %v600_v1 = vrot.slane %v599_v0, 4 }
 0x226   : > { %v601_v2 = vadd.f32 %v600_v1, %v599_v0 }
 0x228   : > { %v602_v3 = vrot.slane %v601_v2, 2 }
 0x22a   : > { %v603_v4 = vadd.f32 %v602_v3, %v601_v2 }
 0x22c   : > { %v604_v5 = vrot.slane %v603_v4, 1 }
 0x22e   : > { %v605_v6 = vadd.f32 %v604_v5, %v603_v4 }
 0x230   : > { %967 = vmatmul.mubr.f32.vlgmr.msra.gmra.mrb[2].mxu1 %v605_v6 }
 0x303   : > { %v672_v7 = vpop.f32.mrb[2].mxu1 }
 0x304   : > { %v673_v8 = vadd.f32 1e-05, %v672_v7  ;;  %v968_v9 = vpop.f32.mrb[3].mxu1 }
 0x306   : > { %1056 = vrsqrt.f32 %v673_v8 }
 0x310   : > { %v1057_v10 = vpop.eup %1056 }
 0x311   : > { %v680_v11 = vrot.slane %v1057_v10, %v565_v29 }
 0x313   : > { %v681_v13 = vmul.f32 %v680_v11, %v567_v33  ;;  %v682_v14 = vmul.f32 %v680_v11, %v568_v34  ;;  %v683_v15 = vmul.f32 %v680_v11, %v569_v35  ;;  %v684_v16 = vmul.f32 %v680_v11, %v570_v36 }
 0x314   : > { %v685_v17 = vmul.f32 %v680_v11, %v571_v37  ;;  %v686_v18 = vmul.f32 %v680_v11, %v572_v38  ;;  %v687_v19 = vmul.f32 %v680_v11, %v573_v39  ;;  %v688_v20 = vmul.f32 %v680_v11, %v574_v40 }
 0x315   : > { %v689_v21 = vmul.f32 %v680_v11, %v575_v41  ;;  %v690_v22 = vmul.f32 %v680_v11, %v576_v26  ;;  %v691_v23 = vmul.f32 %v680_v11, %v577_v42  ;;  %v699_v24 = vmul.f32 %v861_v12, %v681_v13 }
 0x316   : > { %v700_v25 = vmul.f32 %v861_v12, %v682_v14  ;;  %v701_v28 = vmul.f32 %v861_v12, %v683_v15  ;;  %v702_v29 = vmul.f32 %v861_v12, %v684_v16  ;;  %v703_v30 = vmul.f32 %v861_v12, %v685_v17 }
 0x317   : > { %v704_v31 = vmul.f32 %v861_v12, %v686_v18  ;;  %v705_v32 = vmul.f32 %v861_v12, %v687_v19  ;;  %v706_v33 = vmul.f32 %v861_v12, %v688_v20  ;;  %v707_v34 = vmul.f32 %v861_v12, %v689_v21 }
 0x318   : > { %v708_v35 = vmul.f32 %v861_v12, %v690_v22  ;;  %v709_v36 = vmul.f32 %v861_v12, %v691_v23  ;;  %v717_v37 = vadd.f32 %v862_v27, %v699_v24  ;;  %v718_v38 = vadd.f32 %v862_v27, %v700_v25 }
 0x319   : > { %v719_v39 = vadd.f32 %v862_v27, %v701_v28  ;;  %v720_v40 = vadd.f32 %v862_v27, %v702_v29  ;;  %v721_v41 = vadd.f32 %v862_v27, %v703_v30  ;;  %v722_v26 = vadd.f32 %v862_v27, %v704_v31 }
 0x31a   : > { %v723_v42 = vadd.f32 %v862_v27, %v705_v32  ;;  %v724_v43 = vadd.f32 %v862_v27, %v706_v33  ;;  %v725_v44 = vadd.f32 %v862_v27, %v707_v34  ;;  %v726_v45 = vadd.f32 %v862_v27, %v708_v35 }
 0x31b   : > { %v727_v46 = vadd.f32 %v862_v27, %v709_v36  ;;  %vm728_vm3 = vcmp.ge.f32.partialorder %v717_v37, 0.0  ;;  %vm729_vm4 = vcmp.ge.f32.partialorder %v718_v38, 0.0  ;;  %vm730_vm5 = vcmp.ge.f32.partialorder %v719_v39, 0.0 }
 0x31c   : > { %vm731_vm6 = vcmp.ge.f32.partialorder %v720_v40, 0.0  ;;  %vm732_vm7 = vcmp.ge.f32.partialorder %v721_v41, 0.0  ;;  %vm733_vm8 = vcmp.ge.f32.partialorder %v722_v26, 0.0  ;;  %vm734_vm9 = vcmp.ge.f32.partialorder %v723_v42, 0.0 }
 0x31d   : > { %vm735_vm10 = vcmp.ge.f32.partialorder %v724_v43, 0.0  ;;  %vm736_vm11 = vcmp.ge.f32.partialorder %v725_v44, 0.0  ;;  %vm737_vm12 = vcmp.ge.f32.partialorder %v726_v45, 0.0  ;;  %vm738_vm13 = vcmp.ge.f32.partialorder %v727_v46, 0.0 }
 0x31e   : > { %v739_v47 = vmul.f32 0.2, %v717_v37  ;;  %v740_v48 = vmul.f32 0.2, %v718_v38  ;;  %v741_v50 = vmul.f32 0.2, %v719_v39 }
 0x31f   : > { %v742_v52 = vmul.f32 0.2, %v720_v40  ;;  %v743_v49 = vmul.f32 0.2, %v721_v41  ;;  %v744_v53 = vmul.f32 0.2, %v722_v26 }
 0x320   : > { %v745_v51 = vmul.f32 0.2, %v723_v42  ;;  %v746_v54 = vmul.f32 0.2, %v724_v43  ;;  %v747_v55 = vmul.f32 0.2, %v725_v44  ;;  %v750_v56 = vsel %vm728_vm3, %v717_v37, %v739_v47 }
 0x321   : > { %v748_v57 = vmul.f32 0.2, %v726_v45  ;;  %v749_v58 = vmul.f32 0.2, %v727_v46  ;;  %v751_v59 = vsel %vm729_vm4, %v718_v38, %v740_v48  ;;  %v752_v60 = vsel %vm730_vm5, %v719_v39, %v741_v50  ;;  %761 = vst [vmem:[%s1281_s11] sm:$0xff] %v750_v56 }
 0x322   : > { %v753_v61 = vsel %vm731_vm6, %v720_v40, %v742_v52  ;;  %v754_v62 = vsel %vm732_vm7, %v721_v41, %v743_v49  ;;  %v755_v63 = vsel %vm733_vm8, %v722_v26, %v744_v53  ;;  %v756_v0 = vsel %vm734_vm9, %v723_v42, %v745_v51  ;;  %762 = vst [vmem:[%s1281_s11 + $0x8] sm:$0xff] %v751_v59 }
 0x323   : > { %763 = vst [vmem:[%s1281_s11 + $0x10] sm:$0xff] %v752_v60  ;;  %v757_v1 = vsel %vm735_vm10, %v724_v43, %v746_v54  ;;  %v758_v2 = vsel %vm736_vm11, %v725_v44, %v747_v55  ;;  %v759_v3 = vsel %vm737_vm12, %v726_v45, %v748_v57  ;;  %v760_v4 = vsel %vm738_vm13, %v727_v46, %v749_v58 }
 0x324   : > { %764 = vst [vmem:[%s1281_s11 + $0x18] sm:$0xff] %v753_v61  ;;  %765 = vst [vmem:[%s1281_s11 + $0x20] sm:$0xff] %v754_v62 }
 0x325   : > { %766 = vst [vmem:[%s1281_s11 + $0x28] sm:$0xff] %v755_v63  ;;  %767 = vst [vmem:[%s1281_s11 + $0x30] sm:$0xff] %v756_v0 }
 0x326   : > { %768 = vst [vmem:[%s1281_s11 + $0x38] sm:$0xff] %v757_v1  ;;  %769 = vst [vmem:[%s1281_s11 + $0x40] sm:$0xff] %v758_v2 }
 0x327   : > { %770 = vst [vmem:[%s1281_s11 + $0x48] sm:$0xff] %v759_v3  ;;  %771 = vst [vmem:[%s1281_s11 + $0x50] sm:$0x1] %v760_v4 }
 0x328 PF: > { %s15_s18 = sadd.s32 1, %s1064_s18  }
 0x329   : > { %p12_p4 = scmp.ge.s32.totalorder %s15_s18, 4  }
 0x32b   :  { %14 = sbr.rel (!%p12_p4) target bundleno = 1 (0x1), region = 70 }

// kernel: unet2d_forward.23
= control target key start
LH: loop header
LB: loop body
LE: loop exit
PB: predicated region body
PF: predicated region fallthrough
CT: control target
= control target key end

     0   :  { %s1187_s21 = smov 0   ;;  %s1409_s0 = inlined_call_operand.vmem [shape: bf16[2,81,144], index: 0, kind: input, shape index: {}]   ;;  %s1410_s1 = inlined_call_operand.vmem [shape: bf16[144,128], index: 1, kind: input, shape index: {}]   ;;  %s1411_s2 = inlined_call_operand.vmem [shape: f32[128,128], index: 2, kind: input, shape index: {}]   ;;  %s1412_s3 = inlined_call_operand.vmem [shape: f32[1,128], index: 3, kind: input, shape index: {}]   ;;  %s1413_s4 = inlined_call_operand.vmem [shape: f32[1,128], index: 4, kind: input, shape index: {}]   ;;  %s1414_s5 = inlined_call_operand.vmem [shape: f32[2,81,128], index: 5, kind: input, shape index: {}]   ;;  %s1415_s6 = inlined_call_operand.vmem [shape: f32[2,81,128], index: 6, kind: output, shape index: {}]  }
   0x1 LB: > { %s908_s22 = sadd.s32 4294967295, %s1146_s21   ;;  %p912_p0 = scmp.ge.s32.totalorder %s1146_s21, 1  ;;  %s1146_s21 = sphi %s1187_s21, %s16_s21  }
   0x2   : > { %p222_p1 = scmp.lt.s32.totalorder %s1146_s21, 3 }
   0x4   : > { %p223_p2 = pnand %p912_p0, %p222_p1 }
   0x5   : > { %v1112_v0 = vld [vmem:[%s1410_s1] sm:$0xff] (!%p223_p2)   ;;  %v1148_v1 = vmov (!%p223_p2), 0   ;;  %p257_p3 = scmp.lt.s32.totalorder (!%p223_p2), %s908_s22, 1  ;;  %v1113_v2 = vld [vmem:[%s1410_s1 + $0x8] sm:$0xff] (!%p223_p2)   ;;  %v1114_v3 = vld [vmem:[%s1410_s1 + $0x10] sm:$0xff] (!%p223_p2)   ;;  %vm407_vm0 = vcmask (!%p223_p2), 130048  }
   0x6   : > { %226 = sbr.rel (%p223_p2) target bundleno = 810 (0x32a), region = 44  ;;  %426 = vmatprep.subr.bf16.mxu0 (!%p223_p2), %v1148_v1  ;;  %v1115_v4 = vld [vmem:[%s1410_s1 + $0x18] sm:$0xff] (!%p223_p2)   ;;  %v1116_v6 = vld [vmem:[%s1410_s1 + $0x20] sm:$0xff] (!%p223_p2)   ;;  %v1117_v7 = vld [vmem:[%s1410_s1 + $0x28] sm:$0xff] (!%p223_p2)   ;;  %v1149_v26 = vmov (!%p223_p2), 0.0|0.0   ;;  %vm1150_vm1 = vmmov (!%p223_p2), 0  }
   0x7   : > { %427 = vmatpush1.bf16.msra.mxu0 (!%p223_p2), %v1112_v0  ;;  %v1118_v8 = vld [vmem:[%s1410_s1 + $0x30] sm:$0xff] (!%p223_p2)   ;;  %v1119_v9 = vld [vmem:[%s1410_s1 + $0x38] sm:$0xff] (!%p223_p2)   ;;  %v1120_v10 = vld [vmem:[%s1410_s1 + $0x40] sm:$0xff] (!%p223_p2)   ;;  %1051 = vmatprep.subr.bf16.mxu1 (!%p223_p2), %v1149_v26  ;;  %v1151_v48 = vmov (!%p223_p2), 0.0   ;;  %vm515_vm2 = vcmask (!%p223_p2), 1040384  }
   0x8   : > { %428 = vmatprep.subr.bf16.mxu0 (!%p223_p2), %v1148_v1  ;;  %v524_v23 = vld [vmem:[%s1411_s2] sm:$0xff] (!%p223_p2)  ;;  %v525_v24 = vld [vmem:[%s1411_s2 + $0x8] sm:$0xff] (!%p223_p2)  ;;  %v526_v27 = vld [vmem:[%s1411_s2 + $0x10] sm:$0xff] (!%p223_p2)  ;;  %1013 = vmatprep.mubr.msk.f32.mxu1 (!%p223_p2), %vm1150_vm1, %v1151_v48 }
   0x9   : > { %v1253_v25 = vpack.c.bf16 (!%p223_p2), %v525_v24, %v524_v23  ;;  %v527_v28 = vld [vmem:[%s1411_s2 + $0x18] sm:$0xff] (!%p223_p2)  ;;  %v528_v30 = vld [vmem:[%s1411_s2 + $0x20] sm:$0xff] (!%p223_p2)  ;;  %v529_v31 = vld [vmem:[%s1411_s2 + $0x28] sm:$0xff] (!%p223_p2) }
   0xa   : > { %v1264_v29 = vpack.c.bf16 (!%p223_p2), %v527_v28, %v526_v27  ;;  %v1274_v32 = vpack.c.bf16 (!%p223_p2), %v529_v31, %v528_v30  ;;  %v530_v33 = vld [vmem:[%s1411_s2 + $0x30] sm:$0xff] (!%p223_p2)  ;;  %v531_v34 = vld [vmem:[%s1411_s2 + $0x38] sm:$0xff] (!%p223_p2)  ;;  %v532_v36 = vld [vmem:[%s1411_s2 + $0x40] sm:$0xff] (!%p223_p2) }
   0xb   : > { %429 = vmatpush1.bf16.msra.mxu0 (!%p223_p2), %v1113_v2  ;;  %1053 = vmatpush3.bf16.msra.mxu1 (!%p223_p2), %v1253_v25  ;;  %v1284_v35 = vpack.c.bf16 (!%p223_p2), %v531_v34, %v530_v33  ;;  %v533_v37 = vld [vmem:[%s1411_s2 + $0x48] sm:$0xff] (!%p223_p2)  ;;  %v534_v39 = vld [vmem:[%s1411_s2 + $0x50] sm:$0xff] (!%p223_p2)  ;;  %v535_v40 = vld [vmem:[%s1411_s2 + $0x58] sm:$0xff] (!%p223_p2) }
   0xc   : > { %430 = vmatprep.subr.bf16.mxu0 (!%p223_p2), %v1148_v1  ;;  %1054 = vmatprep.subr.bf16.mxu1 (!%p223_p2), %v1149_v26  ;;  %v1294_v38 = vpack.c.bf16 (!%p223_p2), %v533_v37, %v532_v36  ;;  %v1304_v41 = vpack.c.bf16 (!%p223_p2), %v535_v40, %v534_v39  ;;  %v536_v42 = vld [vmem:[%s1411_s2 + $0x60] sm:$0xff] (!%p223_p2)  ;;  %v537_v43 = vld [vmem:[%s1411_s2 + $0x68] sm:$0xff] (!%p223_p2)  ;;  %v538_v45 = vld [vmem:[%s1411_s2 + $0x70] sm:$0xff] (!%p223_p2) }
   0xd   : > { %s1417_s22 = smov (!%p257_p3, %s908_s22), 1  ;;  %v1314_v44 = vpack.c.bf16 %v537_v43, %v536_v42  ;;  %v539_v46 = vld [vmem:[%s1411_s2 + $0x78] sm:$0xff] }
   0xe   : > { %s1201_s27 = smul.u32 88, %s1417_s22  ;;  %v1323_v47 = vpack.c.bf16 %v539_v46, %v538_v45 }
   0xf   : > { %431 = vmatpush1.bf16.msra.mxu0 %v1114_v3  ;;  %1056 = vmatpush3.bf16.msra.mxu1 %v1264_v29 }
  0x10   : > { %s1210_s8 = scalar_lea.vmem %s1409_s0, %s1201_s27  ;;  %432 = vmatprep.subr.bf16.mxu0 %v1148_v1  ;;  %1057 = vmatprep.subr.bf16.mxu1 %v1149_v26  ;;  %s1362_s13 = scalar_lea.vmem %s1414_s5, %s1201_s27 }
  0x11   : > { %v1123_v5 = vld [vmem:[%s1210_s8 + $0x4] ss:$8 sps:$4 sm:$0xff]   ;;  %v1121_v11 = vld [vmem:[%s1210_s8] ss:$8 sps:$4 sm:$0xff]   ;;  %v1124_v12 = vld [vmem:[%s1210_s8 + $0x14] ss:$8 sps:$4 sm:$0xff]   ;;  %s1382_s18 = scalar_lea.vmem %s1415_s6, %s1201_s27 }
  0x12   : > { %937 = vmatprep.mubr.msk.bf16.mxu0 %vm407_vm0, %v1123_v5  ;;  %v1126_v13 = vld [vmem:[%s1210_s8 + $0x10] ss:$8 sps:$4 sm:$0xff]   ;;  %v1127_v14 = vld [vmem:[%s1210_s8 + $0x24] ss:$8 sps:$4 sm:$0xff]   ;;  %v1129_v15 = vld [vmem:[%s1210_s8 + $0x20] ss:$8 sps:$4 sm:$0xff]  }
  0x13   : > { %433 = vmatpush1.bf16.msra.mxu0 %v1115_v4  ;;  %v1130_v16 = vld [vmem:[%s1210_s8 + $0x34] ss:$8 sps:$4 sm:$0xff]   ;;  %v1132_v17 = vld [vmem:[%s1210_s8 + $0x30] ss:$8 sps:$4 sm:$0xff]   ;;  %v1133_v18 = vld [vmem:[%s1210_s8 + $0x44] ss:$8 sps:$4 sm:$0xff]   ;;  %1059 = vmatpush3.bf16.msra.mxu1 %v1274_v32 }
  0x14   : > { %434 = vmatprep.subr.bf16.mxu0 %v1148_v1  ;;  %v283_v19 = vld [vmem:[%s1210_s8 + $0x50] sm:$0x11]  ;;  %v1135_v20 = vld [vmem:[%s1210_s8 + $0x40] ss:$8 sps:$4 sm:$0xff]   ;;  %1060 = vmatprep.subr.bf16.mxu1 %v1149_v26 }
  0x15   : > { %v927_v21 = vcombine.high %v283_v19, %v283_v19  ;;  %v926_v22 = vcombine.low %v283_v19, %v283_v19 }
  0x17   : > { %435 = vmatpush1.bf16.msra.mxu0 %v1116_v6  ;;  %1062 = vmatpush3.bf16.msra.mxu1 %v1284_v35 }
  0x18   : > { %436 = vmatprep.subr.bf16.mxu0 %v1148_v1  ;;  %1063 = vmatprep.subr.bf16.mxu1 %v1149_v26 }
  0x1b   : > { %437 = vmatpush1.bf16.msra.mxu0 %v1117_v7  ;;  %1065 = vmatpush3.bf16.msra.mxu1 %v1294_v38 }
  0x1c   : > { %438 = vmatprep.subr.bf16.mxu0 %v1148_v1  ;;  %1066 = vmatprep.subr.bf16.mxu1 %v1149_v26 }
  0x1f   : > { %439 = vmatpush1.bf16.msra.mxu0 %v1118_v8  ;;  %1068 = vmatpush3.bf16.msra.mxu1 %v1304_v41 }
  0x20   : > { %440 = vmatprep.subr.bf16.mxu0 %v1148_v1  ;;  %1069 = vmatprep.subr.bf16.mxu1 %v1149_v26 }
  0x23   : > { %441 = vmatpush1.bf16.msra.mxu0 %v1119_v9  ;;  %1071 = vmatpush3.bf16.msra.mxu1 %v1314_v44 }
  0x24   : > { %442 = vmatprep.subr.bf16.mxu0 %v1148_v1  ;;  %1072 = vmatprep.subr.bf16.mxu1 %v1149_v26 }
  0x27   : > { %443 = vmatpush1.bf16.msra.mxu0 %v1120_v10  ;;  %1074 = vmatpush3.bf16.msra.mxu1 %v1323_v47 }
  0x28   : > { %1075 = vmatprep.subr.bf16.mxu1 %v1149_v26 }
  0x2a   : > { %459 = vmatmul.mubr.bf16.vlgmr.msra.gmra.mrb[0].mxu0 %v1121_v11 }
  0x2b   : > { %938 = vmatprep.mubr.msk.bf16.mxu0 %vm407_vm0, %v1124_v12 }
  0x32   : > { %467 = vmatmul.mubr.bf16.gmra.mrb[4].mxu0 %v1126_v13 }
  0x33   : > { %939 = vmatprep.mubr.msk.bf16.mxu0 %vm407_vm0, %v1127_v14 }
  0x3a   : > { %475 = vmatmul.mubr.bf16.gmra.mrb[8].mxu0 %v1129_v15 }
  0x3b   : > { %940 = vmatprep.mubr.msk.bf16.mxu0 %vm407_vm0, %v1130_v16 }
  0x42   : > { %483 = vmatmul.mubr.bf16.gmra.mrb[12].mxu0 %v1132_v17 }
  0x43   : > { %941 = vmatprep.mubr.msk.bf16.mxu0 %vm407_vm0, %v1133_v18 }
  0x4a   : > { %491 = vmatmul.mubr.bf16.gmra.mrb[16].mxu0 %v1135_v20 }
  0x4b   : > { %942 = vmatprep.mubr.msk.bf16.mxu0 %vm407_vm0, %v927_v21 }
  0x52   : > { %499 = vmatmul.mubr.bf16.gmra.mrb[20].mxu0 %v926_v22 }
  0xfd   : > { %v1329_v49 = vpop.f32.mrb[0].mxu0 }
  0xfe   : > { %v462_v50 = vpop.f32.mrb[1].mxu0 }
  0xff   : > { %v1331_v51 = vpop.f32.mrb[2].mxu0 }
 0x100   : > { %v506_v52 = vadd.f32 %v1331_v51, %v1329_v49  ;;  %v465_v53 = vpop.f32.mrb[3].mxu0 }
 0x105   : > { %v468_v54 = vpop.f32.mrb[4].mxu0 }
 0x106   : > { %v507_v55 = vadd.f32 %v506_v52, %v468_v54  ;;  %v470_v56 = vpop.f32.mrb[5].mxu0 }
 0x107   : > { %v471_v57 = vpop.f32.mrb[6].mxu0 }
 0x108   : > { %v508_v58 = vadd.f32 %v507_v55, %v471_v57  ;;  %v473_v59 = vpop.f32.mrb[7].mxu0 }
 0x10d   : > { %v476_v60 = vpop.f32.mrb[8].mxu0 }
 0x10e   : > { %v509_v61 = vadd.f32 %v508_v58, %v476_v60  ;;  %v478_v62 = vpop.f32.mrb[9].mxu0 }
 0x10f   : > { %v479_v63 = vpop.f32.mrb[10].mxu0 }
 0x110   : > { %v510_v0 = vadd.f32 %v509_v61, %v479_v63  ;;  %v481_v1 = vpop.f32.mrb[11].mxu0 }
 0x115   : > { %v484_v2 = vpop.f32.mrb[12].mxu0 }
 0x116   : > { %v511_v3 = vadd.f32 %v510_v0, %v484_v2  ;;  %v486_v4 = vpop.f32.mrb[13].mxu0 }
 0x117   : > { %v487_v5 = vpop.f32.mrb[14].mxu0 }
 0x118   : > { %v512_v6 = vadd.f32 %v511_v3, %v487_v5  ;;  %v489_v7 = vpop.f32.mrb[15].mxu0 }
 0x11d   : > { %v492_v8 = vpop.f32.mrb[16].mxu0 }
 0x11e   : > { %v513_v9 = vadd.f32 %v512_v6, %v492_v8  ;;  %v494_v10 = vpop.f32.mrb[17].mxu0 }
 0x11f   : > { %v495_v11 = vpop.f32.mrb[18].mxu0 }
 0x120   : > { %v514_v12 = vadd.f32 %v513_v9, %v495_v11  ;;  %v497_v13 = vpop.f32.mrb[19].mxu0 }
 0x125   : > { %v500_v14 = vpop.f32.mrb[20].mxu0 }
 0x126   : > { %v516_v15 = vsel %vm515_vm2, %v500_v14, 0.0  ;;  %v502_v16 = vpop.f32.mrb[21].mxu0 }
 0x127   : > { %v517_v17 = vadd.f32 %v516_v15, %v514_v12  ;;  %v503_v18 = vpop.f32.mrb[22].mxu0  ;;  %v943_v12 = vld [vmem:[%s1412_s3] ss:$0 sm:$0xff] }
 0x128   : > { %v504_v19 = vpop.f32.mrb[23].mxu0 }
 0x129   : > { %v518_v20 = vrot.slane %v517_v17, 4 }
 0x12b   : > { %v519_v21 = vadd.f32 %v518_v20, %v517_v17 }
 0x12d   : > { %v520_v22 = vrot.slane %v519_v21, 2 }
 0x12f   : > { %v521_v23 = vadd.f32 %v520_v22, %v519_v21 }
 0x131   : > { %v522_v24 = vrot.slane %v521_v23, 1 }
 0x133   : > { %v523_v27 = vadd.f32 %v522_v24, %v521_v23 }
 0x135   : > { %1014 = vmatmul.mubr.f32.vlgmr.msra.gmra.mrb[0].mxu1 %v523_v27  ;;  %v944_v27 = vld [vmem:[%s1413_s4] ss:$0 sm:$0xff] }
 0x136   : > { %1077 = vmatpush3.bf16.msra.mxu1 %v1253_v25  ;;  %1048 = vmatprep.mubr.msk.f32.mxu1 %vm1150_vm1, %v1151_v48  ;;  %v610_v25 = vlaneseq }
 0x137   : > { %1078 = vmatprep.subr.bf16.mxu1 %v1149_v26 }
 0x138   : > { %v611_v28 = vshrl.u32 %v610_v25, 7 }
 0x13a   : > { %1080 = vmatpush3.bf16.msra.mxu1 %v1264_v29  ;;  %v612_v29 = vsub.s32 0, %v611_v28 }
 0x13b   : > { %1081 = vmatprep.subr.bf16.mxu1 %v1149_v26 }
 0x13e   : > { %1083 = vmatpush3.bf16.msra.mxu1 %v1274_v32 }
 0x13f   : > { %1084 = vmatprep.subr.bf16.mxu1 %v1149_v26 }
 0x142   : > { %1086 = vmatpush3.bf16.msra.mxu1 %v1284_v35 }
 0x143   : > { %1087 = vmatprep.subr.bf16.mxu1 %v1149_v26 }
 0x146   : > { %1089 = vmatpush3.bf16.msra.mxu1 %v1294_v38 }
 0x147   : > { %1090 = vmatprep.subr.bf16.mxu1 %v1149_v26 }
 0x14a   : > { %1092 = vmatpush3.bf16.msra.mxu1 %v1304_v41 }
 0x14b   : > { %1093 = vmatprep.subr.bf16.mxu1 %v1149_v26 }
 0x14e   : > { %1095 = vmatpush3.bf16.msra.mxu1 %v1314_v44 }
 0x14f   : > { %1096 = vmatprep.subr.bf16.mxu1 %v1149_v26 }
 0x152   : > { %1098 = vmatpush3.bf16.msra.mxu1 %v1323_v47 }
 0x208   : > { %v606_v30 = vpop.f32.mrb[0].mxu1 }
 0x209   : > { %v613_v31 = vrot.slane %v606_v30, %v612_v29  ;;  %v1015_v32 = vpop.f32.mrb[1].mxu1 }
 0x20a   : > { %v776_v32 = vld [vmem:[%s1362_s13 + $0x8] sm:$0xff] }
 0x20b   : > { %v614_v33 = vsub.f32 %v1329_v49, %v613_v31  ;;  %v615_v34 = vsub.f32 %v1331_v51, %v613_v31  ;;  %v616_v35 = vsub.f32 %v468_v54, %v613_v31  ;;  %v617_v36 = vsub.f32 %v471_v57, %v613_v31 }
 0x20c   : > { %v618_v37 = vsub.f32 %v476_v60, %v613_v31  ;;  %v619_v38 = vsub.f32 %v479_v63, %v613_v31  ;;  %v620_v39 = vsub.f32 %v484_v2, %v613_v31  ;;  %v621_v40 = vsub.f32 %v487_v5, %v613_v31 }
 0x20d   : > { %v622_v41 = vsub.f32 %v492_v8, %v613_v31  ;;  %v623_v26 = vsub.f32 %v495_v11, %v613_v31  ;;  %v624_v42 = vsub.f32 %v500_v14, %v613_v31  ;;  %v625_v43 = vmul.f32 %v614_v33, %v614_v33  ;;  %v775_v31 = vld [vmem:[%s1362_s13] sm:$0xff] }
 0x20e   : > { %v626_v44 = vmul.f32 %v615_v34, %v615_v34  ;;  %v627_v45 = vmul.f32 %v616_v35, %v616_v35  ;;  %v628_v47 = vmul.f32 %v617_v36, %v617_v36  ;;  %v629_v50 = vmul.f32 %v618_v37, %v618_v37 }
 0x20f   : > { %v630_v49 = vmul.f32 %v619_v38, %v619_v38  ;;  %v631_v51 = vmul.f32 %v620_v39, %v620_v39  ;;  %v632_v55 = vmul.f32 %v621_v40, %v621_v40  ;;  %v633_v57 = vmul.f32 %v622_v41, %v622_v41 }
 0x210   : > { %v636_v46 = vadd.f32 %v626_v44, %v625_v43  ;;  %v635_v59 = vmul.f32 %v624_v42, %v624_v42  ;;  %v634_v60 = vmul.f32 %v623_v26, %v623_v26  ;;  %v780_v43 = vld [vmem:[%s1362_s13 + $0x28] sm:$0xff]  ;;  %v781_v44 = vld [vmem:[%s1362_s13 + $0x30] sm:$0xff] }
 0x212   : > { %v637_v48 = vadd.f32 %v636_v46, %v627_v45  ;;  %v645_v63 = vsel %vm515_vm2, %v635_v59, 0.0  ;;  %v782_v45 = vld [vmem:[%s1362_s13 + $0x38] sm:$0xff] }
 0x214   : > { %v638_v52 = vadd.f32 %v637_v48, %v628_v47 }
 0x216   : > { %v639_v53 = vadd.f32 %v638_v52, %v629_v50  ;;  %v783_v52 = vld [vmem:[%s1362_s13 + $0x40] sm:$0xff] }
 0x218   : > { %v640_v54 = vadd.f32 %v639_v53, %v630_v49  ;;  %v784_v49 = vld [vmem:[%s1362_s13 + $0x48] sm:$0xff]  ;;  %v785_v53 = vld [vmem:[%s1362_s13 + $0x50] sm:$0x1] }
 0x21a   : > { %v641_v56 = vadd.f32 %v640_v54, %v631_v51 }
 0x21c   : > { %v642_v58 = vadd.f32 %v641_v56, %v632_v55 }
 0x21e   : > { %v643_v61 = vadd.f32 %v642_v58, %v633_v57 }
 0x220   : > { %v644_v62 = vadd.f32 %v643_v61, %v634_v60 }
 0x222   : > { %v646_v0 = vadd.f32 %v645_v63, %v644_v62 }
 0x224   : > { %v647_v1 = vrot.slane %v646_v0, 4 }
 0x226   : > { %v648_v2 = vadd.f32 %v647_v1, %v646_v0 }
 0x228   : > { %v649_v3 = vrot.slane %v648_v2, 2 }
 0x22a   : > { %v650_v4 = vadd.f32 %v649_v3, %v648_v2 }
 0x22c   : > { %v651_v5 = vrot.slane %v650_v4, 1 }
 0x22e   : > { %v652_v6 = vadd.f32 %v651_v5, %v650_v4 }
 0x230   : > { %1049 = vmatmul.mubr.f32.vlgmr.msra.gmra.mrb[2].mxu1 %v652_v6 }
 0x303   : > { %v719_v7 = vpop.f32.mrb[2].mxu1 }
 0x304   : > { %v720_v8 = vadd.f32 1e-05, %v719_v7  ;;  %v1050_v9 = vpop.f32.mrb[3].mxu1 }
 0x306   : > { %1138 = vrsqrt.f32 %v720_v8 }
 0x310   : > { %v1139_v10 = vpop.eup %1138 }
 0x311   : > { %v727_v11 = vrot.slane %v1139_v10, %v612_v29 }
 0x313   : > { %v728_v13 = vmul.f32 %v727_v11, %v614_v33  ;;  %v729_v14 = vmul.f32 %v727_v11, %v615_v34  ;;  %v730_v15 = vmul.f32 %v727_v11, %v616_v35  ;;  %v731_v16 = vmul.f32 %v727_v11, %v617_v36 }
 0x314   : > { %v732_v17 = vmul.f32 %v727_v11, %v618_v37  ;;  %v733_v18 = vmul.f32 %v727_v11, %v619_v38  ;;  %v734_v19 = vmul.f32 %v727_v11, %v620_v39  ;;  %v735_v20 = vmul.f32 %v727_v11, %v621_v40  ;;  %v777_v37 = vld [vmem:[%s1362_s13 + $0x10] sm:$0xff]  ;;  %v778_v38 = vld [vmem:[%s1362_s13 + $0x18] sm:$0xff]  ;;  %v779_v39 = vld [vmem:[%s1362_s13 + $0x20] sm:$0xff] }
 0x315   : > { %v736_v21 = vmul.f32 %v727_v11, %v622_v41  ;;  %v737_v22 = vmul.f32 %v727_v11, %v623_v26  ;;  %v738_v23 = vmul.f32 %v727_v11, %v624_v42  ;;  %v746_v24 = vmul.f32 %v943_v12, %v728_v13 }
 0x316   : > { %v747_v25 = vmul.f32 %v943_v12, %v729_v14  ;;  %v748_v28 = vmul.f32 %v943_v12, %v730_v15  ;;  %v749_v29 = vmul.f32 %v943_v12, %v731_v16  ;;  %v750_v30 = vmul.f32 %v943_v12, %v732_v17 }
 0x317   : > { %v751_v33 = vmul.f32 %v943_v12, %v733_v18  ;;  %v752_v34 = vmul.f32 %v943_v12, %v734_v19  ;;  %v753_v35 = vmul.f32 %v943_v12, %v735_v20  ;;  %v754_v36 = vmul.f32 %v943_v12, %v736_v21 }
 0x318   : > { %v755_v40 = vmul.f32 %v943_v12, %v737_v22  ;;  %v756_v41 = vmul.f32 %v943_v12, %v738_v23  ;;  %v764_v26 = vadd.f32 %v944_v27, %v746_v24  ;;  %v765_v42 = vadd.f32 %v944_v27, %v747_v25 }
 0x319   : > { %v766_v46 = vadd.f32 %v944_v27, %v748_v28  ;;  %v767_v47 = vadd.f32 %v944_v27, %v749_v29  ;;  %v768_v48 = vadd.f32 %v944_v27, %v750_v30  ;;  %v769_v50 = vadd.f32 %v944_v27, %v751_v33 }
 0x31a   : > { %v770_v51 = vadd.f32 %v944_v27, %v752_v34  ;;  %v771_v54 = vadd.f32 %v944_v27, %v753_v35  ;;  %v772_v55 = vadd.f32 %v944_v27, %v754_v36  ;;  %v773_v56 = vadd.f32 %v944_v27, %v755_v40 }
 0x31b   : > { %v774_v57 = vadd.f32 %v944_v27, %v756_v41  ;;  %v786_v58 = vadd.f32 %v775_v31, %v764_v26  ;;  %v787_v59 = vadd.f32 %v776_v32, %v765_v42  ;;  %v788_v60 = vadd.f32 %v777_v37, %v766_v46 }
 0x31c   : > { %v789_v61 = vadd.f32 %v778_v38, %v767_v47  ;;  %v790_v62 = vadd.f32 %v779_v39, %v768_v48  ;;  %v791_v63 = vadd.f32 %v780_v43, %v769_v50  ;;  %v792_v0 = vadd.f32 %v781_v44, %v770_v51 }
 0x31d   : > { %v793_v1 = vadd.f32 %v782_v45, %v771_v54  ;;  %v794_v2 = vadd.f32 %v783_v52, %v772_v55  ;;  %v795_v3 = vadd.f32 %v784_v49, %v773_v56  ;;  %v796_v4 = vadd.f32 %v785_v53, %v774_v57 }
 0x31e   : > { %vm797_vm3 = vcmp.ge.f32.partialorder %v786_v58, 0.0  ;;  %vm798_vm4 = vcmp.ge.f32.partialorder %v787_v59, 0.0  ;;  %vm799_vm5 = vcmp.ge.f32.partialorder %v788_v60, 0.0  ;;  %vm800_vm6 = vcmp.ge.f32.partialorder %v789_v61, 0.0 }
 0x31f   : > { %vm801_vm7 = vcmp.ge.f32.partialorder %v790_v62, 0.0  ;;  %vm802_vm8 = vcmp.ge.f32.partialorder %v791_v63, 0.0  ;;  %vm803_vm9 = vcmp.ge.f32.partialorder %v792_v0, 0.0  ;;  %vm804_vm10 = vcmp.ge.f32.partialorder %v793_v1, 0.0 }
 0x320   : > { %vm805_vm11 = vcmp.ge.f32.partialorder %v794_v2, 0.0  ;;  %vm806_vm12 = vcmp.ge.f32.partialorder %v795_v3, 0.0  ;;  %vm807_vm13 = vcmp.ge.f32.partialorder %v796_v4, 0.0  ;;  %v808_v5 = vmul.f32 0.2, %v786_v58 }
 0x321   : > { %v809_v6 = vmul.f32 0.2, %v787_v59  ;;  %v810_v7 = vmul.f32 0.2, %v788_v60  ;;  %v811_v8 = vmul.f32 0.2, %v789_v61 }
 0x322   : > { %v812_v9 = vmul.f32 0.2, %v790_v62  ;;  %v813_v10 = vmul.f32 0.2, %v791_v63  ;;  %v814_v11 = vmul.f32 0.2, %v792_v0  ;;  %v819_v12 = vsel %vm797_vm3, %v786_v58, %v808_v5 }
 0x323   : > { %v815_v13 = vmul.f32 0.2, %v793_v1  ;;  %v816_v14 = vmul.f32 0.2, %v794_v2  ;;  %v817_v15 = vmul.f32 0.2, %v795_v3  ;;  %v820_v16 = vsel %vm798_vm4, %v787_v59, %v809_v6  ;;  %830 = vst [vmem:[%s1382_s18] sm:$0xff] %v819_v12 }
 0x324   : > { %v818_v17 = vmul.f32 0.2, %v796_v4  ;;  %v821_v18 = vsel %vm799_vm5, %v788_v60, %v810_v7  ;;  %v822_v19 = vsel %vm800_vm6, %v789_v61, %v811_v8  ;;  %v823_v20 = vsel %vm801_vm7, %v790_v62, %v812_v9  ;;  %831 = vst [vmem:[%s1382_s18 + $0x8] sm:$0xff] %v820_v16 }
 0x325   : > { %v824_v21 = vsel %vm802_vm8, %v791_v63, %v813_v10  ;;  %v825_v22 = vsel %vm803_vm9, %v792_v0, %v814_v11  ;;  %v826_v23 = vsel %vm804_vm10, %v793_v1, %v815_v13  ;;  %v827_v24 = vsel %vm805_vm11, %v794_v2, %v816_v14  ;;  %832 = vst [vmem:[%s1382_s18 + $0x10] sm:$0xff] %v821_v18 }
 0x326   : > { %833 = vst [vmem:[%s1382_s18 + $0x18] sm:$0xff] %v822_v19  ;;  %834 = vst [vmem:[%s1382_s18 + $0x20] sm:$0xff] %v823_v20  ;;  %v828_v27 = vsel %vm806_vm12, %v795_v3, %v817_v15  ;;  %v829_v25 = vsel %vm807_vm13, %v796_v4, %v818_v17 }
 0x327   : > { %835 = vst [vmem:[%s1382_s18 + $0x28] sm:$0xff] %v824_v21  ;;  %836 = vst [vmem:[%s1382_s18 + $0x30] sm:$0xff] %v825_v22 }
 0x328   : > { %837 = vst [vmem:[%s1382_s18 + $0x38] sm:$0xff] %v826_v23  ;;  %838 = vst [vmem:[%s1382_s18 + $0x40] sm:$0xff] %v827_v24 }
 0x329   : > { %839 = vst [vmem:[%s1382_s18 + $0x48] sm:$0xff] %v828_v27  ;;  %840 = vst [vmem:[%s1382_s18 + $0x50] sm:$0x1] %v829_v25 }
 0x32a PF: > { %s16_s21 = sadd.s32 1, %s1146_s21  }
 0x32b   : > { %p13_p4 = scmp.ge.s32.totalorder %s16_s21, 4  }
 0x32d   :  { %15 = sbr.rel (!%p13_p4) target bundleno = 1 (0x1), region = 77 }

// kernel: unet2d_forward.24
= control target key start
LH: loop header
LB: loop body
LE: loop exit
PB: predicated region body
PF: predicated region fallthrough
CT: control target
= control target key end

     0   :  { %s920_s18 = smov 0   ;;  %s1061_s0 = inlined_call_operand.vmem [shape: bf16[2,25,144], index: 0, kind: input, shape index: {}]   ;;  %s1062_s1 = inlined_call_operand.vmem [shape: bf16[144,128], index: 1, kind: input, shape index: {}]   ;;  %s1063_s2 = inlined_call_operand.vmem [shape: f32[128,128], index: 2, kind: input, shape index: {}]   ;;  %s1064_s3 = inlined_call_operand.vmem [shape: f32[1,128], index: 3, kind: input, shape index: {}]   ;;  %s1065_s4 = inlined_call_operand.vmem [shape: f32[1,128], index: 4, kind: input, shape index: {}]   ;;  %s1066_s5 = inlined_call_operand.vmem [shape: f32[2,25,128], index: 5, kind: output, shape index: {}]  }
   0x1 LB: > { %s667_s19 = sadd.s32 4294967295, %s884_s18   ;;  %p671_p0 = scmp.ge.s32.totalorder %s884_s18, 1  ;;  %s884_s18 = sphi %s920_s18, %s15_s18  }
   0x2   : > { %p187_p1 = scmp.lt.s32.totalorder %s884_s18, 3 }
   0x4   : > { %p188_p2 = pnand %p671_p0, %p187_p1 }
   0x5   : > { %v861_v0 = vld [vmem:[%s1062_s1] sm:$0xff] (!%p188_p2)   ;;  %v886_v1 = vmov (!%p188_p2), 0   ;;  %p215_p3 = scmp.lt.s32.totalorder (!%p188_p2), %s667_s19, 1  ;;  %v862_v2 = vld [vmem:[%s1062_s1 + $0x8] sm:$0xff] (!%p188_p2)   ;;  %v887_v3 = vmov (!%p188_p2), 0.0|0.0   ;;  %v863_v4 = vld [vmem:[%s1062_s1 + $0x10] sm:$0xff] (!%p188_p2)   ;;  %v473_v58 = vlaneseq (!%p188_p2) }
   0x6   : > { %191 = sbr.rel (%p188_p2) target bundleno = 754 (0x2f2), region = 40  ;;  %327 = vmatprep.subr.bf16.mxu0 (!%p188_p2), %v886_v1  ;;  %801 = vmatprep.subr.bf16.mxu1 (!%p188_p2), %v887_v3  ;;  %v864_v5 = vld [vmem:[%s1062_s1 + $0x18] sm:$0xff] (!%p188_p2)   ;;  %vm320_vm0 = vcmask (!%p188_p2), 130048   ;;  %v387_v7 = vld [vmem:[%s1063_s2] sm:$0xff] (!%p188_p2)  ;;  %v388_v8 = vld [vmem:[%s1063_s2 + $0x8] sm:$0xff] (!%p188_p2)  ;;  %vm888_vm1 = vmmov (!%p188_p2), 0  }
   0x7   : > { %328 = vmatpush1.bf16.msra.mxu0 (!%p188_p2), %v861_v0  ;;  %v389_v9 = vld [vmem:[%s1063_s2 + $0x10] sm:$0xff] (!%p188_p2)  ;;  %v962_v10 = vpack.c.bf16 (!%p188_p2), %v388_v8, %v387_v7  ;;  %v390_v11 = vld [vmem:[%s1063_s2 + $0x18] sm:$0xff] (!%p188_p2)  ;;  %v865_v12 = vld [vmem:[%s1062_s1 + $0x20] sm:$0xff] (!%p188_p2)   ;;  %v889_v39 = vmov (!%p188_p2), 0.0   ;;  %vm378_vm2 = vcmask (!%p188_p2), 1040384   ;;  %v474_v59 = vshrl.u32 (!%p188_p2), %v473_v58, 7 }
   0x8   : > { %329 = vmatprep.subr.bf16.mxu0 (!%p188_p2), %v886_v1  ;;  %v971_v13 = vpack.c.bf16 (!%p188_p2), %v390_v11, %v389_v9  ;;  %v866_v14 = vld [vmem:[%s1062_s1 + $0x28] sm:$0xff] (!%p188_p2)   ;;  %v867_v15 = vld [vmem:[%s1062_s1 + $0x30] sm:$0xff] (!%p188_p2)   ;;  %v868_v16 = vld [vmem:[%s1062_s1 + $0x38] sm:$0xff] (!%p188_p2)   ;;  %763 = vmatprep.mubr.msk.f32.mxu1 (!%p188_p2), %vm888_vm1, %v889_v39 }
   0x9   : > { %803 = vmatpush3.bf16.msra.mxu1 (!%p188_p2), %v962_v10  ;;  %v869_v17 = vld [vmem:[%s1062_s1 + $0x40] sm:$0xff] (!%p188_p2)   ;;  %v392_v22 = vld [vmem:[%s1063_s2 + $0x28] sm:$0xff] (!%p188_p2)  ;;  %v393_v24 = vld [vmem:[%s1063_s2 + $0x30] sm:$0xff] (!%p188_p2)  ;;  %v475_v60 = vsub.s32 (!%p188_p2), 0, %v474_v59 }
   0xa   : > { %804 = vmatprep.subr.bf16.mxu1 (!%p188_p2), %v887_v3  ;;  %v391_v21 = vld [vmem:[%s1063_s2 + $0x20] sm:$0xff] (!%p188_p2)  ;;  %v394_v25 = vld [vmem:[%s1063_s2 + $0x38] sm:$0xff] (!%p188_p2)  ;;  %v396_v28 = vld [vmem:[%s1063_s2 + $0x48] sm:$0xff] (!%p188_p2) }
   0xb   : > { %330 = vmatpush1.bf16.msra.mxu0 (!%p188_p2), %v862_v2  ;;  %v808_v23 = vpack.c.bf16 (!%p188_p2), %v392_v22, %v391_v21  ;;  %v811_v26 = vpack.c.bf16 (!%p188_p2), %v394_v25, %v393_v24  ;;  %v395_v27 = vld [vmem:[%s1063_s2 + $0x40] sm:$0xff] (!%p188_p2)  ;;  %v397_v30 = vld [vmem:[%s1063_s2 + $0x50] sm:$0xff] (!%p188_p2)  ;;  %v398_v31 = vld [vmem:[%s1063_s2 + $0x58] sm:$0xff] (!%p188_p2) }
   0xc   : > { %331 = vmatprep.subr.bf16.mxu0 (!%p188_p2), %v886_v1  ;;  %v814_v29 = vpack.c.bf16 (!%p188_p2), %v396_v28, %v395_v27  ;;  %v817_v32 = vpack.c.bf16 (!%p188_p2), %v398_v31, %v397_v30  ;;  %v399_v33 = vld [vmem:[%s1063_s2 + $0x60] sm:$0xff] (!%p188_p2)  ;;  %v400_v34 = vld [vmem:[%s1063_s2 + $0x68] sm:$0xff] (!%p188_p2)  ;;  %v401_v36 = vld [vmem:[%s1063_s2 + $0x70] sm:$0xff] (!%p188_p2) }
   0xd   : > { %s1068_s19 = smov (!%p215_p3, %s667_s19), 1  ;;  %806 = vmatpush3.bf16.msra.mxu1 %v971_v13  ;;  %v820_v35 = vpack.c.bf16 %v400_v34, %v399_v33  ;;  %v402_v37 = vld [vmem:[%s1063_s2 + $0x78] sm:$0xff]  ;;  %v692_v28 = vld [vmem:[%s1065_s4] ss:$0 sm:$0xff] }
   0xe   : > { %s695_s24 = sshll.u32 %s1068_s19, 5  ;;  %807 = vmatprep.subr.bf16.mxu1 %v887_v3  ;;  %v823_v38 = vpack.c.bf16 %v402_v37, %v401_v36 }
   0xf   : > { %s946_s29 = scalar_lea.vmem %s1061_s0, %s695_s24  ;;  %332 = vmatpush1.bf16.msra.mxu0 %v863_v4 }
  0x10   : > { %v872_v6 = vld [vmem:[%s946_s29 + $0x4] ss:$8 sps:$4 sm:$0xff]   ;;  %333 = vmatprep.subr.bf16.mxu0 %v886_v1  ;;  %v870_v18 = vld [vmem:[%s946_s29] ss:$8 sps:$4 sm:$0xff]  }
  0x11   : > { %689 = vmatprep.mubr.msk.bf16.mxu0 %vm320_vm0, %v872_v6  ;;  %v873_v19 = vld [vmem:[%s946_s29 + $0x14] ss:$8 sps:$4 sm:$0x1f]   ;;  %v875_v20 = vld [vmem:[%s946_s29 + $0x10] ss:$8 sps:$4 sm:$0x1f]   ;;  %809 = vmatpush3.bf16.msra.mxu1 %v808_v23  ;;  %s224_s29 = scalar_lea.vmem %s1066_s5, %s695_s24 }
  0x12   : > { %810 = vmatprep.subr.bf16.mxu1 %v887_v3 }
  0x13   : > { %334 = vmatpush1.bf16.msra.mxu0 %v864_v5 }
  0x14   : > { %335 = vmatprep.subr.bf16.mxu0 %v886_v1 }
  0x15   : > { %812 = vmatpush3.bf16.msra.mxu1 %v811_v26 }
  0x16   : > { %813 = vmatprep.subr.bf16.mxu1 %v887_v3 }
  0x17   : > { %336 = vmatpush1.bf16.msra.mxu0 %v865_v12 }
  0x18   : > { %337 = vmatprep.subr.bf16.mxu0 %v886_v1 }
  0x19   : > { %815 = vmatpush3.bf16.msra.mxu1 %v814_v29 }
  0x1a   : > { %816 = vmatprep.subr.bf16.mxu1 %v887_v3 }
  0x1b   : > { %338 = vmatpush1.bf16.msra.mxu0 %v866_v14 }
  0x1c   : > { %339 = vmatprep.subr.bf16.mxu0 %v886_v1 }
  0x1d   : > { %818 = vmatpush3.bf16.msra.mxu1 %v817_v32 }
  0x1e   : > { %819 = vmatprep.subr.bf16.mxu1 %v887_v3 }
  0x1f   : > { %340 = vmatpush1.bf16.msra.mxu0 %v867_v15 }
  0x20   : > { %341 = vmatprep.subr.bf16.mxu0 %v886_v1 }
  0x21   : > { %821 = vmatpush3.bf16.msra.mxu1 %v820_v35 }
  0x22   : > { %822 = vmatprep.subr.bf16.mxu1 %v887_v3 }
  0x23   : > { %342 = vmatpush1.bf16.msra.mxu0 %v868_v16 }
  0x24   : > { %343 = vmatprep.subr.bf16.mxu0 %v886_v1 }
  0x25   : > { %824 = vmatpush3.bf16.msra.mxu1 %v823_v38 }
  0x26   : > { %825 = vmatprep.subr.bf16.mxu1 %v887_v3 }
  0x27   : > { %344 = vmatpush1.bf16.msra.mxu0 %v869_v17 }
  0x2a   : > { %360 = vmatmul.mubr.bf16.vlgmr.msra.gmra.mrb[0].mxu0 %v870_v18 }
  0x2b   : > { %690 = vmatprep.mubr.msk.bf16.mxu0 %vm320_vm0, %v873_v19 }
  0x32   : > { %368 = vmatmul.mubr.bf16.gmra.mrb[4].mxu0 %v875_v20 }
  0xfd   : > { %v361_v40 = vpop.f32.mrb[0].mxu0 }
  0xfe   : > { %v363_v41 = vpop.f32.mrb[1].mxu0 }
  0xff   : > { %v364_v42 = vpop.f32.mrb[2].mxu0 }
 0x100   : > { %v376_v43 = vadd.f32 %v364_v42, %v361_v40  ;;  %v366_v44 = vpop.f32.mrb[3].mxu0 }
 0x105   : > { %v369_v45 = vpop.f32.mrb[4].mxu0 }
 0x106   : > { %v377_v46 = vadd.f32 %v376_v43, %v369_v45  ;;  %v371_v47 = vpop.f32.mrb[5].mxu0 }
 0x107   : > { %v372_v48 = vpop.f32.mrb[6].mxu0 }
 0x108   : > { %v379_v49 = vsel %vm378_vm2, %v372_v48, 0.0  ;;  %v374_v50 = vpop.f32.mrb[7].mxu0 }
 0x109   : > { %v380_v51 = vadd.f32 %v379_v49, %v377_v46 }
 0x10b   : > { %v381_v52 = vrot.slane %v380_v51, 4 }
 0x10d   : > { %v382_v53 = vadd.f32 %v381_v52, %v380_v51 }
 0x10f   : > { %v383_v54 = vrot.slane %v382_v53, 2 }
 0x111   : > { %v384_v55 = vadd.f32 %v383_v54, %v382_v53 }
 0x113   : > { %v385_v56 = vrot.slane %v384_v55, 1 }
 0x115   : > { %v386_v57 = vadd.f32 %v385_v56, %v384_v55 }
 0x117   : > { %764 = vmatmul.mubr.f32.vlgmr.msra.gmra.mrb[0].mxu1 %v386_v57 }
 0x118   : > { %827 = vmatpush3.bf16.msra.mxu1 %v962_v10  ;;  %798 = vmatprep.mubr.msk.f32.mxu1 %vm888_vm1, %v889_v39 }
 0x119   : > { %828 = vmatprep.subr.bf16.mxu1 %v887_v3 }
 0x11c   : > { %830 = vmatpush3.bf16.msra.mxu1 %v971_v13 }
 0x11d   : > { %831 = vmatprep.subr.bf16.mxu1 %v887_v3 }
 0x120   : > { %833 = vmatpush3.bf16.msra.mxu1 %v808_v23  ;;  %v691_v23 = vld [vmem:[%s1064_s3] ss:$0 sm:$0xff] }
 0x121   : > { %834 = vmatprep.subr.bf16.mxu1 %v887_v3 }
 0x124   : > { %836 = vmatpush3.bf16.msra.mxu1 %v811_v26 }
 0x125   : > { %837 = vmatprep.subr.bf16.mxu1 %v887_v3 }
 0x128   : > { %839 = vmatpush3.bf16.msra.mxu1 %v814_v29 }
 0x129   : > { %840 = vmatprep.subr.bf16.mxu1 %v887_v3 }
 0x12c   : > { %842 = vmatpush3.bf16.msra.mxu1 %v817_v32 }
 0x12d   : > { %843 = vmatprep.subr.bf16.mxu1 %v887_v3 }
 0x130   : > { %845 = vmatpush3.bf16.msra.mxu1 %v820_v35 }
 0x131   : > { %846 = vmatprep.subr.bf16.mxu1 %v887_v3 }
 0x134   : > { %848 = vmatpush3.bf16.msra.mxu1 %v823_v38 }
 0x1ea   : > { %v469_v61 = vpop.f32.mrb[0].mxu1 }
 0x1eb   : > { %v476_v62 = vrot.slane %v469_v61, %v475_v60  ;;  %v765_v63 = vpop.f32.mrb[1].mxu1 }
 0x1ed   : > { %v477_v0 = vsub.f32 %v361_v40, %v476_v62  ;;  %v478_v1 = vsub.f32 %v364_v42, %v476_v62  ;;  %v479_v2 = vsub.f32 %v369_v45, %v476_v62  ;;  %v480_v4 = vsub.f32 %v372_v48, %v476_v62 }
 0x1ef   : > { %v481_v5 = vmul.f32 %v477_v0, %v477_v0  ;;  %v482_v6 = vmul.f32 %v478_v1, %v478_v1  ;;  %v484_v7 = vmul.f32 %v480_v4, %v480_v4  ;;  %v483_v8 = vmul.f32 %v479_v2, %v479_v2 }
 0x1f1   : > { %v485_v9 = vadd.f32 %v482_v6, %v481_v5  ;;  %v487_v11 = vsel %vm378_vm2, %v484_v7, 0.0 }
 0x1f3   : > { %v486_v10 = vadd.f32 %v485_v9, %v483_v8 }
 0x1f5   : > { %v488_v3 = vadd.f32 %v487_v11, %v486_v10 }
 0x1f7   : > { %v489_v12 = vrot.slane %v488_v3, 4 }
 0x1f9   : > { %v490_v13 = vadd.f32 %v489_v12, %v488_v3 }
 0x1fb   : > { %v491_v14 = vrot.slane %v490_v13, 2 }
 0x1fd   : > { %v492_v15 = vadd.f32 %v491_v14, %v490_v13 }
 0x1ff   : > { %v493_v16 = vrot.slane %v492_v15, 1 }
 0x201   : > { %v494_v17 = vadd.f32 %v493_v16, %v492_v15 }
 0x203   : > { %799 = vmatmul.mubr.f32.vlgmr.msra.gmra.mrb[2].mxu1 %v494_v17 }
 0x2d6   : > { %v561_v18 = vpop.f32.mrb[2].mxu1 }
 0x2d7   : > { %v562_v19 = vadd.f32 1e-05, %v561_v18  ;;  %v800_v20 = vpop.f32.mrb[3].mxu1 }
 0x2d9   : > { %876 = vrsqrt.f32 %v562_v19 }
 0x2e3   : > { %v877_v21 = vpop.eup %876 }
 0x2e4   : > { %v569_v22 = vrot.slane %v877_v21, %v475_v60 }
 0x2e6   : > { %v570_v24 = vmul.f32 %v569_v22, %v477_v0  ;;  %v571_v25 = vmul.f32 %v569_v22, %v478_v1  ;;  %v572_v26 = vmul.f32 %v569_v22, %v479_v2  ;;  %v573_v27 = vmul.f32 %v569_v22, %v480_v4 }
 0x2e8   : > { %v581_v29 = vmul.f32 %v691_v23, %v570_v24  ;;  %v582_v30 = vmul.f32 %v691_v23, %v571_v25  ;;  %v583_v31 = vmul.f32 %v691_v23, %v572_v26  ;;  %v584_v32 = vmul.f32 %v691_v23, %v573_v27 }
 0x2ea   : > { %v592_v33 = vadd.f32 %v692_v28, %v581_v29  ;;  %v593_v34 = vadd.f32 %v692_v28, %v582_v30  ;;  %v594_v35 = vadd.f32 %v692_v28, %v583_v31  ;;  %v595_v36 = vadd.f32 %v692_v28, %v584_v32 }
 0x2ec   : > { %vm596_vm3 = vcmp.ge.f32.partialorder %v592_v33, 0.0  ;;  %vm597_vm4 = vcmp.ge.f32.partialorder %v593_v34, 0.0  ;;  %vm598_vm5 = vcmp.ge.f32.partialorder %v594_v35, 0.0  ;;  %vm599_vm6 = vcmp.ge.f32.partialorder %v595_v36, 0.0 }
 0x2ed   : > { %v600_v37 = vmul.f32 0.2, %v592_v33  ;;  %v601_v38 = vmul.f32 0.2, %v593_v34  ;;  %v602_v39 = vmul.f32 0.2, %v594_v35 }
 0x2ee   : > { %v603_v40 = vmul.f32 0.2, %v595_v36 }
 0x2ef   : > { %v604_v41 = vsel %vm596_vm3, %v592_v33, %v600_v37  ;;  %v605_v42 = vsel %vm597_vm4, %v593_v34, %v601_v38  ;;  %v606_v43 = vsel %vm598_vm5, %v594_v35, %v602_v39 }
 0x2f0   : > { %v607_v44 = vsel %vm599_vm6, %v595_v36, %v603_v40  ;;  %608 = vst [vmem:[%s224_s29] sm:$0xff] %v604_v41  ;;  %609 = vst [vmem:[%s224_s29 + $0x8] sm:$0xff] %v605_v42 }
 0x2f1   : > { %610 = vst [vmem:[%s224_s29 + $0x10] sm:$0xff] %v606_v43  ;;  %611 = vst [vmem:[%s224_s29 + $0x18] sm:$0x1] %v607_v44 }
 0x2f2 PF: > { %s15_s18 = sadd.s32 1, %s884_s18  }
 0x2f3   : > { %p12_p4 = scmp.ge.s32.totalorder %s15_s18, 4  }
 0x2f5   :  { %14 = sbr.rel (!%p12_p4) target bundleno = 1 (0x1), region = 70 }

// kernel: unet2d_forward.26
= control target key start
LH: loop header
LB: loop body
LE: loop exit
PB: predicated region body
PF: predicated region fallthrough
CT: control target
= control target key end

     0   :  { %s1191_s21 = smov 0   ;;  %s1353_s0 = inlined_call_operand.vmem [shape: bf16[2,25,288], index: 0, kind: input, shape index: {}]   ;;  %s1354_s1 = inlined_call_operand.vmem [shape: bf16[288,128], index: 1, kind: input, shape index: {}]   ;;  %s1355_s2 = inlined_call_operand.vmem [shape: f32[128,128], index: 2, kind: input, shape index: {}]   ;;  %s1356_s3 = inlined_call_operand.vmem [shape: f32[1,128], index: 3, kind: input, shape index: {}]   ;;  %s1357_s4 = inlined_call_operand.vmem [shape: f32[1,128], index: 4, kind: input, shape index: {}]   ;;  %s1358_s5 = inlined_call_operand.vmem [shape: f32[2,25,128], index: 5, kind: input, shape index: {}]   ;;  %s1359_s6 = inlined_call_operand.vmem [shape: f32[2,25,128], index: 6, kind: output, shape index: {}]  }
   0x1 LB: > { %s871_s22 = sadd.s32 4294967295, %s1151_s21   ;;  %p875_p0 = scmp.ge.s32.totalorder %s1151_s21, 1  ;;  %s1151_s21 = sphi %s1191_s21, %s16_s21  }
   0x2   : > { %p222_p1 = scmp.lt.s32.totalorder %s1151_s21, 3 }
   0x4   : > { %p223_p2 = pnand %p875_p0, %p222_p1 }
   0x5   : > { %v1117_v0 = vld [vmem:[%s1354_s1 + $0x40] sm:$0xff] (!%p223_p2)   ;;  %v1119_v2 = vld [vmem:[%s1354_s1 + $0x48] sm:$0xff] (!%p223_p2)   ;;  %v1121_v4 = vld [vmem:[%s1354_s1 + $0x50] sm:$0xff] (!%p223_p2)   ;;  %p257_p3 = scmp.lt.s32.totalorder (!%p223_p2), %s871_s22, 1  ;;  %vm455_vm0 = vcmask (!%p223_p2), 261120   ;;  %v1153_v18 = vmov (!%p223_p2), 0.0|0.0  }
   0x6   : > { %226 = sbr.rel (%p223_p2) target bundleno = 757 (0x2f5), region = 44  ;;  %v1118_v1 = vld [vmem:[%s1354_s1] sm:$0xff] (!%p223_p2)   ;;  %913 = vmatprep.subr.bf16.mxu0 (!%p223_p2), %v1117_v0  ;;  %v1120_v3 = vld [vmem:[%s1354_s1 + $0x8] sm:$0xff] (!%p223_p2)   ;;  %v1122_v5 = vld [vmem:[%s1354_s1 + $0x10] sm:$0xff] (!%p223_p2)   ;;  %vm1154_vm1 = vmmov (!%p223_p2), 0   ;;  %v1155_v49 = vmov (!%p223_p2), 0.0  }
   0x7   : > { %914 = vmatpush3.bf16.msra.mxu0 (!%p223_p2), %v1118_v1  ;;  %v1123_v6 = vld [vmem:[%s1354_s1 + $0x58] sm:$0xff] (!%p223_p2)   ;;  %v1125_v8 = vld [vmem:[%s1354_s1 + $0x60] sm:$0xff] (!%p223_p2)   ;;  %v1127_v11 = vld [vmem:[%s1354_s1 + $0x68] sm:$0xff] (!%p223_p2)   ;;  %vm562_vm2 = vcmask (!%p223_p2), 1040384  }
   0x8   : > { %915 = vmatprep.subr.bf16.mxu0 (!%p223_p2), %v1119_v2  ;;  %v1124_v7 = vld [vmem:[%s1354_s1 + $0x18] sm:$0xff] (!%p223_p2)   ;;  %v1131_v9 = vld [vmem:[%s1354_s1 + $0x80] sm:$0xff] (!%p223_p2)   ;;  %v1134_v12 = vld [vmem:[%s1354_s1 + $0x88] sm:$0xff] (!%p223_p2)  }
   0x9   : > { %v1126_v10 = vld [vmem:[%s1354_s1 + $0x20] sm:$0xff] (!%p223_p2)   ;;  %979 = vmatprep.subr.bf16.mxu1 (!%p223_p2), %v1131_v9  ;;  %v1128_v13 = vld [vmem:[%s1354_s1 + $0x28] sm:$0xff] (!%p223_p2)   ;;  %v1129_v15 = vld [vmem:[%s1354_s1 + $0x70] sm:$0xff] (!%p223_p2)  }
   0xa   : > { %980 = vmatpush3.bf16.msra.mxu1 (!%p223_p2), %v1131_v9  ;;  %v1130_v19 = vld [vmem:[%s1354_s1 + $0x30] sm:$0xff] (!%p223_p2)   ;;  %v1132_v20 = vld [vmem:[%s1354_s1 + $0x78] sm:$0xff] (!%p223_p2)   ;;  %v571_v25 = vld [vmem:[%s1355_s2] sm:$0xff] (!%p223_p2) }
   0xb   : > { %916 = vmatpush3.bf16.msra.mxu0 (!%p223_p2), %v1120_v3  ;;  %981 = vmatprep.subr.bf16.mxu1 (!%p223_p2), %v1134_v12  ;;  %v1133_v21 = vld [vmem:[%s1354_s1 + $0x38] sm:$0xff] (!%p223_p2)   ;;  %v572_v26 = vld [vmem:[%s1355_s2 + $0x8] sm:$0xff] (!%p223_p2)  ;;  %v573_v28 = vld [vmem:[%s1355_s2 + $0x10] sm:$0xff] (!%p223_p2) }
   0xc   : > { %917 = vmatprep.subr.bf16.mxu0 (!%p223_p2), %v1121_v4  ;;  %v1058_v27 = vpack.c.bf16 (!%p223_p2), %v572_v26, %v571_v25  ;;  %v574_v29 = vld [vmem:[%s1355_s2 + $0x18] sm:$0xff] (!%p223_p2)  ;;  %v575_v31 = vld [vmem:[%s1355_s2 + $0x20] sm:$0xff] (!%p223_p2)  ;;  %v576_v32 = vld [vmem:[%s1355_s2 + $0x28] sm:$0xff] (!%p223_p2) }
   0xd   : > { %s1361_s22 = smov (!%p257_p3, %s871_s22), 1  ;;  %v1061_v30 = vpack.c.bf16 %v574_v29, %v573_v28  ;;  %v1064_v33 = vpack.c.bf16 %v576_v32, %v575_v31  ;;  %v577_v34 = vld [vmem:[%s1355_s2 + $0x30] sm:$0xff]  ;;  %v578_v35 = vld [vmem:[%s1355_s2 + $0x38] sm:$0xff]  ;;  %v579_v37 = vld [vmem:[%s1355_s2 + $0x40] sm:$0xff] }
   0xe   : > { %s1105_s17 = smul.u32 48, %s1361_s22  ;;  %982 = vmatpush3.bf16.msra.mxu1 %v1134_v12  ;;  %v1067_v36 = vpack.c.bf16 %v578_v35, %v577_v34  ;;  %v580_v38 = vld [vmem:[%s1355_s2 + $0x48] sm:$0xff]  ;;  %v581_v40 = vld [vmem:[%s1355_s2 + $0x50] sm:$0xff]  ;;  %v582_v41 = vld [vmem:[%s1355_s2 + $0x58] sm:$0xff]  ;;  %s911_s29 = sshll.u32 %s1361_s22, 5 }
   0xf   : > { %918 = vmatpush3.bf16.msra.mxu0 %v1122_v5  ;;  %1057 = vmatprep.subr.bf16.mxu1 %v1153_v18  ;;  %v1070_v39 = vpack.c.bf16 %v580_v38, %v579_v37  ;;  %v1073_v42 = vpack.c.bf16 %v582_v41, %v581_v40  ;;  %v583_v43 = vld [vmem:[%s1355_s2 + $0x60] sm:$0xff]  ;;  %v584_v44 = vld [vmem:[%s1355_s2 + $0x68] sm:$0xff]  ;;  %v585_v46 = vld [vmem:[%s1355_s2 + $0x70] sm:$0xff]  ;;  %s266_s8 = scalar_lea.vmem %s1358_s5, %s911_s29  ;;  %s271_s15 = scalar_lea.vmem %s1359_s6, %s911_s29 }
  0x10   : > { %919 = vmatprep.subr.bf16.mxu0 %v1123_v6  ;;  %s1241_s28 = scalar_lea.vmem %s1353_s0, %s1105_s17  ;;  %v1076_v45 = vpack.c.bf16 %v584_v44, %v583_v43  ;;  %v586_v47 = vld [vmem:[%s1355_s2 + $0x78] sm:$0xff] }
  0x11   : > { %v1137_v14 = vld [vmem:[%s1241_s28 + $0x4] ss:$12 sps:$4 sm:$0xff]   ;;  %v1138_v16 = vld [vmem:[%s1241_s28 + $0x8] ss:$12 sps:$4 sm:$0xff]   ;;  %v1135_v22 = vld [vmem:[%s1241_s28] ss:$12 sps:$4 sm:$0xff]   ;;  %v1079_v48 = vpack.c.bf16 %v586_v47, %v585_v46 }
  0x12   : > { %494 = vmatprep.mubr.bf16.mxu0 %v1137_v14  ;;  %v1139_v17 = vld [vmem:[%s1241_s28 + $0x20] ss:$12 sps:$4 sm:$0x1f]   ;;  %983 = vmatprep.mubr.msk.bf16.mxu1 %vm455_vm0, %v1138_v16  ;;  %v1140_v23 = vld [vmem:[%s1241_s28 + $0x1c] ss:$12 sps:$4 sm:$0x1f]   ;;  %v657_v16 = vlaneseq }
  0x13   : > { %920 = vmatpush3.bf16.msra.mxu0 %v1124_v7  ;;  %984 = vmatmul.mubr.msk.bf16.vlgmr.msra.gmra.mrb[0].mxu1 %vm455_vm0, %v1139_v17  ;;  %v1142_v24 = vld [vmem:[%s1241_s28 + $0x18] ss:$12 sps:$4 sm:$0x1f]  }
  0x14   : > { %921 = vmatprep.subr.bf16.mxu0 %v1125_v8  ;;  %1059 = vmatpush3.bf16.msra.mxu1 %v1058_v27  ;;  %v658_v17 = vshrl.u32 %v657_v16, 7 }
  0x15   : > { %1060 = vmatprep.subr.bf16.mxu1 %v1153_v18  ;;  %1019 = vmatprep.mubr.msk.f32.mxu1 %vm1154_vm1, %v1155_v49 }
  0x17   : > { %922 = vmatpush3.bf16.msra.mxu0 %v1126_v10 }
  0x18   : > { %923 = vmatprep.subr.bf16.mxu0 %v1127_v11  ;;  %1062 = vmatpush3.bf16.msra.mxu1 %v1061_v30 }
  0x19   : > { %1063 = vmatprep.subr.bf16.mxu1 %v1153_v18 }
  0x1b   : > { %924 = vmatpush3.bf16.msra.mxu0 %v1128_v13 }
  0x1c   : > { %925 = vmatprep.subr.bf16.mxu0 %v1129_v15  ;;  %1065 = vmatpush3.bf16.msra.mxu1 %v1064_v33 }
  0x1d   : > { %1066 = vmatprep.subr.bf16.mxu1 %v1153_v18 }
  0x1f   : > { %926 = vmatpush3.bf16.msra.mxu0 %v1130_v19 }
  0x20   : > { %927 = vmatprep.subr.bf16.mxu0 %v1132_v20  ;;  %1068 = vmatpush3.bf16.msra.mxu1 %v1067_v36 }
  0x21   : > { %1069 = vmatprep.subr.bf16.mxu1 %v1153_v18 }
  0x23   : > { %928 = vmatpush3.bf16.msra.mxu0 %v1133_v21 }
  0x24   : > { %1081 = vmatprep.subr.bf16.mxu0 %v1153_v18  ;;  %1071 = vmatpush3.bf16.msra.mxu1 %v1070_v39 }
  0x25   : > { %1072 = vmatprep.subr.bf16.mxu1 %v1153_v18 }
  0x26   : > { %495 = vmatmul.mubr.bf16.vlgmr.msra.gmra.mrb[0].mxu0 %v1135_v22 }
  0x27   : > { %502 = vmatprep.mubr.bf16.mxu0 %v1140_v23  ;;  %1083 = vmatpush3.bf16.msra.mxu0 %v1058_v27 }
  0x28   : > { %1084 = vmatprep.subr.bf16.mxu0 %v1153_v18  ;;  %1074 = vmatpush3.bf16.msra.mxu1 %v1073_v42 }
  0x29   : > { %1075 = vmatprep.subr.bf16.mxu1 %v1153_v18 }
  0x2b   : > { %1086 = vmatpush3.bf16.msra.mxu0 %v1061_v30 }
  0x2c   : > { %1087 = vmatprep.subr.bf16.mxu0 %v1153_v18  ;;  %1077 = vmatpush3.bf16.msra.mxu1 %v1076_v45 }
  0x2d   : > { %1078 = vmatprep.subr.bf16.mxu1 %v1153_v18 }
  0x2e   : > { %503 = vmatmul.mubr.bf16.gmra.mrb[4].mxu0 %v1142_v24 }
  0x2f   : > { %1089 = vmatpush3.bf16.msra.mxu0 %v1064_v33  ;;  %1054 = vmatprep.mubr.msk.f32.mxu0 %vm1154_vm1, %v1155_v49 }
  0x30   : > { %1090 = vmatprep.subr.bf16.mxu0 %v1153_v18  ;;  %1080 = vmatpush3.bf16.msra.mxu1 %v1079_v48 }
  0x33   : > { %1092 = vmatpush3.bf16.msra.mxu0 %v1067_v36 }
  0x34   : > { %1093 = vmatprep.subr.bf16.mxu0 %v1153_v18 }
  0x37   : > { %1095 = vmatpush3.bf16.msra.mxu0 %v1070_v39 }
  0x38   : > { %1096 = vmatprep.subr.bf16.mxu0 %v1153_v18 }
  0x3b   : > { %1098 = vmatpush3.bf16.msra.mxu0 %v1073_v42 }
  0x3c   : > { %1099 = vmatprep.subr.bf16.mxu0 %v1153_v18 }
  0x3f   : > { %1101 = vmatpush3.bf16.msra.mxu0 %v1076_v45  ;;  %v907_v45 = vld [vmem:[%s1356_s3] ss:$0 sm:$0xff] }
  0x40   : > { %1102 = vmatprep.subr.bf16.mxu0 %v1153_v18  ;;  %v659_v18 = vsub.s32 0, %v658_v17 }
  0x43   : > { %1104 = vmatpush3.bf16.msra.mxu0 %v1079_v48 }
  0xe6   : > { %v985_v50 = vpop.f32.mrb[0].mxu1 }
  0xe7   : > { %v545_v51 = vpop.f32.mrb[1].mxu1 }
  0xe8   : > { %v986_v52 = vpop.f32.mrb[2].mxu1 }
  0xe9   : > { %v548_v53 = vpop.f32.mrb[3].mxu1 }
  0xf9   : > { %v929_v54 = vpop.f32.mrb[0].mxu0 }
  0xfa   : > { %v930_v55 = vpop.f32.mrb[1].mxu0 }
  0xfb   : > { %v931_v56 = vadd.f32 %v930_v55, %v929_v54  ;;  %v932_v57 = vpop.f32.mrb[2].mxu0 }
  0xfc   : > { %v933_v58 = vpop.f32.mrb[3].mxu0 }
  0xfd   : > { %v934_v59 = vadd.f32 %v933_v58, %v932_v57  ;;  %v546_v60 = vadd.f32 %v931_v56, %v545_v51  ;;  %v780_v51 = vld [vmem:[%s266_s8] sm:$0xff]  ;;  %v781_v56 = vld [vmem:[%s266_s8 + $0x8] sm:$0xff]  ;;  %v782_v57 = vld [vmem:[%s266_s8 + $0x10] sm:$0xff] }
  0xfe   : > { %v783_v58 = vld [vmem:[%s266_s8 + $0x18] sm:$0x1] }
  0xff   : > { %v549_v61 = vadd.f32 %v934_v59, %v548_v53 }
 0x101   : > { %v935_v62 = vpop.f32.mrb[4].mxu0  ;;  %v560_v3 = vadd.f32 %v549_v61, %v546_v60 }
 0x102   : > { %v936_v63 = vpop.f32.mrb[5].mxu0 }
 0x103   : > { %v937_v0 = vadd.f32 %v936_v63, %v935_v62  ;;  %v938_v1 = vpop.f32.mrb[6].mxu0 }
 0x104   : > { %v939_v2 = vpop.f32.mrb[7].mxu0 }
 0x105   : > { %v554_v4 = vadd.f32 %v985_v50, %v937_v0  ;;  %v940_v5 = vadd.f32 %v939_v2, %v938_v1  ;;  %v908_v50 = vld [vmem:[%s1357_s4] ss:$0 sm:$0xff] }
 0x107   : > { %v561_v6 = vadd.f32 %v560_v3, %v554_v4  ;;  %v557_v7 = vadd.f32 %v986_v52, %v940_v5 }
 0x109   : > { %v563_v8 = vsel %vm562_vm2, %v557_v7, 0.0 }
 0x10a   : > { %v564_v9 = vadd.f32 %v563_v8, %v561_v6 }
 0x10c   : > { %v565_v10 = vrot.slane %v564_v9, 4 }
 0x10e   : > { %v566_v11 = vadd.f32 %v565_v10, %v564_v9 }
 0x110   : > { %v567_v12 = vrot.slane %v566_v11, 2 }
 0x112   : > { %v568_v13 = vadd.f32 %v567_v12, %v566_v11 }
 0x114   : > { %v569_v14 = vrot.slane %v568_v13, 1 }
 0x116   : > { %v570_v15 = vadd.f32 %v569_v14, %v568_v13 }
 0x118   : > { %1020 = vmatmul.mubr.f32.vlgmr.msra.gmra.mrb[4].mxu1 %v570_v15 }
 0x1eb   : > { %v653_v19 = vpop.f32.mrb[4].mxu1 }
 0x1ec   : > { %v660_v20 = vrot.slane %v653_v19, %v659_v18  ;;  %v1021_v21 = vpop.f32.mrb[5].mxu1 }
 0x1ee   : > { %v661_v22 = vsub.f32 %v546_v60, %v660_v20  ;;  %v662_v23 = vsub.f32 %v549_v61, %v660_v20  ;;  %v663_v24 = vsub.f32 %v554_v4, %v660_v20  ;;  %v664_v25 = vsub.f32 %v557_v7, %v660_v20 }
 0x1f0   : > { %v665_v26 = vmul.f32 %v661_v22, %v661_v22  ;;  %v666_v27 = vmul.f32 %v662_v23, %v662_v23  ;;  %v668_v28 = vmul.f32 %v664_v25, %v664_v25  ;;  %v667_v29 = vmul.f32 %v663_v24, %v663_v24 }
 0x1f2   : > { %v669_v30 = vadd.f32 %v666_v27, %v665_v26  ;;  %v671_v32 = vsel %vm562_vm2, %v668_v28, 0.0 }
 0x1f4   : > { %v670_v31 = vadd.f32 %v669_v30, %v667_v29 }
 0x1f6   : > { %v672_v33 = vadd.f32 %v671_v32, %v670_v31 }
 0x1f8   : > { %v673_v34 = vrot.slane %v672_v33, 4 }
 0x1fa   : > { %v674_v35 = vadd.f32 %v673_v34, %v672_v33 }
 0x1fc   : > { %v675_v36 = vrot.slane %v674_v35, 2 }
 0x1fe   : > { %v676_v37 = vadd.f32 %v675_v36, %v674_v35 }
 0x200   : > { %v677_v38 = vrot.slane %v676_v37, 1 }
 0x202   : > { %v678_v39 = vadd.f32 %v677_v38, %v676_v37 }
 0x204   : > { %1055 = vmatmul.mubr.f32.vlgmr.msra.gmra.mrb[8].mxu0 %v678_v39 }
 0x2d7   : > { %v745_v40 = vpop.f32.mrb[8].mxu0 }
 0x2d8   : > { %v746_v41 = vadd.f32 1e-05, %v745_v40  ;;  %v1056_v42 = vpop.f32.mrb[9].mxu0 }
 0x2da   : > { %1143 = vrsqrt.f32 %v746_v41 }
 0x2e4   : > { %v1144_v43 = vpop.eup %1143 }
 0x2e5   : > { %v753_v44 = vrot.slane %v1144_v43, %v659_v18 }
 0x2e7   : > { %v754_v46 = vmul.f32 %v753_v44, %v661_v22  ;;  %v755_v47 = vmul.f32 %v753_v44, %v662_v23  ;;  %v756_v48 = vmul.f32 %v753_v44, %v663_v24  ;;  %v757_v49 = vmul.f32 %v753_v44, %v664_v25 }
 0x2e9   : > { %v765_v52 = vmul.f32 %v907_v45, %v754_v46  ;;  %v766_v53 = vmul.f32 %v907_v45, %v755_v47  ;;  %v767_v54 = vmul.f32 %v907_v45, %v756_v48  ;;  %v768_v55 = vmul.f32 %v907_v45, %v757_v49 }
 0x2eb   : > { %v776_v59 = vadd.f32 %v908_v50, %v765_v52  ;;  %v777_v60 = vadd.f32 %v908_v50, %v766_v53  ;;  %v778_v61 = vadd.f32 %v908_v50, %v767_v54  ;;  %v779_v62 = vadd.f32 %v908_v50, %v768_v55 }
 0x2ed   : > { %v784_v63 = vadd.f32 %v780_v51, %v776_v59  ;;  %v785_v0 = vadd.f32 %v781_v56, %v777_v60  ;;  %v786_v1 = vadd.f32 %v782_v57, %v778_v61  ;;  %v787_v2 = vadd.f32 %v783_v58, %v779_v62 }
 0x2ef   : > { %vm788_vm3 = vcmp.ge.f32.partialorder %v784_v63, 0.0  ;;  %vm789_vm4 = vcmp.ge.f32.partialorder %v785_v0, 0.0  ;;  %vm790_vm5 = vcmp.ge.f32.partialorder %v786_v1, 0.0  ;;  %vm791_vm6 = vcmp.ge.f32.partialorder %v787_v2, 0.0 }
 0x2f0   : > { %v792_v3 = vmul.f32 0.2, %v784_v63  ;;  %v793_v4 = vmul.f32 0.2, %v785_v0  ;;  %v794_v5 = vmul.f32 0.2, %v786_v1 }
 0x2f1   : > { %v795_v6 = vmul.f32 0.2, %v787_v2 }
 0x2f2   : > { %v796_v7 = vsel %vm788_vm3, %v784_v63, %v792_v3  ;;  %v797_v8 = vsel %vm789_vm4, %v785_v0, %v793_v4  ;;  %v798_v9 = vsel %vm790_vm5, %v786_v1, %v794_v5 }
 0x2f3   : > { %v799_v10 = vsel %vm791_vm6, %v787_v2, %v795_v6  ;;  %800 = vst [vmem:[%s271_s15] sm:$0xff] %v796_v7  ;;  %801 = vst [vmem:[%s271_s15 + $0x8] sm:$0xff] %v797_v8 }
 0x2f4   : > { %802 = vst [vmem:[%s271_s15 + $0x10] sm:$0xff] %v798_v9  ;;  %803 = vst [vmem:[%s271_s15 + $0x18] sm:$0x1] %v799_v10 }
 0x2f5 PF: > { %s16_s21 = sadd.s32 1, %s1151_s21  }
 0x2f6   : > { %p13_p4 = scmp.ge.s32.totalorder %s16_s21, 4  }
 0x2f8   :  { %15 = sbr.rel (!%p13_p4) target bundleno = 1 (0x1), region = 77 }

// kernel: unet2d_forward.25
= control target key start
LH: loop header
LB: loop body
LE: loop exit
PB: predicated region body
PF: predicated region fallthrough
CT: control target
= control target key end

     0   :  { %s1116_s18 = smov 0   ;;  %s1273_s0 = inlined_call_operand.vmem [shape: bf16[2,25,288], index: 0, kind: input, shape index: {}]   ;;  %s1274_s1 = inlined_call_operand.vmem [shape: bf16[288,128], index: 1, kind: input, shape index: {}]   ;;  %s1275_s2 = inlined_call_operand.vmem [shape: f32[128,128], index: 2, kind: input, shape index: {}]   ;;  %s1276_s3 = inlined_call_operand.vmem [shape: f32[1,128], index: 3, kind: input, shape index: {}]   ;;  %s1277_s4 = inlined_call_operand.vmem [shape: f32[1,128], index: 4, kind: input, shape index: {}]   ;;  %s1278_s5 = inlined_call_operand.vmem [shape: f32[2,25,128], index: 5, kind: output, shape index: {}]  }
   0x1 LB: > { %s804_s19 = sadd.s32 4294967295, %s1081_s18   ;;  %p808_p0 = scmp.ge.s32.totalorder %s1081_s18, 1  ;;  %s1081_s18 = sphi %s1116_s18, %s15_s18  }
   0x2   : > { %p187_p1 = scmp.lt.s32.totalorder %s1081_s18, 3 }
   0x4   : > { %p188_p2 = pnand %p808_p0, %p187_p1 }
   0x5   : > { %v1047_v0 = vld [vmem:[%s1274_s1 + $0x40] sm:$0xff] (!%p188_p2)   ;;  %v1049_v2 = vld [vmem:[%s1274_s1 + $0x48] sm:$0xff] (!%p188_p2)   ;;  %v1051_v4 = vld [vmem:[%s1274_s1 + $0x50] sm:$0xff] (!%p188_p2)   ;;  %p215_p3 = scmp.lt.s32.totalorder (!%p188_p2), %s804_s19, 1  ;;  %vm408_vm0 = vcmask (!%p188_p2), 261120   ;;  %v1083_v18 = vmov (!%p188_p2), 0.0|0.0  }
   0x6   : > { %191 = sbr.rel (%p188_p2) target bundleno = 755 (0x2f3), region = 40  ;;  %v1048_v1 = vld [vmem:[%s1274_s1] sm:$0xff] (!%p188_p2)   ;;  %843 = vmatprep.subr.bf16.mxu0 (!%p188_p2), %v1047_v0  ;;  %v1050_v3 = vld [vmem:[%s1274_s1 + $0x8] sm:$0xff] (!%p188_p2)   ;;  %v1052_v5 = vld [vmem:[%s1274_s1 + $0x10] sm:$0xff] (!%p188_p2)   ;;  %vm1084_vm1 = vmmov (!%p188_p2), 0   ;;  %v1085_v49 = vmov (!%p188_p2), 0.0  }
   0x7   : > { %844 = vmatpush3.bf16.msra.mxu0 (!%p188_p2), %v1048_v1  ;;  %v1053_v6 = vld [vmem:[%s1274_s1 + $0x58] sm:$0xff] (!%p188_p2)   ;;  %v1055_v8 = vld [vmem:[%s1274_s1 + $0x60] sm:$0xff] (!%p188_p2)   ;;  %v1057_v11 = vld [vmem:[%s1274_s1 + $0x68] sm:$0xff] (!%p188_p2)   ;;  %vm515_vm2 = vcmask (!%p188_p2), 1040384  }
   0x8   : > { %845 = vmatprep.subr.bf16.mxu0 (!%p188_p2), %v1049_v2  ;;  %v1054_v7 = vld [vmem:[%s1274_s1 + $0x18] sm:$0xff] (!%p188_p2)   ;;  %v1061_v9 = vld [vmem:[%s1274_s1 + $0x80] sm:$0xff] (!%p188_p2)   ;;  %v1058_v12 = vld [vmem:[%s1274_s1 + $0x28] sm:$0xff] (!%p188_p2)  }
   0x9   : > { %v1056_v10 = vld [vmem:[%s1274_s1 + $0x20] sm:$0xff] (!%p188_p2)   ;;  %909 = vmatprep.subr.bf16.mxu1 (!%p188_p2), %v1061_v9  ;;  %v1064_v13 = vld [vmem:[%s1274_s1 + $0x88] sm:$0xff] (!%p188_p2)   ;;  %v1059_v14 = vld [vmem:[%s1274_s1 + $0x70] sm:$0xff] (!%p188_p2)  }
   0xa   : > { %910 = vmatpush3.bf16.msra.mxu1 (!%p188_p2), %v1061_v9  ;;  %v1060_v19 = vld [vmem:[%s1274_s1 + $0x30] sm:$0xff] (!%p188_p2)   ;;  %v1062_v20 = vld [vmem:[%s1274_s1 + $0x78] sm:$0xff] (!%p188_p2)   ;;  %v524_v25 = vld [vmem:[%s1275_s2] sm:$0xff] (!%p188_p2) }
   0xb   : > { %846 = vmatpush3.bf16.msra.mxu0 (!%p188_p2), %v1050_v3  ;;  %911 = vmatprep.subr.bf16.mxu1 (!%p188_p2), %v1064_v13  ;;  %v1063_v21 = vld [vmem:[%s1274_s1 + $0x38] sm:$0xff] (!%p188_p2)   ;;  %v525_v26 = vld [vmem:[%s1275_s2 + $0x8] sm:$0xff] (!%p188_p2)  ;;  %v526_v28 = vld [vmem:[%s1275_s2 + $0x10] sm:$0xff] (!%p188_p2) }
   0xc   : > { %847 = vmatprep.subr.bf16.mxu0 (!%p188_p2), %v1051_v4  ;;  %v988_v27 = vpack.c.bf16 (!%p188_p2), %v525_v26, %v524_v25  ;;  %v527_v29 = vld [vmem:[%s1275_s2 + $0x18] sm:$0xff] (!%p188_p2)  ;;  %v528_v31 = vld [vmem:[%s1275_s2 + $0x20] sm:$0xff] (!%p188_p2)  ;;  %v529_v32 = vld [vmem:[%s1275_s2 + $0x28] sm:$0xff] (!%p188_p2) }
   0xd   : > { %s1280_s19 = smov (!%p215_p3, %s804_s19), 1  ;;  %v991_v30 = vpack.c.bf16 %v527_v29, %v526_v28  ;;  %v994_v33 = vpack.c.bf16 %v529_v32, %v528_v31  ;;  %v530_v34 = vld [vmem:[%s1275_s2 + $0x30] sm:$0xff]  ;;  %v531_v35 = vld [vmem:[%s1275_s2 + $0x38] sm:$0xff]  ;;  %v532_v37 = vld [vmem:[%s1275_s2 + $0x40] sm:$0xff] }
   0xe   : > { %s1035_s13 = smul.u32 48, %s1280_s19  ;;  %912 = vmatpush3.bf16.msra.mxu1 %v1064_v13  ;;  %v997_v36 = vpack.c.bf16 %v531_v35, %v530_v34  ;;  %v533_v38 = vld [vmem:[%s1275_s2 + $0x48] sm:$0xff]  ;;  %v534_v40 = vld [vmem:[%s1275_s2 + $0x50] sm:$0xff]  ;;  %v535_v41 = vld [vmem:[%s1275_s2 + $0x58] sm:$0xff]  ;;  %s842_s27 = sshll.u32 %s1280_s19, 5 }
   0xf   : > { %848 = vmatpush3.bf16.msra.mxu0 %v1052_v5  ;;  %987 = vmatprep.subr.bf16.mxu1 %v1083_v18  ;;  %v1000_v39 = vpack.c.bf16 %v533_v38, %v532_v37  ;;  %v1003_v42 = vpack.c.bf16 %v535_v41, %v534_v40  ;;  %v536_v43 = vld [vmem:[%s1275_s2 + $0x60] sm:$0xff]  ;;  %v537_v44 = vld [vmem:[%s1275_s2 + $0x68] sm:$0xff]  ;;  %v538_v46 = vld [vmem:[%s1275_s2 + $0x70] sm:$0xff]  ;;  %s224_s30 = scalar_lea.vmem %s1278_s5, %s842_s27 }
  0x10   : > { %849 = vmatprep.subr.bf16.mxu0 %v1053_v6  ;;  %s1166_s24 = scalar_lea.vmem %s1273_s0, %s1035_s13  ;;  %v1006_v45 = vpack.c.bf16 %v537_v44, %v536_v43  ;;  %v539_v47 = vld [vmem:[%s1275_s2 + $0x78] sm:$0xff] }
  0x11   : > { %v1067_v15 = vld [vmem:[%s1166_s24 + $0x4] ss:$12 sps:$4 sm:$0xff]   ;;  %v1068_v16 = vld [vmem:[%s1166_s24 + $0x8] ss:$12 sps:$4 sm:$0xff]   ;;  %v1065_v22 = vld [vmem:[%s1166_s24] ss:$12 sps:$4 sm:$0xff]   ;;  %v1009_v48 = vpack.c.bf16 %v539_v47, %v538_v46 }
  0x12   : > { %447 = vmatprep.mubr.bf16.mxu0 %v1067_v15  ;;  %v1069_v17 = vld [vmem:[%s1166_s24 + $0x20] ss:$12 sps:$4 sm:$0x1f]   ;;  %913 = vmatprep.mubr.msk.bf16.mxu1 %vm408_vm0, %v1068_v16  ;;  %v1070_v23 = vld [vmem:[%s1166_s24 + $0x1c] ss:$12 sps:$4 sm:$0x1f]   ;;  %v610_v16 = vlaneseq }
  0x13   : > { %850 = vmatpush3.bf16.msra.mxu0 %v1054_v7  ;;  %914 = vmatmul.mubr.msk.bf16.vlgmr.msra.gmra.mrb[0].mxu1 %vm408_vm0, %v1069_v17  ;;  %v1072_v24 = vld [vmem:[%s1166_s24 + $0x18] ss:$12 sps:$4 sm:$0x1f]  }
  0x14   : > { %851 = vmatprep.subr.bf16.mxu0 %v1055_v8  ;;  %989 = vmatpush3.bf16.msra.mxu1 %v988_v27  ;;  %v611_v17 = vshrl.u32 %v610_v16, 7 }
  0x15   : > { %990 = vmatprep.subr.bf16.mxu1 %v1083_v18  ;;  %949 = vmatprep.mubr.msk.f32.mxu1 %vm1084_vm1, %v1085_v49 }
  0x17   : > { %852 = vmatpush3.bf16.msra.mxu0 %v1056_v10 }
  0x18   : > { %853 = vmatprep.subr.bf16.mxu0 %v1057_v11  ;;  %992 = vmatpush3.bf16.msra.mxu1 %v991_v30 }
  0x19   : > { %993 = vmatprep.subr.bf16.mxu1 %v1083_v18 }
  0x1b   : > { %854 = vmatpush3.bf16.msra.mxu0 %v1058_v12 }
  0x1c   : > { %855 = vmatprep.subr.bf16.mxu0 %v1059_v14  ;;  %995 = vmatpush3.bf16.msra.mxu1 %v994_v33 }
  0x1d   : > { %996 = vmatprep.subr.bf16.mxu1 %v1083_v18 }
  0x1f   : > { %856 = vmatpush3.bf16.msra.mxu0 %v1060_v19 }
  0x20   : > { %857 = vmatprep.subr.bf16.mxu0 %v1062_v20  ;;  %998 = vmatpush3.bf16.msra.mxu1 %v997_v36 }
  0x21   : > { %999 = vmatprep.subr.bf16.mxu1 %v1083_v18 }
  0x23   : > { %858 = vmatpush3.bf16.msra.mxu0 %v1063_v21 }
  0x24   : > { %1011 = vmatprep.subr.bf16.mxu0 %v1083_v18  ;;  %1001 = vmatpush3.bf16.msra.mxu1 %v1000_v39 }
  0x25   : > { %1002 = vmatprep.subr.bf16.mxu1 %v1083_v18 }
  0x26   : > { %448 = vmatmul.mubr.bf16.vlgmr.msra.gmra.mrb[0].mxu0 %v1065_v22 }
  0x27   : > { %455 = vmatprep.mubr.bf16.mxu0 %v1070_v23  ;;  %1013 = vmatpush3.bf16.msra.mxu0 %v988_v27 }
  0x28   : > { %1014 = vmatprep.subr.bf16.mxu0 %v1083_v18  ;;  %1004 = vmatpush3.bf16.msra.mxu1 %v1003_v42 }
  0x29   : > { %1005 = vmatprep.subr.bf16.mxu1 %v1083_v18 }
  0x2b   : > { %1016 = vmatpush3.bf16.msra.mxu0 %v991_v30 }
  0x2c   : > { %1017 = vmatprep.subr.bf16.mxu0 %v1083_v18  ;;  %1007 = vmatpush3.bf16.msra.mxu1 %v1006_v45 }
  0x2d   : > { %1008 = vmatprep.subr.bf16.mxu1 %v1083_v18 }
  0x2e   : > { %456 = vmatmul.mubr.bf16.gmra.mrb[4].mxu0 %v1072_v24 }
  0x2f   : > { %1019 = vmatpush3.bf16.msra.mxu0 %v994_v33  ;;  %984 = vmatprep.mubr.msk.f32.mxu0 %vm1084_vm1, %v1085_v49 }
  0x30   : > { %1020 = vmatprep.subr.bf16.mxu0 %v1083_v18  ;;  %1010 = vmatpush3.bf16.msra.mxu1 %v1009_v48 }
  0x33   : > { %1022 = vmatpush3.bf16.msra.mxu0 %v997_v36 }
  0x34   : > { %1023 = vmatprep.subr.bf16.mxu0 %v1083_v18 }
  0x37   : > { %1025 = vmatpush3.bf16.msra.mxu0 %v1000_v39 }
  0x38   : > { %1026 = vmatprep.subr.bf16.mxu0 %v1083_v18 }
  0x3b   : > { %1028 = vmatpush3.bf16.msra.mxu0 %v1003_v42 }
  0x3c   : > { %1029 = vmatprep.subr.bf16.mxu0 %v1083_v18 }
  0x3f   : > { %1031 = vmatpush3.bf16.msra.mxu0 %v1006_v45  ;;  %v838_v45 = vld [vmem:[%s1276_s3] ss:$0 sm:$0xff] }
  0x40   : > { %1032 = vmatprep.subr.bf16.mxu0 %v1083_v18  ;;  %v612_v18 = vsub.s32 0, %v611_v17 }
  0x43   : > { %1034 = vmatpush3.bf16.msra.mxu0 %v1009_v48 }
  0xe6   : > { %v915_v50 = vpop.f32.mrb[0].mxu1 }
  0xe7   : > { %v498_v51 = vpop.f32.mrb[1].mxu1 }
  0xe8   : > { %v916_v52 = vpop.f32.mrb[2].mxu1 }
  0xe9   : > { %v501_v53 = vpop.f32.mrb[3].mxu1 }
  0xf9   : > { %v859_v54 = vpop.f32.mrb[0].mxu0 }
  0xfa   : > { %v860_v55 = vpop.f32.mrb[1].mxu0 }
  0xfb   : > { %v861_v56 = vadd.f32 %v860_v55, %v859_v54  ;;  %v862_v57 = vpop.f32.mrb[2].mxu0 }
  0xfc   : > { %v863_v58 = vpop.f32.mrb[3].mxu0 }
  0xfd   : > { %v864_v59 = vadd.f32 %v863_v58, %v862_v57  ;;  %v499_v60 = vadd.f32 %v861_v56, %v498_v51 }
  0xff   : > { %v502_v61 = vadd.f32 %v864_v59, %v501_v53 }
 0x101   : > { %v865_v62 = vpop.f32.mrb[4].mxu0  ;;  %v513_v3 = vadd.f32 %v502_v61, %v499_v60 }
 0x102   : > { %v866_v63 = vpop.f32.mrb[5].mxu0 }
 0x103   : > { %v867_v0 = vadd.f32 %v866_v63, %v865_v62  ;;  %v868_v1 = vpop.f32.mrb[6].mxu0 }
 0x104   : > { %v869_v2 = vpop.f32.mrb[7].mxu0 }
 0x105   : > { %v507_v4 = vadd.f32 %v915_v50, %v867_v0  ;;  %v870_v5 = vadd.f32 %v869_v2, %v868_v1  ;;  %v839_v50 = vld [vmem:[%s1277_s4] ss:$0 sm:$0xff] }
 0x107   : > { %v514_v6 = vadd.f32 %v513_v3, %v507_v4  ;;  %v510_v7 = vadd.f32 %v916_v52, %v870_v5 }
 0x109   : > { %v516_v8 = vsel %vm515_vm2, %v510_v7, 0.0 }
 0x10a   : > { %v517_v9 = vadd.f32 %v516_v8, %v514_v6 }
 0x10c   : > { %v518_v10 = vrot.slane %v517_v9, 4 }
 0x10e   : > { %v519_v11 = vadd.f32 %v518_v10, %v517_v9 }
 0x110   : > { %v520_v12 = vrot.slane %v519_v11, 2 }
 0x112   : > { %v521_v13 = vadd.f32 %v520_v12, %v519_v11 }
 0x114   : > { %v522_v14 = vrot.slane %v521_v13, 1 }
 0x116   : > { %v523_v15 = vadd.f32 %v522_v14, %v521_v13 }
 0x118   : > { %950 = vmatmul.mubr.f32.vlgmr.msra.gmra.mrb[4].mxu1 %v523_v15 }
 0x1eb   : > { %v606_v19 = vpop.f32.mrb[4].mxu1 }
 0x1ec   : > { %v613_v20 = vrot.slane %v606_v19, %v612_v18  ;;  %v951_v21 = vpop.f32.mrb[5].mxu1 }
 0x1ee   : > { %v614_v22 = vsub.f32 %v499_v60, %v613_v20  ;;  %v615_v23 = vsub.f32 %v502_v61, %v613_v20  ;;  %v616_v24 = vsub.f32 %v507_v4, %v613_v20  ;;  %v617_v25 = vsub.f32 %v510_v7, %v613_v20 }
 0x1f0   : > { %v618_v26 = vmul.f32 %v614_v22, %v614_v22  ;;  %v619_v27 = vmul.f32 %v615_v23, %v615_v23  ;;  %v621_v28 = vmul.f32 %v617_v25, %v617_v25  ;;  %v620_v29 = vmul.f32 %v616_v24, %v616_v24 }
 0x1f2   : > { %v622_v30 = vadd.f32 %v619_v27, %v618_v26  ;;  %v624_v32 = vsel %vm515_vm2, %v621_v28, 0.0 }
 0x1f4   : > { %v623_v31 = vadd.f32 %v622_v30, %v620_v29 }
 0x1f6   : > { %v625_v33 = vadd.f32 %v624_v32, %v623_v31 }
 0x1f8   : > { %v626_v34 = vrot.slane %v625_v33, 4 }
 0x1fa   : > { %v627_v35 = vadd.f32 %v626_v34, %v625_v33 }
 0x1fc   : > { %v628_v36 = vrot.slane %v627_v35, 2 }
 0x1fe   : > { %v629_v37 = vadd.f32 %v628_v36, %v627_v35 }
 0x200   : > { %v630_v38 = vrot.slane %v629_v37, 1 }
 0x202   : > { %v631_v39 = vadd.f32 %v630_v38, %v629_v37 }
 0x204   : > { %985 = vmatmul.mubr.f32.vlgmr.msra.gmra.mrb[8].mxu0 %v631_v39 }
 0x2d7   : > { %v698_v40 = vpop.f32.mrb[8].mxu0 }
 0x2d8   : > { %v699_v41 = vadd.f32 1e-05, %v698_v40  ;;  %v986_v42 = vpop.f32.mrb[9].mxu0 }
 0x2da   : > { %1073 = vrsqrt.f32 %v699_v41 }
 0x2e4   : > { %v1074_v43 = vpop.eup %1073 }
 0x2e5   : > { %v706_v44 = vrot.slane %v1074_v43, %v612_v18 }
 0x2e7   : > { %v707_v46 = vmul.f32 %v706_v44, %v614_v22  ;;  %v708_v47 = vmul.f32 %v706_v44, %v615_v23  ;;  %v709_v48 = vmul.f32 %v706_v44, %v616_v24  ;;  %v710_v49 = vmul.f32 %v706_v44, %v617_v25 }
 0x2e9   : > { %v718_v51 = vmul.f32 %v838_v45, %v707_v46  ;;  %v719_v52 = vmul.f32 %v838_v45, %v708_v47  ;;  %v720_v53 = vmul.f32 %v838_v45, %v709_v48  ;;  %v721_v54 = vmul.f32 %v838_v45, %v710_v49 }
 0x2eb   : > { %v729_v55 = vadd.f32 %v839_v50, %v718_v51  ;;  %v730_v56 = vadd.f32 %v839_v50, %v719_v52  ;;  %v731_v57 = vadd.f32 %v839_v50, %v720_v53  ;;  %v732_v58 = vadd.f32 %v839_v50, %v721_v54 }
 0x2ed   : > { %vm733_vm3 = vcmp.ge.f32.partialorder %v729_v55, 0.0  ;;  %vm734_vm4 = vcmp.ge.f32.partialorder %v730_v56, 0.0  ;;  %vm735_vm5 = vcmp.ge.f32.partialorder %v731_v57, 0.0  ;;  %vm736_vm6 = vcmp.ge.f32.partialorder %v732_v58, 0.0 }
 0x2ee   : > { %v737_v59 = vmul.f32 0.2, %v729_v55  ;;  %v738_v60 = vmul.f32 0.2, %v730_v56  ;;  %v739_v61 = vmul.f32 0.2, %v731_v57 }
 0x2ef   : > { %v740_v62 = vmul.f32 0.2, %v732_v58 }
 0x2f0   : > { %v741_v63 = vsel %vm733_vm3, %v729_v55, %v737_v59  ;;  %v742_v0 = vsel %vm734_vm4, %v730_v56, %v738_v60  ;;  %v743_v1 = vsel %vm735_vm5, %v731_v57, %v739_v61 }
 0x2f1   : > { %v744_v2 = vsel %vm736_vm6, %v732_v58, %v740_v62  ;;  %745 = vst [vmem:[%s224_s30] sm:$0xff] %v741_v63  ;;  %746 = vst [vmem:[%s224_s30 + $0x8] sm:$0xff] %v742_v0 }
 0x2f2   : > { %747 = vst [vmem:[%s224_s30 + $0x10] sm:$0xff] %v743_v1  ;;  %748 = vst [vmem:[%s224_s30 + $0x18] sm:$0x1] %v744_v2 }
 0x2f3 PF: > { %s15_s18 = sadd.s32 1, %s1081_s18  }
 0x2f4   : > { %p12_p4 = scmp.ge.s32.totalorder %s15_s18, 4  }
 0x2f6   :  { %14 = sbr.rel (!%p12_p4) target bundleno = 1 (0x1), region = 70 }

// kernel: unet2d_forward.33
= control target key start
LH: loop header
LB: loop body
LE: loop exit
PB: predicated region body
PF: predicated region fallthrough
CT: control target
= control target key end

     0   :  { %s1036_s12 = smov 0   ;;  %s1264_s0 = inlined_call_operand.vmem [shape: bf16[2,289,200], index: 0, kind: input, shape index: {}]   ;;  %s1265_s1 = inlined_call_operand.vmem [shape: bf16[200,128], index: 1, kind: input, shape index: {}]   ;;  %s1266_s2 = inlined_call_operand.vmem [shape: f32[1,128], index: 2, kind: input, shape index: {}]   ;;  %s1267_s3 = inlined_call_operand.vmem [shape: f32[2,289,128], index: 3, kind: output, shape index: {}]  }
   0x1 LB: > { %s822_s13 = sadd.s32 4294967295, %s1013_s12   ;;  %p826_p0 = scmp.ge.s32.totalorder %s1013_s12, 1  ;;  %s1013_s12 = sphi %s1036_s12, %s13_s12  }
   0x2   : > { %p137_p1 = scmp.lt.s32.totalorder %s1013_s12, 3 }
   0x4   : > { %p138_p2 = pnand %p826_p0, %p137_p1 }
   0x5   : > { %v938_v0 = vld [vmem:[%s1265_s1] sm:$0xff] (!%p138_p2)   ;;  %v1015_v1 = vmov (!%p138_p2), 0   ;;  %v939_v2 = vld [vmem:[%s1265_s1 + $0x8] sm:$0xff] (!%p138_p2)   ;;  %p161_p3 = scmp.lt.s32.totalorder (!%p138_p2), %s822_s13, 1  ;;  %v940_v3 = vld [vmem:[%s1265_s1 + $0x10] sm:$0xff] (!%p138_p2)   ;;  %vm484_vm0 = vcmask (!%p138_p2), 588800  }
   0x6   : > { %141 = sbr.rel (%p138_p2) target bundleno = 347 (0x15b), region = 32  ;;  %546 = vmatprep.subr.bf16.mxu0 (!%p138_p2), %v1015_v1  ;;  %902 = vmatprep.subr.bf16.mxu1 (!%p138_p2), %v1015_v1  ;;  %v941_v4 = vld [vmem:[%s1265_s1 + $0x18] sm:$0xff] (!%p138_p2)   ;;  %v942_v6 = vld [vmem:[%s1265_s1 + $0x20] sm:$0xff] (!%p138_p2)   ;;  %v943_v8 = vld [vmem:[%s1265_s1 + $0x28] sm:$0xff] (!%p138_p2)   ;;  %vm542_vm1 = vcmask (!%p138_p2), 1043456  }
   0x7   : > { %547 = vmatpush1.bf16.msra.mxu0 (!%p138_p2), %v938_v0  ;;  %915 = vmatpush1.bf16.msra.mxu1 (!%p138_p2), %v938_v0  ;;  %v944_v9 = vld [vmem:[%s1265_s1 + $0x30] sm:$0xff] (!%p138_p2)   ;;  %v945_v10 = vld [vmem:[%s1265_s1 + $0x38] sm:$0xff] (!%p138_p2)   ;;  %v946_v11 = vld [vmem:[%s1265_s1 + $0x40] sm:$0xff] (!%p138_p2)  }
   0x8   : > { %548 = vmatprep.subr.bf16.mxu0 (!%p138_p2), %v1015_v1  ;;  %903 = vmatprep.subr.bf16.mxu1 (!%p138_p2), %v1015_v1  ;;  %v947_v12 = vld [vmem:[%s1265_s1 + $0x48] sm:$0xff] (!%p138_p2)   ;;  %v948_v13 = vld [vmem:[%s1265_s1 + $0x50] sm:$0xff] (!%p138_p2)   ;;  %v949_v14 = vld [vmem:[%s1265_s1 + $0x58] sm:$0xff] (!%p138_p2)  }
   0x9   : > { %v950_v15 = vld [vmem:[%s1265_s1 + $0x60] ss:$0 sps:$4 sm:$0xff] (!%p138_p2)  }
   0xa   : > { %v544_v16 = vsel (!%p138_p2), %vm542_vm1, %v950_v15, 0  ;;  %v1178_v54 = vld [vmem:[%s1266_s2] ss:$0 sm:$0xff] (!%p138_p2) }
   0xb   : > { %549 = vmatpush1.bf16.msra.mxu0 (!%p138_p2), %v939_v2  ;;  %916 = vmatpush1.bf16.msra.mxu1 (!%p138_p2), %v939_v2 }
   0xc   : > { %550 = vmatprep.subr.bf16.mxu0 (!%p138_p2), %v1015_v1  ;;  %904 = vmatprep.subr.bf16.mxu1 (!%p138_p2), %v1015_v1 }
   0xd   : > { %s1269_s13 = smov (!%p161_p3, %s822_s13), 1 }
   0xe   : > { %s928_s20 = smul.u32 296, %s1269_s13 }
   0xf   : > { %551 = vmatpush1.bf16.msra.mxu0 %v940_v3  ;;  %917 = vmatpush1.bf16.msra.mxu1 %v940_v3 }
  0x10   : > { %s1070_s25 = scalar_lea.vmem %s1264_s0, %s928_s20  ;;  %552 = vmatprep.subr.bf16.mxu0 %v1015_v1  ;;  %905 = vmatprep.subr.bf16.mxu1 %v1015_v1  ;;  %s1185_s24 = scalar_lea.vmem %s1267_s3, %s928_s20 }
  0x11   : > { %v953_v5 = vld [vmem:[%s1070_s25 + $0x4] ss:$8 sps:$4 sm:$0xff]   ;;  %v951_v17 = vld [vmem:[%s1070_s25] ss:$8 sps:$4 sm:$0xff]   ;;  %v957_v19 = vld [vmem:[%s1070_s25 + $0x14] ss:$8 sps:$4 sm:$0xff]  }
  0x12   : > { %v956_v7 = vld [vmem:[%s1070_s25 + $0xa4] ss:$8 sps:$4 sm:$0xff]   ;;  %881 = vmatprep.mubr.msk.bf16.mxu0 %vm484_vm0, %v953_v5  ;;  %v954_v18 = vld [vmem:[%s1070_s25 + $0xa0] ss:$8 sps:$4 sm:$0xff]   ;;  %v960_v20 = vld [vmem:[%s1070_s25 + $0xb4] ss:$8 sps:$4 sm:$0xff]  }
  0x13   : > { %553 = vmatpush1.bf16.msra.mxu0 %v941_v4  ;;  %918 = vmatpush1.bf16.msra.mxu1 %v941_v4  ;;  %v959_v21 = vld [vmem:[%s1070_s25 + $0x10] ss:$8 sps:$4 sm:$0xff]   ;;  %v962_v23 = vld [vmem:[%s1070_s25 + $0x24] ss:$8 sps:$4 sm:$0xff]   ;;  %v965_v25 = vld [vmem:[%s1070_s25 + $0x20] ss:$8 sps:$4 sm:$0xff]  }
  0x14   : > { %554 = vmatprep.subr.bf16.mxu0 %v1015_v1  ;;  %906 = vmatprep.subr.bf16.mxu1 %v1015_v1  ;;  %v964_v22 = vld [vmem:[%s1070_s25 + $0xb0] ss:$8 sps:$4 sm:$0xff]   ;;  %v966_v24 = vld [vmem:[%s1070_s25 + $0xc4] ss:$8 sps:$4 sm:$0xff]   ;;  %v970_v26 = vld [vmem:[%s1070_s25 + $0xc0] ss:$8 sps:$4 sm:$0xff]  }
  0x15   : > { %891 = vmatprep.mubr.msk.bf16.mxu1 %vm484_vm0, %v956_v7  ;;  %v968_v27 = vld [vmem:[%s1070_s25 + $0x34] ss:$8 sps:$4 sm:$0xff]   ;;  %v971_v29 = vld [vmem:[%s1070_s25 + $0x30] ss:$8 sps:$4 sm:$0xff]   ;;  %v974_v31 = vld [vmem:[%s1070_s25 + $0x44] ss:$8 sps:$4 sm:$0xff]  }
  0x16   : > { %v972_v28 = vld [vmem:[%s1070_s25 + $0xd4] ss:$8 sps:$4 sm:$0xff]   ;;  %v976_v30 = vld [vmem:[%s1070_s25 + $0xd0] ss:$8 sps:$4 sm:$0xff]   ;;  %v978_v32 = vld [vmem:[%s1070_s25 + $0xe4] ss:$8 sps:$4 sm:$0xff]  }
  0x17   : > { %555 = vmatpush1.bf16.msra.mxu0 %v942_v6  ;;  %919 = vmatpush1.bf16.msra.mxu1 %v942_v6  ;;  %v977_v33 = vld [vmem:[%s1070_s25 + $0x40] ss:$8 sps:$4 sm:$0xff]   ;;  %v980_v35 = vld [vmem:[%s1070_s25 + $0x54] ss:$8 sps:$4 sm:$0xff]   ;;  %v983_v37 = vld [vmem:[%s1070_s25 + $0x50] ss:$8 sps:$4 sm:$0xff]  }
  0x18   : > { %556 = vmatprep.subr.bf16.mxu0 %v1015_v1  ;;  %907 = vmatprep.subr.bf16.mxu1 %v1015_v1  ;;  %v982_v34 = vld [vmem:[%s1070_s25 + $0xe0] ss:$8 sps:$4 sm:$0xff]   ;;  %v984_v36 = vld [vmem:[%s1070_s25 + $0xf4] ss:$8 sps:$4 sm:$0xff]   ;;  %v988_v38 = vld [vmem:[%s1070_s25 + $0xf0] ss:$8 sps:$4 sm:$0xff]  }
  0x19   : > { %v986_v39 = vld [vmem:[%s1070_s25 + $0x64] ss:$8 sps:$4 sm:$0xff]   ;;  %v989_v41 = vld [vmem:[%s1070_s25 + $0x60] ss:$8 sps:$4 sm:$0xff]   ;;  %v992_v43 = vld [vmem:[%s1070_s25 + $0x74] ss:$8 sps:$4 sm:$0xff]  }
  0x1a   : > { %v990_v40 = vld [vmem:[%s1070_s25 + $0x104] ss:$8 sps:$4 sm:$0xff]   ;;  %v994_v42 = vld [vmem:[%s1070_s25 + $0x100] ss:$8 sps:$4 sm:$0xff]   ;;  %v996_v44 = vld [vmem:[%s1070_s25 + $0x114] ss:$8 sps:$4 sm:$0xff]  }
  0x1b   : > { %557 = vmatpush1.bf16.msra.mxu0 %v943_v8  ;;  %920 = vmatpush1.bf16.msra.mxu1 %v943_v8  ;;  %v208_v45 = vld [vmem:[%s1070_s25 + $0x120] sm:$0x11]  ;;  %v995_v46 = vld [vmem:[%s1070_s25 + $0x70] ss:$8 sps:$4 sm:$0xff]   ;;  %v1003_v52 = vld [vmem:[%s1070_s25 + $0x94] ss:$8 sps:$4 sm:$0xff]  }
  0x1c   : > { %558 = vmatprep.subr.bf16.mxu0 %v1015_v1  ;;  %908 = vmatprep.subr.bf16.mxu1 %v1015_v1  ;;  %v1000_v47 = vld [vmem:[%s1070_s25 + $0x110] ss:$8 sps:$4 sm:$0xff]   ;;  %v998_v48 = vld [vmem:[%s1070_s25 + $0x84] ss:$8 sps:$4 sm:$0xff]   ;;  %v867_v49 = vcombine.high %v208_v45, %v208_v45  ;;  %v1001_v50 = vld [vmem:[%s1070_s25 + $0x80] ss:$8 sps:$4 sm:$0xff]   ;;  %v866_v51 = vcombine.low %v208_v45, %v208_v45 }
  0x1d   : > { %v1006_v53 = vld [vmem:[%s1070_s25 + $0x90] ss:$8 sps:$4 sm:$0xff]  }
  0x1f   : > { %559 = vmatpush1.bf16.msra.mxu0 %v944_v9  ;;  %921 = vmatpush1.bf16.msra.mxu1 %v944_v9 }
  0x20   : > { %560 = vmatprep.subr.bf16.mxu0 %v1015_v1  ;;  %909 = vmatprep.subr.bf16.mxu1 %v1015_v1 }
  0x23   : > { %561 = vmatpush1.bf16.msra.mxu0 %v945_v10  ;;  %922 = vmatpush1.bf16.msra.mxu1 %v945_v10 }
  0x24   : > { %562 = vmatprep.subr.bf16.mxu0 %v1015_v1  ;;  %910 = vmatprep.subr.bf16.mxu1 %v1015_v1 }
  0x27   : > { %563 = vmatpush1.bf16.msra.mxu0 %v946_v11  ;;  %923 = vmatpush1.bf16.msra.mxu1 %v946_v11 }
  0x28   : > { %564 = vmatprep.subr.bf16.mxu0 %v1015_v1  ;;  %911 = vmatprep.subr.bf16.mxu1 %v1015_v1 }
  0x2b   : > { %565 = vmatpush1.bf16.msra.mxu0 %v947_v12  ;;  %924 = vmatpush1.bf16.msra.mxu1 %v947_v12 }
  0x2c   : > { %566 = vmatprep.subr.bf16.mxu0 %v1015_v1  ;;  %912 = vmatprep.subr.bf16.mxu1 %v1015_v1 }
  0x2f   : > { %567 = vmatpush1.bf16.msra.mxu0 %v948_v13  ;;  %925 = vmatpush1.bf16.msra.mxu1 %v948_v13 }
  0x30   : > { %568 = vmatprep.subr.bf16.mxu0 %v1015_v1  ;;  %913 = vmatprep.subr.bf16.mxu1 %v1015_v1 }
  0x33   : > { %569 = vmatpush1.bf16.msra.mxu0 %v949_v14  ;;  %926 = vmatpush1.bf16.msra.mxu1 %v949_v14 }
  0x34   : > { %570 = vmatprep.subr.bf16.mxu0 %v1015_v1  ;;  %914 = vmatprep.subr.bf16.mxu1 %v1015_v1 }
  0x37   : > { %571 = vmatpush1.bf16.msra.mxu0 %v544_v16  ;;  %927 = vmatpush1.bf16.msra.mxu1 %v544_v16 }
  0x3a   : > { %579 = vmatmul.mubr.bf16.vlgmr.msra.gmra.mrb[0].mxu0 %v951_v17  ;;  %659 = vmatmul.mubr.bf16.vlgmr.msra.gmra.mrb[0].mxu1 %v954_v18 }
  0x3b   : > { %882 = vmatprep.mubr.msk.bf16.mxu0 %vm484_vm0, %v957_v19  ;;  %892 = vmatprep.mubr.msk.bf16.mxu1 %vm484_vm0, %v960_v20 }
  0x42   : > { %587 = vmatmul.mubr.bf16.gmra.mrb[4].mxu0 %v959_v21  ;;  %667 = vmatmul.mubr.bf16.gmra.mrb[4].mxu1 %v964_v22 }
  0x43   : > { %883 = vmatprep.mubr.msk.bf16.mxu0 %vm484_vm0, %v962_v23  ;;  %893 = vmatprep.mubr.msk.bf16.mxu1 %vm484_vm0, %v966_v24 }
  0x4a   : > { %595 = vmatmul.mubr.bf16.gmra.mrb[8].mxu0 %v965_v25  ;;  %675 = vmatmul.mubr.bf16.gmra.mrb[8].mxu1 %v970_v26 }
  0x4b   : > { %884 = vmatprep.mubr.msk.bf16.mxu0 %vm484_vm0, %v968_v27  ;;  %894 = vmatprep.mubr.msk.bf16.mxu1 %vm484_vm0, %v972_v28 }
  0x52   : > { %603 = vmatmul.mubr.bf16.gmra.mrb[12].mxu0 %v971_v29  ;;  %683 = vmatmul.mubr.bf16.gmra.mrb[12].mxu1 %v976_v30 }
  0x53   : > { %885 = vmatprep.mubr.msk.bf16.mxu0 %vm484_vm0, %v974_v31  ;;  %895 = vmatprep.mubr.msk.bf16.mxu1 %vm484_vm0, %v978_v32 }
  0x5a   : > { %611 = vmatmul.mubr.bf16.gmra.mrb[16].mxu0 %v977_v33  ;;  %691 = vmatmul.mubr.bf16.gmra.mrb[16].mxu1 %v982_v34 }
  0x5b   : > { %886 = vmatprep.mubr.msk.bf16.mxu0 %vm484_vm0, %v980_v35  ;;  %896 = vmatprep.mubr.msk.bf16.mxu1 %vm484_vm0, %v984_v36 }
  0x62   : > { %619 = vmatmul.mubr.bf16.gmra.mrb[20].mxu0 %v983_v37  ;;  %699 = vmatmul.mubr.bf16.gmra.mrb[20].mxu1 %v988_v38 }
  0x63   : > { %887 = vmatprep.mubr.msk.bf16.mxu0 %vm484_vm0, %v986_v39  ;;  %897 = vmatprep.mubr.msk.bf16.mxu1 %vm484_vm0, %v990_v40 }
  0x6a   : > { %627 = vmatmul.mubr.bf16.gmra.mrb[24].mxu0 %v989_v41  ;;  %707 = vmatmul.mubr.bf16.gmra.mrb[24].mxu1 %v994_v42 }
  0x6b   : > { %888 = vmatprep.mubr.msk.bf16.mxu0 %vm484_vm0, %v992_v43  ;;  %898 = vmatprep.mubr.msk.bf16.mxu1 %vm484_vm0, %v996_v44 }
  0x72   : > { %635 = vmatmul.mubr.bf16.gmra.mrb[28].mxu0 %v995_v46  ;;  %715 = vmatmul.mubr.bf16.gmra.mrb[28].mxu1 %v1000_v47 }
  0x73   : > { %889 = vmatprep.mubr.msk.bf16.mxu0 %vm484_vm0, %v998_v48  ;;  %899 = vmatprep.mubr.msk.bf16.mxu1 %vm484_vm0, %v867_v49 }
  0x7a   : > { %643 = vmatmul.mubr.bf16.gmra.mrb[32].mxu0 %v1001_v50  ;;  %723 = vmatmul.mubr.bf16.gmra.mrb[32].mxu1 %v866_v51 }
  0x7b   : > { %890 = vmatprep.mubr.msk.bf16.mxu0 %vm484_vm0, %v1003_v52 }
  0x82   : > { %651 = vmatmul.mubr.bf16.gmra.mrb[36].mxu0 %v1006_v53 }
 0x10d   : > { %v580_v55 = vpop.f32.mrb[0].mxu0  ;;  %v660_v56 = vpop.f32.mrb[0].mxu1 }
 0x10e   : > { %v581_v57 = vadd.f32 %v1178_v54, %v580_v55  ;;  %v582_v58 = vpop.f32.mrb[1].mxu0  ;;  %v661_v59 = vadd.f32 %v1178_v54, %v660_v56  ;;  %v662_v60 = vpop.f32.mrb[1].mxu1 }
 0x10f   : > { %v583_v61 = vpop.f32.mrb[2].mxu0  ;;  %v663_v62 = vpop.f32.mrb[2].mxu1 }
 0x110   : > { %730 = vst [vmem:[%s1185_s24] sm:$0xff] %v581_v57  ;;  %v584_v63 = vadd.f32 %v1178_v54, %v583_v61  ;;  %v585_v0 = vpop.f32.mrb[3].mxu0  ;;  %750 = vst [vmem:[%s1185_s24 + $0xa0] sm:$0xff] %v661_v59  ;;  %v664_v1 = vadd.f32 %v1178_v54, %v663_v62  ;;  %v665_v2 = vpop.f32.mrb[3].mxu1 }
 0x112   : > { %731 = vst [vmem:[%s1185_s24 + $0x8] sm:$0xff] %v584_v63  ;;  %751 = vst [vmem:[%s1185_s24 + $0xa8] sm:$0xff] %v664_v1 }
 0x115   : > { %v588_v3 = vpop.f32.mrb[4].mxu0  ;;  %v668_v4 = vpop.f32.mrb[4].mxu1 }
 0x116   : > { %v589_v5 = vadd.f32 %v1178_v54, %v588_v3  ;;  %v590_v6 = vpop.f32.mrb[5].mxu0  ;;  %v669_v7 = vadd.f32 %v1178_v54, %v668_v4  ;;  %v670_v8 = vpop.f32.mrb[5].mxu1 }
 0x117   : > { %v591_v9 = vpop.f32.mrb[6].mxu0  ;;  %v671_v10 = vpop.f32.mrb[6].mxu1 }
 0x118   : > { %732 = vst [vmem:[%s1185_s24 + $0x10] sm:$0xff] %v589_v5  ;;  %v592_v11 = vadd.f32 %v1178_v54, %v591_v9  ;;  %v593_v12 = vpop.f32.mrb[7].mxu0  ;;  %752 = vst [vmem:[%s1185_s24 + $0xb0] sm:$0xff] %v669_v7  ;;  %v672_v13 = vadd.f32 %v1178_v54, %v671_v10  ;;  %v673_v14 = vpop.f32.mrb[7].mxu1 }
 0x11a   : > { %733 = vst [vmem:[%s1185_s24 + $0x18] sm:$0xff] %v592_v11  ;;  %753 = vst [vmem:[%s1185_s24 + $0xb8] sm:$0xff] %v672_v13 }
 0x11d   : > { %v596_v15 = vpop.f32.mrb[8].mxu0  ;;  %v676_v16 = vpop.f32.mrb[8].mxu1 }
 0x11e   : > { %v597_v17 = vadd.f32 %v1178_v54, %v596_v15  ;;  %v598_v18 = vpop.f32.mrb[9].mxu0  ;;  %v677_v19 = vadd.f32 %v1178_v54, %v676_v16  ;;  %v678_v20 = vpop.f32.mrb[9].mxu1 }
 0x11f   : > { %v599_v21 = vpop.f32.mrb[10].mxu0  ;;  %v679_v22 = vpop.f32.mrb[10].mxu1 }
 0x120   : > { %734 = vst [vmem:[%s1185_s24 + $0x20] sm:$0xff] %v597_v17  ;;  %v600_v23 = vadd.f32 %v1178_v54, %v599_v21  ;;  %v601_v24 = vpop.f32.mrb[11].mxu0  ;;  %754 = vst [vmem:[%s1185_s24 + $0xc0] sm:$0xff] %v677_v19  ;;  %v680_v25 = vadd.f32 %v1178_v54, %v679_v22  ;;  %v681_v26 = vpop.f32.mrb[11].mxu1 }
 0x122   : > { %735 = vst [vmem:[%s1185_s24 + $0x28] sm:$0xff] %v600_v23  ;;  %755 = vst [vmem:[%s1185_s24 + $0xc8] sm:$0xff] %v680_v25 }
 0x125   : > { %v604_v27 = vpop.f32.mrb[12].mxu0  ;;  %v684_v28 = vpop.f32.mrb[12].mxu1 }
 0x126   : > { %v605_v29 = vadd.f32 %v1178_v54, %v604_v27  ;;  %v606_v30 = vpop.f32.mrb[13].mxu0  ;;  %v685_v31 = vadd.f32 %v1178_v54, %v684_v28  ;;  %v686_v32 = vpop.f32.mrb[13].mxu1 }
 0x127   : > { %v607_v33 = vpop.f32.mrb[14].mxu0  ;;  %v687_v34 = vpop.f32.mrb[14].mxu1 }
 0x128   : > { %736 = vst [vmem:[%s1185_s24 + $0x30] sm:$0xff] %v605_v29  ;;  %v608_v35 = vadd.f32 %v1178_v54, %v607_v33  ;;  %v609_v36 = vpop.f32.mrb[15].mxu0  ;;  %756 = vst [vmem:[%s1185_s24 + $0xd0] sm:$0xff] %v685_v31  ;;  %v688_v37 = vadd.f32 %v1178_v54, %v687_v34  ;;  %v689_v38 = vpop.f32.mrb[15].mxu1 }
 0x12a   : > { %737 = vst [vmem:[%s1185_s24 + $0x38] sm:$0xff] %v608_v35  ;;  %757 = vst [vmem:[%s1185_s24 + $0xd8] sm:$0xff] %v688_v37 }
 0x12d   : > { %v612_v39 = vpop.f32.mrb[16].mxu0  ;;  %v692_v40 = vpop.f32.mrb[16].mxu1 }
 0x12e   : > { %v613_v41 = vadd.f32 %v1178_v54, %v612_v39  ;;  %v614_v42 = vpop.f32.mrb[17].mxu0  ;;  %v693_v43 = vadd.f32 %v1178_v54, %v692_v40  ;;  %v694_v44 = vpop.f32.mrb[17].mxu1 }
 0x12f   : > { %v615_v45 = vpop.f32.mrb[18].mxu0  ;;  %v695_v46 = vpop.f32.mrb[18].mxu1 }
 0x130   : > { %738 = vst [vmem:[%s1185_s24 + $0x40] sm:$0xff] %v613_v41  ;;  %v616_v47 = vadd.f32 %v1178_v54, %v615_v45  ;;  %v617_v48 = vpop.f32.mrb[19].mxu0  ;;  %758 = vst [vmem:[%s1185_s24 + $0xe0] sm:$0xff] %v693_v43  ;;  %v696_v49 = vadd.f32 %v1178_v54, %v695_v46  ;;  %v697_v50 = vpop.f32.mrb[19].mxu1 }
 0x132   : > { %739 = vst [vmem:[%s1185_s24 + $0x48] sm:$0xff] %v616_v47  ;;  %759 = vst [vmem:[%s1185_s24 + $0xe8] sm:$0xff] %v696_v49 }
 0x135   : > { %v620_v51 = vpop.f32.mrb[20].mxu0  ;;  %v700_v52 = vpop.f32.mrb[20].mxu1 }
 0x136   : > { %v621_v53 = vadd.f32 %v1178_v54, %v620_v51  ;;  %v622_v55 = vpop.f32.mrb[21].mxu0  ;;  %v701_v56 = vadd.f32 %v1178_v54, %v700_v52  ;;  %v702_v57 = vpop.f32.mrb[21].mxu1 }
 0x137   : > { %v623_v58 = vpop.f32.mrb[22].mxu0  ;;  %v703_v59 = vpop.f32.mrb[22].mxu1 }
 0x138   : > { %740 = vst [vmem:[%s1185_s24 + $0x50] sm:$0xff] %v621_v53  ;;  %v624_v60 = vadd.f32 %v1178_v54, %v623_v58  ;;  %v625_v61 = vpop.f32.mrb[23].mxu0  ;;  %760 = vst [vmem:[%s1185_s24 + $0xf0] sm:$0xff] %v701_v56  ;;  %v704_v62 = vadd.f32 %v1178_v54, %v703_v59  ;;  %v705_v63 = vpop.f32.mrb[23].mxu1 }
 0x13a   : > { %741 = vst [vmem:[%s1185_s24 + $0x58] sm:$0xff] %v624_v60  ;;  %761 = vst [vmem:[%s1185_s24 + $0xf8] sm:$0xff] %v704_v62 }
 0x13d   : > { %v628_v0 = vpop.f32.mrb[24].mxu0  ;;  %v708_v1 = vpop.f32.mrb[24].mxu1 }
 0x13e   : > { %v629_v2 = vadd.f32 %v1178_v54, %v628_v0  ;;  %v630_v3 = vpop.f32.mrb[25].mxu0  ;;  %v709_v4 = vadd.f32 %v1178_v54, %v708_v1  ;;  %v710_v5 = vpop.f32.mrb[25].mxu1 }
 0x13f   : > { %v631_v6 = vpop.f32.mrb[26].mxu0  ;;  %v711_v7 = vpop.f32.mrb[26].mxu1 }
 0x140   : > { %742 = vst [vmem:[%s1185_s24 + $0x60] sm:$0xff] %v629_v2  ;;  %v632_v8 = vadd.f32 %v1178_v54, %v631_v6  ;;  %v633_v9 = vpop.f32.mrb[27].mxu0  ;;  %762 = vst [vmem:[%s1185_s24 + $0x100] sm:$0xff] %v709_v4  ;;  %v712_v10 = vadd.f32 %v1178_v54, %v711_v7  ;;  %v713_v11 = vpop.f32.mrb[27].mxu1 }
 0x142   : > { %743 = vst [vmem:[%s1185_s24 + $0x68] sm:$0xff] %v632_v8  ;;  %763 = vst [vmem:[%s1185_s24 + $0x108] sm:$0xff] %v712_v10 }
 0x145   : > { %v636_v12 = vpop.f32.mrb[28].mxu0  ;;  %v716_v13 = vpop.f32.mrb[28].mxu1 }
 0x146   : > { %v637_v14 = vadd.f32 %v1178_v54, %v636_v12  ;;  %v638_v15 = vpop.f32.mrb[29].mxu0  ;;  %v717_v16 = vadd.f32 %v1178_v54, %v716_v13  ;;  %v718_v17 = vpop.f32.mrb[29].mxu1 }
 0x147   : > { %v639_v18 = vpop.f32.mrb[30].mxu0  ;;  %v719_v19 = vpop.f32.mrb[30].mxu1 }
 0x148   : > { %744 = vst [vmem:[%s1185_s24 + $0x70] sm:$0xff] %v637_v14  ;;  %v640_v20 = vadd.f32 %v1178_v54, %v639_v18  ;;  %v641_v21 = vpop.f32.mrb[31].mxu0  ;;  %764 = vst [vmem:[%s1185_s24 + $0x110] sm:$0xff] %v717_v16  ;;  %v720_v22 = vadd.f32 %v1178_v54, %v719_v19  ;;  %v721_v23 = vpop.f32.mrb[31].mxu1 }
 0x14a   : > { %745 = vst [vmem:[%s1185_s24 + $0x78] sm:$0xff] %v640_v20  ;;  %765 = vst [vmem:[%s1185_s24 + $0x118] sm:$0xff] %v720_v22 }
 0x14d   : > { %v644_v24 = vpop.f32.mrb[32].mxu0  ;;  %v724_v25 = vpop.f32.mrb[32].mxu1 }
 0x14e   : > { %v645_v26 = vadd.f32 %v1178_v54, %v644_v24  ;;  %v646_v27 = vpop.f32.mrb[33].mxu0  ;;  %v725_v28 = vadd.f32 %v1178_v54, %v724_v25  ;;  %v726_v29 = vpop.f32.mrb[33].mxu1 }
 0x14f   : > { %v647_v30 = vpop.f32.mrb[34].mxu0  ;;  %v727_v31 = vpop.f32.mrb[34].mxu1 }
 0x150   : > { %746 = vst [vmem:[%s1185_s24 + $0x80] sm:$0xff] %v645_v26  ;;  %v648_v32 = vadd.f32 %v1178_v54, %v647_v30  ;;  %v649_v33 = vpop.f32.mrb[35].mxu0  ;;  %766 = vst [vmem:[%s1185_s24 + $0x120] sm:$0x1] %v725_v28  ;;  %v728_v34 = vpop.f32.mrb[35].mxu1 }
 0x152   : > { %747 = vst [vmem:[%s1185_s24 + $0x88] sm:$0xff] %v648_v32 }
 0x155   : > { %v652_v35 = vpop.f32.mrb[36].mxu0 }
 0x156   : > { %v653_v36 = vadd.f32 %v1178_v54, %v652_v35  ;;  %v654_v37 = vpop.f32.mrb[37].mxu0 }
 0x157   : > { %v655_v38 = vpop.f32.mrb[38].mxu0 }
 0x158   : > { %748 = vst [vmem:[%s1185_s24 + $0x90] sm:$0xff] %v653_v36  ;;  %v656_v39 = vadd.f32 %v1178_v54, %v655_v38  ;;  %v657_v40 = vpop.f32.mrb[39].mxu0 }
 0x15a   : > { %749 = vst [vmem:[%s1185_s24 + $0x98] sm:$0xff] %v656_v39 }
 0x15b PF: > { %s13_s12 = sadd.s32 1, %s1013_s12  }
 0x15c   : > { %p10_p4 = scmp.ge.s32.totalorder %s13_s12, 4  }
 0x15e   :  { %12 = sbr.rel (!%p10_p4) target bundleno = 1 (0x1), region = 62 }

</bundles_post_ra>
